<compile_context>
chip_gen: v5e
topology: v5e:2x2
jax: 0.10.0
libtpu: 0.0.40
codegen_flags: <defaults>
</compile_context>

<pallas_src>
import math
from functools import partial

import jax
import jax.numpy as jnp
from jax import lax
from jax.experimental import pallas as pl
from jax.experimental.pallas import tpu as pltpu


def _round_up(a, b):
    return (a + b - 1) // b * b


# ----------------------------------------------------------------------------
# In-kernel exact GELU.  erf via Abramowitz & Stegun 7.1.26 (|err| <= 1.5e-7):
# uses only mul/add/div/exp, which all lower cleanly to VPU + EUP.
# ----------------------------------------------------------------------------
_ERF_P = 0.3275911
_ERF_A = (0.254829592, -0.284496736, 1.421413741, -1.453152027, 1.061405429)


def _erf_approx(x):
    a1, a2, a3, a4, a5 = _ERF_A
    sgn = jnp.where(x >= 0.0, 1.0, -1.0)
    ax = jnp.abs(x)
    t = 1.0 / (1.0 + _ERF_P * ax)
    poly = ((((a5 * t + a4) * t + a3) * t + a2) * t + a1) * t
    return sgn * (1.0 - poly * jnp.exp(-ax * ax))


def _gelu_exact(x):
    return 0.5 * x * (1.0 + _erf_approx(x * (1.0 / math.sqrt(2.0))))


# ----------------------------------------------------------------------------
# Fused kernel: one batch image per grid step, everything resident in VMEM.
# ----------------------------------------------------------------------------
def _fused_attention_kernel(x_ref, wvs_ref, dww_ref, w0_ref,
                            bns_ref, bnb_ref, w1_ref, b1_ref, wp_ref, bp_ref,
                            o_ref, pad_ref, *, H, W, C, KMAX, WOFF):
    N = H * W
    P = (KMAX - 1) // 2

    # ---- v / s projections: one bf16 MXU matmul against [Wv^T | Ws^T] ----
    x = x_ref[0]                                                   # (N, C) f32
    vs = jnp.dot(x.astype(jnp.bfloat16), wvs_ref[...],
                 preferred_element_type=jnp.float32)               # (N, 2C) f32
    v = vs[:, :C]
    s = vs[:, C:]

    # ---- unified depthwise conv over all ca-heads (f32, VPU) ----
    # Zero the padded scratch each step (safe under megacore sharding), then
    # drop the image at (row P, col WOFF); WOFF is a multiple of 8 so the
    # interior store is sublane-aligned.
    pad_ref[...] = jnp.zeros_like(pad_ref)
    pad_ref[P:P + H, WOFF:WOFF + W, :] = s.reshape(H, W, C)
    xpad = pad_ref[...]                                            # (H+2P, Wp, C)

    c0 = WOFF - P
    acc = jnp.zeros((H, W, C), jnp.float32)
    for kh in range(KMAX):
        for kw in range(KMAX):
            w_tap = dww_ref[kh * KMAX + kw]                        # (C,) f32
            acc = acc + xpad[kh:kh + H, c0 + kw:c0 + kw + W, :] * w_tap
    s_conv = acc.reshape(N, C)                                     # (N, C) f32

    # ---- proj0 (grouped 1x1, interleave folded into weight rows)
    #      -> BN(eval, conv-bias + proj0-bias folded into shift)
    #      -> exact erf GELU -> proj1 ----
    h = jnp.dot(s_conv.astype(jnp.bfloat16), w0_ref[...],
                preferred_element_type=jnp.float32)                # (N, E)
    h = h * bns_ref[...] + bnb_ref[...]
    g = _gelu_exact(h)
    sp = jnp.dot(g.astype(jnp.bfloat16), w1_ref[...],
                 preferred_element_type=jnp.float32) + b1_ref[...]  # (N, C)

    # ---- out = (s_out * v) @ Wproj^T + b ----
    y = sp * v
    o_ref[0] = jnp.dot(y.astype(jnp.bfloat16), wp_ref[...],
                       preferred_element_type=jnp.float32) + bp_ref[...]


# ----------------------------------------------------------------------------
# Kernel-side parameter preparation (fusions / permutations / bf16 casts)
# ----------------------------------------------------------------------------
def prepare_kernel_params(p, C):
    heads = p["ca_num_heads"]
    Cg = C // heads
    E = p["w1_t"].shape[0]
    KMAX = 3 + 2 * (heads - 1)

    kp = {"heads": heads, "E": E, "KMAX": KMAX}

    # Fused v/s weight -> one (C, 2C) bf16 MXU operand.
    kp["wvs"] = jnp.concatenate([p["wv_t"], p["ws_t"]], axis=1).astype(jnp.bfloat16)

    # Unified depthwise weight: head i's (3+2i)^2 kernel zero-embedded in a
    # KMAX x KMAX window; channels in natural head-major order c = i*Cg + g.
    dw_all = jnp.zeros((KMAX, KMAX, C), jnp.float32)
    for i in range(heads):
        K = 3 + 2 * i
        off = (KMAX - K) // 2
        dw_all = dw_all.at[off:off + K, off:off + K, i * Cg:(i + 1) * Cg].set(
            p["dw_w"][i].reshape(K, K, Cg))
    kp["dw_w"] = dw_all.reshape(KMAX * KMAX, C)

    # proj0 as dense matmul; PyTorch's interleave c = g*heads + i is folded
    # into a row permutation of the block-diagonal weight.
    perm = jnp.array([(c % Cg) * heads + (c // Cg) for c in range(C)])
    w0_perm = p["w0_big"][perm]                                    # (C, E) f32
    kp["w0"] = w0_perm.astype(jnp.bfloat16)

    # Depthwise-conv bias folded through proj0 into the BN shift.
    dw_b = jnp.concatenate([p["dw_b"][i].reshape(Cg) for i in range(heads)])
    kp["bn_scale"] = p["bn_scale"]
    kp["bn_shift"] = p["bn_shift"] + (dw_b[None, :] @ w0_perm) * p["bn_scale"]

    kp["w1"] = p["w1_t"].astype(jnp.bfloat16)
    kp["b1"] = p["b1"]
    kp["wproj"] = p["wproj_t"].astype(jnp.bfloat16)
    kp["bproj"] = p["bproj"]
    return kp


# ----------------------------------------------------------------------------
# Wrapper
# ----------------------------------------------------------------------------
def attention_forward(x, H, W, p, kp=None):
    B, N, C = x.shape
    assert N == H * W
    if kp is None:
        kp = prepare_kernel_params(p, C)
    E, KMAX = kp["E"], kp["KMAX"]
    P = (KMAX - 1) // 2
    WOFF = _round_up(max(8, P), 8)           # sublane-aligned image column offset
    Wp = WOFF + W + P                        # padded image width in scratch

    kern = partial(_fused_attention_kernel, H=H, W=W, C=C, KMAX=KMAX, WOFF=WOFF)
    const2 = lambda b: (0, 0)

    out = pl.pallas_call(
        kern,
        grid=(B,),
        in_specs=[
            pl.BlockSpec((1, N, C), lambda b: (b, 0, 0)),       # x
            pl.BlockSpec((C, 2 * C), const2),                   # [Wv^T | Ws^T] bf16
            pl.BlockSpec((KMAX * KMAX, C), const2),             # unified dw weight
            pl.BlockSpec((C, E), const2),                       # proj0 (permuted) bf16
            pl.BlockSpec((1, E), const2),                       # BN scale
            pl.BlockSpec((1, E), const2),                       # BN shift (+ biases)
            pl.BlockSpec((E, C), const2),                       # proj1 bf16
            pl.BlockSpec((1, C), const2),                       # proj1 bias
            pl.BlockSpec((C, C), const2),                       # proj bf16
            pl.BlockSpec((1, C), const2),                       # proj bias
        ],
        out_specs=pl.BlockSpec((1, N, C), lambda b: (b, 0, 0)),
        out_shape=jax.ShapeDtypeStruct((B, N, C), jnp.float32),
        scratch_shapes=[pltpu.VMEM((H + 2 * P, Wp, C), jnp.float32)],
        compiler_params=pltpu.CompilerParams(
            dimension_semantics=("parallel",),
        ),
    )(x, kp["wvs"], kp["dw_w"], kp["w0"], kp["bn_scale"],
      kp["bn_shift"], kp["w1"], kp["b1"], kp["wproj"], kp["bproj"])
    return out


# ----------------------------------------------------------------------------
# Deterministic synthetic parameters (shapes follow the module __init__)
# ----------------------------------------------------------------------------
def init_params(key, C, ca_num_heads=4, expand_ratio=2):
    heads = ca_num_heads
    Cg = C // heads
    E = C * expand_ratio
    opg = E // Cg                              # proj0 out-channels per group
    ks = jax.random.split(key, 16)
    std = 0.05
    p = {"ca_num_heads": heads}
    p["wv_t"] = jax.random.normal(ks[0], (C, C)) * std       # Linear v (no bias)
    p["ws_t"] = jax.random.normal(ks[1], (C, C)) * std       # Linear s (no bias)
    dw_w, dw_b = [], []
    for i in range(heads):                                    # local_conv_{i+1}
        K = 3 + 2 * i
        kk = jax.random.split(ks[2 + i], 2)
        dw_w.append(jax.random.normal(kk[0], (K * K, Cg)) * std)
        dw_b.append(jax.random.normal(kk[1], (1, Cg)) * std)
    p["dw_w"], p["dw_b"] = dw_w, dw_b
    # proj0: Conv2d(C, E, 1, groups=Cg) -> per-group weight (out=opg, in=heads)
    w0_g = jax.random.normal(ks[6], (Cg, opg, heads)) * std
    b0 = jax.random.normal(ks[7], (E,)) * std
    p["w0_g"], p["b0"] = w0_g, b0
    w0_big = jnp.zeros((C, E), jnp.float32)                   # block-diagonal form
    for g in range(Cg):
        w0_big = w0_big.at[g * heads:(g + 1) * heads, g * opg:(g + 1) * opg].set(w0_g[g].T)
    p["w0_big"] = w0_big
    # BatchNorm2d(E), eval mode
    gamma = 1.0 + 0.05 * jax.random.normal(ks[8], (E,))
    beta = 0.05 * jax.random.normal(ks[9], (E,))
    mean = 0.05 * jax.random.normal(ks[10], (E,))
    var = jnp.abs(jax.random.normal(ks[11], (E,))) * 0.1 + 0.9
    eps = 1e-5
    scale = gamma / jnp.sqrt(var + eps)
    p["bn_scale"] = scale.reshape(1, E)
    p["bn_shift"] = ((b0 - mean) * scale + beta).reshape(1, E)
    p["gamma"], p["beta"], p["mean"], p["var"] = gamma, beta, mean, var
    # proj1: Conv2d(E, C, 1)
    p["w1_t"] = jax.random.normal(ks[12], (E, C)) * std
    p["b1"] = (jax.random.normal(ks[13], (C,)) * std).reshape(1, C)
    # proj: Linear(C, C) with bias
    p["wproj_t"] = jax.random.normal(ks[14], (C, C)) * std
    p["bproj"] = (jax.random.normal(ks[15], (C,)) * std).reshape(1, C)
    return p


# ----------------------------------------------------------------------------
# Pure-JAX reference (independent conv path) for a sanity check
# ----------------------------------------------------------------------------
def reference_forward(x, H, W, p):
    B, N, C = x.shape
    heads = p["ca_num_heads"]
    Cg = C // heads
    E = p["w1_t"].shape[0]
    v = x @ p["wv_t"]
    s = x @ p["ws_t"]
    s5 = s.reshape(B, H, W, heads, Cg)
    outs = []
    for i in range(heads):
        K = 3 + 2 * i
        w = p["dw_w"][i].reshape(K, K, 1, Cg)
        o = lax.conv_general_dilated(
            s5[:, :, :, i, :], w, window_strides=(1, 1), padding="SAME",
            dimension_numbers=("NHWC", "HWIO", "NHWC"), feature_group_count=Cg)
        outs.append(o + p["dw_b"][i].reshape(1, 1, 1, Cg))
    s_mix = jnp.stack(outs, axis=-1).reshape(B, H, W, C)
    sm = s_mix.reshape(B, H * W, Cg, heads)
    h = jnp.einsum("bngi,goi->bngo", sm, p["w0_g"]).reshape(B, H * W, E) + p["b0"]
    h = (h - p["mean"]) / jnp.sqrt(p["var"] + 1e-5) * p["gamma"] + p["beta"]
    g = jax.nn.gelu(h, approximate=False)
    sp = g @ p["w1_t"] + p["b1"]
    return (sp * v) @ p["wproj_t"] + p["bproj"]


# ----------------------------------------------------------------------------
if __name__ == "__main__":
    B, H, W, C = 2, 8, 8, 32      # dim=32 divisible by ca_num_heads=4 and sa_num_heads=8
    N = H * W
    key = jax.random.PRNGKey(0)
    kx, kparam = jax.random.split(key)
    x = jax.random.normal(kx, (B, N, C), jnp.float32)
    params = init_params(kparam, C, ca_num_heads=4, expand_ratio=2)

    out = jax.block_until_ready(attention_forward(x, H, W, params))
    ref = jax.block_until_ready(reference_forward(x, H, W, params))

    assert out.shape == (B, N, C)
    max_err = float(jnp.max(jnp.abs(out - ref)))
    assert jnp.allclose(out, ref, rtol=3e-2, atol=3e-2), max_err

    print("KERNEL_OK")
</pallas_src>

<mosaic_0001>
module attributes {stable_mosaic.version = 11 : i64} {
  func.func @_fused_attention_kernel(%arg0: i32, %arg1: memref<1x64x32xf32, #tpu.memory_space<vmem>>, %arg2: memref<32x64xbf16, #tpu.memory_space<vmem>>, %arg3: memref<81x32xf32, #tpu.memory_space<vmem>>, %arg4: memref<32x64xbf16, #tpu.memory_space<vmem>>, %arg5: memref<1x64xf32, #tpu.memory_space<vmem>>, %arg6: memref<1x64xf32, #tpu.memory_space<vmem>>, %arg7: memref<64x32xbf16, #tpu.memory_space<vmem>>, %arg8: memref<1x32xf32, #tpu.memory_space<vmem>>, %arg9: memref<32x32xbf16, #tpu.memory_space<vmem>>, %arg10: memref<1x32xf32, #tpu.memory_space<vmem>>, %arg11: memref<1x64x32xf32, #tpu.memory_space<vmem>>, %arg12: memref<16x20x32xf32, #tpu.memory_space<vmem>>) attributes {dimension_semantics = [#tpu.dimension_semantics<parallel>], iteration_bounds = array<i64: 2>, scalar_prefetch = 0 : i64, scratch_operands = 1 : i64, tpu.core_type = #tpu.core_type<tc>, window_params = [{transform_indices = @transform_0, window_bounds = array<i64: 1, 64, 32>}, {pipeline_mode = #tpu.pipeline_mode<synchronous>, transform_indices = @transform_1, window_bounds = array<i64: 32, 64>}, {pipeline_mode = #tpu.pipeline_mode<synchronous>, transform_indices = @transform_2, window_bounds = array<i64: 81, 32>}, {pipeline_mode = #tpu.pipeline_mode<synchronous>, transform_indices = @transform_3, window_bounds = array<i64: 32, 64>}, {pipeline_mode = #tpu.pipeline_mode<synchronous>, transform_indices = @transform_4, window_bounds = array<i64: 1, 64>}, {pipeline_mode = #tpu.pipeline_mode<synchronous>, transform_indices = @transform_5, window_bounds = array<i64: 1, 64>}, {pipeline_mode = #tpu.pipeline_mode<synchronous>, transform_indices = @transform_6, window_bounds = array<i64: 64, 32>}, {pipeline_mode = #tpu.pipeline_mode<synchronous>, transform_indices = @transform_7, window_bounds = array<i64: 1, 32>}, {pipeline_mode = #tpu.pipeline_mode<synchronous>, transform_indices = @transform_8, window_bounds = array<i64: 32, 32>}, {pipeline_mode = #tpu.pipeline_mode<synchronous>, transform_indices = @transform_9, window_bounds = array<i64: 1, 32>}, {transform_indices = @transform_10, window_bounds = array<i64: 1, 64, 32>}]} {
    %c0 = arith.constant 0 : index
    %c0_0 = arith.constant 0 : index
    %c0_1 = arith.constant 0 : index
    %0 = vector.load %arg1[%c0, %c0_0, %c0_1] : memref<1x64x32xf32, #tpu.memory_space<vmem>>, vector<1x64x32xf32>
    %1 = vector.shape_cast %0 : vector<1x64x32xf32> to vector<64x32xf32>
    %2 = arith.truncf %1 : vector<64x32xf32> to vector<64x32xbf16>
    %c0_2 = arith.constant 0 : index
    %c0_3 = arith.constant 0 : index
    %3 = vector.load %arg2[%c0_2, %c0_3] : memref<32x64xbf16, #tpu.memory_space<vmem>>, vector<32x64xbf16>
    %cst = arith.constant dense<0.000000e+00> : vector<64x64xf32>
    %4 = tpu.matmul %2, %3, %cst {dimension_numbers = #tpu.dot_dimension_numbers<[1], [0], [0], [1], [0, 0, 1, 1], [], []>} : vector<64x32xbf16>, vector<32x64xbf16>, vector<64x64xf32> -> vector<64x64xf32>
    %5 = vector.extract_strided_slice %4 {offsets = [0, 0], sizes = [64, 32], strides = [1, 1]} : vector<64x64xf32> to vector<64x32xf32>
    %6 = vector.extract_strided_slice %4 {offsets = [0, 32], sizes = [64, 32], strides = [1, 1]} : vector<64x64xf32> to vector<64x32xf32>
    %cst_4 = arith.constant 0.000000e+00 : f32
    %7 = vector.broadcast %cst_4 : f32 to vector<16x20x32xf32>
    %c0_5 = arith.constant 0 : index
    %c0_6 = arith.constant 0 : index
    %c0_7 = arith.constant 0 : index
    %8 = vector.load %arg12[%c0_5, %c0_6, %c0_7] : memref<16x20x32xf32, #tpu.memory_space<vmem>>, vector<16x20x32xf32>
    tpu.vector_store %arg12[%c0_5, %c0_6, %c0_7], %7 {strides = array<i32>} : memref<16x20x32xf32, #tpu.memory_space<vmem>>, vector<16x20x32xf32>,
    %9 = vector.shape_cast %6 : vector<64x32xf32> to vector<8x8x32xf32>
    %c4 = arith.constant 4 : index
    %c8 = arith.constant 8 : index
    %c0_8 = arith.constant 0 : index
    %10 = vector.load %arg12[%c4, %c8, %c0_8] : memref<16x20x32xf32, #tpu.memory_space<vmem>>, vector<8x8x32xf32>
    tpu.vector_store %arg12[%c4, %c8, %c0_8], %9 {strides = array<i32>} : memref<16x20x32xf32, #tpu.memory_space<vmem>>, vector<8x8x32xf32>,
    %c0_9 = arith.constant 0 : index
    %c0_10 = arith.constant 0 : index
    %c0_11 = arith.constant 0 : index
    %11 = vector.load %arg12[%c0_9, %c0_10, %c0_11] : memref<16x20x32xf32, #tpu.memory_space<vmem>>, vector<16x20x32xf32>
    %cst_12 = arith.constant 0.000000e+00 : f32
    %12 = vector.broadcast %cst_12 : f32 to vector<8x8x32xf32>
    %c0_13 = arith.constant 0 : index
    %c0_14 = arith.constant 0 : index
    %13 = vector.load %arg3[%c0_13, %c0_14] : memref<81x32xf32, #tpu.memory_space<vmem>>, vector<1x32xf32>
    %14 = vector.shape_cast %13 : vector<1x32xf32> to vector<32xf32>
    %15 = vector.extract_strided_slice %11 {offsets = [0, 4, 0], sizes = [8, 8, 32], strides = [1, 1, 1]} : vector<16x20x32xf32> to vector<8x8x32xf32>
    %16 = vector.shape_cast %14 : vector<32xf32> to vector<1x1x32xf32>
    %17 = vector.broadcast %16 : vector<1x1x32xf32> to vector<8x8x32xf32>
    %18 = arith.mulf %15, %17 : vector<8x8x32xf32>
    %19 = arith.addf %12, %18 : vector<8x8x32xf32>
    %c1 = arith.constant 1 : index
    %c0_15 = arith.constant 0 : index
    %20 = vector.load %arg3[%c1, %c0_15] : memref<81x32xf32, #tpu.memory_space<vmem>>, vector<1x32xf32>
    %21 = vector.shape_cast %20 : vector<1x32xf32> to vector<32xf32>
    %22 = vector.extract_strided_slice %11 {offsets = [0, 5, 0], sizes = [8, 8, 32], strides = [1, 1, 1]} : vector<16x20x32xf32> to vector<8x8x32xf32>
    %23 = vector.shape_cast %21 : vector<32xf32> to vector<1x1x32xf32>
    %24 = vector.broadcast %23 : vector<1x1x32xf32> to vector<8x8x32xf32>
    %25 = arith.mulf %22, %24 : vector<8x8x32xf32>
    %26 = arith.addf %19, %25 : vector<8x8x32xf32>
    %c2 = arith.constant 2 : index
    %c0_16 = arith.constant 0 : index
    %27 = vector.load %arg3[%c2, %c0_16] : memref<81x32xf32, #tpu.memory_space<vmem>>, vector<1x32xf32>
    %28 = vector.shape_cast %27 : vector<1x32xf32> to vector<32xf32>
    %29 = vector.extract_strided_slice %11 {offsets = [0, 6, 0], sizes = [8, 8, 32], strides = [1, 1, 1]} : vector<16x20x32xf32> to vector<8x8x32xf32>
    %30 = vector.shape_cast %28 : vector<32xf32> to vector<1x1x32xf32>
    %31 = vector.broadcast %30 : vector<1x1x32xf32> to vector<8x8x32xf32>
    %32 = arith.mulf %29, %31 : vector<8x8x32xf32>
    %33 = arith.addf %26, %32 : vector<8x8x32xf32>
    %c3 = arith.constant 3 : index
    %c0_17 = arith.constant 0 : index
    %34 = vector.load %arg3[%c3, %c0_17] : memref<81x32xf32, #tpu.memory_space<vmem>>, vector<1x32xf32>
    %35 = vector.shape_cast %34 : vector<1x32xf32> to vector<32xf32>
    %36 = vector.extract_strided_slice %11 {offsets = [0, 7, 0], sizes = [8, 8, 32], strides = [1, 1, 1]} : vector<16x20x32xf32> to vector<8x8x32xf32>
    %37 = vector.shape_cast %35 : vector<32xf32> to vector<1x1x32xf32>
    %38 = vector.broadcast %37 : vector<1x1x32xf32> to vector<8x8x32xf32>
    %39 = arith.mulf %36, %38 : vector<8x8x32xf32>
    %40 = arith.addf %33, %39 : vector<8x8x32xf32>
    %c4_18 = arith.constant 4 : index
    %c0_19 = arith.constant 0 : index
    %41 = vector.load %arg3[%c4_18, %c0_19] : memref<81x32xf32, #tpu.memory_space<vmem>>, vector<1x32xf32>
    %42 = vector.shape_cast %41 : vector<1x32xf32> to vector<32xf32>
    %43 = vector.extract_strided_slice %11 {offsets = [0, 8, 0], sizes = [8, 8, 32], strides = [1, 1, 1]} : vector<16x20x32xf32> to vector<8x8x32xf32>
    %44 = vector.shape_cast %42 : vector<32xf32> to vector<1x1x32xf32>
    %45 = vector.broadcast %44 : vector<1x1x32xf32> to vector<8x8x32xf32>
    %46 = arith.mulf %43, %45 : vector<8x8x32xf32>
    %47 = arith.addf %40, %46 : vector<8x8x32xf32>
    %c5 = arith.constant 5 : index
    %c0_20 = arith.constant 0 : index
    %48 = vector.load %arg3[%c5, %c0_20] : memref<81x32xf32, #tpu.memory_space<vmem>>, vector<1x32xf32>
    %49 = vector.shape_cast %48 : vector<1x32xf32> to vector<32xf32>
    %50 = vector.extract_strided_slice %11 {offsets = [0, 9, 0], sizes = [8, 8, 32], strides = [1, 1, 1]} : vector<16x20x32xf32> to vector<8x8x32xf32>
    %51 = vector.shape_cast %49 : vector<32xf32> to vector<1x1x32xf32>
    %52 = vector.broadcast %51 : vector<1x1x32xf32> to vector<8x8x32xf32>
    %53 = arith.mulf %50, %52 : vector<8x8x32xf32>
    %54 = arith.addf %47, %53 : vector<8x8x32xf32>
    %c6 = arith.constant 6 : index
    %c0_21 = arith.constant 0 : index
    %55 = vector.load %arg3[%c6, %c0_21] : memref<81x32xf32, #tpu.memory_space<vmem>>, vector<1x32xf32>
    %56 = vector.shape_cast %55 : vector<1x32xf32> to vector<32xf32>
    %57 = vector.extract_strided_slice %11 {offsets = [0, 10, 0], sizes = [8, 8, 32], strides = [1, 1, 1]} : vector<16x20x32xf32> to vector<8x8x32xf32>
    %58 = vector.shape_cast %56 : vector<32xf32> to vector<1x1x32xf32>
    %59 = vector.broadcast %58 : vector<1x1x32xf32> to vector<8x8x32xf32>
    %60 = arith.mulf %57, %59 : vector<8x8x32xf32>
    %61 = arith.addf %54, %60 : vector<8x8x32xf32>
    %c7 = arith.constant 7 : index
    %c0_22 = arith.constant 0 : index
    %62 = vector.load %arg3[%c7, %c0_22] : memref<81x32xf32, #tpu.memory_space<vmem>>, vector<1x32xf32>
    %63 = vector.shape_cast %62 : vector<1x32xf32> to vector<32xf32>
    %64 = vector.extract_strided_slice %11 {offsets = [0, 11, 0], sizes = [8, 8, 32], strides = [1, 1, 1]} : vector<16x20x32xf32> to vector<8x8x32xf32>
    %65 = vector.shape_cast %63 : vector<32xf32> to vector<1x1x32xf32>
    %66 = vector.broadcast %65 : vector<1x1x32xf32> to vector<8x8x32xf32>
    %67 = arith.mulf %64, %66 : vector<8x8x32xf32>
    %68 = arith.addf %61, %67 : vector<8x8x32xf32>
    %c8_23 = arith.constant 8 : index
    %c0_24 = arith.constant 0 : index
    %69 = vector.load %arg3[%c8_23, %c0_24] : memref<81x32xf32, #tpu.memory_space<vmem>>, vector<1x32xf32>
    %70 = vector.shape_cast %69 : vector<1x32xf32> to vector<32xf32>
    %71 = vector.extract_strided_slice %11 {offsets = [0, 12, 0], sizes = [8, 8, 32], strides = [1, 1, 1]} : vector<16x20x32xf32> to vector<8x8x32xf32>
    %72 = vector.shape_cast %70 : vector<32xf32> to vector<1x1x32xf32>
    %73 = vector.broadcast %72 : vector<1x1x32xf32> to vector<8x8x32xf32>
    %74 = arith.mulf %71, %73 : vector<8x8x32xf32>
    %75 = arith.addf %68, %74 : vector<8x8x32xf32>
    %c9 = arith.constant 9 : index
    %c0_25 = arith.constant 0 : index
    %76 = vector.load %arg3[%c9, %c0_25] : memref<81x32xf32, #tpu.memory_space<vmem>>, vector<1x32xf32>
    %77 = vector.shape_cast %76 : vector<1x32xf32> to vector<32xf32>
    %78 = vector.extract_strided_slice %11 {offsets = [1, 4, 0], sizes = [8, 8, 32], strides = [1, 1, 1]} : vector<16x20x32xf32> to vector<8x8x32xf32>
    %79 = vector.shape_cast %77 : vector<32xf32> to vector<1x1x32xf32>
    %80 = vector.broadcast %79 : vector<1x1x32xf32> to vector<8x8x32xf32>
    %81 = arith.mulf %78, %80 : vector<8x8x32xf32>
    %82 = arith.addf %75, %81 : vector<8x8x32xf32>
    %c10 = arith.constant 10 : index
    %c0_26 = arith.constant 0 : index
    %83 = vector.load %arg3[%c10, %c0_26] : memref<81x32xf32, #tpu.memory_space<vmem>>, vector<1x32xf32>
    %84 = vector.shape_cast %83 : vector<1x32xf32> to vector<32xf32>
    %85 = vector.extract_strided_slice %11 {offsets = [1, 5, 0], sizes = [8, 8, 32], strides = [1, 1, 1]} : vector<16x20x32xf32> to vector<8x8x32xf32>
    %86 = vector.shape_cast %84 : vector<32xf32> to vector<1x1x32xf32>
    %87 = vector.broadcast %86 : vector<1x1x32xf32> to vector<8x8x32xf32>
    %88 = arith.mulf %85, %87 : vector<8x8x32xf32>
    %89 = arith.addf %82, %88 : vector<8x8x32xf32>
    %c11 = arith.constant 11 : index
    %c0_27 = arith.constant 0 : index
    %90 = vector.load %arg3[%c11, %c0_27] : memref<81x32xf32, #tpu.memory_space<vmem>>, vector<1x32xf32>
    %91 = vector.shape_cast %90 : vector<1x32xf32> to vector<32xf32>
    %92 = vector.extract_strided_slice %11 {offsets = [1, 6, 0], sizes = [8, 8, 32], strides = [1, 1, 1]} : vector<16x20x32xf32> to vector<8x8x32xf32>
    %93 = vector.shape_cast %91 : vector<32xf32> to vector<1x1x32xf32>
    %94 = vector.broadcast %93 : vector<1x1x32xf32> to vector<8x8x32xf32>
    %95 = arith.mulf %92, %94 : vector<8x8x32xf32>
    %96 = arith.addf %89, %95 : vector<8x8x32xf32>
    %c12 = arith.constant 12 : index
    %c0_28 = arith.constant 0 : index
    %97 = vector.load %arg3[%c12, %c0_28] : memref<81x32xf32, #tpu.memory_space<vmem>>, vector<1x32xf32>
    %98 = vector.shape_cast %97 : vector<1x32xf32> to vector<32xf32>
    %99 = vector.extract_strided_slice %11 {offsets = [1, 7, 0], sizes = [8, 8, 32], strides = [1, 1, 1]} : vector<16x20x32xf32> to vector<8x8x32xf32>
    %100 = vector.shape_cast %98 : vector<32xf32> to vector<1x1x32xf32>
    %101 = vector.broadcast %100 : vector<1x1x32xf32> to vector<8x8x32xf32>
    %102 = arith.mulf %99, %101 : vector<8x8x32xf32>
    %103 = arith.addf %96, %102 : vector<8x8x32xf32>
    %c13 = arith.constant 13 : index
    %c0_29 = arith.constant 0 : index
    %104 = vector.load %arg3[%c13, %c0_29] : memref<81x32xf32, #tpu.memory_space<vmem>>, vector<1x32xf32>
    %105 = vector.shape_cast %104 : vector<1x32xf32> to vector<32xf32>
    %106 = vector.extract_strided_slice %11 {offsets = [1, 8, 0], sizes = [8, 8, 32], strides = [1, 1, 1]} : vector<16x20x32xf32> to vector<8x8x32xf32>
    %107 = vector.shape_cast %105 : vector<32xf32> to vector<1x1x32xf32>
    %108 = vector.broadcast %107 : vector<1x1x32xf32> to vector<8x8x32xf32>
    %109 = arith.mulf %106, %108 : vector<8x8x32xf32>
    %110 = arith.addf %103, %109 : vector<8x8x32xf32>
    %c14 = arith.constant 14 : index
    %c0_30 = arith.constant 0 : index
    %111 = vector.load %arg3[%c14, %c0_30] : memref<81x32xf32, #tpu.memory_space<vmem>>, vector<1x32xf32>
    %112 = vector.shape_cast %111 : vector<1x32xf32> to vector<32xf32>
    %113 = vector.extract_strided_slice %11 {offsets = [1, 9, 0], sizes = [8, 8, 32], strides = [1, 1, 1]} : vector<16x20x32xf32> to vector<8x8x32xf32>
    %114 = vector.shape_cast %112 : vector<32xf32> to vector<1x1x32xf32>
    %115 = vector.broadcast %114 : vector<1x1x32xf32> to vector<8x8x32xf32>
    %116 = arith.mulf %113, %115 : vector<8x8x32xf32>
    %117 = arith.addf %110, %116 : vector<8x8x32xf32>
    %c15 = arith.constant 15 : index
    %c0_31 = arith.constant 0 : index
    %118 = vector.load %arg3[%c15, %c0_31] : memref<81x32xf32, #tpu.memory_space<vmem>>, vector<1x32xf32>
    %119 = vector.shape_cast %118 : vector<1x32xf32> to vector<32xf32>
    %120 = vector.extract_strided_slice %11 {offsets = [1, 10, 0], sizes = [8, 8, 32], strides = [1, 1, 1]} : vector<16x20x32xf32> to vector<8x8x32xf32>
    %121 = vector.shape_cast %119 : vector<32xf32> to vector<1x1x32xf32>
    %122 = vector.broadcast %121 : vector<1x1x32xf32> to vector<8x8x32xf32>
    %123 = arith.mulf %120, %122 : vector<8x8x32xf32>
    %124 = arith.addf %117, %123 : vector<8x8x32xf32>
    %c16 = arith.constant 16 : index
    %c0_32 = arith.constant 0 : index
    %125 = vector.load %arg3[%c16, %c0_32] : memref<81x32xf32, #tpu.memory_space<vmem>>, vector<1x32xf32>
    %126 = vector.shape_cast %125 : vector<1x32xf32> to vector<32xf32>
    %127 = vector.extract_strided_slice %11 {offsets = [1, 11, 0], sizes = [8, 8, 32], strides = [1, 1, 1]} : vector<16x20x32xf32> to vector<8x8x32xf32>
    %128 = vector.shape_cast %126 : vector<32xf32> to vector<1x1x32xf32>
    %129 = vector.broadcast %128 : vector<1x1x32xf32> to vector<8x8x32xf32>
    %130 = arith.mulf %127, %129 : vector<8x8x32xf32>
    %131 = arith.addf %124, %130 : vector<8x8x32xf32>
    %c17 = arith.constant 17 : index
    %c0_33 = arith.constant 0 : index
    %132 = vector.load %arg3[%c17, %c0_33] : memref<81x32xf32, #tpu.memory_space<vmem>>, vector<1x32xf32>
    %133 = vector.shape_cast %132 : vector<1x32xf32> to vector<32xf32>
    %134 = vector.extract_strided_slice %11 {offsets = [1, 12, 0], sizes = [8, 8, 32], strides = [1, 1, 1]} : vector<16x20x32xf32> to vector<8x8x32xf32>
    %135 = vector.shape_cast %133 : vector<32xf32> to vector<1x1x32xf32>
    %136 = vector.broadcast %135 : vector<1x1x32xf32> to vector<8x8x32xf32>
    %137 = arith.mulf %134, %136 : vector<8x8x32xf32>
    %138 = arith.addf %131, %137 : vector<8x8x32xf32>
    %c18 = arith.constant 18 : index
    %c0_34 = arith.constant 0 : index
    %139 = vector.load %arg3[%c18, %c0_34] : memref<81x32xf32, #tpu.memory_space<vmem>>, vector<1x32xf32>
    %140 = vector.shape_cast %139 : vector<1x32xf32> to vector<32xf32>
    %141 = vector.extract_strided_slice %11 {offsets = [2, 4, 0], sizes = [8, 8, 32], strides = [1, 1, 1]} : vector<16x20x32xf32> to vector<8x8x32xf32>
    %142 = vector.shape_cast %140 : vector<32xf32> to vector<1x1x32xf32>
    %143 = vector.broadcast %142 : vector<1x1x32xf32> to vector<8x8x32xf32>
    %144 = arith.mulf %141, %143 : vector<8x8x32xf32>
    %145 = arith.addf %138, %144 : vector<8x8x32xf32>
    %c19 = arith.constant 19 : index
    %c0_35 = arith.constant 0 : index
    %146 = vector.load %arg3[%c19, %c0_35] : memref<81x32xf32, #tpu.memory_space<vmem>>, vector<1x32xf32>
    %147 = vector.shape_cast %146 : vector<1x32xf32> to vector<32xf32>
    %148 = vector.extract_strided_slice %11 {offsets = [2, 5, 0], sizes = [8, 8, 32], strides = [1, 1, 1]} : vector<16x20x32xf32> to vector<8x8x32xf32>
    %149 = vector.shape_cast %147 : vector<32xf32> to vector<1x1x32xf32>
    %150 = vector.broadcast %149 : vector<1x1x32xf32> to vector<8x8x32xf32>
    %151 = arith.mulf %148, %150 : vector<8x8x32xf32>
    %152 = arith.addf %145, %151 : vector<8x8x32xf32>
    %c20 = arith.constant 20 : index
    %c0_36 = arith.constant 0 : index
    %153 = vector.load %arg3[%c20, %c0_36] : memref<81x32xf32, #tpu.memory_space<vmem>>, vector<1x32xf32>
    %154 = vector.shape_cast %153 : vector<1x32xf32> to vector<32xf32>
    %155 = vector.extract_strided_slice %11 {offsets = [2, 6, 0], sizes = [8, 8, 32], strides = [1, 1, 1]} : vector<16x20x32xf32> to vector<8x8x32xf32>
    %156 = vector.shape_cast %154 : vector<32xf32> to vector<1x1x32xf32>
    %157 = vector.broadcast %156 : vector<1x1x32xf32> to vector<8x8x32xf32>
    %158 = arith.mulf %155, %157 : vector<8x8x32xf32>
    %159 = arith.addf %152, %158 : vector<8x8x32xf32>
    %c21 = arith.constant 21 : index
    %c0_37 = arith.constant 0 : index
    %160 = vector.load %arg3[%c21, %c0_37] : memref<81x32xf32, #tpu.memory_space<vmem>>, vector<1x32xf32>
    %161 = vector.shape_cast %160 : vector<1x32xf32> to vector<32xf32>
    %162 = vector.extract_strided_slice %11 {offsets = [2, 7, 0], sizes = [8, 8, 32], strides = [1, 1, 1]} : vector<16x20x32xf32> to vector<8x8x32xf32>
    %163 = vector.shape_cast %161 : vector<32xf32> to vector<1x1x32xf32>
    %164 = vector.broadcast %163 : vector<1x1x32xf32> to vector<8x8x32xf32>
    %165 = arith.mulf %162, %164 : vector<8x8x32xf32>
    %166 = arith.addf %159, %165 : vector<8x8x32xf32>
    %c22 = arith.constant 22 : index
    %c0_38 = arith.constant 0 : index
    %167 = vector.load %arg3[%c22, %c0_38] : memref<81x32xf32, #tpu.memory_space<vmem>>, vector<1x32xf32>
    %168 = vector.shape_cast %167 : vector<1x32xf32> to vector<32xf32>
    %169 = vector.extract_strided_slice %11 {offsets = [2, 8, 0], sizes = [8, 8, 32], strides = [1, 1, 1]} : vector<16x20x32xf32> to vector<8x8x32xf32>
    %170 = vector.shape_cast %168 : vector<32xf32> to vector<1x1x32xf32>
    %171 = vector.broadcast %170 : vector<1x1x32xf32> to vector<8x8x32xf32>
    %172 = arith.mulf %169, %171 : vector<8x8x32xf32>
    %173 = arith.addf %166, %172 : vector<8x8x32xf32>
    %c23 = arith.constant 23 : index
    %c0_39 = arith.constant 0 : index
    %174 = vector.load %arg3[%c23, %c0_39] : memref<81x32xf32, #tpu.memory_space<vmem>>, vector<1x32xf32>
    %175 = vector.shape_cast %174 : vector<1x32xf32> to vector<32xf32>
    %176 = vector.extract_strided_slice %11 {offsets = [2, 9, 0], sizes = [8, 8, 32], strides = [1, 1, 1]} : vector<16x20x32xf32> to vector<8x8x32xf32>
    %177 = vector.shape_cast %175 : vector<32xf32> to vector<1x1x32xf32>
    %178 = vector.broadcast %177 : vector<1x1x32xf32> to vector<8x8x32xf32>
    %179 = arith.mulf %176, %178 : vector<8x8x32xf32>
    %180 = arith.addf %173, %179 : vector<8x8x32xf32>
    %c24 = arith.constant 24 : index
    %c0_40 = arith.constant 0 : index
    %181 = vector.load %arg3[%c24, %c0_40] : memref<81x32xf32, #tpu.memory_space<vmem>>, vector<1x32xf32>
    %182 = vector.shape_cast %181 : vector<1x32xf32> to vector<32xf32>
    %183 = vector.extract_strided_slice %11 {offsets = [2, 10, 0], sizes = [8, 8, 32], strides = [1, 1, 1]} : vector<16x20x32xf32> to vector<8x8x32xf32>
    %184 = vector.shape_cast %182 : vector<32xf32> to vector<1x1x32xf32>
    %185 = vector.broadcast %184 : vector<1x1x32xf32> to vector<8x8x32xf32>
    %186 = arith.mulf %183, %185 : vector<8x8x32xf32>
    %187 = arith.addf %180, %186 : vector<8x8x32xf32>
    %c25 = arith.constant 25 : index
    %c0_41 = arith.constant 0 : index
    %188 = vector.load %arg3[%c25, %c0_41] : memref<81x32xf32, #tpu.memory_space<vmem>>, vector<1x32xf32>
    %189 = vector.shape_cast %188 : vector<1x32xf32> to vector<32xf32>
    %190 = vector.extract_strided_slice %11 {offsets = [2, 11, 0], sizes = [8, 8, 32], strides = [1, 1, 1]} : vector<16x20x32xf32> to vector<8x8x32xf32>
    %191 = vector.shape_cast %189 : vector<32xf32> to vector<1x1x32xf32>
    %192 = vector.broadcast %191 : vector<1x1x32xf32> to vector<8x8x32xf32>
    %193 = arith.mulf %190, %192 : vector<8x8x32xf32>
    %194 = arith.addf %187, %193 : vector<8x8x32xf32>
    %c26 = arith.constant 26 : index
    %c0_42 = arith.constant 0 : index
    %195 = vector.load %arg3[%c26, %c0_42] : memref<81x32xf32, #tpu.memory_space<vmem>>, vector<1x32xf32>
    %196 = vector.shape_cast %195 : vector<1x32xf32> to vector<32xf32>
    %197 = vector.extract_strided_slice %11 {offsets = [2, 12, 0], sizes = [8, 8, 32], strides = [1, 1, 1]} : vector<16x20x32xf32> to vector<8x8x32xf32>
    %198 = vector.shape_cast %196 : vector<32xf32> to vector<1x1x32xf32>
    %199 = vector.broadcast %198 : vector<1x1x32xf32> to vector<8x8x32xf32>
    %200 = arith.mulf %197, %199 : vector<8x8x32xf32>
    %201 = arith.addf %194, %200 : vector<8x8x32xf32>
    %c27 = arith.constant 27 : index
    %c0_43 = arith.constant 0 : index
    %202 = vector.load %arg3[%c27, %c0_43] : memref<81x32xf32, #tpu.memory_space<vmem>>, vector<1x32xf32>
    %203 = vector.shape_cast %202 : vector<1x32xf32> to vector<32xf32>
    %204 = vector.extract_strided_slice %11 {offsets = [3, 4, 0], sizes = [8, 8, 32], strides = [1, 1, 1]} : vector<16x20x32xf32> to vector<8x8x32xf32>
    %205 = vector.shape_cast %203 : vector<32xf32> to vector<1x1x32xf32>
    %206 = vector.broadcast %205 : vector<1x1x32xf32> to vector<8x8x32xf32>
    %207 = arith.mulf %204, %206 : vector<8x8x32xf32>
    %208 = arith.addf %201, %207 : vector<8x8x32xf32>
    %c28 = arith.constant 28 : index
    %c0_44 = arith.constant 0 : index
    %209 = vector.load %arg3[%c28, %c0_44] : memref<81x32xf32, #tpu.memory_space<vmem>>, vector<1x32xf32>
    %210 = vector.shape_cast %209 : vector<1x32xf32> to vector<32xf32>
    %211 = vector.extract_strided_slice %11 {offsets = [3, 5, 0], sizes = [8, 8, 32], strides = [1, 1, 1]} : vector<16x20x32xf32> to vector<8x8x32xf32>
    %212 = vector.shape_cast %210 : vector<32xf32> to vector<1x1x32xf32>
    %213 = vector.broadcast %212 : vector<1x1x32xf32> to vector<8x8x32xf32>
    %214 = arith.mulf %211, %213 : vector<8x8x32xf32>
    %215 = arith.addf %208, %214 : vector<8x8x32xf32>
    %c29 = arith.constant 29 : index
    %c0_45 = arith.constant 0 : index
    %216 = vector.load %arg3[%c29, %c0_45] : memref<81x32xf32, #tpu.memory_space<vmem>>, vector<1x32xf32>
    %217 = vector.shape_cast %216 : vector<1x32xf32> to vector<32xf32>
    %218 = vector.extract_strided_slice %11 {offsets = [3, 6, 0], sizes = [8, 8, 32], strides = [1, 1, 1]} : vector<16x20x32xf32> to vector<8x8x32xf32>
    %219 = vector.shape_cast %217 : vector<32xf32> to vector<1x1x32xf32>
    %220 = vector.broadcast %219 : vector<1x1x32xf32> to vector<8x8x32xf32>
    %221 = arith.mulf %218, %220 : vector<8x8x32xf32>
    %222 = arith.addf %215, %221 : vector<8x8x32xf32>
    %c30 = arith.constant 30 : index
    %c0_46 = arith.constant 0 : index
    %223 = vector.load %arg3[%c30, %c0_46] : memref<81x32xf32, #tpu.memory_space<vmem>>, vector<1x32xf32>
    %224 = vector.shape_cast %223 : vector<1x32xf32> to vector<32xf32>
    %225 = vector.extract_strided_slice %11 {offsets = [3, 7, 0], sizes = [8, 8, 32], strides = [1, 1, 1]} : vector<16x20x32xf32> to vector<8x8x32xf32>
    %226 = vector.shape_cast %224 : vector<32xf32> to vector<1x1x32xf32>
    %227 = vector.broadcast %226 : vector<1x1x32xf32> to vector<8x8x32xf32>
    %228 = arith.mulf %225, %227 : vector<8x8x32xf32>
    %229 = arith.addf %222, %228 : vector<8x8x32xf32>
    %c31 = arith.constant 31 : index
    %c0_47 = arith.constant 0 : index
    %230 = vector.load %arg3[%c31, %c0_47] : memref<81x32xf32, #tpu.memory_space<vmem>>, vector<1x32xf32>
    %231 = vector.shape_cast %230 : vector<1x32xf32> to vector<32xf32>
    %232 = vector.extract_strided_slice %11 {offsets = [3, 8, 0], sizes = [8, 8, 32], strides = [1, 1, 1]} : vector<16x20x32xf32> to vector<8x8x32xf32>
    %233 = vector.shape_cast %231 : vector<32xf32> to vector<1x1x32xf32>
    %234 = vector.broadcast %233 : vector<1x1x32xf32> to vector<8x8x32xf32>
    %235 = arith.mulf %232, %234 : vector<8x8x32xf32>
    %236 = arith.addf %229, %235 : vector<8x8x32xf32>
    %c32 = arith.constant 32 : index
    %c0_48 = arith.constant 0 : index
    %237 = vector.load %arg3[%c32, %c0_48] : memref<81x32xf32, #tpu.memory_space<vmem>>, vector<1x32xf32>
    %238 = vector.shape_cast %237 : vector<1x32xf32> to vector<32xf32>
    %239 = vector.extract_strided_slice %11 {offsets = [3, 9, 0], sizes = [8, 8, 32], strides = [1, 1, 1]} : vector<16x20x32xf32> to vector<8x8x32xf32>
    %240 = vector.shape_cast %238 : vector<32xf32> to vector<1x1x32xf32>
    %241 = vector.broadcast %240 : vector<1x1x32xf32> to vector<8x8x32xf32>
    %242 = arith.mulf %239, %241 : vector<8x8x32xf32>
    %243 = arith.addf %236, %242 : vector<8x8x32xf32>
    %c33 = arith.constant 33 : index
    %c0_49 = arith.constant 0 : index
    %244 = vector.load %arg3[%c33, %c0_49] : memref<81x32xf32, #tpu.memory_space<vmem>>, vector<1x32xf32>
    %245 = vector.shape_cast %244 : vector<1x32xf32> to vector<32xf32>
    %246 = vector.extract_strided_slice %11 {offsets = [3, 10, 0], sizes = [8, 8, 32], strides = [1, 1, 1]} : vector<16x20x32xf32> to vector<8x8x32xf32>
    %247 = vector.shape_cast %245 : vector<32xf32> to vector<1x1x32xf32>
    %248 = vector.broadcast %247 : vector<1x1x32xf32> to vector<8x8x32xf32>
    %249 = arith.mulf %246, %248 : vector<8x8x32xf32>
    %250 = arith.addf %243, %249 : vector<8x8x32xf32>
    %c34 = arith.constant 34 : index
    %c0_50 = arith.constant 0 : index
    %251 = vector.load %arg3[%c34, %c0_50] : memref<81x32xf32, #tpu.memory_space<vmem>>, vector<1x32xf32>
    %252 = vector.shape_cast %251 : vector<1x32xf32> to vector<32xf32>
    %253 = vector.extract_strided_slice %11 {offsets = [3, 11, 0], sizes = [8, 8, 32], strides = [1, 1, 1]} : vector<16x20x32xf32> to vector<8x8x32xf32>
    %254 = vector.shape_cast %252 : vector<32xf32> to vector<1x1x32xf32>
    %255 = vector.broadcast %254 : vector<1x1x32xf32> to vector<8x8x32xf32>
    %256 = arith.mulf %253, %255 : vector<8x8x32xf32>
    %257 = arith.addf %250, %256 : vector<8x8x32xf32>
    %c35 = arith.constant 35 : index
    %c0_51 = arith.constant 0 : index
    %258 = vector.load %arg3[%c35, %c0_51] : memref<81x32xf32, #tpu.memory_space<vmem>>, vector<1x32xf32>
    %259 = vector.shape_cast %258 : vector<1x32xf32> to vector<32xf32>
    %260 = vector.extract_strided_slice %11 {offsets = [3, 12, 0], sizes = [8, 8, 32], strides = [1, 1, 1]} : vector<16x20x32xf32> to vector<8x8x32xf32>
    %261 = vector.shape_cast %259 : vector<32xf32> to vector<1x1x32xf32>
    %262 = vector.broadcast %261 : vector<1x1x32xf32> to vector<8x8x32xf32>
    %263 = arith.mulf %260, %262 : vector<8x8x32xf32>
    %264 = arith.addf %257, %263 : vector<8x8x32xf32>
    %c36 = arith.constant 36 : index
    %c0_52 = arith.constant 0 : index
    %265 = vector.load %arg3[%c36, %c0_52] : memref<81x32xf32, #tpu.memory_space<vmem>>, vector<1x32xf32>
    %266 = vector.shape_cast %265 : vector<1x32xf32> to vector<32xf32>
    %267 = vector.extract_strided_slice %11 {offsets = [4, 4, 0], sizes = [8, 8, 32], strides = [1, 1, 1]} : vector<16x20x32xf32> to vector<8x8x32xf32>
    %268 = vector.shape_cast %266 : vector<32xf32> to vector<1x1x32xf32>
    %269 = vector.broadcast %268 : vector<1x1x32xf32> to vector<8x8x32xf32>
    %270 = arith.mulf %267, %269 : vector<8x8x32xf32>
    %271 = arith.addf %264, %270 : vector<8x8x32xf32>
    %c37 = arith.constant 37 : index
    %c0_53 = arith.constant 0 : index
    %272 = vector.load %arg3[%c37, %c0_53] : memref<81x32xf32, #tpu.memory_space<vmem>>, vector<1x32xf32>
    %273 = vector.shape_cast %272 : vector<1x32xf32> to vector<32xf32>
    %274 = vector.extract_strided_slice %11 {offsets = [4, 5, 0], sizes = [8, 8, 32], strides = [1, 1, 1]} : vector<16x20x32xf32> to vector<8x8x32xf32>
    %275 = vector.shape_cast %273 : vector<32xf32> to vector<1x1x32xf32>
    %276 = vector.broadcast %275 : vector<1x1x32xf32> to vector<8x8x32xf32>
    %277 = arith.mulf %274, %276 : vector<8x8x32xf32>
    %278 = arith.addf %271, %277 : vector<8x8x32xf32>
    %c38 = arith.constant 38 : index
    %c0_54 = arith.constant 0 : index
    %279 = vector.load %arg3[%c38, %c0_54] : memref<81x32xf32, #tpu.memory_space<vmem>>, vector<1x32xf32>
    %280 = vector.shape_cast %279 : vector<1x32xf32> to vector<32xf32>
    %281 = vector.extract_strided_slice %11 {offsets = [4, 6, 0], sizes = [8, 8, 32], strides = [1, 1, 1]} : vector<16x20x32xf32> to vector<8x8x32xf32>
    %282 = vector.shape_cast %280 : vector<32xf32> to vector<1x1x32xf32>
    %283 = vector.broadcast %282 : vector<1x1x32xf32> to vector<8x8x32xf32>
    %284 = arith.mulf %281, %283 : vector<8x8x32xf32>
    %285 = arith.addf %278, %284 : vector<8x8x32xf32>
    %c39 = arith.constant 39 : index
    %c0_55 = arith.constant 0 : index
    %286 = vector.load %arg3[%c39, %c0_55] : memref<81x32xf32, #tpu.memory_space<vmem>>, vector<1x32xf32>
    %287 = vector.shape_cast %286 : vector<1x32xf32> to vector<32xf32>
    %288 = vector.extract_strided_slice %11 {offsets = [4, 7, 0], sizes = [8, 8, 32], strides = [1, 1, 1]} : vector<16x20x32xf32> to vector<8x8x32xf32>
    %289 = vector.shape_cast %287 : vector<32xf32> to vector<1x1x32xf32>
    %290 = vector.broadcast %289 : vector<1x1x32xf32> to vector<8x8x32xf32>
    %291 = arith.mulf %288, %290 : vector<8x8x32xf32>
    %292 = arith.addf %285, %291 : vector<8x8x32xf32>
    %c40 = arith.constant 40 : index
    %c0_56 = arith.constant 0 : index
    %293 = vector.load %arg3[%c40, %c0_56] : memref<81x32xf32, #tpu.memory_space<vmem>>, vector<1x32xf32>
    %294 = vector.shape_cast %293 : vector<1x32xf32> to vector<32xf32>
    %295 = vector.extract_strided_slice %11 {offsets = [4, 8, 0], sizes = [8, 8, 32], strides = [1, 1, 1]} : vector<16x20x32xf32> to vector<8x8x32xf32>
    %296 = vector.shape_cast %294 : vector<32xf32> to vector<1x1x32xf32>
    %297 = vector.broadcast %296 : vector<1x1x32xf32> to vector<8x8x32xf32>
    %298 = arith.mulf %295, %297 : vector<8x8x32xf32>
    %299 = arith.addf %292, %298 : vector<8x8x32xf32>
    %c41 = arith.constant 41 : index
    %c0_57 = arith.constant 0 : index
    %300 = vector.load %arg3[%c41, %c0_57] : memref<81x32xf32, #tpu.memory_space<vmem>>, vector<1x32xf32>
    %301 = vector.shape_cast %300 : vector<1x32xf32> to vector<32xf32>
    %302 = vector.extract_strided_slice %11 {offsets = [4, 9, 0], sizes = [8, 8, 32], strides = [1, 1, 1]} : vector<16x20x32xf32> to vector<8x8x32xf32>
    %303 = vector.shape_cast %301 : vector<32xf32> to vector<1x1x32xf32>
    %304 = vector.broadcast %303 : vector<1x1x32xf32> to vector<8x8x32xf32>
    %305 = arith.mulf %302, %304 : vector<8x8x32xf32>
    %306 = arith.addf %299, %305 : vector<8x8x32xf32>
    %c42 = arith.constant 42 : index
    %c0_58 = arith.constant 0 : index
    %307 = vector.load %arg3[%c42, %c0_58] : memref<81x32xf32, #tpu.memory_space<vmem>>, vector<1x32xf32>
    %308 = vector.shape_cast %307 : vector<1x32xf32> to vector<32xf32>
    %309 = vector.extract_strided_slice %11 {offsets = [4, 10, 0], sizes = [8, 8, 32], strides = [1, 1, 1]} : vector<16x20x32xf32> to vector<8x8x32xf32>
    %310 = vector.shape_cast %308 : vector<32xf32> to vector<1x1x32xf32>
    %311 = vector.broadcast %310 : vector<1x1x32xf32> to vector<8x8x32xf32>
    %312 = arith.mulf %309, %311 : vector<8x8x32xf32>
    %313 = arith.addf %306, %312 : vector<8x8x32xf32>
    %c43 = arith.constant 43 : index
    %c0_59 = arith.constant 0 : index
    %314 = vector.load %arg3[%c43, %c0_59] : memref<81x32xf32, #tpu.memory_space<vmem>>, vector<1x32xf32>
    %315 = vector.shape_cast %314 : vector<1x32xf32> to vector<32xf32>
    %316 = vector.extract_strided_slice %11 {offsets = [4, 11, 0], sizes = [8, 8, 32], strides = [1, 1, 1]} : vector<16x20x32xf32> to vector<8x8x32xf32>
    %317 = vector.shape_cast %315 : vector<32xf32> to vector<1x1x32xf32>
    %318 = vector.broadcast %317 : vector<1x1x32xf32> to vector<8x8x32xf32>
    %319 = arith.mulf %316, %318 : vector<8x8x32xf32>
    %320 = arith.addf %313, %319 : vector<8x8x32xf32>
    %c44 = arith.constant 44 : index
    %c0_60 = arith.constant 0 : index
    %321 = vector.load %arg3[%c44, %c0_60] : memref<81x32xf32, #tpu.memory_space<vmem>>, vector<1x32xf32>
    %322 = vector.shape_cast %321 : vector<1x32xf32> to vector<32xf32>
    %323 = vector.extract_strided_slice %11 {offsets = [4, 12, 0], sizes = [8, 8, 32], strides = [1, 1, 1]} : vector<16x20x32xf32> to vector<8x8x32xf32>
    %324 = vector.shape_cast %322 : vector<32xf32> to vector<1x1x32xf32>
    %325 = vector.broadcast %324 : vector<1x1x32xf32> to vector<8x8x32xf32>
    %326 = arith.mulf %323, %325 : vector<8x8x32xf32>
    %327 = arith.addf %320, %326 : vector<8x8x32xf32>
    %c45 = arith.constant 45 : index
    %c0_61 = arith.constant 0 : index
    %328 = vector.load %arg3[%c45, %c0_61] : memref<81x32xf32, #tpu.memory_space<vmem>>, vector<1x32xf32>
    %329 = vector.shape_cast %328 : vector<1x32xf32> to vector<32xf32>
    %330 = vector.extract_strided_slice %11 {offsets = [5, 4, 0], sizes = [8, 8, 32], strides = [1, 1, 1]} : vector<16x20x32xf32> to vector<8x8x32xf32>
    %331 = vector.shape_cast %329 : vector<32xf32> to vector<1x1x32xf32>
    %332 = vector.broadcast %331 : vector<1x1x32xf32> to vector<8x8x32xf32>
    %333 = arith.mulf %330, %332 : vector<8x8x32xf32>
    %334 = arith.addf %327, %333 : vector<8x8x32xf32>
    %c46 = arith.constant 46 : index
    %c0_62 = arith.constant 0 : index
    %335 = vector.load %arg3[%c46, %c0_62] : memref<81x32xf32, #tpu.memory_space<vmem>>, vector<1x32xf32>
    %336 = vector.shape_cast %335 : vector<1x32xf32> to vector<32xf32>
    %337 = vector.extract_strided_slice %11 {offsets = [5, 5, 0], sizes = [8, 8, 32], strides = [1, 1, 1]} : vector<16x20x32xf32> to vector<8x8x32xf32>
    %338 = vector.shape_cast %336 : vector<32xf32> to vector<1x1x32xf32>
    %339 = vector.broadcast %338 : vector<1x1x32xf32> to vector<8x8x32xf32>
    %340 = arith.mulf %337, %339 : vector<8x8x32xf32>
    %341 = arith.addf %334, %340 : vector<8x8x32xf32>
    %c47 = arith.constant 47 : index
    %c0_63 = arith.constant 0 : index
    %342 = vector.load %arg3[%c47, %c0_63] : memref<81x32xf32, #tpu.memory_space<vmem>>, vector<1x32xf32>
    %343 = vector.shape_cast %342 : vector<1x32xf32> to vector<32xf32>
    %344 = vector.extract_strided_slice %11 {offsets = [5, 6, 0], sizes = [8, 8, 32], strides = [1, 1, 1]} : vector<16x20x32xf32> to vector<8x8x32xf32>
    %345 = vector.shape_cast %343 : vector<32xf32> to vector<1x1x32xf32>
    %346 = vector.broadcast %345 : vector<1x1x32xf32> to vector<8x8x32xf32>
    %347 = arith.mulf %344, %346 : vector<8x8x32xf32>
    %348 = arith.addf %341, %347 : vector<8x8x32xf32>
    %c48 = arith.constant 48 : index
    %c0_64 = arith.constant 0 : index
    %349 = vector.load %arg3[%c48, %c0_64] : memref<81x32xf32, #tpu.memory_space<vmem>>, vector<1x32xf32>
    %350 = vector.shape_cast %349 : vector<1x32xf32> to vector<32xf32>
    %351 = vector.extract_strided_slice %11 {offsets = [5, 7, 0], sizes = [8, 8, 32], strides = [1, 1, 1]} : vector<16x20x32xf32> to vector<8x8x32xf32>
    %352 = vector.shape_cast %350 : vector<32xf32> to vector<1x1x32xf32>
    %353 = vector.broadcast %352 : vector<1x1x32xf32> to vector<8x8x32xf32>
    %354 = arith.mulf %351, %353 : vector<8x8x32xf32>
    %355 = arith.addf %348, %354 : vector<8x8x32xf32>
    %c49 = arith.constant 49 : index
    %c0_65 = arith.constant 0 : index
    %356 = vector.load %arg3[%c49, %c0_65] : memref<81x32xf32, #tpu.memory_space<vmem>>, vector<1x32xf32>
    %357 = vector.shape_cast %356 : vector<1x32xf32> to vector<32xf32>
    %358 = vector.extract_strided_slice %11 {offsets = [5, 8, 0], sizes = [8, 8, 32], strides = [1, 1, 1]} : vector<16x20x32xf32> to vector<8x8x32xf32>
    %359 = vector.shape_cast %357 : vector<32xf32> to vector<1x1x32xf32>
    %360 = vector.broadcast %359 : vector<1x1x32xf32> to vector<8x8x32xf32>
    %361 = arith.mulf %358, %360 : vector<8x8x32xf32>
    %362 = arith.addf %355, %361 : vector<8x8x32xf32>
    %c50 = arith.constant 50 : index
    %c0_66 = arith.constant 0 : index
    %363 = vector.load %arg3[%c50, %c0_66] : memref<81x32xf32, #tpu.memory_space<vmem>>, vector<1x32xf32>
    %364 = vector.shape_cast %363 : vector<1x32xf32> to vector<32xf32>
    %365 = vector.extract_strided_slice %11 {offsets = [5, 9, 0], sizes = [8, 8, 32], strides = [1, 1, 1]} : vector<16x20x32xf32> to vector<8x8x32xf32>
    %366 = vector.shape_cast %364 : vector<32xf32> to vector<1x1x32xf32>
    %367 = vector.broadcast %366 : vector<1x1x32xf32> to vector<8x8x32xf32>
    %368 = arith.mulf %365, %367 : vector<8x8x32xf32>
    %369 = arith.addf %362, %368 : vector<8x8x32xf32>
    %c51 = arith.constant 51 : index
    %c0_67 = arith.constant 0 : index
    %370 = vector.load %arg3[%c51, %c0_67] : memref<81x32xf32, #tpu.memory_space<vmem>>, vector<1x32xf32>
    %371 = vector.shape_cast %370 : vector<1x32xf32> to vector<32xf32>
    %372 = vector.extract_strided_slice %11 {offsets = [5, 10, 0], sizes = [8, 8, 32], strides = [1, 1, 1]} : vector<16x20x32xf32> to vector<8x8x32xf32>
    %373 = vector.shape_cast %371 : vector<32xf32> to vector<1x1x32xf32>
    %374 = vector.broadcast %373 : vector<1x1x32xf32> to vector<8x8x32xf32>
    %375 = arith.mulf %372, %374 : vector<8x8x32xf32>
    %376 = arith.addf %369, %375 : vector<8x8x32xf32>
    %c52 = arith.constant 52 : index
    %c0_68 = arith.constant 0 : index
    %377 = vector.load %arg3[%c52, %c0_68] : memref<81x32xf32, #tpu.memory_space<vmem>>, vector<1x32xf32>
    %378 = vector.shape_cast %377 : vector<1x32xf32> to vector<32xf32>
    %379 = vector.extract_strided_slice %11 {offsets = [5, 11, 0], sizes = [8, 8, 32], strides = [1, 1, 1]} : vector<16x20x32xf32> to vector<8x8x32xf32>
    %380 = vector.shape_cast %378 : vector<32xf32> to vector<1x1x32xf32>
    %381 = vector.broadcast %380 : vector<1x1x32xf32> to vector<8x8x32xf32>
    %382 = arith.mulf %379, %381 : vector<8x8x32xf32>
    %383 = arith.addf %376, %382 : vector<8x8x32xf32>
    %c53 = arith.constant 53 : index
    %c0_69 = arith.constant 0 : index
    %384 = vector.load %arg3[%c53, %c0_69] : memref<81x32xf32, #tpu.memory_space<vmem>>, vector<1x32xf32>
    %385 = vector.shape_cast %384 : vector<1x32xf32> to vector<32xf32>
    %386 = vector.extract_strided_slice %11 {offsets = [5, 12, 0], sizes = [8, 8, 32], strides = [1, 1, 1]} : vector<16x20x32xf32> to vector<8x8x32xf32>
    %387 = vector.shape_cast %385 : vector<32xf32> to vector<1x1x32xf32>
    %388 = vector.broadcast %387 : vector<1x1x32xf32> to vector<8x8x32xf32>
    %389 = arith.mulf %386, %388 : vector<8x8x32xf32>
    %390 = arith.addf %383, %389 : vector<8x8x32xf32>
    %c54 = arith.constant 54 : index
    %c0_70 = arith.constant 0 : index
    %391 = vector.load %arg3[%c54, %c0_70] : memref<81x32xf32, #tpu.memory_space<vmem>>, vector<1x32xf32>
    %392 = vector.shape_cast %391 : vector<1x32xf32> to vector<32xf32>
    %393 = vector.extract_strided_slice %11 {offsets = [6, 4, 0], sizes = [8, 8, 32], strides = [1, 1, 1]} : vector<16x20x32xf32> to vector<8x8x32xf32>
    %394 = vector.shape_cast %392 : vector<32xf32> to vector<1x1x32xf32>
    %395 = vector.broadcast %394 : vector<1x1x32xf32> to vector<8x8x32xf32>
    %396 = arith.mulf %393, %395 : vector<8x8x32xf32>
    %397 = arith.addf %390, %396 : vector<8x8x32xf32>
    %c55 = arith.constant 55 : index
    %c0_71 = arith.constant 0 : index
    %398 = vector.load %arg3[%c55, %c0_71] : memref<81x32xf32, #tpu.memory_space<vmem>>, vector<1x32xf32>
    %399 = vector.shape_cast %398 : vector<1x32xf32> to vector<32xf32>
    %400 = vector.extract_strided_slice %11 {offsets = [6, 5, 0], sizes = [8, 8, 32], strides = [1, 1, 1]} : vector<16x20x32xf32> to vector<8x8x32xf32>
    %401 = vector.shape_cast %399 : vector<32xf32> to vector<1x1x32xf32>
    %402 = vector.broadcast %401 : vector<1x1x32xf32> to vector<8x8x32xf32>
    %403 = arith.mulf %400, %402 : vector<8x8x32xf32>
    %404 = arith.addf %397, %403 : vector<8x8x32xf32>
    %c56 = arith.constant 56 : index
    %c0_72 = arith.constant 0 : index
    %405 = vector.load %arg3[%c56, %c0_72] : memref<81x32xf32, #tpu.memory_space<vmem>>, vector<1x32xf32>
    %406 = vector.shape_cast %405 : vector<1x32xf32> to vector<32xf32>
    %407 = vector.extract_strided_slice %11 {offsets = [6, 6, 0], sizes = [8, 8, 32], strides = [1, 1, 1]} : vector<16x20x32xf32> to vector<8x8x32xf32>
    %408 = vector.shape_cast %406 : vector<32xf32> to vector<1x1x32xf32>
    %409 = vector.broadcast %408 : vector<1x1x32xf32> to vector<8x8x32xf32>
    %410 = arith.mulf %407, %409 : vector<8x8x32xf32>
    %411 = arith.addf %404, %410 : vector<8x8x32xf32>
    %c57 = arith.constant 57 : index
    %c0_73 = arith.constant 0 : index
    %412 = vector.load %arg3[%c57, %c0_73] : memref<81x32xf32, #tpu.memory_space<vmem>>, vector<1x32xf32>
    %413 = vector.shape_cast %412 : vector<1x32xf32> to vector<32xf32>
    %414 = vector.extract_strided_slice %11 {offsets = [6, 7, 0], sizes = [8, 8, 32], strides = [1, 1, 1]} : vector<16x20x32xf32> to vector<8x8x32xf32>
    %415 = vector.shape_cast %413 : vector<32xf32> to vector<1x1x32xf32>
    %416 = vector.broadcast %415 : vector<1x1x32xf32> to vector<8x8x32xf32>
    %417 = arith.mulf %414, %416 : vector<8x8x32xf32>
    %418 = arith.addf %411, %417 : vector<8x8x32xf32>
    %c58 = arith.constant 58 : index
    %c0_74 = arith.constant 0 : index
    %419 = vector.load %arg3[%c58, %c0_74] : memref<81x32xf32, #tpu.memory_space<vmem>>, vector<1x32xf32>
    %420 = vector.shape_cast %419 : vector<1x32xf32> to vector<32xf32>
    %421 = vector.extract_strided_slice %11 {offsets = [6, 8, 0], sizes = [8, 8, 32], strides = [1, 1, 1]} : vector<16x20x32xf32> to vector<8x8x32xf32>
    %422 = vector.shape_cast %420 : vector<32xf32> to vector<1x1x32xf32>
    %423 = vector.broadcast %422 : vector<1x1x32xf32> to vector<8x8x32xf32>
    %424 = arith.mulf %421, %423 : vector<8x8x32xf32>
    %425 = arith.addf %418, %424 : vector<8x8x32xf32>
    %c59 = arith.constant 59 : index
    %c0_75 = arith.constant 0 : index
    %426 = vector.load %arg3[%c59, %c0_75] : memref<81x32xf32, #tpu.memory_space<vmem>>, vector<1x32xf32>
    %427 = vector.shape_cast %426 : vector<1x32xf32> to vector<32xf32>
    %428 = vector.extract_strided_slice %11 {offsets = [6, 9, 0], sizes = [8, 8, 32], strides = [1, 1, 1]} : vector<16x20x32xf32> to vector<8x8x32xf32>
    %429 = vector.shape_cast %427 : vector<32xf32> to vector<1x1x32xf32>
    %430 = vector.broadcast %429 : vector<1x1x32xf32> to vector<8x8x32xf32>
    %431 = arith.mulf %428, %430 : vector<8x8x32xf32>
    %432 = arith.addf %425, %431 : vector<8x8x32xf32>
    %c60 = arith.constant 60 : index
    %c0_76 = arith.constant 0 : index
    %433 = vector.load %arg3[%c60, %c0_76] : memref<81x32xf32, #tpu.memory_space<vmem>>, vector<1x32xf32>
    %434 = vector.shape_cast %433 : vector<1x32xf32> to vector<32xf32>
    %435 = vector.extract_strided_slice %11 {offsets = [6, 10, 0], sizes = [8, 8, 32], strides = [1, 1, 1]} : vector<16x20x32xf32> to vector<8x8x32xf32>
    %436 = vector.shape_cast %434 : vector<32xf32> to vector<1x1x32xf32>
    %437 = vector.broadcast %436 : vector<1x1x32xf32> to vector<8x8x32xf32>
    %438 = arith.mulf %435, %437 : vector<8x8x32xf32>
    %439 = arith.addf %432, %438 : vector<8x8x32xf32>
    %c61 = arith.constant 61 : index
    %c0_77 = arith.constant 0 : index
    %440 = vector.load %arg3[%c61, %c0_77] : memref<81x32xf32, #tpu.memory_space<vmem>>, vector<1x32xf32>
    %441 = vector.shape_cast %440 : vector<1x32xf32> to vector<32xf32>
    %442 = vector.extract_strided_slice %11 {offsets = [6, 11, 0], sizes = [8, 8, 32], strides = [1, 1, 1]} : vector<16x20x32xf32> to vector<8x8x32xf32>
    %443 = vector.shape_cast %441 : vector<32xf32> to vector<1x1x32xf32>
    %444 = vector.broadcast %443 : vector<1x1x32xf32> to vector<8x8x32xf32>
    %445 = arith.mulf %442, %444 : vector<8x8x32xf32>
    %446 = arith.addf %439, %445 : vector<8x8x32xf32>
    %c62 = arith.constant 62 : index
    %c0_78 = arith.constant 0 : index
    %447 = vector.load %arg3[%c62, %c0_78] : memref<81x32xf32, #tpu.memory_space<vmem>>, vector<1x32xf32>
    %448 = vector.shape_cast %447 : vector<1x32xf32> to vector<32xf32>
    %449 = vector.extract_strided_slice %11 {offsets = [6, 12, 0], sizes = [8, 8, 32], strides = [1, 1, 1]} : vector<16x20x32xf32> to vector<8x8x32xf32>
    %450 = vector.shape_cast %448 : vector<32xf32> to vector<1x1x32xf32>
    %451 = vector.broadcast %450 : vector<1x1x32xf32> to vector<8x8x32xf32>
    %452 = arith.mulf %449, %451 : vector<8x8x32xf32>
    %453 = arith.addf %446, %452 : vector<8x8x32xf32>
    %c63 = arith.constant 63 : index
    %c0_79 = arith.constant 0 : index
    %454 = vector.load %arg3[%c63, %c0_79] : memref<81x32xf32, #tpu.memory_space<vmem>>, vector<1x32xf32>
    %455 = vector.shape_cast %454 : vector<1x32xf32> to vector<32xf32>
    %456 = vector.extract_strided_slice %11 {offsets = [7, 4, 0], sizes = [8, 8, 32], strides = [1, 1, 1]} : vector<16x20x32xf32> to vector<8x8x32xf32>
    %457 = vector.shape_cast %455 : vector<32xf32> to vector<1x1x32xf32>
    %458 = vector.broadcast %457 : vector<1x1x32xf32> to vector<8x8x32xf32>
    %459 = arith.mulf %456, %458 : vector<8x8x32xf32>
    %460 = arith.addf %453, %459 : vector<8x8x32xf32>
    %c64 = arith.constant 64 : index
    %c0_80 = arith.constant 0 : index
    %461 = vector.load %arg3[%c64, %c0_80] : memref<81x32xf32, #tpu.memory_space<vmem>>, vector<1x32xf32>
    %462 = vector.shape_cast %461 : vector<1x32xf32> to vector<32xf32>
    %463 = vector.extract_strided_slice %11 {offsets = [7, 5, 0], sizes = [8, 8, 32], strides = [1, 1, 1]} : vector<16x20x32xf32> to vector<8x8x32xf32>
    %464 = vector.shape_cast %462 : vector<32xf32> to vector<1x1x32xf32>
    %465 = vector.broadcast %464 : vector<1x1x32xf32> to vector<8x8x32xf32>
    %466 = arith.mulf %463, %465 : vector<8x8x32xf32>
    %467 = arith.addf %460, %466 : vector<8x8x32xf32>
    %c65 = arith.constant 65 : index
    %c0_81 = arith.constant 0 : index
    %468 = vector.load %arg3[%c65, %c0_81] : memref<81x32xf32, #tpu.memory_space<vmem>>, vector<1x32xf32>
    %469 = vector.shape_cast %468 : vector<1x32xf32> to vector<32xf32>
    %470 = vector.extract_strided_slice %11 {offsets = [7, 6, 0], sizes = [8, 8, 32], strides = [1, 1, 1]} : vector<16x20x32xf32> to vector<8x8x32xf32>
    %471 = vector.shape_cast %469 : vector<32xf32> to vector<1x1x32xf32>
    %472 = vector.broadcast %471 : vector<1x1x32xf32> to vector<8x8x32xf32>
    %473 = arith.mulf %470, %472 : vector<8x8x32xf32>
    %474 = arith.addf %467, %473 : vector<8x8x32xf32>
    %c66 = arith.constant 66 : index
    %c0_82 = arith.constant 0 : index
    %475 = vector.load %arg3[%c66, %c0_82] : memref<81x32xf32, #tpu.memory_space<vmem>>, vector<1x32xf32>
    %476 = vector.shape_cast %475 : vector<1x32xf32> to vector<32xf32>
    %477 = vector.extract_strided_slice %11 {offsets = [7, 7, 0], sizes = [8, 8, 32], strides = [1, 1, 1]} : vector<16x20x32xf32> to vector<8x8x32xf32>
    %478 = vector.shape_cast %476 : vector<32xf32> to vector<1x1x32xf32>
    %479 = vector.broadcast %478 : vector<1x1x32xf32> to vector<8x8x32xf32>
    %480 = arith.mulf %477, %479 : vector<8x8x32xf32>
    %481 = arith.addf %474, %480 : vector<8x8x32xf32>
    %c67 = arith.constant 67 : index
    %c0_83 = arith.constant 0 : index
    %482 = vector.load %arg3[%c67, %c0_83] : memref<81x32xf32, #tpu.memory_space<vmem>>, vector<1x32xf32>
    %483 = vector.shape_cast %482 : vector<1x32xf32> to vector<32xf32>
    %484 = vector.extract_strided_slice %11 {offsets = [7, 8, 0], sizes = [8, 8, 32], strides = [1, 1, 1]} : vector<16x20x32xf32> to vector<8x8x32xf32>
    %485 = vector.shape_cast %483 : vector<32xf32> to vector<1x1x32xf32>
    %486 = vector.broadcast %485 : vector<1x1x32xf32> to vector<8x8x32xf32>
    %487 = arith.mulf %484, %486 : vector<8x8x32xf32>
    %488 = arith.addf %481, %487 : vector<8x8x32xf32>
    %c68 = arith.constant 68 : index
    %c0_84 = arith.constant 0 : index
    %489 = vector.load %arg3[%c68, %c0_84] : memref<81x32xf32, #tpu.memory_space<vmem>>, vector<1x32xf32>
    %490 = vector.shape_cast %489 : vector<1x32xf32> to vector<32xf32>
    %491 = vector.extract_strided_slice %11 {offsets = [7, 9, 0], sizes = [8, 8, 32], strides = [1, 1, 1]} : vector<16x20x32xf32> to vector<8x8x32xf32>
    %492 = vector.shape_cast %490 : vector<32xf32> to vector<1x1x32xf32>
    %493 = vector.broadcast %492 : vector<1x1x32xf32> to vector<8x8x32xf32>
    %494 = arith.mulf %491, %493 : vector<8x8x32xf32>
    %495 = arith.addf %488, %494 : vector<8x8x32xf32>
    %c69 = arith.constant 69 : index
    %c0_85 = arith.constant 0 : index
    %496 = vector.load %arg3[%c69, %c0_85] : memref<81x32xf32, #tpu.memory_space<vmem>>, vector<1x32xf32>
    %497 = vector.shape_cast %496 : vector<1x32xf32> to vector<32xf32>
    %498 = vector.extract_strided_slice %11 {offsets = [7, 10, 0], sizes = [8, 8, 32], strides = [1, 1, 1]} : vector<16x20x32xf32> to vector<8x8x32xf32>
    %499 = vector.shape_cast %497 : vector<32xf32> to vector<1x1x32xf32>
    %500 = vector.broadcast %499 : vector<1x1x32xf32> to vector<8x8x32xf32>
    %501 = arith.mulf %498, %500 : vector<8x8x32xf32>
    %502 = arith.addf %495, %501 : vector<8x8x32xf32>
    %c70 = arith.constant 70 : index
    %c0_86 = arith.constant 0 : index
    %503 = vector.load %arg3[%c70, %c0_86] : memref<81x32xf32, #tpu.memory_space<vmem>>, vector<1x32xf32>
    %504 = vector.shape_cast %503 : vector<1x32xf32> to vector<32xf32>
    %505 = vector.extract_strided_slice %11 {offsets = [7, 11, 0], sizes = [8, 8, 32], strides = [1, 1, 1]} : vector<16x20x32xf32> to vector<8x8x32xf32>
    %506 = vector.shape_cast %504 : vector<32xf32> to vector<1x1x32xf32>
    %507 = vector.broadcast %506 : vector<1x1x32xf32> to vector<8x8x32xf32>
    %508 = arith.mulf %505, %507 : vector<8x8x32xf32>
    %509 = arith.addf %502, %508 : vector<8x8x32xf32>
    %c71 = arith.constant 71 : index
    %c0_87 = arith.constant 0 : index
    %510 = vector.load %arg3[%c71, %c0_87] : memref<81x32xf32, #tpu.memory_space<vmem>>, vector<1x32xf32>
    %511 = vector.shape_cast %510 : vector<1x32xf32> to vector<32xf32>
    %512 = vector.extract_strided_slice %11 {offsets = [7, 12, 0], sizes = [8, 8, 32], strides = [1, 1, 1]} : vector<16x20x32xf32> to vector<8x8x32xf32>
    %513 = vector.shape_cast %511 : vector<32xf32> to vector<1x1x32xf32>
    %514 = vector.broadcast %513 : vector<1x1x32xf32> to vector<8x8x32xf32>
    %515 = arith.mulf %512, %514 : vector<8x8x32xf32>
    %516 = arith.addf %509, %515 : vector<8x8x32xf32>
    %c72 = arith.constant 72 : index
    %c0_88 = arith.constant 0 : index
    %517 = vector.load %arg3[%c72, %c0_88] : memref<81x32xf32, #tpu.memory_space<vmem>>, vector<1x32xf32>
    %518 = vector.shape_cast %517 : vector<1x32xf32> to vector<32xf32>
    %519 = vector.extract_strided_slice %11 {offsets = [8, 4, 0], sizes = [8, 8, 32], strides = [1, 1, 1]} : vector<16x20x32xf32> to vector<8x8x32xf32>
    %520 = vector.shape_cast %518 : vector<32xf32> to vector<1x1x32xf32>
    %521 = vector.broadcast %520 : vector<1x1x32xf32> to vector<8x8x32xf32>
    %522 = arith.mulf %519, %521 : vector<8x8x32xf32>
    %523 = arith.addf %516, %522 : vector<8x8x32xf32>
    %c73 = arith.constant 73 : index
    %c0_89 = arith.constant 0 : index
    %524 = vector.load %arg3[%c73, %c0_89] : memref<81x32xf32, #tpu.memory_space<vmem>>, vector<1x32xf32>
    %525 = vector.shape_cast %524 : vector<1x32xf32> to vector<32xf32>
    %526 = vector.extract_strided_slice %11 {offsets = [8, 5, 0], sizes = [8, 8, 32], strides = [1, 1, 1]} : vector<16x20x32xf32> to vector<8x8x32xf32>
    %527 = vector.shape_cast %525 : vector<32xf32> to vector<1x1x32xf32>
    %528 = vector.broadcast %527 : vector<1x1x32xf32> to vector<8x8x32xf32>
    %529 = arith.mulf %526, %528 : vector<8x8x32xf32>
    %530 = arith.addf %523, %529 : vector<8x8x32xf32>
    %c74 = arith.constant 74 : index
    %c0_90 = arith.constant 0 : index
    %531 = vector.load %arg3[%c74, %c0_90] : memref<81x32xf32, #tpu.memory_space<vmem>>, vector<1x32xf32>
    %532 = vector.shape_cast %531 : vector<1x32xf32> to vector<32xf32>
    %533 = vector.extract_strided_slice %11 {offsets = [8, 6, 0], sizes = [8, 8, 32], strides = [1, 1, 1]} : vector<16x20x32xf32> to vector<8x8x32xf32>
    %534 = vector.shape_cast %532 : vector<32xf32> to vector<1x1x32xf32>
    %535 = vector.broadcast %534 : vector<1x1x32xf32> to vector<8x8x32xf32>
    %536 = arith.mulf %533, %535 : vector<8x8x32xf32>
    %537 = arith.addf %530, %536 : vector<8x8x32xf32>
    %c75 = arith.constant 75 : index
    %c0_91 = arith.constant 0 : index
    %538 = vector.load %arg3[%c75, %c0_91] : memref<81x32xf32, #tpu.memory_space<vmem>>, vector<1x32xf32>
    %539 = vector.shape_cast %538 : vector<1x32xf32> to vector<32xf32>
    %540 = vector.extract_strided_slice %11 {offsets = [8, 7, 0], sizes = [8, 8, 32], strides = [1, 1, 1]} : vector<16x20x32xf32> to vector<8x8x32xf32>
    %541 = vector.shape_cast %539 : vector<32xf32> to vector<1x1x32xf32>
    %542 = vector.broadcast %541 : vector<1x1x32xf32> to vector<8x8x32xf32>
    %543 = arith.mulf %540, %542 : vector<8x8x32xf32>
    %544 = arith.addf %537, %543 : vector<8x8x32xf32>
    %c76 = arith.constant 76 : index
    %c0_92 = arith.constant 0 : index
    %545 = vector.load %arg3[%c76, %c0_92] : memref<81x32xf32, #tpu.memory_space<vmem>>, vector<1x32xf32>
    %546 = vector.shape_cast %545 : vector<1x32xf32> to vector<32xf32>
    %547 = vector.extract_strided_slice %11 {offsets = [8, 8, 0], sizes = [8, 8, 32], strides = [1, 1, 1]} : vector<16x20x32xf32> to vector<8x8x32xf32>
    %548 = vector.shape_cast %546 : vector<32xf32> to vector<1x1x32xf32>
    %549 = vector.broadcast %548 : vector<1x1x32xf32> to vector<8x8x32xf32>
    %550 = arith.mulf %547, %549 : vector<8x8x32xf32>
    %551 = arith.addf %544, %550 : vector<8x8x32xf32>
    %c77 = arith.constant 77 : index
    %c0_93 = arith.constant 0 : index
    %552 = vector.load %arg3[%c77, %c0_93] : memref<81x32xf32, #tpu.memory_space<vmem>>, vector<1x32xf32>
    %553 = vector.shape_cast %552 : vector<1x32xf32> to vector<32xf32>
    %554 = vector.extract_strided_slice %11 {offsets = [8, 9, 0], sizes = [8, 8, 32], strides = [1, 1, 1]} : vector<16x20x32xf32> to vector<8x8x32xf32>
    %555 = vector.shape_cast %553 : vector<32xf32> to vector<1x1x32xf32>
    %556 = vector.broadcast %555 : vector<1x1x32xf32> to vector<8x8x32xf32>
    %557 = arith.mulf %554, %556 : vector<8x8x32xf32>
    %558 = arith.addf %551, %557 : vector<8x8x32xf32>
    %c78 = arith.constant 78 : index
    %c0_94 = arith.constant 0 : index
    %559 = vector.load %arg3[%c78, %c0_94] : memref<81x32xf32, #tpu.memory_space<vmem>>, vector<1x32xf32>
    %560 = vector.shape_cast %559 : vector<1x32xf32> to vector<32xf32>
    %561 = vector.extract_strided_slice %11 {offsets = [8, 10, 0], sizes = [8, 8, 32], strides = [1, 1, 1]} : vector<16x20x32xf32> to vector<8x8x32xf32>
    %562 = vector.shape_cast %560 : vector<32xf32> to vector<1x1x32xf32>
    %563 = vector.broadcast %562 : vector<1x1x32xf32> to vector<8x8x32xf32>
    %564 = arith.mulf %561, %563 : vector<8x8x32xf32>
    %565 = arith.addf %558, %564 : vector<8x8x32xf32>
    %c79 = arith.constant 79 : index
    %c0_95 = arith.constant 0 : index
    %566 = vector.load %arg3[%c79, %c0_95] : memref<81x32xf32, #tpu.memory_space<vmem>>, vector<1x32xf32>
    %567 = vector.shape_cast %566 : vector<1x32xf32> to vector<32xf32>
    %568 = vector.extract_strided_slice %11 {offsets = [8, 11, 0], sizes = [8, 8, 32], strides = [1, 1, 1]} : vector<16x20x32xf32> to vector<8x8x32xf32>
    %569 = vector.shape_cast %567 : vector<32xf32> to vector<1x1x32xf32>
    %570 = vector.broadcast %569 : vector<1x1x32xf32> to vector<8x8x32xf32>
    %571 = arith.mulf %568, %570 : vector<8x8x32xf32>
    %572 = arith.addf %565, %571 : vector<8x8x32xf32>
    %c80 = arith.constant 80 : index
    %c0_96 = arith.constant 0 : index
    %573 = vector.load %arg3[%c80, %c0_96] : memref<81x32xf32, #tpu.memory_space<vmem>>, vector<1x32xf32>
    %574 = vector.shape_cast %573 : vector<1x32xf32> to vector<32xf32>
    %575 = vector.extract_strided_slice %11 {offsets = [8, 12, 0], sizes = [8, 8, 32], strides = [1, 1, 1]} : vector<16x20x32xf32> to vector<8x8x32xf32>
    %576 = vector.shape_cast %574 : vector<32xf32> to vector<1x1x32xf32>
    %577 = vector.broadcast %576 : vector<1x1x32xf32> to vector<8x8x32xf32>
    %578 = arith.mulf %575, %577 : vector<8x8x32xf32>
    %579 = arith.addf %572, %578 : vector<8x8x32xf32>
    %580 = vector.shape_cast %579 : vector<8x8x32xf32> to vector<64x32xf32>
    %581 = arith.truncf %580 : vector<64x32xf32> to vector<64x32xbf16>
    %c0_97 = arith.constant 0 : index
    %c0_98 = arith.constant 0 : index
    %582 = vector.load %arg4[%c0_97, %c0_98] : memref<32x64xbf16, #tpu.memory_space<vmem>>, vector<32x64xbf16>
    %cst_99 = arith.constant dense<0.000000e+00> : vector<64x64xf32>
    %583 = tpu.matmul %581, %582, %cst_99 {dimension_numbers = #tpu.dot_dimension_numbers<[1], [0], [0], [1], [0, 0, 1, 1], [], []>} : vector<64x32xbf16>, vector<32x64xbf16>, vector<64x64xf32> -> vector<64x64xf32>
    %c0_100 = arith.constant 0 : index
    %c0_101 = arith.constant 0 : index
    %584 = vector.load %arg5[%c0_100, %c0_101] : memref<1x64xf32, #tpu.memory_space<vmem>>, vector<1x64xf32>
    %585 = vector.broadcast %584 : vector<1x64xf32> to vector<64x64xf32>
    %586 = arith.mulf %583, %585 : vector<64x64xf32>
    %c0_102 = arith.constant 0 : index
    %c0_103 = arith.constant 0 : index
    %587 = vector.load %arg6[%c0_102, %c0_103] : memref<1x64xf32, #tpu.memory_space<vmem>>, vector<1x64xf32>
    %588 = vector.broadcast %587 : vector<1x64xf32> to vector<64x64xf32>
    %589 = arith.addf %586, %588 : vector<64x64xf32>
    %cst_104 = arith.constant 5.000000e-01 : f32
    %590 = vector.broadcast %cst_104 : f32 to vector<64x64xf32>
    %591 = arith.mulf %590, %589 : vector<64x64xf32>
    %cst_105 = arith.constant 0.707106769 : f32
    %592 = vector.broadcast %cst_105 : f32 to vector<64x64xf32>
    %593 = arith.mulf %589, %592 : vector<64x64xf32>
    %cst_106 = arith.constant 0.000000e+00 : f32
    %594 = vector.broadcast %cst_106 : f32 to vector<64x64xf32>
    %595 = arith.cmpf oge, %593, %594 : vector<64x64xf32>
    %cst_107 = arith.constant 1.000000e+00 : f32
    %cst_108 = arith.constant -1.000000e+00 : f32
    %596 = vector.broadcast %cst_107 : f32 to vector<64x64xf32>
    %597 = vector.broadcast %cst_108 : f32 to vector<64x64xf32>
    %598 = arith.select %595, %596, %597 : vector<64x64xi1>, vector<64x64xf32>
    %599 = math.absf %593 : vector<64x64xf32>
    %cst_109 = arith.constant 0.327591091 : f32
    %600 = vector.broadcast %cst_109 : f32 to vector<64x64xf32>
    %601 = arith.mulf %600, %599 : vector<64x64xf32>
    %cst_110 = arith.constant 1.000000e+00 : f32
    %602 = vector.broadcast %cst_110 : f32 to vector<64x64xf32>
    %603 = arith.addf %602, %601 : vector<64x64xf32>
    %cst_111 = arith.constant 1.000000e+00 : f32
    %604 = vector.broadcast %cst_111 : f32 to vector<64x64xf32>
    %605 = arith.divf %604, %603 : vector<64x64xf32>
    %cst_112 = arith.constant 1.06140542 : f32
    %606 = vector.broadcast %cst_112 : f32 to vector<64x64xf32>
    %607 = arith.mulf %606, %605 : vector<64x64xf32>
    %cst_113 = arith.constant -1.45315206 : f32
    %608 = vector.broadcast %cst_113 : f32 to vector<64x64xf32>
    %609 = arith.addf %607, %608 : vector<64x64xf32>
    %610 = arith.mulf %609, %605 : vector<64x64xf32>
    %cst_114 = arith.constant 1.42141378 : f32
    %611 = vector.broadcast %cst_114 : f32 to vector<64x64xf32>
    %612 = arith.addf %610, %611 : vector<64x64xf32>
    %613 = arith.mulf %612, %605 : vector<64x64xf32>
    %cst_115 = arith.constant -0.284496725 : f32
    %614 = vector.broadcast %cst_115 : f32 to vector<64x64xf32>
    %615 = arith.addf %613, %614 : vector<64x64xf32>
    %616 = arith.mulf %615, %605 : vector<64x64xf32>
    %cst_116 = arith.constant 0.254829586 : f32
    %617 = vector.broadcast %cst_116 : f32 to vector<64x64xf32>
    %618 = arith.addf %616, %617 : vector<64x64xf32>
    %619 = arith.mulf %618, %605 : vector<64x64xf32>
    %cst_117 = arith.constant 0.000000e+00 : f32
    %620 = vector.broadcast %cst_117 : f32 to vector<64x64xf32>
    %621 = arith.subf %620, %599 : vector<64x64xf32>
    %622 = arith.mulf %621, %599 : vector<64x64xf32>
    %623 = math.exp %622 : vector<64x64xf32>
    %624 = arith.mulf %619, %623 : vector<64x64xf32>
    %cst_118 = arith.constant 1.000000e+00 : f32
    %625 = vector.broadcast %cst_118 : f32 to vector<64x64xf32>
    %626 = arith.subf %625, %624 : vector<64x64xf32>
    %627 = arith.mulf %598, %626 : vector<64x64xf32>
    %cst_119 = arith.constant 1.000000e+00 : f32
    %628 = vector.broadcast %cst_119 : f32 to vector<64x64xf32>
    %629 = arith.addf %628, %627 : vector<64x64xf32>
    %630 = arith.mulf %591, %629 : vector<64x64xf32>
    %631 = arith.truncf %630 : vector<64x64xf32> to vector<64x64xbf16>
    %c0_120 = arith.constant 0 : index
    %c0_121 = arith.constant 0 : index
    %632 = vector.load %arg7[%c0_120, %c0_121] : memref<64x32xbf16, #tpu.memory_space<vmem>>, vector<64x32xbf16>
    %cst_122 = arith.constant dense<0.000000e+00> : vector<64x32xf32>
    %633 = tpu.matmul %631, %632, %cst_122 {dimension_numbers = #tpu.dot_dimension_numbers<[1], [0], [0], [1], [0, 0, 1, 1], [], []>} : vector<64x64xbf16>, vector<64x32xbf16>, vector<64x32xf32> -> vector<64x32xf32>
    %c0_123 = arith.constant 0 : index
    %c0_124 = arith.constant 0 : index
    %634 = vector.load %arg8[%c0_123, %c0_124] : memref<1x32xf32, #tpu.memory_space<vmem>>, vector<1x32xf32>
    %635 = vector.broadcast %634 : vector<1x32xf32> to vector<64x32xf32>
    %636 = arith.addf %633, %635 : vector<64x32xf32>
    %637 = arith.mulf %636, %5 : vector<64x32xf32>
    %638 = arith.truncf %637 : vector<64x32xf32> to vector<64x32xbf16>
    %c0_125 = arith.constant 0 : index
    %c0_126 = arith.constant 0 : index
    %639 = vector.load %arg9[%c0_125, %c0_126] : memref<32x32xbf16, #tpu.memory_space<vmem>>, vector<32x32xbf16>
    %cst_127 = arith.constant dense<0.000000e+00> : vector<64x32xf32>
    %640 = tpu.matmul %638, %639, %cst_127 {dimension_numbers = #tpu.dot_dimension_numbers<[1], [0], [0], [1], [0, 0, 1, 1], [], []>} : vector<64x32xbf16>, vector<32x32xbf16>, vector<64x32xf32> -> vector<64x32xf32>
    %c0_128 = arith.constant 0 : index
    %c0_129 = arith.constant 0 : index
    %641 = vector.load %arg10[%c0_128, %c0_129] : memref<1x32xf32, #tpu.memory_space<vmem>>, vector<1x32xf32>
    %642 = vector.broadcast %641 : vector<1x32xf32> to vector<64x32xf32>
    %643 = arith.addf %640, %642 : vector<64x32xf32>
    %c0_130 = arith.constant 0 : index
    %c0_131 = arith.constant 0 : index
    %c0_132 = arith.constant 0 : index
    %644 = vector.load %arg11[%c0_130, %c0_131, %c0_132] : memref<1x64x32xf32, #tpu.memory_space<vmem>>, vector<1x64x32xf32>
    %645 = vector.shape_cast %644 : vector<1x64x32xf32> to vector<64x32xf32>
    %646 = vector.shape_cast %643 : vector<64x32xf32> to vector<1x64x32xf32>
    tpu.vector_store %arg11[%c0_130, %c0_131, %c0_132], %646 {strides = array<i32>} : memref<1x64x32xf32, #tpu.memory_space<vmem>>, vector<1x64x32xf32>,
    return
  }
  func.func @transform_0(%arg0: i32) -> (i32, i32, i32) {
    %c0_i32 = arith.constant 0 : i32
    %c0_i32_0 = arith.constant 0 : i32
    %c0_i32_1 = arith.constant 0 : i32
    return %arg0, %c0_i32, %c0_i32_0 : i32, i32, i32
  }
  func.func @transform_1(%arg0: i32) -> (i32, i32) {
    %c0_i32 = arith.constant 0 : i32
    %c0_i32_0 = arith.constant 0 : i32
    %c0_i32_1 = arith.constant 0 : i32
    return %c0_i32, %c0_i32_0 : i32, i32
  }
  func.func @transform_2(%arg0: i32) -> (i32, i32) {
    %c0_i32 = arith.constant 0 : i32
    %c0_i32_0 = arith.constant 0 : i32
    %c0_i32_1 = arith.constant 0 : i32
    return %c0_i32, %c0_i32_0 : i32, i32
  }
  func.func @transform_3(%arg0: i32) -> (i32, i32) {
    %c0_i32 = arith.constant 0 : i32
    %c0_i32_0 = arith.constant 0 : i32
    %c0_i32_1 = arith.constant 0 : i32
    return %c0_i32, %c0_i32_0 : i32, i32
  }
  func.func @transform_4(%arg0: i32) -> (i32, i32) {
    %c0_i32 = arith.constant 0 : i32
    %c0_i32_0 = arith.constant 0 : i32
    %c0_i32_1 = arith.constant 0 : i32
    return %c0_i32, %c0_i32_0 : i32, i32
  }
  func.func @transform_5(%arg0: i32) -> (i32, i32) {
    %c0_i32 = arith.constant 0 : i32
    %c0_i32_0 = arith.constant 0 : i32
    %c0_i32_1 = arith.constant 0 : i32
    return %c0_i32, %c0_i32_0 : i32, i32
  }
  func.func @transform_6(%arg0: i32) -> (i32, i32) {
    %c0_i32 = arith.constant 0 : i32
    %c0_i32_0 = arith.constant 0 : i32
    %c0_i32_1 = arith.constant 0 : i32
    return %c0_i32, %c0_i32_0 : i32, i32
  }
  func.func @transform_7(%arg0: i32) -> (i32, i32) {
    %c0_i32 = arith.constant 0 : i32
    %c0_i32_0 = arith.constant 0 : i32
    %c0_i32_1 = arith.constant 0 : i32
    return %c0_i32, %c0_i32_0 : i32, i32
  }
  func.func @transform_8(%arg0: i32) -> (i32, i32) {
    %c0_i32 = arith.constant 0 : i32
    %c0_i32_0 = arith.constant 0 : i32
    %c0_i32_1 = arith.constant 0 : i32
    return %c0_i32, %c0_i32_0 : i32, i32
  }
  func.func @transform_9(%arg0: i32) -> (i32, i32) {
    %c0_i32 = arith.constant 0 : i32
    %c0_i32_0 = arith.constant 0 : i32
    %c0_i32_1 = arith.constant 0 : i32
    return %c0_i32, %c0_i32_0 : i32, i32
  }
  func.func @transform_10(%arg0: i32) -> (i32, i32, i32) {
    %c0_i32 = arith.constant 0 : i32
    %c0_i32_0 = arith.constant 0 : i32
    %c0_i32_1 = arith.constant 0 : i32
    return %arg0, %c0_i32, %c0_i32_0 : i32, i32, i32
  }
}

</mosaic_0001>

<bundles_post_ra>
// kernel: tpu_custom_call.1
= control target key start
LH: loop header
LB: loop body
LE: loop exit
PB: predicated region body
PF: predicated region fallthrough
CT: control target
= control target key end

     0   :  { %s7757_s13 = smov 0   ;;  %s11125_s0 = inlined_call_operand.vmem [shape: f32[2,64,32], index: 0, kind: input, shape index: {}]   ;;  %s11126_s1 = inlined_call_operand.vmem [shape: bf16[32,64], index: 1, kind: input, shape index: {}]   ;;  %s11127_s2 = inlined_call_operand.vmem [shape: f32[81,32], index: 2, kind: input, shape index: {}]   ;;  %s11128_s3 = inlined_call_operand.vmem [shape: bf16[32,64], index: 3, kind: input, shape index: {}]   ;;  %s11129_s4 = inlined_call_operand.vmem [shape: f32[1,64], index: 4, kind: input, shape index: {}]   ;;  %s11130_s5 = inlined_call_operand.vmem [shape: f32[1,64], index: 5, kind: input, shape index: {}]   ;;  %s11131_s6 = inlined_call_operand.vmem [shape: bf16[64,32], index: 6, kind: input, shape index: {}]   ;;  %s11132_s7 = inlined_call_operand.vmem [shape: f32[1,32], index: 7, kind: input, shape index: {}]   ;;  %s11133_s8 = inlined_call_operand.vmem [shape: bf16[32,32], index: 8, kind: input, shape index: {}]   ;;  %s11134_s9 = inlined_call_operand.vmem [shape: f32[1,32], index: 9, kind: input, shape index: {}]   ;;  %s11135_s10 = inlined_call_operand.vmem [shape: f32[2,64,32], index: 10, kind: output, shape index: {}]  }
   0x1 LB: > { %s7169_s14 = sadd.s32 4294967295, %s7697_s13   ;;  %p7173_p0 = scmp.ge.s32.totalorder %s7697_s13, 1  ;;  %s7697_s13 = sphi %s7757_s13, %s20_s13  }
   0x2   : > { %p312_p1 = scmp.lt.s32.totalorder %s7697_s13, 3 }
   0x4   : > { %p313_p2 = pnand %p7173_p0, %p312_p1 }
   0x5   : > { %p350_p3 = scmp.lt.s32.totalorder (!%p313_p2), %s7169_s14, 1  ;;  %s7699_s23 = smov (!%p313_p2), 96  }
   0x6   : > { %316 = sbr.rel (%p313_p2) target bundleno = 1634 (0x662), region = 60 }
   0xb   : > { %v7239_v0 = vld [vmem:[%s11126_s1 + $0x8] sm:$0xff]  ;;  %v7238_v1 = vld [vmem:[%s11126_s1] sm:$0xff]  ;;  %s11137_s14 = smov (!%p350_p3, %s7169_s14), 1  ;;  %vm389_vm0 = vcmask 261120   ;;  %v7700_v16 = vmov 0.0   ;;  %vm637_vm1 = vcmask 1046528  }
   0xc   : > { %408 = vmatpush.bf16.msra.mxu0 %v7239_v0  ;;  %s7236_s19 = sshll.u32 %s11137_s14, 6  ;;  %445 = vst.msk [vmem:[#allocation2 + $0x68] sm:$0xff] %vm389_vm0, %v7700_v16  ;;  %v7812_v18 = vld [vmem:[%s11127_s2 + $0x1] ss:$0 sm:$0xff]  ;;  %v7821_v20 = vld [vmem:[%s11127_s2] ss:$0 sm:$0xff] }
   0xd   : > { %s354_s22 = scalar_lea.vmem %s11125_s0, %s7236_s19  ;;  %431 = vst.msk [vmem:[#allocation2] sm:$0xff] %vm389_vm0, %v7700_v16  ;;  %v7826_v21 = vld [vmem:[%s11127_s2 + $0x2] ss:$0 sm:$0xff]  ;;  %v7845_v28 = vld [vmem:[%s11127_s2 + $0x3] ss:$0 sm:$0xff]  ;;  %vm728_vm2 = vcmask 1045504   ;;  %s11101_s18 = scalar_lea.vmem %s11135_s10, %s7236_s19 }
   0xe   : > { %v361_v2 = vld [vmem:[%s354_s22] sm:$0xff]  ;;  %v362_v3 = vld [vmem:[%s354_s22 + $0x8] sm:$0xff]  ;;  %v363_v5 = vld [vmem:[%s354_s22 + $0x10] sm:$0xff]  ;;  %432 = vst.msk [vmem:[#allocation2 + $0x8] sm:$0xff] %vm389_vm0, %v7700_v16  ;;  %vm819_vm3 = vcmask 1044480   ;;  %vm433_vm4 = vcmask 257024  }
   0xf   : > { %v369_v4 = vpack.c.bf16 %v362_v3, %v361_v2  ;;  %v364_v6 = vld [vmem:[%s354_s22 + $0x18] sm:$0xff]  ;;  %v365_v8 = vld [vmem:[%s354_s22 + $0x20] sm:$0xff]  ;;  %v366_v9 = vld [vmem:[%s354_s22 + $0x28] sm:$0xff]  ;;  %435 = vst.msk [vmem:[#allocation2 + $0x18] sm:$0xff] %vm389_vm0, %v7700_v16  ;;  %vm960_vm5 = vcmask 1042432   ;;  %vm1051_vm6 = vcmask 1041408  }
  0x10   : > { %409 = vmatpush.bf16.msra.mxu0 %v7238_v1  ;;  %v370_v7 = vpack.c.bf16 %v364_v6, %v363_v5  ;;  %v371_v10 = vpack.c.bf16 %v366_v9, %v365_v8  ;;  %v367_v11 = vld [vmem:[%s354_s22 + $0x30] sm:$0xff]  ;;  %v368_v12 = vld [vmem:[%s354_s22 + $0x38] sm:$0xff]  ;;  %436 = vst.msk [vmem:[#allocation2 + $0x20] sm:$0xff] %vm389_vm0, %v7700_v16  ;;  %v7858_v36 = vld [vmem:[%s11127_s2 + $0x4] ss:$0 sm:$0xff]  ;;  %vm1142_vm7 = vcmask 1040384  }
  0x11   : > { %v372_v13 = vpack.c.bf16 %v368_v12, %v367_v11  ;;  %438 = vst.msk [vmem:[#allocation2 + $0x30] sm:$0xff] %vm389_vm0, %v7700_v16  ;;  %v7869_v38 = vld [vmem:[%s11127_s2 + $0x5] ss:$0 sm:$0xff]  ;;  %v7882_v46 = vld [vmem:[%s11127_s2 + $0x6] ss:$0 sm:$0xff]  ;;  %vm6513_vm8 = vcmask 1043456  }
  0x12   : > { %439 = vst.msk [vmem:[#allocation2 + $0x38] sm:$0xff] %vm389_vm0, %v7700_v16  ;;  %v7896_v51 = vld [vmem:[%s11127_s2 + $0x7] ss:$0 sm:$0xff]  ;;  %v7924_v60 = vld [vmem:[%s11127_s2 + $0x8] ss:$0 sm:$0xff] }
  0x13   : > { %7186 = vmatmul.msk.bf16.vlgmr.msra.gmra.mxu0 %vm389_vm0, %v369_v4  ;;  %441 = vst.msk [vmem:[#allocation2 + $0x48] sm:$0xff] %vm389_vm0, %v7700_v16  ;;  %v7936_v63 = vld [vmem:[%s11127_s2 + $0x9] ss:$0 sm:$0xff]  ;;  %v7941_v0 = vld [vmem:[%s11127_s2 + $0xa] ss:$0 sm:$0xff] }
  0x14   : > { %442 = vst.msk [vmem:[#allocation2 + $0x50] sm:$0xff] %vm389_vm0, %v7700_v16  ;;  %v521_v19 = vld [vmem:[#allocation2] sm:$0xff] }
  0x15   : > { %444 = vst.msk [vmem:[#allocation2 + $0x60] sm:$0xff] %vm389_vm0, %v7700_v16  ;;  %v7830_v22 = vld [vmem:[#allocation2 + $0x8] sm:$0xff]  ;;  %v605_v23 = vmul.f32 %v7812_v18, %v521_v19  ;;  %v696_v26 = vmul.f32 %v7826_v21, %v521_v19  ;;  %v571_v29 = vmul.f32 %v7821_v20, %v521_v19  ;;  %v787_v35 = vmul.f32 %v7845_v28, %v521_v19 }
  0x16   : > { %447 = vst.msk [vmem:[#allocation2 + $0x78] sm:$0xff] %vm389_vm0, %v7700_v16  ;;  %v572_v24 = vmul.f32 %v7821_v20, %v7830_v22  ;;  %v606_v25 = vmul.f32 %v7812_v18, %v7830_v22  ;;  %v697_v27 = vmul.f32 %v7826_v21, %v7830_v22  ;;  %v788_v37 = vmul.f32 %v7845_v28, %v7830_v22  ;;  %v7945_v1 = vld [vmem:[#allocation2 + $0x18] sm:$0xff] }
  0x17   : > { %448 = vst.msk [vmem:[#allocation2 + $0x80] sm:$0xff] %vm389_vm0, %v7700_v16  ;;  %v638_v30 = vrot.slane %v605_v23, 1  ;;  %v729_v33 = vrot.slane %v696_v26, 2  ;;  %v820_v42 = vrot.slane %v787_v35, 3  ;;  %v878_v45 = vmul.f32 %v7858_v36, %v7830_v22  ;;  %v7947_v2 = vld [vmem:[#allocation2 + $0x20] sm:$0xff] }
  0x18   : > { %450 = vst.msk [vmem:[#allocation2 + $0x90] sm:$0xff] %vm389_vm0, %v7700_v16  ;;  %v639_v32 = vrot.slane %v606_v25, 1  ;;  %v730_v34 = vrot.slane %v697_v27, 2  ;;  %v821_v44 = vrot.slane %v788_v37, 3  ;;  %v7891_v50 = vmul.f32 %v7869_v38, %v7830_v22  ;;  %v7989_v25 = vld [vmem:[%s11127_s2 + $0xb] ss:$0 sm:$0xff] }
  0x19   : > { %451 = vst.msk [vmem:[#allocation2 + $0x98] sm:$0xff] %vm389_vm0, %v7700_v16  ;;  %v894_v49 = vrot.slane %v878_v45, 4  ;;  %v7904_v54 = vmul.f32 %v7882_v46, %v7830_v22  ;;  %v7917_v58 = vmul.f32 %v7896_v51, %v7830_v22  ;;  %v1201_v5 = vmul.f32 %v7924_v60, %v7830_v22 }
  0x1a   : > { %453 = vst.msk [vmem:[#allocation2 + $0xa8] sm:$0xff] %vm389_vm0, %v7700_v16  ;;  %v640_v39 = vsel %vm637_vm1, %v638_v30, %v639_v32  ;;  %v679_v40 = vadd.f32 %v639_v32, %v572_v24  ;;  %v731_v41 = vsel %vm728_vm2, %v729_v33, %v730_v34  ;;  %v822_v48 = vsel %vm819_vm3, %v820_v42, %v821_v44 }
  0x1b   : > { %454 = vst.msk [vmem:[#allocation2 + $0xb0] sm:$0xff] %vm389_vm0, %v7700_v16  ;;  %v678_v43 = vadd.f32 %v640_v39, %v571_v29  ;;  %v961_v57 = vrot.slane %v7891_v50, 5  ;;  %v1052_v62 = vrot.slane %v7904_v54, 6  ;;  %v1143_v4 = vrot.slane %v7917_v58, 7 }
  0x1c   : > { %456 = vst.msk [vmem:[#allocation2 + $0xc0] sm:$0xff] %vm389_vm0, %v7700_v16  ;;  %v770_v52 = vadd.f32 %v730_v34, %v679_v40  ;;  %v607_v6 = vmul.f32 %v7812_v18, %v7945_v1  ;;  %v1269_v9 = vmul.f32 %v7941_v0, %v7945_v1  ;;  %v1235_v11 = vmul.f32 %v7936_v63, %v7945_v1 }
  0x1d   : > { %457 = vst.msk [vmem:[#allocation2 + $0xc8] sm:$0xff] %vm389_vm0, %v7700_v16  ;;  %v769_v47 = vadd.f32 %v731_v41, %v678_v43  ;;  %v7972_v12 = vmul.f32 %v7936_v63, %v7947_v2  ;;  %v574_v19 = vmul.f32 %v7821_v20, %v7947_v2  ;;  %v698_v24 = vmul.f32 %v7826_v21, %v7945_v1 }
  0x1e   : > { %459 = vst.msk [vmem:[#allocation2 + $0xd8] sm:$0xff] %vm389_vm0, %v7700_v16  ;;  %v861_v59 = vadd.f32 %v821_v44, %v770_v52  ;;  %v641_v22 = vrot.slane %v607_v6, 1  ;;  %v573_v26 = vmul.f32 %v7821_v20, %v7945_v1  ;;  %v699_v27 = vmul.f32 %v7826_v21, %v7947_v2  ;;  %v8050_v6 = vld [vmem:[%s11127_s2 + $0xe] ss:$0 sm:$0xff] }
  0x1f   : > { %460 = vst.msk [vmem:[#allocation2 + $0xe0] sm:$0xff] %vm389_vm0, %v7700_v16  ;;  %v860_v53 = vadd.f32 %v822_v48, %v769_v47  ;;  %v1301_v30 = vrot.slane %v1269_v9, 1  ;;  %v732_v34 = vrot.slane %v698_v24, 2  ;;  %v789_v35 = vmul.f32 %v7845_v28, %v7945_v1 }
  0x20   : > { %462 = vst.msk [vmem:[#allocation2 + $0xf0] sm:$0xff] %vm389_vm0, %v7700_v16  ;;  %v7960_v8 = vadd.f32 %v894_v49, %v861_v59  ;;  %v733_v20 = vrot.slane %v699_v27, 2  ;;  %v790_v21 = vmul.f32 %v7845_v28, %v7947_v2  ;;  %v879_v41 = vmul.f32 %v7858_v36, %v7947_v2  ;;  %v8025_v36 = vld [vmem:[%s11127_s2 + $0xc] ss:$0 sm:$0xff] }
  0x21   : > { %463 = vst.msk [vmem:[#allocation2 + $0xf8] sm:$0xff] %vm389_vm0, %v7700_v16  ;;  %v910_v56 = vadd.f32 %v894_v49, %v860_v53  ;;  %v823_v40 = vrot.slane %v789_v35, 3  ;;  %v1359_v43 = vmul.f32 %v7989_v25, %v7945_v1  ;;  %v8020_v47 = vmul.f32 %v7869_v38, %v7947_v2 }
  0x22   : > { %465 = vst.msk [vmem:[#allocation2 + $0x108] sm:$0xff] %vm389_vm0, %v7700_v16  ;;  %v734_v44 = vsel %vm728_vm2, %v732_v34, %v733_v20  ;;  %v824_v28 = vrot.slane %v790_v21, 3  ;;  %v895_v49 = vrot.slane %v879_v41, 4  ;;  %v8034_v53 = vmul.f32 %v7989_v25, %v7947_v2 }
  0x23   : > { %7187 = vmatmul.msk.bf16.gmra.mxu0 %vm389_vm0, %v370_v7  ;;  %466 = vst.msk [vmem:[#allocation2 + $0x110] sm:$0xff] %vm389_vm0, %v7700_v16  ;;  %v1001_v61 = vadd.f32 %v961_v57, %v910_v56  ;;  %v608_v7 = vmul.f32 %v7812_v18, %v7947_v2  ;;  %v8039_v56 = vld [vmem:[%s11127_s2 + $0xd] ss:$0 sm:$0xff]  ;;  %v1112_v24 = vmul.f32 %v7896_v51, %v7947_v2 }
  0x24   : > { %468 = vst.msk [vmem:[#allocation2 + $0x120] sm:$0xff] %vm389_vm0, %v7700_v16  ;;  %v825_v59 = vsel %vm819_vm3, %v823_v40, %v824_v28 }
  0x25   : > { %469 = vst.msk [vmem:[#allocation2 + $0x128] sm:$0xff] %vm389_vm0, %v7700_v16  ;;  %v1092_v3 = vadd.f32 %v1052_v62, %v1001_v61  ;;  %v642_v23 = vrot.slane %v608_v7, 1 }
  0x26   : > { %471 = vst.msk [vmem:[#allocation2 + $0x138] sm:$0xff] %vm389_vm0, %v7700_v16 }
  0x27   : > { %472 = vst.msk [vmem:[#allocation2 + $0x140] sm:$0xff] %vm389_vm0, %v7700_v16  ;;  %v643_v32 = vsel %vm637_vm1, %v641_v22, %v642_v23  ;;  %v681_v33 = vadd.f32 %v642_v23, %v574_v19  ;;  %v1392_v19 = vrot.slane %v8034_v53, 2 }
  0x28   : > { %474 = vst.msk [vmem:[#allocation2 + $0x150] sm:$0xff] %vm389_vm0, %v7700_v16  ;;  %v680_v37 = vadd.f32 %v643_v32, %v573_v26  ;;  %v8065_v26 = vmul.f32 %v8025_v36, %v7945_v1  ;;  %v8078_v32 = vmul.f32 %v8039_v56, %v7947_v2 }
  0x29   : > { %475 = vst.msk [vmem:[#allocation2 + $0x158] sm:$0xff] %vm389_vm0, %v7700_v16  ;;  %v772_v45 = vadd.f32 %v733_v20, %v681_v33  ;;  %v1146_v33 = vrot.slane %v1112_v24, 7 }
  0x2a   : > { %477 = vst.msk [vmem:[#allocation2 + $0x168] sm:$0xff] %vm389_vm0, %v7700_v16  ;;  %v771_v48 = vadd.f32 %v734_v44, %v680_v37  ;;  %v1481_v35 = vrot.slane %v8065_v26, 3  ;;  %v8087_v37 = vmul.f32 %v8050_v6, %v7947_v2 }
  0x2b   : > { %478 = vst.msk [vmem:[#allocation2 + $0x170] sm:$0xff] %vm389_vm0, %v7700_v16  ;;  %v863_v61 = vadd.f32 %v824_v28, %v772_v45 }
  0x2c   : > { %434 = vst.msk [vmem:[#allocation2 + $0x10] sm:$0xf] %vm433_vm4, %v7700_v16  ;;  %v862_v9 = vadd.f32 %v825_v59, %v771_v48  ;;  %v8105_v59 = vld [vmem:[#allocation2 + $0x30] sm:$0xff] }
  0x2d   : > { %437 = vst.msk [vmem:[#allocation2 + $0x28] sm:$0xf] %vm433_vm4, %v7700_v16  ;;  %v913_v22 = vadd.f32 %v895_v49, %v863_v61 }
  0x2e   : > { %440 = vst.msk [vmem:[#allocation2 + $0x40] sm:$0xf] %vm433_vm4, %v7700_v16  ;;  %v912_v27 = vadd.f32 %v895_v49, %v862_v9 }
  0x2f   : > { %443 = vst.msk [vmem:[#allocation2 + $0x58] sm:$0xf] %vm433_vm4, %v7700_v16 }
  0x30   : > { %446 = vst.msk [vmem:[#allocation2 + $0x70] sm:$0xf] %vm433_vm4, %v7700_v16 }
  0x31   : > { %449 = vst.msk [vmem:[#allocation2 + $0x88] sm:$0xf] %vm433_vm4, %v7700_v16 }
  0x32   : > { %452 = vst.msk [vmem:[#allocation2 + $0xa0] sm:$0xf] %vm433_vm4, %v7700_v16 }
  0x33   : > { %7188 = vmatmul.msk.bf16.gmra.mxu0 %vm389_vm0, %v371_v10  ;;  %v1183_v10 = vadd.f32 %v1143_v4, %v1092_v3  ;;  %v964_v3 = vrot.slane %v8020_v47, 5  ;;  %455 = vst.msk [vmem:[#allocation2 + $0xb8] sm:$0xf] %vm433_vm4, %v7700_v16  ;;  %v523_v1 = vld [vmem:[#allocation2 + $0x10] sm:$0xf] }
  0x34   : > { %458 = vst.msk [vmem:[#allocation2 + $0xd0] sm:$0xf] %vm433_vm4, %v7700_v16  ;;  %v8091_v20 = vld [vmem:[#allocation2 + $0x28] sm:$0xf]  ;;  %v929_v21 = vmul.f32 %v7869_v38, %v523_v1  ;;  %v1020_v40 = vmul.f32 %v7882_v46, %v523_v1  ;;  %v1111_v41 = vmul.f32 %v7896_v51, %v523_v1  ;;  %v1202_v28 = vmul.f32 %v7924_v60, %v523_v1 }
  0x35   : > { %v1217_v29 = vadd.f32 %v1201_v5, %v1183_v10  ;;  %v1021_v5 = vmul.f32 %v7882_v46, %v7947_v2  ;;  %461 = vst.msk [vmem:[#allocation2 + $0xe8] sm:$0xf] %vm433_vm4, %v7700_v16  ;;  %v1022_v44 = vmul.f32 %v7882_v46, %v8091_v20  ;;  %v1113_v45 = vmul.f32 %v7896_v51, %v8091_v20  ;;  %v8111_v46 = vld [vmem:[#allocation2 + $0x38] sm:$0xff] }
  0x36   : > { %v962_v47 = vrot.slane %v929_v21, 5  ;;  %v1053_v48 = vrot.slane %v1020_v40, 6  ;;  %464 = vst.msk [vmem:[#allocation2 + $0x100] sm:$0xf] %vm433_vm4, %v7700_v16  ;;  %v1204_v58 = vmul.f32 %v7924_v60, %v8091_v20  ;;  %v1237_v1 = vmul.f32 %v7936_v63, %v8105_v59 }
  0x37   : > { %v1251_v39 = vadd.f32 %v1235_v11, %v1217_v29  ;;  %v1391_v11 = vrot.slane %v1359_v43, 2  ;;  %v1055_v23 = vrot.slane %v1021_v5, 6  ;;  %v931_v43 = vmul.f32 %v7869_v38, %v8091_v20  ;;  %467 = vst.msk [vmem:[#allocation2 + $0x118] sm:$0xf] %vm433_vm4, %v7700_v16 }
  0x38   : > { %v1056_v5 = vrot.slane %v1022_v44, 6  ;;  %v1147_v9 = vrot.slane %v1113_v45, 7  ;;  %v1203_v38 = vmul.f32 %v7924_v60, %v7947_v2  ;;  %v963_v51 = vsel %vm960_vm5, %v961_v57, %v962_v47  ;;  %470 = vst.msk [vmem:[#allocation2 + $0x130] sm:$0xf] %vm433_vm4, %v7700_v16 }
  0x39   : > { %v1393_v29 = vsel %vm728_vm2, %v1391_v11, %v1392_v19  ;;  %v965_v61 = vrot.slane %v931_v43, 5  ;;  %v1054_v11 = vsel %vm1051_vm6, %v1052_v62, %v1053_v48  ;;  %v1002_v50 = vadd.f32 %v963_v51, %v7960_v8  ;;  %473 = vst.msk [vmem:[#allocation2 + $0x148] sm:$0xf] %vm433_vm4, %v7700_v16  ;;  %v8161_v51 = vld [vmem:[#allocation2 + $0x40] sm:$0xf] }
  0x3a   : > { %v1057_v57 = vsel %vm1051_vm6, %v1055_v23, %v1056_v5  ;;  %v1148_v54 = vsel %vm1142_vm7, %v1146_v33, %v1147_v9  ;;  %v1271_v8 = vmul.f32 %v7941_v0, %v8105_v59  ;;  %476 = vst.msk [vmem:[#allocation2 + $0x160] sm:$0xf] %vm433_vm4, %v7700_v16  ;;  %v1452_v47 = vmul.f32 %v8025_v36, %v8111_v46 }
  0x3b   : > { %v1093_v21 = vadd.f32 %v1054_v11, %v1002_v50  ;;  %479 = vst.msk [vmem:[#allocation2 + $0x178] sm:$0xf] %vm433_vm4, %v7700_v16  ;;  %v1540_v16 = vmul.f32 %v8039_v56, %v8111_v46  ;;  %v7274_v50 = vld [vmem:[%s11127_s2 + $0xf] ss:$0 sm:$0xff]  ;;  %v1591_v56 = vmul.f32 %v8050_v6, %v8111_v46  ;;  %vm6991_vm4 = vcmask 523264  }
  0x3c   : > { %v1304_v40 = vrot.slane %v1271_v8, 1  ;;  %v7275_v8 = vld [vmem:[%s11127_s2 + $0x10] ss:$0 sm:$0xff]  ;;  %v1680_v53 = vmul.f32 %v7274_v50, %v8091_v20 }
  0x3d   : > { %v1556_v26 = vrot.slane %v1540_v16, 4 }
  0x43   : > { %7189 = vmatmul.msk.bf16.gmra.mxu0 %vm389_vm0, %v372_v13  ;;  %v7976_v13 = vmul.f32 %v7941_v0, %v7947_v2 }
  0x45   : > { %v1302_v42 = vrot.slane %v7976_v13, 1 }
  0x47   : > { %v1303_v52 = vsel %vm637_vm1, %v1301_v30, %v1302_v42  ;;  %v8074_v30 = vmul.f32 %v8025_v36, %v7947_v2 }
  0x48   : > { %v1341_v10 = vadd.f32 %v1303_v52, %v1251_v39  ;;  %v1003_v39 = vadd.f32 %v964_v3, %v912_v27  ;;  %v1144_v52 = vrot.slane %v1111_v41, 7 }
  0x4a   : > { %v8082_v34 = vadd.f32 %v1393_v29, %v1341_v10  ;;  %v1094_v49 = vadd.f32 %v1055_v23, %v1003_v39  ;;  %v1145_v24 = vsel %vm1142_vm7, %v1143_v4, %v1144_v52  ;;  %v966_v29 = vsel %vm960_vm5, %v964_v3, %v965_v61 }
  0x4b   : > { %v1004_v62 = vadd.f32 %v966_v29, %v913_v22  ;;  %v1238_v3 = vmul.f32 %v7936_v63, %v8111_v46  ;;  %v1272_v22 = vmul.f32 %v7941_v0, %v8111_v46  ;;  %v1362_v39 = vmul.f32 %v7989_v25, %v8111_v46 }
  0x4c   : > { %v1185_v27 = vadd.f32 %v1146_v33, %v1094_v49  ;;  %v1361_v33 = vmul.f32 %v7989_v25, %v8105_v59  ;;  %v1184_v63 = vadd.f32 %v1145_v24, %v1093_v21  ;;  %v1451_v0 = vmul.f32 %v8025_v36, %v8105_v59 }
  0x4d   : > { %v1095_v60 = vadd.f32 %v1057_v57, %v1004_v62  ;;  %v1305_v41 = vrot.slane %v1272_v22, 1  ;;  %v1395_v45 = vrot.slane %v1362_v39, 2  ;;  %v1482_v49 = vrot.slane %v8074_v30, 3 }
  0x4e   : > { %v1219_v4 = vadd.f32 %v1203_v38, %v1185_v27  ;;  %v1394_v44 = vrot.slane %v1361_v33, 2  ;;  %v1218_v25 = vadd.f32 %v1202_v28, %v1184_v63  ;;  %v1484_v52 = vrot.slane %v1451_v0, 3 }
  0x4f   : > { %v1186_v43 = vadd.f32 %v1148_v54, %v1095_v60  ;;  %v1306_v48 = vsel %vm637_vm1, %v1304_v40, %v1305_v41  ;;  %v1485_v38 = vrot.slane %v1452_v47, 3  ;;  %v1483_v36 = vsel %vm819_vm3, %v1481_v35, %v1482_v49  ;;  %v7276_v47 = vld [vmem:[%s11127_s2 + $0x11] ss:$0 sm:$0xff] }
  0x50   : > { %v1253_v23 = vadd.f32 %v1237_v1, %v1219_v4  ;;  %v1396_v9 = vsel %vm728_vm2, %v1394_v44, %v1395_v45  ;;  %v1252_v11 = vadd.f32 %v7972_v12, %v1218_v25  ;;  %v1555_v28 = vrot.slane %v8078_v32, 4 }
  0x51   : > { %v1220_v61 = vadd.f32 %v1204_v58, %v1186_v43  ;;  %v1486_v27 = vsel %vm819_vm3, %v1484_v52, %v1485_v38  ;;  %v1521_v29 = vadd.f32 %v1483_v36, %v8082_v34  ;;  %v1590_v35 = vmul.f32 %v8050_v6, %v8091_v20 }
  0x52   : > { %v1343_v5 = vadd.f32 %v1306_v48, %v1253_v23  ;;  %v1342_v12 = vadd.f32 %v1302_v42, %v1252_v11  ;;  %v1592_v34 = vmul.f32 %v8050_v6, %v8161_v51  ;;  %v1621_v58 = vrot.slane %v8087_v37, 5 }
  0x53   : > { %v1254_v30 = vadd.f32 %v1238_v3, %v1220_v61  ;;  %v1571_v54 = vadd.f32 %v1555_v28, %v1521_v29  ;;  %v1622_v13 = vrot.slane %v1590_v35, 5  ;;  %v1624_v42 = vrot.slane %v1591_v56, 5 }
  0x54   : > { %v1433_v24 = vadd.f32 %v1396_v9, %v1343_v5  ;;  %v1432_v62 = vadd.f32 %v1392_v19, %v1342_v12  ;;  %v1625_v21 = vrot.slane %v1592_v34, 5  ;;  %v1679_v3 = vmul.f32 %v7274_v50, %v7947_v2  ;;  %v8208_v12 = vld [vmem:[#allocation2 + $0x48] sm:$0xff] }
  0x55   : > { %v1344_v32 = vadd.f32 %v1305_v41, %v1254_v30  ;;  %v1623_v60 = vsel %vm960_vm5, %v1621_v58, %v1622_v13  ;;  %v1661_v6 = vadd.f32 %v1621_v58, %v1571_v54  ;;  %v1681_v33 = vmul.f32 %v7274_v50, %v8111_v46  ;;  %v7277_v30 = vld [vmem:[%s11127_s2 + $0x12] ss:$0 sm:$0xff]  ;;  %v7278_v54 = vld [vmem:[%s11127_s2 + $0x13] ss:$0 sm:$0xff] }
  0x56   : > { %v1523_v57 = vadd.f32 %v1486_v27, %v1433_v24  ;;  %v1522_v22 = vadd.f32 %v1482_v49, %v1432_v62  ;;  %v1626_v37 = vsel %vm960_vm5, %v1624_v42, %v1625_v21  ;;  %v1682_v63 = vmul.f32 %v7274_v50, %v8161_v51 }
  0x57   : > { %v1434_v4 = vadd.f32 %v1395_v45, %v1344_v32  ;;  %v1711_v40 = vrot.slane %v1679_v3, 6  ;;  %v1712_v41 = vrot.slane %v1680_v53, 6  ;;  %v1714_v43 = vrot.slane %v1681_v33, 6 }
  0x58   : > { %v1573_v1 = vadd.f32 %v1556_v26, %v1523_v57  ;;  %v1572_v39 = vadd.f32 %v1555_v28, %v1522_v22  ;;  %v1769_v44 = vmul.f32 %v7275_v8, %v7947_v2  ;;  %v1770_v45 = vmul.f32 %v7275_v8, %v8091_v20 }
  0x59   : > { %v1524_v19 = vadd.f32 %v1485_v38, %v1434_v4  ;;  %v1713_v48 = vsel %vm1051_vm6, %v1711_v40, %v1712_v41  ;;  %v1715_v49 = vrot.slane %v1682_v63, 6  ;;  %v1751_v52 = vadd.f32 %v1711_v40, %v1661_v6 }
  0x5a   : > { %v1663_v23 = vadd.f32 %v1624_v42, %v1573_v1  ;;  %v1662_v25 = vadd.f32 %v1623_v60, %v1572_v39  ;;  %v1771_v9 = vmul.f32 %v7275_v8, %v8111_v46  ;;  %v1772_v38 = vmul.f32 %v7275_v8, %v8161_v51 }
  0x5b   : > { %v1574_v0 = vadd.f32 %v1556_v26, %v1524_v19  ;;  %v1716_v11 = vsel %vm1051_vm6, %v1714_v43, %v1715_v49  ;;  %v1801_v16 = vrot.slane %v1769_v44, 7  ;;  %v1802_v28 = vrot.slane %v1770_v45, 7  ;;  %v8210_v26 = vld [vmem:[#allocation2 + $0x50] sm:$0xff] }
  0x5c   : > { %v1753_v5 = vadd.f32 %v1714_v43, %v1663_v23  ;;  %v1752_v36 = vadd.f32 %v1713_v48, %v1662_v25  ;;  %v1804_v27 = vrot.slane %v1771_v9, 7  ;;  %v1805_v29 = vrot.slane %v1772_v38, 7  ;;  %v7280_v43 = vld [vmem:[%s11127_s2 + $0x15] ss:$0 sm:$0xff] }
  0x5d   : > { %v1664_v61 = vadd.f32 %v1626_v37, %v1574_v0  ;;  %v1859_v50 = vmul.f32 %v7276_v47, %v7947_v2  ;;  %v1803_v35 = vsel %vm1142_vm7, %v1801_v16, %v1802_v28  ;;  %v1841_v56 = vadd.f32 %v1801_v16, %v1751_v52 }
  0x5e   : > { %v1860_v32 = vmul.f32 %v7276_v47, %v8091_v20  ;;  %v1861_v57 = vmul.f32 %v7276_v47, %v8111_v46  ;;  %v1806_v34 = vsel %vm1142_vm7, %v1804_v27, %v1805_v29  ;;  %v1842_v62 = vadd.f32 %v1803_v35, %v1752_v36  ;;  %v7279_v20 = vld [vmem:[%s11127_s2 + $0x14] ss:$0 sm:$0xff] }
  0x5f   : > { %v1754_v24 = vadd.f32 %v1716_v11, %v1664_v61  ;;  %v1843_v58 = vadd.f32 %v1804_v27, %v1753_v5  ;;  %v1862_v2 = vmul.f32 %v7276_v47, %v8161_v51  ;;  %v1875_v42 = vadd.f32 %v1859_v50, %v1841_v56  ;;  %v7282_v27 = vld [vmem:[%s11127_s2 + $0x17] ss:$0 sm:$0xff] }
  0x60   : > { %v1893_v4 = vmul.f32 %v7277_v30, %v8105_v59  ;;  %v1894_v1 = vmul.f32 %v7277_v30, %v8111_v46  ;;  %v1876_v21 = vadd.f32 %v1860_v32, %v1842_v62  ;;  %v1895_v8 = vmul.f32 %v7277_v30, %v8208_v12 }
  0x61   : > { %v1844_v13 = vadd.f32 %v1806_v34, %v1754_v24  ;;  %v1877_v3 = vadd.f32 %v1861_v57, %v1843_v58  ;;  %v1896_v22 = vmul.f32 %v7277_v30, %v8210_v26  ;;  %v1927_v53 = vmul.f32 %v7278_v54, %v8105_v59  ;;  %v7281_v24 = vld [vmem:[%s11127_s2 + $0x16] ss:$0 sm:$0xff] }
  0x62   : > { %v1909_v6 = vadd.f32 %v1893_v4, %v1875_v42  ;;  %v1928_v19 = vmul.f32 %v7278_v54, %v8111_v46  ;;  %v1910_v37 = vadd.f32 %v1894_v1, %v1876_v21  ;;  %v1929_v33 = vmul.f32 %v7278_v54, %v8208_v12 }
  0x63   : > { %v1878_v60 = vadd.f32 %v1862_v2, %v1844_v13  ;;  %v1911_v23 = vadd.f32 %v1895_v8, %v1877_v3  ;;  %v1930_v39 = vmul.f32 %v7278_v54, %v8210_v26  ;;  %v1959_v40 = vrot.slane %v1927_v53, 1  ;;  %v8252_v13 = vld [vmem:[#allocation2 + $0x58] sm:$0xf] }
  0x64   : > { %v1960_v41 = vrot.slane %v1928_v19, 1  ;;  %v2017_v0 = vmul.f32 %v7279_v20, %v8105_v59  ;;  %v1962_v44 = vrot.slane %v1929_v33, 1  ;;  %v2018_v47 = vmul.f32 %v7279_v20, %v8111_v46 }
  0x65   : > { %v1912_v63 = vadd.f32 %v1896_v22, %v1878_v60  ;;  %v1963_v45 = vrot.slane %v1930_v39, 1  ;;  %v2019_v25 = vmul.f32 %v7279_v20, %v8208_v12  ;;  %v2020_v52 = vmul.f32 %v7279_v20, %v8210_v26  ;;  %v7283_v60 = vld [vmem:[%s11127_s2 + $0x18] ss:$0 sm:$0xff] }
  0x66   : > { %v1961_v48 = vsel %vm637_vm1, %v1959_v40, %v1960_v41  ;;  %v2000_v49 = vadd.f32 %v1960_v41, %v1910_v37  ;;  %v2049_v61 = vrot.slane %v2017_v0, 2  ;;  %v2050_v11 = vrot.slane %v2018_v47, 2 }
  0x67   : > { %v1964_v5 = vsel %vm637_vm1, %v1962_v44, %v1963_v45  ;;  %v1999_v9 = vadd.f32 %v1961_v48, %v1909_v6  ;;  %v2002_v38 = vadd.f32 %v1963_v45, %v1912_v63  ;;  %v2052_v16 = vrot.slane %v2019_v25, 2  ;;  %v7284_v48 = vld [vmem:[%s11127_s2 + $0x19] ss:$0 sm:$0xff] }
  0x68   : > { %v2001_v36 = vadd.f32 %v1964_v5, %v1911_v23  ;;  %v2053_v28 = vrot.slane %v2020_v52, 2  ;;  %v2107_v30 = vmul.f32 %v7280_v43, %v8105_v59  ;;  %v2051_v29 = vsel %vm728_vm2, %v2049_v61, %v2050_v11 }
  0x69   : > { %v2090_v50 = vadd.f32 %v2050_v11, %v2000_v49  ;;  %v2108_v35 = vmul.f32 %v7280_v43, %v8111_v46  ;;  %v2109_v56 = vmul.f32 %v7280_v43, %v8208_v12  ;;  %v2089_v57 = vadd.f32 %v2051_v29, %v1999_v9 }
  0x6a   : > { %v2054_v32 = vsel %vm728_vm2, %v2052_v16, %v2053_v28  ;;  %v2092_v54 = vadd.f32 %v2053_v28, %v2002_v38  ;;  %v2110_v59 = vmul.f32 %v7280_v43, %v8210_v26  ;;  %v2139_v62 = vrot.slane %v2107_v30, 3 }
  0x6b   : > { %v2091_v34 = vadd.f32 %v2054_v32, %v2001_v36  ;;  %v2140_v58 = vrot.slane %v2108_v35, 3  ;;  %v2142_v2 = vrot.slane %v2109_v56, 3  ;;  %v2197_v4 = vmul.f32 %v7281_v24, %v8111_v46 }
  0x6c   : > { %v2143_v42 = vrot.slane %v2110_v59, 3  ;;  %v2198_v1 = vmul.f32 %v7281_v24, %v8210_v26  ;;  %v2247_v20 = vmul.f32 %v7282_v27, %v8111_v46  ;;  %v2248_v8 = vmul.f32 %v7282_v27, %v8161_v51 }
  0x6d   : > { %v2141_v21 = vsel %vm819_vm3, %v2139_v62, %v2140_v58  ;;  %v2180_v3 = vadd.f32 %v2140_v58, %v2090_v50  ;;  %v2249_v22 = vmul.f32 %v7282_v27, %v8210_v26  ;;  %v2213_v37 = vrot.slane %v2197_v4, 4 }
  0x6e   : > { %v2144_v6 = vsel %vm819_vm3, %v2142_v2, %v2143_v42  ;;  %v2179_v53 = vadd.f32 %v2141_v21, %v2089_v57  ;;  %v2182_v19 = vadd.f32 %v2143_v42, %v2092_v54  ;;  %v2214_v33 = vrot.slane %v2198_v1, 4  ;;  %v8286_v42 = vld [vmem:[%s11127_s2 + $0x1b] ss:$0 sm:$0xff] }
  0x6f   : > { %v2181_v23 = vadd.f32 %v2144_v6, %v2091_v34  ;;  %v2250_v39 = vmul.f32 %v7282_v27, %v8252_v13  ;;  %v2279_v63 = vrot.slane %v2247_v20, 5  ;;  %v2230_v41 = vadd.f32 %v2213_v37, %v2180_v3  ;;  %v7285_v27 = vld [vmem:[%s11127_s2 + $0x1a] ss:$0 sm:$0xff]  ;;  %v8292_v3 = vld [vmem:[%s11127_s2 + $0x1c] ss:$0 sm:$0xff] }
  0x70   : > { %v2229_v40 = vadd.f32 %v2213_v37, %v2179_v53  ;;  %v2280_v0 = vrot.slane %v2248_v8, 5  ;;  %v2282_v43 = vrot.slane %v2249_v22, 5  ;;  %v2232_v45 = vadd.f32 %v2214_v33, %v2182_v19  ;;  %v8294_v8 = vld [vmem:[#allocation2 + $0x60] sm:$0xff] }
  0x71   : > { %v2231_v44 = vadd.f32 %v2214_v33, %v2181_v23  ;;  %v2283_v47 = vrot.slane %v2250_v39, 5  ;;  %v2337_v25 = vmul.f32 %v7283_v60, %v8111_v46  ;;  %v2338_v61 = vmul.f32 %v7283_v60, %v8161_v51  ;;  %v8304_v33 = vld [vmem:[%s11127_s2 + $0x1d] ss:$0 sm:$0xff] }
  0x72   : > { %v2281_v49 = vsel %vm960_vm5, %v2279_v63, %v2280_v0  ;;  %v2319_v52 = vadd.f32 %v2279_v63, %v2229_v40  ;;  %v2339_v5 = vmul.f32 %v7283_v60, %v8210_v26  ;;  %v2340_v36 = vmul.f32 %v7283_v60, %v8252_v13 }
  0x73   : > { %v2284_v9 = vsel %vm960_vm5, %v2282_v43, %v2283_v47  ;;  %v2320_v38 = vadd.f32 %v2281_v49, %v2230_v41  ;;  %v2321_v11 = vadd.f32 %v2282_v43, %v2231_v44  ;;  %v2369_v28 = vrot.slane %v2337_v25, 6 }
  0x74   : > { %v2322_v16 = vadd.f32 %v2284_v9, %v2232_v45  ;;  %v2370_v30 = vrot.slane %v2338_v61, 6  ;;  %v2372_v24 = vrot.slane %v2339_v5, 6  ;;  %v2373_v29 = vrot.slane %v2340_v36, 6  ;;  %v8317_v45 = vld [vmem:[%s11127_s2 + $0x1e] ss:$0 sm:$0xff] }
  0x75   : > { %v2427_v50 = vmul.f32 %v7284_v48, %v8111_v46  ;;  %v2428_v35 = vmul.f32 %v7284_v48, %v8161_v51  ;;  %v2429_v56 = vmul.f32 %v7284_v48, %v8210_v26  ;;  %v2409_v57 = vadd.f32 %v2369_v28, %v2319_v52 }
  0x76   : > { %v2371_v32 = vsel %vm1051_vm6, %v2369_v28, %v2370_v30  ;;  %v2411_v54 = vadd.f32 %v2372_v24, %v2321_v11  ;;  %v2430_v59 = vmul.f32 %v7284_v48, %v8252_v13  ;;  %v2374_v34 = vsel %vm1051_vm6, %v2372_v24, %v2373_v29  ;;  %v7290_v28 = vld [vmem:[%s11127_s2 + $0x1f] ss:$0 sm:$0xff]  ;;  %v7291_v30 = vld [vmem:[%s11127_s2 + $0x20] ss:$0 sm:$0xff] }
  0x77   : > { %v2410_v62 = vadd.f32 %v2371_v32, %v2320_v38  ;;  %v2459_v58 = vrot.slane %v2427_v50, 7  ;;  %v2460_v2 = vrot.slane %v2428_v35, 7  ;;  %v2412_v4 = vadd.f32 %v2374_v34, %v2322_v16  ;;  %v8352_v35 = vld [vmem:[#allocation2 + $0x70] sm:$0xf] }
  0x78   : > { %v2462_v1 = vrot.slane %v2429_v56, 7  ;;  %v2463_v20 = vrot.slane %v2430_v59, 7  ;;  %v2517_v21 = vmul.f32 %v7285_v27, %v8111_v46  ;;  %v2518_v6 = vmul.f32 %v7285_v27, %v8161_v51  ;;  %v7292_v59 = vld [vmem:[%s11127_s2 + $0x21] ss:$0 sm:$0xff] }
  0x79   : > { %v2461_v22 = vsel %vm1142_vm7, %v2459_v58, %v2460_v2  ;;  %v2499_v60 = vadd.f32 %v2459_v58, %v2409_v57  ;;  %v2519_v53 = vmul.f32 %v7285_v27, %v8210_v26  ;;  %v2520_v46 = vmul.f32 %v7285_v27, %v8252_v13 }
  0x7a   : > { %v2464_v19 = vsel %vm1142_vm7, %v2462_v1, %v2463_v20  ;;  %v2500_v37 = vadd.f32 %v2461_v22, %v2410_v62  ;;  %v2501_v23 = vadd.f32 %v2462_v1, %v2411_v54  ;;  %v2551_v40 = vmul.f32 %v8286_v42, %v8208_v12  ;;  %v7293_v22 = vld [vmem:[%s11127_s2 + $0x22] ss:$0 sm:$0xff] }
  0x7b   : > { %v2502_v39 = vadd.f32 %v2464_v19, %v2412_v4  ;;  %v2533_v63 = vadd.f32 %v2517_v21, %v2499_v60  ;;  %v2552_v51 = vmul.f32 %v8286_v42, %v8210_v26  ;;  %v2553_v43 = vmul.f32 %v8286_v42, %v8294_v8 }
  0x7c   : > { %v2534_v41 = vadd.f32 %v2518_v6, %v2500_v37  ;;  %v2535_v0 = vadd.f32 %v2519_v53, %v2501_v23  ;;  %v2585_v44 = vmul.f32 %v8292_v3, %v8208_v12  ;;  %v2586_v48 = vmul.f32 %v8292_v3, %v8210_v26 }
  0x7d   : > { %v8319_v47 = vadd.f32 %v2520_v46, %v2502_v39  ;;  %v2567_v25 = vadd.f32 %v2551_v40, %v2533_v63  ;;  %v8325_v49 = vmul.f32 %v8292_v3, %v8294_v8  ;;  %v2675_v9 = vmul.f32 %v8304_v33, %v8208_v12 }
  0x7e   : > { %v2568_v52 = vadd.f32 %v2552_v51, %v2534_v41  ;;  %v8327_v61 = vadd.f32 %v2553_v43, %v2535_v0  ;;  %v2617_v5 = vrot.slane %v2585_v44, 1  ;;  %v2618_v38 = vrot.slane %v2586_v48, 1  ;;  %v7294_v0 = vld [vmem:[%s11127_s2 + $0x23] ss:$0 sm:$0xff] }
  0x7f   : > { %v2620_v11 = vrot.slane %v8325_v49, 1  ;;  %v2676_v36 = vmul.f32 %v8304_v33, %v8210_v26  ;;  %v8336_v16 = vmul.f32 %v8304_v33, %v8294_v8  ;;  %v2707_v24 = vrot.slane %v2675_v9, 2  ;;  %v7295_v49 = vld [vmem:[%s11127_s2 + $0x24] ss:$0 sm:$0xff] }
  0x80   : > { %v2765_v27 = vmul.f32 %v8317_v45, %v8208_v12  ;;  %v2766_v29 = vmul.f32 %v8317_v45, %v8210_v26  ;;  %v8350_v50 = vmul.f32 %v8317_v45, %v8294_v8  ;;  %v2619_v56 = vsel %vm637_vm1, %v2617_v5, %v2618_v38 }
  0x81   : > { %v2658_v32 = vadd.f32 %v2618_v38, %v2568_v52  ;;  %v2708_v57 = vrot.slane %v2676_v36, 2  ;;  %v2710_v54 = vrot.slane %v8336_v16, 2  ;;  %v2657_v34 = vadd.f32 %v2619_v56, %v2567_v25 }
  0x82   : > { %v2797_v62 = vrot.slane %v2765_v27, 3  ;;  %v2798_v58 = vrot.slane %v2766_v29, 3  ;;  %v2800_v2 = vrot.slane %v8350_v50, 3  ;;  %v2855_v20 = vmul.f32 %v7290_v28, %v8210_v26 }
  0x83   : > { %v2709_v4 = vsel %vm728_vm2, %v2707_v24, %v2708_v57  ;;  %v2748_v1 = vadd.f32 %v2708_v57, %v2658_v32  ;;  %v2905_v21 = vmul.f32 %v7291_v30, %v8210_v26  ;;  %v2906_v53 = vmul.f32 %v7291_v30, %v8252_v13 }
  0x84   : > { %v2747_v60 = vadd.f32 %v2709_v4, %v2657_v34  ;;  %v2799_v6 = vsel %vm819_vm3, %v2797_v62, %v2798_v58  ;;  %v2908_v19 = vmul.f32 %v7291_v30, %v8352_v35  ;;  %v2871_v23 = vrot.slane %v2855_v20, 4 }
  0x85   : > { %v2838_v37 = vadd.f32 %v2798_v58, %v2748_v1  ;;  %v2937_v46 = vrot.slane %v2905_v21, 5  ;;  %v2995_v39 = vmul.f32 %v7292_v59, %v8210_v26  ;;  %v2938_v40 = vrot.slane %v2906_v53, 5 }
  0x86   : > { %v2837_v63 = vadd.f32 %v2799_v6, %v2747_v60  ;;  %v2941_v51 = vrot.slane %v2908_v19, 5  ;;  %v2996_v41 = vmul.f32 %v7292_v59, %v8252_v13  ;;  %v2998_v44 = vmul.f32 %v7292_v59, %v8352_v35 }
  0x87   : > { %v2888_v43 = vadd.f32 %v2871_v23, %v2838_v37  ;;  %v3027_v25 = vrot.slane %v2995_v39, 6  ;;  %v3085_v48 = vmul.f32 %v7293_v22, %v8210_v26  ;;  %v2939_v5 = vsel %vm960_vm5, %v2937_v46, %v2938_v40 }
  0x88   : > { %v2887_v52 = vadd.f32 %v2871_v23, %v2837_v63  ;;  %v3028_v9 = vrot.slane %v2996_v41, 6  ;;  %v3086_v38 = vmul.f32 %v7293_v22, %v8252_v13  ;;  %v3031_v24 = vrot.slane %v2998_v44, 6 }
  0x89   : > { %v2978_v36 = vadd.f32 %v2939_v5, %v2888_v43  ;;  %v3088_v27 = vmul.f32 %v7293_v22, %v8352_v35  ;;  %v3117_v29 = vrot.slane %v3085_v48, 7  ;;  %v3175_v62 = vmul.f32 %v7294_v0, %v8210_v26 }
  0x8a   : > { %v2977_v57 = vadd.f32 %v2937_v46, %v2887_v52  ;;  %v3118_v34 = vrot.slane %v3086_v38, 7  ;;  %v3176_v48 = vmul.f32 %v7294_v0, %v8252_v13 }
  0x8b   : > { %v3121_v16 = vrot.slane %v3088_v27, 7 }
  0x8c   : > { %v3067_v6 = vadd.f32 %v3027_v25, %v2977_v57  ;;  %v3119_v41 = vsel %vm1142_vm7, %v3117_v29, %v3118_v34 }
  0x8e   : > { %v3157_v43 = vadd.f32 %v3117_v29, %v3067_v6  ;;  %v3209_v29 = vmul.f32 %v7295_v49, %v8294_v8 }
  0x90   : > { %v7783_v14 = vpop.f32.mrf.mxu0  ;;  %v3191_v38 = vadd.f32 %v3175_v62, %v3157_v43 }
  0x91   : > { %488 = vrot.lane.b32.xlu0 %v7783_v14, %s7699_s23 }
  0x92   : > { %v3225_v62 = vadd.f32 %v3209_v29, %v3191_v38 }
  0x98   : > { %v7787_v15 = vpop.f32.mrf.mxu0 }
  0x99   : > { %490 = vrot.lane.b32.xlu0 %v7787_v15, %s7699_s23 }
  0xa0   : > { %v7799_v17 = vpop.f32.mrf.mxu0 }
  0xa1   : > { %492 = vrot.lane.b32.xlu1 %v7799_v17, %s7699_s23 }
  0xa8   : > { %v7850_v31 = vpop.f32.mrf.mxu0 }
  0xa9   : > { %494 = vrot.lane.b32.xlu1 %v7850_v31, %s7699_s23 }
  0xb0   : > { %v7906_v55 = vpop.f32.mrf.mxu0 }
  0xb1   : > { %496 = vrot.lane.b32.xlu2 %v7906_v55, %s7699_s23 }
  0xb8   : > { %v7978_v18 = vpop.f32.mrf.mxu0 }
  0xb9   : > { %498 = vrot.lane.b32.xlu2 %v7978_v18, %s7699_s23 }
  0xc0   : > { %v8052_v7 = vpop.f32.mrf.mxu0 }
  0xc1   : > { %500 = vrot.lane.b32.xlu0 %v8052_v7, %s7699_s23 }
  0xc8   : > { %v8109_v10 = vpop.f32.mrf.mxu0 }
  0xc9   : > { %502 = vrot.lane.b32.xlu1 %v8109_v10, %s7699_s23 }
 0x103   : > { %v489_v12 = vpop.permute.xlu0 %488 }
 0x104   : > { %513 = vst.msk [vmem:[#allocation2 + $0x68] sm:$0xff] %vm389_vm0, %v489_v12  ;;  %v3029_v12 = vsel %vm1051_vm6, %v3027_v25, %v3028_v9  ;;  %v3178_v9 = vmul.f32 %v7294_v0, %v8352_v35 }
 0x10b   : > { %v8380_v50 = vld [vmem:[#allocation2 + $0x68] sm:$0xff]  ;;  %v491_v56 = vpop.permute.xlu0 %490  ;;  %v497_v32 = vpop.permute.xlu2 %496 }
 0x10c   : > { %514 = vst.msk [vmem:[#allocation2 + $0x80] sm:$0xff] %vm389_vm0, %v491_v56  ;;  %v2554_v58 = vmul.f32 %v8286_v42, %v8380_v50  ;;  %v2588_v4 = vmul.f32 %v8292_v3, %v8380_v50  ;;  %v2678_v1 = vmul.f32 %v8304_v33, %v8380_v50  ;;  %v2768_v20 = vmul.f32 %v8317_v45, %v8380_v50  ;;  %v7297_v56 = vld [vmem:[%s11127_s2 + $0x26] ss:$0 sm:$0xff] }
 0x10d   : > { %517 = vst.msk [vmem:[#allocation2 + $0xc8] sm:$0xff] %vm389_vm0, %v497_v32  ;;  %v2856_v21 = vmul.f32 %v7290_v28, %v8380_v50  ;;  %v2907_v26 = vmul.f32 %v7291_v30, %v8380_v50  ;;  %v8397_v60 = vmul.f32 %v7292_v59, %v8380_v50  ;;  %v3068_v45 = vadd.f32 %v3029_v12, %v2978_v36  ;;  %v8426_v36 = vld [vmem:[#allocation2 + $0x78] sm:$0xff] }
 0x10e   : > { %v2570_v42 = vadd.f32 %v2554_v58, %v8319_v47  ;;  %v2621_v53 = vrot.slane %v2588_v4, 1  ;;  %v2711_v3 = vrot.slane %v2678_v1, 2  ;;  %v2801_v19 = vrot.slane %v2768_v20, 3 }
 0x10f   : > { %v2872_v37 = vrot.slane %v2856_v21, 4  ;;  %v2940_v33 = vrot.slane %v2907_v26, 5  ;;  %v3030_v23 = vrot.slane %v8397_v60, 6  ;;  %v3087_v40 = vmul.f32 %v7293_v22, %v8380_v50  ;;  %v7296_v22 = vld [vmem:[%s11127_s2 + $0x25] ss:$0 sm:$0xff] }
 0x110   : > { %v2622_v28 = vsel %vm637_vm1, %v2620_v11, %v2621_v53  ;;  %v2660_v46 = vadd.f32 %v2621_v53, %v2570_v42  ;;  %v2712_v30 = vsel %vm728_vm2, %v2710_v54, %v2711_v3  ;;  %v2802_v59 = vsel %vm819_vm3, %v2800_v2, %v2801_v19 }
 0x111   : > { %v2659_v47 = vadd.f32 %v2622_v28, %v8327_v61  ;;  %v2942_v39 = vsel %vm960_vm5, %v2940_v33, %v2941_v51  ;;  %v3032_v63 = vsel %vm1051_vm6, %v3030_v23, %v3031_v24  ;;  %v3120_v25 = vrot.slane %v3087_v40, 7  ;;  %v7298_v28 = vld [vmem:[%s11127_s2 + $0x27] ss:$0 sm:$0xff] }
 0x112   : > { %v2750_v11 = vadd.f32 %v2711_v3, %v2660_v46  ;;  %v3158_v51 = vadd.f32 %v3119_v41, %v3068_v45  ;;  %v3177_v5 = vmul.f32 %v7294_v0, %v8380_v50  ;;  %v3210_v57 = vmul.f32 %v7295_v49, %v8380_v50 }
 0x113   : > { %v8416_v54 = vld [vmem:[#allocation2 + $0x80] sm:$0xff]  ;;  %v493_v2 = vpop.permute.xlu1 %492  ;;  %v499_v44 = vpop.permute.xlu2 %498  ;;  %v2749_v61 = vadd.f32 %v2712_v30, %v2659_v47  ;;  %v3122_v27 = vsel %vm1142_vm7, %v3120_v25, %v3121_v16  ;;  %v3211_v0 = vmul.f32 %v7295_v49, %v8426_v36  ;;  %v3243_v58 = vmul.f32 %v7296_v22, %v8294_v8 }
 0x114   : > { %515 = vst.msk [vmem:[#allocation2 + $0x98] sm:$0xff] %vm389_vm0, %v493_v2  ;;  %v2840_v52 = vadd.f32 %v2801_v19, %v2750_v11  ;;  %v3192_v13 = vadd.f32 %v3176_v48, %v3158_v51  ;;  %v3212_v12 = vmul.f32 %v7295_v49, %v8416_v54  ;;  %v3244_v4 = vmul.f32 %v7296_v22, %v8380_v50  ;;  %v7299_v51 = vld [vmem:[%s11127_s2 + $0x28] ss:$0 sm:$0xff] }
 0x115   : > { %518 = vst.msk [vmem:[#allocation2 + $0xe0] sm:$0xff] %vm389_vm0, %v499_v44  ;;  %v2839_v24 = vadd.f32 %v2802_v59, %v2749_v61  ;;  %v3245_v21 = vmul.f32 %v7296_v22, %v8426_v36  ;;  %v3246_v26 = vmul.f32 %v7296_v22, %v8416_v54  ;;  %v3275_v6 = vrot.slane %v3243_v58, 1  ;;  %v7241_v58 = vld [vmem:[%s11128_s3 + $0x8] sm:$0xff] }
 0x116   : > { %v2890_v32 = vadd.f32 %v2872_v37, %v2840_v52  ;;  %v3226_v20 = vadd.f32 %v3210_v57, %v3192_v13  ;;  %v3276_v42 = vrot.slane %v3244_v4, 1  ;;  %v3333_v53 = vmul.f32 %v7297_v56, %v8294_v8  ;;  %6584 = vmatpush.bf16.msra.mxu1 %v7241_v58 }
 0x117   : > { %v2889_v34 = vadd.f32 %v2872_v37, %v2839_v24  ;;  %v3278_v19 = vrot.slane %v3245_v21, 1  ;;  %v3279_v45 = vrot.slane %v3246_v26, 1  ;;  %v3334_v37 = vmul.f32 %v7297_v56, %v8380_v50 }
 0x118   : > { %v2980_v1 = vadd.f32 %v2942_v39, %v2890_v32  ;;  %v3277_v59 = vsel %vm637_vm1, %v3275_v6, %v3276_v42  ;;  %v3316_v47 = vadd.f32 %v3276_v42, %v3226_v20  ;;  %v3336_v49 = vmul.f32 %v7297_v56, %v8416_v54  ;;  %v7301_v42 = vld [vmem:[%s11127_s2 + $0x2a] ss:$0 sm:$0xff] }
 0x119   : > { %v2979_v60 = vadd.f32 %v2940_v33, %v2889_v34  ;;  %v3335_v33 = vmul.f32 %v7297_v56, %v8426_v36  ;;  %v3315_v40 = vadd.f32 %v3277_v59, %v3225_v62  ;;  %v3365_v41 = vrot.slane %v3333_v53, 2  ;;  %v7240_v53 = vld [vmem:[%s11128_s3] sm:$0xff] }
 0x11a   : > { %v3070_v3 = vadd.f32 %v3032_v63, %v2980_v1  ;;  %v3280_v63 = vsel %vm637_vm1, %v3278_v19, %v3279_v45  ;;  %v3366_v16 = vrot.slane %v3334_v37, 2  ;;  %v3369_v44 = vrot.slane %v3336_v49, 2  ;;  %6585 = vmatpush.bf16.msra.mxu1 %v7240_v53 }
 0x11b   : > { %v495_v46 = vpop.permute.xlu1 %494  ;;  %v3069_v30 = vadd.f32 %v3030_v23, %v2979_v60  ;;  %v3368_v43 = vrot.slane %v3335_v33, 2  ;;  %v3423_v23 = vmul.f32 %v7298_v28, %v8294_v8  ;;  %v3424_v61 = vmul.f32 %v7298_v28, %v8380_v50 }
 0x11c   : > { %516 = vst.msk [vmem:[#allocation2 + $0xb0] sm:$0xff] %vm389_vm0, %v495_v46  ;;  %v3160_v39 = vadd.f32 %v3122_v27, %v3070_v3  ;;  %v3367_v22 = vsel %vm728_vm2, %v3365_v41, %v3366_v16  ;;  %v3406_v52 = vadd.f32 %v3366_v16, %v3316_v47  ;;  %v3425_v38 = vmul.f32 %v7298_v28, %v8426_v36  ;;  %v7302_v16 = vld [vmem:[%s11127_s2 + $0x2b] ss:$0 sm:$0xff] }
 0x11d   : > { %v3159_v11 = vadd.f32 %v3120_v25, %v3069_v30  ;;  %v7300_v25 = vld [vmem:[%s11127_s2 + $0x29] ss:$0 sm:$0xff]  ;;  %v3370_v24 = vsel %vm728_vm2, %v3368_v43, %v3369_v44  ;;  %v3405_v8 = vadd.f32 %v3367_v22, %v3315_v40  ;;  %v3426_v27 = vmul.f32 %v7298_v28, %v8416_v54 }
 0x11e   : > { %v3194_v2 = vadd.f32 %v3178_v9, %v3160_v39  ;;  %v3455_v29 = vrot.slane %v3423_v23, 3  ;;  %v3456_v56 = vrot.slane %v3424_v61, 3  ;;  %v3458_v32 = vrot.slane %v3425_v38, 3 }
 0x11f   : > { %v3193_v48 = vadd.f32 %v3177_v5, %v3159_v11  ;;  %v3459_v57 = vrot.slane %v3426_v27, 3  ;;  %v3513_v34 = vmul.f32 %v7299_v51, %v8380_v50  ;;  %v3514_v62 = vmul.f32 %v7299_v51, %v8416_v54 }
 0x120   : > { %v3228_v9 = vadd.f32 %v3212_v12, %v3194_v2  ;;  %v8467_v12 = vld [vmem:[#allocation2 + $0x88] sm:$0xf]  ;;  %v3457_v1 = vsel %vm819_vm3, %v3455_v29, %v3456_v56  ;;  %v3496_v20 = vadd.f32 %v3456_v56, %v3406_v52  ;;  %v3565_v37 = vmul.f32 %v7300_v25, %v8416_v54 }
 0x121   : > { %v3227_v13 = vadd.f32 %v3211_v0, %v3193_v48  ;;  %v3563_v0 = vmul.f32 %v7300_v25, %v8380_v50  ;;  %v3460_v26 = vsel %vm819_vm3, %v3458_v32, %v3459_v57  ;;  %v3495_v60 = vadd.f32 %v3457_v1, %v3405_v8  ;;  %v7304_v1 = vld [vmem:[%s11127_s2 + $0x2d] ss:$0 sm:$0xff] }
 0x122   : > { %v3318_v5 = vadd.f32 %v3279_v45, %v3228_v9  ;;  %v3529_v6 = vrot.slane %v3513_v34, 4  ;;  %v3530_v19 = vrot.slane %v3514_v62, 4  ;;  %v3564_v45 = vmul.f32 %v7300_v25, %v8352_v35 }
 0x123   : > { %v3317_v4 = vadd.f32 %v3280_v63, %v3227_v13  ;;  %v3566_v59 = vmul.f32 %v7300_v25, %v8467_v12  ;;  %v3595_v33 = vrot.slane %v3563_v0, 5  ;;  %v3598_v63 = vrot.slane %v3565_v37, 5 }
 0x124   : > { %v3408_v21 = vadd.f32 %v3369_v44, %v3318_v5  ;;  %v3545_v46 = vadd.f32 %v3529_v6, %v3495_v60  ;;  %v3546_v30 = vadd.f32 %v3529_v6, %v3496_v20  ;;  %v3596_v39 = vrot.slane %v3564_v45, 5  ;;  %v8503_v60 = vld [vmem:[#allocation2 + $0x98] sm:$0xff] }
 0x125   : > { %v3407_v3 = vadd.f32 %v3370_v24, %v3317_v4  ;;  %v3599_v49 = vrot.slane %v3566_v59, 5  ;;  %v3653_v11 = vmul.f32 %v7301_v42, %v8380_v50  ;;  %v3654_v41 = vmul.f32 %v7301_v42, %v8352_v35  ;;  %v7303_v24 = vld [vmem:[%s11127_s2 + $0x2c] ss:$0 sm:$0xff] }
 0x126   : > { %v3498_v28 = vadd.f32 %v3459_v57, %v3408_v21  ;;  %v3597_v2 = vsel %vm960_vm5, %v3595_v33, %v3596_v39  ;;  %v3635_v44 = vadd.f32 %v3595_v33, %v3545_v46  ;;  %v3655_v23 = vmul.f32 %v7301_v42, %v8416_v54  ;;  %v7306_v33 = vld [vmem:[%s11127_s2 + $0x2f] ss:$0 sm:$0xff] }
 0x127   : > { %v3497_v47 = vadd.f32 %v3460_v26, %v3407_v3  ;;  %v3600_v61 = vsel %vm960_vm5, %v3598_v63, %v3599_v49  ;;  %v3636_v51 = vadd.f32 %v3597_v2, %v3546_v30  ;;  %v3656_v48 = vmul.f32 %v7301_v42, %v8467_v12 }
 0x128   : > { %v3548_v40 = vadd.f32 %v3530_v19, %v3498_v28  ;;  %v3685_v22 = vrot.slane %v3653_v11, 6  ;;  %v3686_v25 = vrot.slane %v3654_v41, 6  ;;  %v3688_v9 = vrot.slane %v3655_v23, 6 }
 0x129   : > { %v3547_v43 = vadd.f32 %v3530_v19, %v3497_v47  ;;  %v3689_v8 = vrot.slane %v3656_v48, 6  ;;  %v3743_v13 = vmul.f32 %v7302_v16, %v8380_v50  ;;  %v3744_v29 = vmul.f32 %v7302_v16, %v8352_v35  ;;  %v7305_v19 = vld [vmem:[%s11127_s2 + $0x2e] ss:$0 sm:$0xff] }
 0x12a   : > { %v3638_v38 = vadd.f32 %v3600_v61, %v3548_v40  ;;  %v3725_v27 = vadd.f32 %v3685_v22, %v3635_v44  ;;  %v3687_v56 = vsel %vm1051_vm6, %v3685_v22, %v3686_v25  ;;  %v3745_v5 = vmul.f32 %v7302_v16, %v8416_v54  ;;  %v7307_v25 = vld [vmem:[%s11127_s2 + $0x30] ss:$0 sm:$0xff] }
 0x12b   : > { %v3637_v52 = vadd.f32 %v3598_v63, %v3547_v43  ;;  %v3746_v57 = vmul.f32 %v7302_v16, %v8467_v12  ;;  %v3690_v34 = vsel %vm1051_vm6, %v3688_v9, %v3689_v8  ;;  %v3726_v62 = vadd.f32 %v3687_v56, %v3636_v51 }
 0x12c   : > { %v3775_v58 = vrot.slane %v3743_v13, 7  ;;  %v3776_v4 = vrot.slane %v3744_v29, 7  ;;  %v3728_v20 = vadd.f32 %v3690_v34, %v3638_v38  ;;  %v3778_v0 = vrot.slane %v3745_v5, 7 }
 0x12d   : > { %v3727_v32 = vadd.f32 %v3688_v9, %v3637_v52  ;;  %v3779_v21 = vrot.slane %v3746_v57, 7  ;;  %v3833_v26 = vmul.f32 %v7303_v24, %v8380_v50  ;;  %v3834_v53 = vmul.f32 %v7303_v24, %v8352_v35  ;;  %v8513_v50 = vld [vmem:[#allocation2 + $0x90] sm:$0xff] }
 0x12e   : > { %v3777_v6 = vsel %vm1142_vm7, %v3775_v58, %v3776_v4  ;;  %v3815_v42 = vadd.f32 %v3775_v58, %v3725_v27  ;;  %v3835_v3 = vmul.f32 %v7303_v24, %v8416_v54  ;;  %v3836_v46 = vmul.f32 %v7303_v24, %v8467_v12 }
 0x12f   : > { %v3780_v45 = vsel %vm1142_vm7, %v3778_v0, %v3779_v21  ;;  %v3816_v37 = vadd.f32 %v3777_v6, %v3726_v62  ;;  %v3817_v28 = vadd.f32 %v3778_v0, %v3727_v32  ;;  %v3867_v47 = vmul.f32 %v7304_v1, %v8426_v36  ;;  %v7308_v0 = vld [vmem:[%s11127_s2 + $0x31] ss:$0 sm:$0xff]  ;;  %v7309_v21 = vld [vmem:[%s11127_s2 + $0x32] ss:$0 sm:$0xff] }
 0x130   : > { %v3818_v30 = vadd.f32 %v3780_v45, %v3728_v20  ;;  %v3849_v59 = vadd.f32 %v3833_v26, %v3815_v42  ;;  %v3868_v35 = vmul.f32 %v7304_v1, %v8416_v54  ;;  %v3869_v49 = vmul.f32 %v7304_v1, %v8513_v50 }
 0x131   : > { %v3850_v63 = vadd.f32 %v3834_v53, %v3816_v37  ;;  %v3851_v40 = vadd.f32 %v3835_v3, %v3817_v28  ;;  %v3870_v11 = vmul.f32 %v7304_v1, %v8503_v60  ;;  %v3901_v43 = vmul.f32 %v7305_v19, %v8426_v36 }
 0x132   : > { %v3852_v41 = vadd.f32 %v3836_v46, %v3818_v30  ;;  %v3883_v16 = vadd.f32 %v3867_v47, %v3849_v59  ;;  %v3902_v2 = vmul.f32 %v7305_v19, %v8416_v54  ;;  %v3903_v61 = vmul.f32 %v7305_v19, %v8513_v50  ;;  %v8549_v47 = vld [vmem:[#allocation2 + $0xa0] sm:$0xf] }
 0x133   : > { %v501_v39 = vpop.permute.xlu0 %500  ;;  %v3884_v44 = vadd.f32 %v3868_v35, %v3850_v63  ;;  %v3885_v23 = vadd.f32 %v3869_v49, %v3851_v40  ;;  %v3904_v51 = vmul.f32 %v7305_v19, %v8503_v60  ;;  %v3933_v22 = vrot.slane %v3901_v43, 1 }
 0x134   : > { %519 = vst.msk [vmem:[#allocation2 + $0xf8] sm:$0xff] %vm389_vm0, %v501_v39  ;;  %v3886_v48 = vadd.f32 %v3870_v11, %v3852_v41  ;;  %v3934_v52 = vrot.slane %v3902_v2, 1  ;;  %v3991_v38 = vmul.f32 %v7306_v33, %v8426_v36  ;;  %v3936_v9 = vrot.slane %v3903_v61, 1 }
 0x135   : > { %v3937_v24 = vrot.slane %v3904_v51, 1  ;;  %v3992_v8 = vmul.f32 %v7306_v33, %v8416_v54  ;;  %v3993_v27 = vmul.f32 %v7306_v33, %v8513_v50  ;;  %v3994_v56 = vmul.f32 %v7306_v33, %v8503_v60 }
 0x136   : > { %v3935_v13 = vsel %vm637_vm1, %v3933_v22, %v3934_v52  ;;  %v3974_v29 = vadd.f32 %v3934_v52, %v3884_v44  ;;  %v4023_v32 = vrot.slane %v3991_v38, 2  ;;  %v4081_v20 = vmul.f32 %v7307_v25, %v8426_v36 }
 0x137   : > { %v3938_v5 = vsel %vm637_vm1, %v3936_v9, %v3937_v24  ;;  %v3973_v57 = vadd.f32 %v3935_v13, %v3883_v16  ;;  %v3976_v34 = vadd.f32 %v3937_v24, %v3886_v48  ;;  %v4024_v62 = vrot.slane %v3992_v8, 2  ;;  %v7310_v16 = vld [vmem:[%s11127_s2 + $0x33] ss:$0 sm:$0xff] }
 0x138   : > { %v3975_v58 = vadd.f32 %v3938_v5, %v3885_v23  ;;  %v4026_v4 = vrot.slane %v3993_v27, 2  ;;  %v4027_v1 = vrot.slane %v3994_v56, 2  ;;  %v4082_v53 = vmul.f32 %v7307_v25, %v8416_v54 }
 0x139   : > { %v4025_v6 = vsel %vm728_vm2, %v4023_v32, %v4024_v62  ;;  %v4064_v42 = vadd.f32 %v4024_v62, %v3974_v29  ;;  %v4083_v3 = vmul.f32 %v7307_v25, %v8513_v50  ;;  %v4084_v37 = vmul.f32 %v7307_v25, %v8503_v60  ;;  %v7311_v29 = vld [vmem:[%s11127_s2 + $0x34] ss:$0 sm:$0xff] }
 0x13a   : > { %v4028_v36 = vsel %vm728_vm2, %v4026_v4, %v4027_v1  ;;  %v4063_v19 = vadd.f32 %v4025_v6, %v3973_v57  ;;  %v4066_v45 = vadd.f32 %v4027_v1, %v3976_v34  ;;  %v4113_v46 = vrot.slane %v4081_v20, 3 }
 0x13b   : > { %v503_v26 = vpop.permute.xlu1 %502  ;;  %v4065_v28 = vadd.f32 %v4028_v36, %v3975_v58  ;;  %v4114_v30 = vrot.slane %v4082_v53, 3  ;;  %v4116_v59 = vrot.slane %v4083_v3, 3  ;;  %v4117_v35 = vrot.slane %v4084_v37, 3 }
 0x13c   : > { %520 = vst.msk [vmem:[#allocation2 + $0x110] sm:$0xff] %vm389_vm0, %v503_v26  ;;  %v4171_v33 = vmul.f32 %v7308_v0, %v8416_v54  ;;  %v4172_v39 = vmul.f32 %v7308_v0, %v8503_v60  ;;  %v4221_v63 = vmul.f32 %v7309_v21, %v8416_v54  ;;  %v4222_v11 = vmul.f32 %v7309_v21, %v8467_v12  ;;  %v7312_v26 = vld [vmem:[%s11127_s2 + $0x35] ss:$0 sm:$0xff] }
 0x13d   : > { %v4115_v40 = vsel %vm819_vm3, %v4113_v46, %v4114_v30  ;;  %v4154_v49 = vadd.f32 %v4114_v30, %v4064_v42  ;;  %v4223_v41 = vmul.f32 %v7309_v21, %v8503_v60  ;;  %v4118_v43 = vsel %vm819_vm3, %v4116_v59, %v4117_v35 }
 0x13e   : > { %v4153_v2 = vadd.f32 %v4115_v40, %v4063_v19  ;;  %v4156_v44 = vadd.f32 %v4117_v35, %v4066_v45  ;;  %v4187_v23 = vrot.slane %v4171_v33, 4  ;;  %v4155_v61 = vadd.f32 %v4118_v43, %v4065_v28  ;;  %v7313_v35 = vld [vmem:[%s11127_s2 + $0x36] ss:$0 sm:$0xff] }
 0x13f   : > { %v4188_v51 = vrot.slane %v4172_v39, 4  ;;  %v4224_v48 = vmul.f32 %v7309_v21, %v8549_v47  ;;  %v4253_v22 = vrot.slane %v4221_v63, 5  ;;  %v4254_v25 = vrot.slane %v4222_v11, 5 }
 0x140   : > { %v4203_v52 = vadd.f32 %v4187_v23, %v4153_v2  ;;  %v4204_v38 = vadd.f32 %v4187_v23, %v4154_v49  ;;  %v4256_v9 = vrot.slane %v4223_v41, 5  ;;  %v4311_v13 = vmul.f32 %v7310_v16, %v8416_v54  ;;  %v8584_v49 = vld [vmem:[#allocation2 + $0xb0] sm:$0xff] }
 0x141   : > { %v4205_v24 = vadd.f32 %v4188_v51, %v4155_v61  ;;  %v4206_v8 = vadd.f32 %v4188_v51, %v4156_v44  ;;  %v4257_v27 = vrot.slane %v4224_v48, 5  ;;  %v4255_v56 = vsel %vm960_vm5, %v4253_v22, %v4254_v25  ;;  %v7314_v2 = vld [vmem:[%s11127_s2 + $0x37] ss:$0 sm:$0xff] }
 0x142   : > { %v4293_v32 = vadd.f32 %v4253_v22, %v4203_v52  ;;  %v4312_v5 = vmul.f32 %v7310_v16, %v8467_v12  ;;  %v4313_v57 = vmul.f32 %v7310_v16, %v8503_v60  ;;  %v4294_v62 = vadd.f32 %v4255_v56, %v4204_v38  ;;  %v7315_v38 = vld [vmem:[%s11127_s2 + $0x38] ss:$0 sm:$0xff] }
 0x143   : > { %v4258_v34 = vsel %vm960_vm5, %v4256_v9, %v4257_v27  ;;  %v4295_v58 = vadd.f32 %v4256_v9, %v4205_v24  ;;  %v4314_v4 = vmul.f32 %v7310_v16, %v8549_v47  ;;  %v4343_v20 = vrot.slane %v4311_v13, 6 }
 0x144   : > { %v4296_v1 = vadd.f32 %v4258_v34, %v4206_v8  ;;  %v4344_v0 = vrot.slane %v4312_v5, 6  ;;  %v4346_v21 = vrot.slane %v4313_v57, 6  ;;  %v4401_v42 = vmul.f32 %v7311_v29, %v8416_v54 }
 0x145   : > { %v4347_v6 = vrot.slane %v4314_v4, 6  ;;  %v4402_v53 = vmul.f32 %v7311_v29, %v8467_v12  ;;  %v4403_v3 = vmul.f32 %v7311_v29, %v8503_v60  ;;  %v4383_v19 = vadd.f32 %v4343_v20, %v4293_v32 }
 0x146   : > { %v4345_v36 = vsel %vm1051_vm6, %v4343_v20, %v4344_v0  ;;  %v4385_v45 = vadd.f32 %v4346_v21, %v4295_v58  ;;  %v4404_v37 = vmul.f32 %v7311_v29, %v8549_v47  ;;  %v4433_v30 = vrot.slane %v4401_v42, 7  ;;  %v7316_v20 = vld [vmem:[%s11127_s2 + $0x39] ss:$0 sm:$0xff] }
 0x147   : > { %v4348_v28 = vsel %vm1051_vm6, %v4346_v21, %v4347_v6  ;;  %v4384_v46 = vadd.f32 %v4345_v36, %v4294_v62  ;;  %v4434_v59 = vrot.slane %v4402_v53, 7  ;;  %v4436_v39 = vrot.slane %v4403_v3, 7 }
 0x148   : > { %v4386_v33 = vadd.f32 %v4348_v28, %v4296_v1  ;;  %v4437_v63 = vrot.slane %v4404_v37, 7  ;;  %v4491_v40 = vmul.f32 %v7312_v26, %v8416_v54  ;;  %v4473_v41 = vadd.f32 %v4433_v30, %v4383_v19  ;;  %v8594_v54 = vld [vmem:[#allocation2 + $0xa8] sm:$0xff] }
 0x149   : > { %v4435_v11 = vsel %vm1142_vm7, %v4433_v30, %v4434_v59  ;;  %v4492_v16 = vmul.f32 %v7312_v26, %v8467_v12  ;;  %v4493_v43 = vmul.f32 %v7312_v26, %v8503_v60  ;;  %v4475_v61 = vadd.f32 %v4436_v39, %v4385_v45 }
 0x14a   : > { %v4438_v44 = vsel %vm1142_vm7, %v4436_v39, %v4437_v63  ;;  %v4474_v23 = vadd.f32 %v4435_v11, %v4384_v46  ;;  %v4494_v51 = vmul.f32 %v7312_v26, %v8549_v47  ;;  %v4507_v22 = vadd.f32 %v4491_v40, %v4473_v41  ;;  %v7318_v39 = vld [vmem:[%s11127_s2 + $0x3b] ss:$0 sm:$0xff] }
 0x14b   : > { %v4476_v48 = vadd.f32 %v4438_v44, %v4386_v33  ;;  %v4525_v52 = vmul.f32 %v7313_v35, %v8513_v50  ;;  %v4526_v12 = vmul.f32 %v7313_v35, %v8503_v60  ;;  %v4509_v9 = vadd.f32 %v4493_v43, %v4475_v61  ;;  %v7317_v33 = vld [vmem:[%s11127_s2 + $0x3a] ss:$0 sm:$0xff] }
 0x14c   : > { %v4508_v25 = vadd.f32 %v4492_v16, %v4474_v23  ;;  %v4527_v24 = vmul.f32 %v7313_v35, %v8594_v54  ;;  %v4528_v8 = vmul.f32 %v7313_v35, %v8584_v49  ;;  %v4559_v29 = vmul.f32 %v7314_v2, %v8513_v50 }
 0x14d   : > { %v4510_v27 = vadd.f32 %v4494_v51, %v4476_v48  ;;  %v4541_v13 = vadd.f32 %v4525_v52, %v4507_v22  ;;  %v4560_v56 = vmul.f32 %v7314_v2, %v8503_v60  ;;  %v4561_v57 = vmul.f32 %v7314_v2, %v8594_v54  ;;  %v8628_v48 = vld [vmem:[#allocation2 + $0xb8] sm:$0xf] }
 0x14e   : > { %v4542_v32 = vadd.f32 %v4526_v12, %v4508_v25  ;;  %v4543_v5 = vadd.f32 %v4527_v24, %v4509_v9  ;;  %v4562_v34 = vmul.f32 %v7314_v2, %v8584_v49  ;;  %v4591_v58 = vrot.slane %v4559_v29, 1 }
 0x14f   : > { %v4544_v62 = vadd.f32 %v4528_v8, %v4510_v27  ;;  %v4592_v4 = vrot.slane %v4560_v56, 1  ;;  %v4649_v1 = vmul.f32 %v7315_v38, %v8513_v50  ;;  %v4594_v0 = vrot.slane %v4561_v57, 1  ;;  %v7319_v27 = vld [vmem:[%s11127_s2 + $0x3c] ss:$0 sm:$0xff] }
 0x150   : > { %v4595_v21 = vrot.slane %v4562_v34, 1  ;;  %v4650_v26 = vmul.f32 %v7315_v38, %v8503_v60  ;;  %v4651_v6 = vmul.f32 %v7315_v38, %v8594_v54  ;;  %v4652_v3 = vmul.f32 %v7315_v38, %v8584_v49 }
 0x151   : > { %v4593_v42 = vsel %vm637_vm1, %v4591_v58, %v4592_v4  ;;  %v4632_v53 = vadd.f32 %v4592_v4, %v4542_v32  ;;  %v4681_v36 = vrot.slane %v4649_v1, 2  ;;  %v4739_v35 = vmul.f32 %v7316_v20, %v8513_v50 }
 0x152   : > { %v4596_v19 = vsel %vm637_vm1, %v4594_v0, %v4595_v21  ;;  %v4631_v45 = vadd.f32 %v4593_v42, %v4541_v13  ;;  %v4634_v37 = vadd.f32 %v4595_v21, %v4544_v62  ;;  %v4682_v28 = vrot.slane %v4650_v26, 2  ;;  %v7320_v42 = vld [vmem:[%s11127_s2 + $0x3d] ss:$0 sm:$0xff] }
 0x153   : > { %v4633_v46 = vadd.f32 %v4596_v19, %v4543_v5  ;;  %v4684_v30 = vrot.slane %v4651_v6, 2  ;;  %v4685_v59 = vrot.slane %v4652_v3, 2  ;;  %v4740_v11 = vmul.f32 %v7316_v20, %v8503_v60 }
 0x154   : > { %v4683_v63 = vsel %vm728_vm2, %v4681_v36, %v4682_v28  ;;  %v4722_v40 = vadd.f32 %v4682_v28, %v4632_v53  ;;  %v4741_v41 = vmul.f32 %v7316_v20, %v8594_v54  ;;  %v4742_v50 = vmul.f32 %v7316_v20, %v8584_v49 }
 0x155   : > { %v4686_v16 = vsel %vm728_vm2, %v4684_v30, %v4685_v59  ;;  %v4721_v43 = vadd.f32 %v4683_v63, %v4631_v45  ;;  %v4724_v2 = vadd.f32 %v4685_v59, %v4634_v37  ;;  %v4771_v23 = vrot.slane %v4739_v35, 3 }
 0x156   : > { %v4723_v44 = vadd.f32 %v4686_v16, %v4633_v46  ;;  %v4772_v61 = vrot.slane %v4740_v11, 3  ;;  %v4774_v51 = vrot.slane %v4741_v41, 3  ;;  %v4775_v22 = vrot.slane %v4742_v50, 3 }
 0x157   : > { %v4829_v52 = vmul.f32 %v7317_v33, %v8503_v60  ;;  %v4830_v12 = vmul.f32 %v7317_v33, %v8584_v49  ;;  %v4879_v38 = vmul.f32 %v7318_v39, %v8503_v60  ;;  %v4880_v24 = vmul.f32 %v7318_v39, %v8549_v47 }
 0x158   : > { %v4773_v25 = vsel %vm819_vm3, %v4771_v23, %v4772_v61  ;;  %v4812_v9 = vadd.f32 %v4772_v61, %v4722_v40  ;;  %v4881_v8 = vmul.f32 %v7318_v39, %v8584_v49  ;;  %v4776_v13 = vsel %vm819_vm3, %v4774_v51, %v4775_v22 }
 0x159   : > { %v4811_v29 = vadd.f32 %v4773_v25, %v4721_v43  ;;  %v4814_v56 = vadd.f32 %v4775_v22, %v4724_v2  ;;  %v4845_v32 = vrot.slane %v4829_v52, 4  ;;  %v4813_v5 = vadd.f32 %v4776_v13, %v4723_v44  ;;  %v7322_v22 = vld [vmem:[%s11127_s2 + $0x3f] ss:$0 sm:$0xff] }
 0x15a   : > { %v4846_v57 = vrot.slane %v4830_v12, 4  ;;  %v4882_v34 = vmul.f32 %v7318_v39, %v8628_v48  ;;  %v4911_v62 = vrot.slane %v4879_v38, 5  ;;  %v4912_v1 = vrot.slane %v4880_v24, 5  ;;  %v7321_v39 = vld [vmem:[%s11127_s2 + $0x3e] ss:$0 sm:$0xff] }
 0x15b   : > { %v4861_v58 = vadd.f32 %v4845_v32, %v4811_v29  ;;  %v4862_v4 = vadd.f32 %v4845_v32, %v4812_v9  ;;  %v4914_v20 = vrot.slane %v4881_v8, 5  ;;  %v4969_v6 = vmul.f32 %v7319_v27, %v8503_v60  ;;  %v8663_v9 = vld [vmem:[#allocation2 + $0xc8] sm:$0xff]  ;;  %v7323_v29 = vld [vmem:[%s11127_s2 + $0x40] ss:$0 sm:$0xff] }
 0x15c   : > { %v4863_v0 = vadd.f32 %v4846_v57, %v4813_v5  ;;  %v4864_v21 = vadd.f32 %v4846_v57, %v4814_v56  ;;  %v4915_v26 = vrot.slane %v4882_v34, 5  ;;  %v4913_v53 = vsel %vm960_vm5, %v4911_v62, %v4912_v1 }
 0x15d   : > { %v4951_v3 = vadd.f32 %v4911_v62, %v4861_v58  ;;  %v4970_v36 = vmul.f32 %v7319_v27, %v8549_v47  ;;  %v4971_v19 = vmul.f32 %v7319_v27, %v8584_v49  ;;  %v4952_v37 = vadd.f32 %v4913_v53, %v4862_v4  ;;  %v7324_v4 = vld [vmem:[%s11127_s2 + $0x41] ss:$0 sm:$0xff] }
 0x15e   : > { %v4916_v45 = vsel %vm960_vm5, %v4914_v20, %v4915_v26  ;;  %v4953_v28 = vadd.f32 %v4914_v20, %v4863_v0  ;;  %v4972_v46 = vmul.f32 %v7319_v27, %v8628_v48  ;;  %v5001_v59 = vrot.slane %v4969_v6, 6 }
 0x15f   : > { %v4954_v30 = vadd.f32 %v4916_v45, %v4864_v21  ;;  %v5002_v35 = vrot.slane %v4970_v36, 6  ;;  %v5004_v33 = vrot.slane %v4971_v19, 6  ;;  %v5059_v40 = vmul.f32 %v7320_v42, %v8503_v60 }
 0x160   : > { %v5005_v63 = vrot.slane %v4972_v46, 6  ;;  %v5060_v11 = vmul.f32 %v7320_v42, %v8549_v47  ;;  %v5061_v41 = vmul.f32 %v7320_v42, %v8584_v49  ;;  %v5041_v43 = vadd.f32 %v5001_v59, %v4951_v3 }
 0x161   : > { %v5003_v16 = vsel %vm1051_vm6, %v5001_v59, %v5002_v35  ;;  %v5043_v2 = vadd.f32 %v5004_v33, %v4953_v28  ;;  %v5062_v50 = vmul.f32 %v7320_v42, %v8628_v48  ;;  %v5091_v61 = vrot.slane %v5059_v40, 7  ;;  %v7325_v59 = vld [vmem:[%s11127_s2 + $0x42] ss:$0 sm:$0xff] }
 0x162   : > { %v5006_v44 = vsel %vm1051_vm6, %v5004_v33, %v5005_v63  ;;  %v5042_v23 = vadd.f32 %v5003_v16, %v4952_v37  ;;  %v5092_v51 = vrot.slane %v5060_v11, 7  ;;  %v5094_v12 = vrot.slane %v5061_v41, 7 }
 0x163   : > { %v5044_v52 = vadd.f32 %v5006_v44, %v4954_v30  ;;  %v5095_v38 = vrot.slane %v5062_v50, 7  ;;  %v5149_v25 = vmul.f32 %v7321_v39, %v8503_v60  ;;  %v5131_v8 = vadd.f32 %v5091_v61, %v5041_v43  ;;  %v8673_v60 = vld [vmem:[#allocation2 + $0xc0] sm:$0xff] }
 0x164   : > { %v5093_v24 = vsel %vm1142_vm7, %v5091_v61, %v5092_v51  ;;  %v5150_v27 = vmul.f32 %v7321_v39, %v8549_v47  ;;  %v5151_v13 = vmul.f32 %v7321_v39, %v8584_v49  ;;  %v5133_v5 = vadd.f32 %v5094_v12, %v5043_v2 }
 0x165   : > { %v5096_v56 = vsel %vm1142_vm7, %v5094_v12, %v5095_v38  ;;  %v5132_v32 = vadd.f32 %v5093_v24, %v5042_v23  ;;  %v5152_v57 = vmul.f32 %v7321_v39, %v8628_v48  ;;  %v5165_v62 = vadd.f32 %v5149_v25, %v5131_v8  ;;  %v7327_v12 = vld [vmem:[%s11127_s2 + $0x44] ss:$0 sm:$0xff] }
 0x166   : > { %v5134_v34 = vadd.f32 %v5096_v56, %v5044_v52  ;;  %v5183_v58 = vmul.f32 %v7322_v22, %v8594_v54  ;;  %v5184_v47 = vmul.f32 %v7322_v22, %v8584_v49  ;;  %v5167_v20 = vadd.f32 %v5151_v13, %v5133_v5  ;;  %v7326_v52 = vld [vmem:[%s11127_s2 + $0x43] ss:$0 sm:$0xff] }
 0x167   : > { %v5166_v1 = vadd.f32 %v5150_v27, %v5132_v32  ;;  %v5185_v0 = vmul.f32 %v7322_v22, %v8673_v60  ;;  %v5186_v21 = vmul.f32 %v7322_v22, %v8663_v9  ;;  %v5217_v42 = vmul.f32 %v7323_v29, %v8594_v54 }
 0x168   : > { %v5168_v26 = vadd.f32 %v5152_v57, %v5134_v34  ;;  %v5199_v6 = vadd.f32 %v5183_v58, %v5165_v62  ;;  %v5218_v53 = vmul.f32 %v7323_v29, %v8584_v49  ;;  %v5219_v19 = vmul.f32 %v7323_v29, %v8673_v60  ;;  %v8707_v34 = vld [vmem:[#allocation2 + $0xd0] sm:$0xf] }
 0x169   : > { %v5200_v3 = vadd.f32 %v5184_v47, %v5166_v1  ;;  %v5201_v36 = vadd.f32 %v5185_v0, %v5167_v20  ;;  %v5220_v45 = vmul.f32 %v7323_v29, %v8663_v9  ;;  %v5249_v28 = vrot.slane %v5217_v42, 1 }
 0x16a   : > { %v5202_v37 = vadd.f32 %v5186_v21, %v5168_v26  ;;  %v5250_v46 = vrot.slane %v5218_v53, 1  ;;  %v5307_v30 = vmul.f32 %v7324_v4, %v8594_v54  ;;  %v5252_v35 = vrot.slane %v5219_v19, 1  ;;  %v7328_v26 = vld [vmem:[%s11127_s2 + $0x45] ss:$0 sm:$0xff] }
 0x16b   : > { %v5253_v33 = vrot.slane %v5220_v45, 1  ;;  %v5308_v39 = vmul.f32 %v7324_v4, %v8584_v49  ;;  %v5309_v63 = vmul.f32 %v7324_v4, %v8673_v60  ;;  %v5310_v41 = vmul.f32 %v7324_v4, %v8663_v9 }
 0x16c   : > { %v5251_v40 = vsel %vm637_vm1, %v5249_v28, %v5250_v46  ;;  %v5290_v11 = vadd.f32 %v5250_v46, %v5200_v3  ;;  %v5339_v16 = vrot.slane %v5307_v30, 2  ;;  %v5397_v22 = vmul.f32 %v7325_v59, %v8594_v54 }
 0x16d   : > { %v5254_v43 = vsel %vm637_vm1, %v5252_v35, %v5253_v33  ;;  %v5289_v2 = vadd.f32 %v5251_v40, %v5199_v6  ;;  %v5292_v50 = vadd.f32 %v5253_v33, %v5202_v37  ;;  %v5340_v44 = vrot.slane %v5308_v39, 2  ;;  %v7329_v40 = vld [vmem:[%s11127_s2 + $0x46] ss:$0 sm:$0xff] }
 0x16e   : > { %v5291_v23 = vadd.f32 %v5254_v43, %v5201_v36  ;;  %v5342_v61 = vrot.slane %v5309_v63, 2  ;;  %v5343_v51 = vrot.slane %v5310_v41, 2  ;;  %v5398_v24 = vmul.f32 %v7325_v59, %v8584_v49 }
 0x16f   : > { %v5341_v38 = vsel %vm728_vm2, %v5339_v16, %v5340_v44  ;;  %v5380_v25 = vadd.f32 %v5340_v44, %v5290_v11  ;;  %v5399_v8 = vmul.f32 %v7325_v59, %v8673_v60  ;;  %v5400_v54 = vmul.f32 %v7325_v59, %v8663_v9 }
 0x170   : > { %v5344_v27 = vsel %vm728_vm2, %v5342_v61, %v5343_v51  ;;  %v5379_v13 = vadd.f32 %v5341_v38, %v5289_v2  ;;  %v5382_v29 = vadd.f32 %v5343_v51, %v5292_v50  ;;  %v5429_v32 = vrot.slane %v5397_v22, 3 }
 0x171   : > { %v5381_v56 = vadd.f32 %v5344_v27, %v5291_v23  ;;  %v5430_v5 = vrot.slane %v5398_v24, 3  ;;  %v5432_v57 = vrot.slane %v5399_v8, 3  ;;  %v5433_v62 = vrot.slane %v5400_v54, 3 }
 0x172   : > { %v5487_v58 = vmul.f32 %v7326_v52, %v8584_v49  ;;  %v5488_v47 = vmul.f32 %v7326_v52, %v8663_v9  ;;  %v5537_v4 = vmul.f32 %v7327_v12, %v8584_v49  ;;  %v5538_v0 = vmul.f32 %v7327_v12, %v8628_v48 }
 0x173   : > { %v5431_v1 = vsel %vm819_vm3, %v5429_v32, %v5430_v5  ;;  %v5470_v20 = vadd.f32 %v5430_v5, %v5380_v25  ;;  %v5539_v21 = vmul.f32 %v7327_v12, %v8663_v9  ;;  %v5434_v6 = vsel %vm819_vm3, %v5432_v57, %v5433_v62 }
 0x174   : > { %v5469_v42 = vadd.f32 %v5431_v1, %v5379_v13  ;;  %v5472_v53 = vadd.f32 %v5433_v62, %v5382_v29  ;;  %v5503_v3 = vrot.slane %v5487_v58, 4  ;;  %v5471_v36 = vadd.f32 %v5434_v6, %v5381_v56  ;;  %v7331_v62 = vld [vmem:[%s11127_s2 + $0x48] ss:$0 sm:$0xff] }
 0x175   : > { %v5504_v19 = vrot.slane %v5488_v47, 4  ;;  %v5540_v45 = vmul.f32 %v7327_v12, %v8707_v34  ;;  %v5569_v37 = vrot.slane %v5537_v4, 5  ;;  %v5570_v30 = vrot.slane %v5538_v0, 5  ;;  %v7330_v12 = vld [vmem:[%s11127_s2 + $0x47] ss:$0 sm:$0xff] }
 0x176   : > { %v5519_v28 = vadd.f32 %v5503_v3, %v5469_v42  ;;  %v5520_v46 = vadd.f32 %v5503_v3, %v5470_v20  ;;  %v5572_v59 = vrot.slane %v5539_v21, 5  ;;  %v5627_v63 = vmul.f32 %v7328_v26, %v8584_v49  ;;  %v8742_v20 = vld [vmem:[#allocation2 + $0xe0] sm:$0xff]  ;;  %v7332_v42 = vld [vmem:[%s11127_s2 + $0x49] ss:$0 sm:$0xff] }
 0x177   : > { %v5521_v35 = vadd.f32 %v5504_v19, %v5471_v36  ;;  %v5522_v33 = vadd.f32 %v5504_v19, %v5472_v53  ;;  %v5573_v39 = vrot.slane %v5540_v45, 5  ;;  %v5571_v11 = vsel %vm960_vm5, %v5569_v37, %v5570_v30 }
 0x178   : > { %v5609_v41 = vadd.f32 %v5569_v37, %v5519_v28  ;;  %v5628_v16 = vmul.f32 %v7328_v26, %v8628_v48  ;;  %v5629_v43 = vmul.f32 %v7328_v26, %v8663_v9  ;;  %v5610_v50 = vadd.f32 %v5571_v11, %v5520_v46 }
 0x179   : > { %v5574_v2 = vsel %vm960_vm5, %v5572_v59, %v5573_v39  ;;  %v5611_v44 = vadd.f32 %v5572_v59, %v5521_v35  ;;  %v5630_v23 = vmul.f32 %v7328_v26, %v8707_v34  ;;  %v5659_v51 = vrot.slane %v5627_v63, 6 }
 0x17a   : > { %v5612_v61 = vadd.f32 %v5574_v2, %v5522_v33  ;;  %v5660_v22 = vrot.slane %v5628_v16, 6  ;;  %v5662_v52 = vrot.slane %v5629_v43, 6  ;;  %v5717_v25 = vmul.f32 %v7329_v40, %v8584_v49 }
 0x17b   : > { %v5663_v38 = vrot.slane %v5630_v23, 6  ;;  %v5718_v24 = vmul.f32 %v7329_v40, %v8628_v48  ;;  %v5719_v8 = vmul.f32 %v7329_v40, %v8663_v9  ;;  %v5699_v13 = vadd.f32 %v5659_v51, %v5609_v41 }
 0x17c   : > { %v5661_v27 = vsel %vm1051_vm6, %v5659_v51, %v5660_v22  ;;  %v5701_v29 = vadd.f32 %v5662_v52, %v5611_v44  ;;  %v5720_v54 = vmul.f32 %v7329_v40, %v8707_v34  ;;  %v5749_v5 = vrot.slane %v5717_v25, 7  ;;  %v7334_v51 = vld [vmem:[%s11127_s2 + $0x4b] ss:$0 sm:$0xff] }
 0x17d   : > { %v5664_v56 = vsel %vm1051_vm6, %v5662_v52, %v5663_v38  ;;  %v5700_v32 = vadd.f32 %v5661_v27, %v5610_v50  ;;  %v5750_v57 = vrot.slane %v5718_v24, 7  ;;  %v5752_v47 = vrot.slane %v5719_v8, 7 }
 0x17e   : > { %v5702_v58 = vadd.f32 %v5664_v56, %v5612_v61  ;;  %v5753_v4 = vrot.slane %v5720_v54, 7  ;;  %v5807_v1 = vmul.f32 %v7330_v12, %v8584_v49  ;;  %v5789_v21 = vadd.f32 %v5749_v5, %v5699_v13  ;;  %v548_v49 = vld [vmem:[#allocation2 + $0xd8] sm:$0xff] }
 0x17f   : > { %v5751_v0 = vsel %vm1142_vm7, %v5749_v5, %v5750_v57  ;;  %v5808_v26 = vmul.f32 %v7330_v12, %v8628_v48  ;;  %v5809_v6 = vmul.f32 %v7330_v12, %v8663_v9  ;;  %v5791_v36 = vadd.f32 %v5752_v47, %v5701_v29  ;;  %v7333_v48 = vld [vmem:[%s11127_s2 + $0x4a] ss:$0 sm:$0xff] }
 0x180   : > { %v5754_v53 = vsel %vm1142_vm7, %v5752_v47, %v5753_v4  ;;  %v5790_v3 = vadd.f32 %v5751_v0, %v5700_v32  ;;  %v5810_v19 = vmul.f32 %v7330_v12, %v8707_v34  ;;  %v5823_v37 = vadd.f32 %v5807_v1, %v5789_v21  ;;  %v7336_v47 = vld [vmem:[%s11127_s2 + $0x4d] ss:$0 sm:$0xff] }
 0x181   : > { %v5792_v45 = vadd.f32 %v5754_v53, %v5702_v58  ;;  %v5841_v28 = vmul.f32 %v7331_v62, %v8673_v60  ;;  %v5842_v46 = vmul.f32 %v7331_v62, %v8663_v9  ;;  %v5825_v59 = vadd.f32 %v5809_v6, %v5791_v36  ;;  %v7335_v58 = vld [vmem:[%s11127_s2 + $0x4c] ss:$0 sm:$0xff] }
 0x182   : > { %v5824_v30 = vadd.f32 %v5808_v26, %v5790_v3  ;;  %v5843_v35 = vmul.f32 %v7331_v62, %v548_v49  ;;  %v5844_v33 = vmul.f32 %v7331_v62, %v8742_v20  ;;  %v5875_v40 = vmul.f32 %v7332_v42, %v8673_v60 }
 0x183   : > { %v5826_v39 = vadd.f32 %v5810_v19, %v5792_v45  ;;  %v5857_v63 = vadd.f32 %v5841_v28, %v5823_v37  ;;  %v5876_v11 = vmul.f32 %v7332_v42, %v8663_v9  ;;  %v5877_v43 = vmul.f32 %v7332_v42, %v548_v49  ;;  %v8780_v45 = vld [vmem:[#allocation2 + $0xe8] sm:$0xf] }
 0x184   : > { %v5858_v41 = vadd.f32 %v5842_v46, %v5824_v30  ;;  %v5859_v16 = vadd.f32 %v5843_v35, %v5825_v59  ;;  %v5878_v2 = vmul.f32 %v7332_v42, %v8742_v20  ;;  %v5907_v44 = vrot.slane %v5875_v40, 1 }
 0x185   : > { %v5860_v50 = vadd.f32 %v5844_v33, %v5826_v39  ;;  %v5908_v23 = vrot.slane %v5876_v11, 1  ;;  %v5965_v61 = vmul.f32 %v7333_v48, %v8673_v60  ;;  %v5910_v22 = vrot.slane %v5877_v43, 1  ;;  %v7337_v33 = vld [vmem:[%s11127_s2 + $0x4e] ss:$0 sm:$0xff] }
 0x186   : > { %v5911_v52 = vrot.slane %v5878_v2, 1  ;;  %v5966_v12 = vmul.f32 %v7333_v48, %v8663_v9  ;;  %v5967_v38 = vmul.f32 %v7333_v48, %v548_v49  ;;  %v5968_v8 = vmul.f32 %v7333_v48, %v8742_v20 }
 0x187   : > { %v5909_v25 = vsel %vm637_vm1, %v5907_v44, %v5908_v23  ;;  %v5948_v24 = vadd.f32 %v5908_v23, %v5858_v41  ;;  %v5997_v27 = vrot.slane %v5965_v61, 2  ;;  %v6055_v62 = vmul.f32 %v7334_v51, %v8673_v60 }
 0x188   : > { %v5912_v13 = vsel %vm637_vm1, %v5910_v22, %v5911_v52  ;;  %v5947_v29 = vadd.f32 %v5909_v25, %v5857_v63  ;;  %v5950_v54 = vadd.f32 %v5911_v52, %v5860_v50  ;;  %v5998_v56 = vrot.slane %v5966_v12, 2 }
 0x189   : > { %v5949_v32 = vadd.f32 %v5912_v13, %v5859_v16  ;;  %v6000_v5 = vrot.slane %v5967_v38, 2  ;;  %v6001_v57 = vrot.slane %v5968_v8, 2  ;;  %v6056_v0 = vmul.f32 %v7334_v51, %v8663_v9  ;;  %v7338_v38 = vld [vmem:[%s11127_s2 + $0x4f] ss:$0 sm:$0xff] }
 0x18a   : > { %v5999_v4 = vsel %vm728_vm2, %v5997_v27, %v5998_v56  ;;  %v6038_v1 = vadd.f32 %v5998_v56, %v5948_v24  ;;  %v6057_v21 = vmul.f32 %v7334_v51, %v548_v49  ;;  %v6058_v60 = vmul.f32 %v7334_v51, %v8742_v20 }
 0x18b   : > { %v6002_v26 = vsel %vm728_vm2, %v6000_v5, %v6001_v57  ;;  %v6037_v6 = vadd.f32 %v5999_v4, %v5947_v29  ;;  %v6040_v42 = vadd.f32 %v6001_v57, %v5950_v54  ;;  %v6087_v3 = vrot.slane %v6055_v62, 3 }
 0x18c   : > { %v6039_v53 = vadd.f32 %v6002_v26, %v5949_v32  ;;  %v6088_v36 = vrot.slane %v6056_v0, 3  ;;  %v6090_v19 = vrot.slane %v6057_v21, 3  ;;  %v6091_v37 = vrot.slane %v6058_v60, 3 }
 0x18d   : > { %v6145_v28 = vmul.f32 %v7335_v58, %v8663_v9  ;;  %v6146_v46 = vmul.f32 %v7335_v58, %v8742_v20  ;;  %v6195_v48 = vmul.f32 %v7336_v47, %v8663_v9  ;;  %v6196_v59 = vmul.f32 %v7336_v47, %v8707_v34  ;;  %v7339_v58 = vld [vmem:[%s11127_s2 + $0x50] ss:$0 sm:$0xff] }
 0x18e   : > { %v6089_v49 = vsel %vm819_vm3, %v6087_v3, %v6088_v36  ;;  %v6128_v30 = vadd.f32 %v6088_v36, %v6038_v1  ;;  %v6197_v35 = vmul.f32 %v7336_v47, %v8742_v20  ;;  %v6092_v39 = vsel %vm819_vm3, %v6090_v19, %v6091_v37 }
 0x18f   : > { %v6127_v63 = vadd.f32 %v6089_v49, %v6037_v6  ;;  %v6130_v40 = vadd.f32 %v6091_v37, %v6040_v42  ;;  %v6161_v11 = vrot.slane %v6145_v28, 4  ;;  %v6129_v41 = vadd.f32 %v6092_v39, %v6039_v53 }
 0x190   : > { %v6162_v16 = vrot.slane %v6146_v46, 4  ;;  %v6198_v43 = vmul.f32 %v7336_v47, %v8780_v45  ;;  %v6227_v2 = vrot.slane %v6195_v48, 5  ;;  %v6228_v23 = vrot.slane %v6196_v59, 5 }
 0x191   : > { %v6177_v50 = vadd.f32 %v6161_v11, %v6127_v63  ;;  %v6178_v44 = vadd.f32 %v6161_v11, %v6128_v30  ;;  %v6230_v61 = vrot.slane %v6197_v35, 5  ;;  %v6285_v12 = vmul.f32 %v7337_v33, %v8663_v9 }
 0x192   : > { %v6179_v51 = vadd.f32 %v6162_v16, %v6129_v41  ;;  %v6180_v22 = vadd.f32 %v6162_v16, %v6130_v40  ;;  %v6231_v52 = vrot.slane %v6198_v43, 5  ;;  %v6229_v25 = vsel %vm960_vm5, %v6227_v2, %v6228_v23  ;;  %v7377_v41 = vld [vmem:[#allocation2 + $0x30] sm:$0xff] }
 0x193   : > { %v6267_v24 = vadd.f32 %v6227_v2, %v6177_v50  ;;  %v6286_v8 = vmul.f32 %v7337_v33, %v8707_v34  ;;  %v6287_v27 = vmul.f32 %v7337_v33, %v8742_v20  ;;  %v6268_v29 = vadd.f32 %v6229_v25, %v6178_v44  ;;  %v8823_v50 = vld [vmem:[#allocation2 + $0x48] sm:$0xff] }
 0x194   : > { %v6232_v13 = vsel %vm960_vm5, %v6230_v61, %v6231_v52  ;;  %v6269_v54 = vadd.f32 %v6230_v61, %v6179_v51  ;;  %v6288_v56 = vmul.f32 %v7337_v33, %v8780_v45  ;;  %v6317_v5 = vrot.slane %v6285_v12, 6  ;;  %v8826_v61 = vld [vmem:[#allocation2 + $0x50] sm:$0xff] }
 0x195   : > { %v6270_v32 = vadd.f32 %v6232_v13, %v6180_v22  ;;  %v6318_v57 = vrot.slane %v6286_v8, 6  ;;  %v6320_v62 = vrot.slane %v6287_v27, 6  ;;  %v6375_v4 = vmul.f32 %v7338_v38, %v8663_v9  ;;  %v7381_v22 = vld [vmem:[%s11127_s2 + $0x1] ss:$0 sm:$0xff] }
 0x196   : > { %v6321_v47 = vrot.slane %v6288_v56, 6  ;;  %v6376_v1 = vmul.f32 %v7338_v38, %v8707_v34  ;;  %v6377_v0 = vmul.f32 %v7338_v38, %v8742_v20  ;;  %v6357_v26 = vadd.f32 %v6317_v5, %v6267_v24 }
 0x197   : > { %v6319_v21 = vsel %vm1051_vm6, %v6317_v5, %v6318_v57  ;;  %v6359_v6 = vadd.f32 %v6320_v62, %v6269_v54  ;;  %v6378_v42 = vmul.f32 %v7338_v38, %v8780_v45  ;;  %v6407_v3 = vrot.slane %v6375_v4, 7 }
 0x198   : > { %v6322_v60 = vsel %vm1051_vm6, %v6320_v62, %v6321_v47  ;;  %v6358_v53 = vadd.f32 %v6319_v21, %v6268_v29  ;;  %v6408_v36 = vrot.slane %v6376_v1, 7  ;;  %v6410_v37 = vrot.slane %v6377_v0, 7  ;;  %v7382_v29 = vld [vmem:[%s11127_s2 + $0x2] ss:$0 sm:$0xff] }
 0x199   : > { %v6360_v19 = vadd.f32 %v6322_v60, %v6270_v32  ;;  %v6411_v28 = vrot.slane %v6378_v42, 7  ;;  %v6465_v46 = vmul.f32 %v7339_v58, %v8663_v9  ;;  %v6447_v49 = vadd.f32 %v6407_v3, %v6357_v26  ;;  %v7376_v9 = vld [vmem:[%s11127_s2] ss:$0 sm:$0xff] }
 0x19a   : > { %v6409_v48 = vsel %vm1142_vm7, %v6407_v3, %v6408_v36  ;;  %v6466_v30 = vmul.f32 %v7339_v58, %v8707_v34  ;;  %v6467_v59 = vmul.f32 %v7339_v58, %v8742_v20  ;;  %v6449_v39 = vadd.f32 %v6410_v37, %v6359_v6  ;;  %v8820_v34 = vld [vmem:[#allocation2 + $0x38] sm:$0xff] }
 0x19b   : > { %v6412_v35 = vsel %vm1142_vm7, %v6410_v37, %v6411_v28  ;;  %v6448_v33 = vadd.f32 %v6409_v48, %v6358_v53  ;;  %v6468_v63 = vmul.f32 %v7339_v58, %v8780_v45  ;;  %v6481_v11 = vadd.f32 %v6465_v46, %v6447_v49  ;;  %v7383_v37 = vld [vmem:[%s11127_s2 + $0x3] ss:$0 sm:$0xff] }
 0x19c   : > { %v6450_v40 = vadd.f32 %v6412_v35, %v6360_v19  ;;  %v575_v16 = vmul.f32 %v7377_v41, %v7376_v9  ;;  %v6483_v2 = vadd.f32 %v6467_v59, %v6449_v39  ;;  %v576_v20 = vmul.f32 %v8820_v34, %v7376_v9 }
 0x19d   : > { %v6482_v43 = vadd.f32 %v6466_v30, %v6448_v33  ;;  %v577_v44 = vmul.f32 %v8823_v50, %v7376_v9  ;;  %v6514_v23 = vrot.slane %v6481_v11, 4  ;;  %v578_v51 = vmul.f32 %v8826_v61, %v7376_v9 }
 0x19e   : > { %v6484_v45 = vadd.f32 %v6468_v63, %v6450_v40  ;;  %v609_v52 = vmul.f32 %v7381_v22, %v7377_v41  ;;  %v6517_v38 = vrot.slane %v6483_v2, 4  ;;  %v610_v25 = vmul.f32 %v7381_v22, %v8820_v34 }
 0x19f   : > { %v6515_v12 = vrot.slane %v6482_v43, 4  ;;  %v611_v24 = vmul.f32 %v7381_v22, %v8823_v50  ;;  %v612_v27 = vmul.f32 %v7381_v22, %v8826_v61  ;;  %v700_v54 = vmul.f32 %v7382_v29, %v7377_v41 }
 0x1a0   : > { %v6518_v8 = vrot.slane %v6484_v45, 4  ;;  %v644_v13 = vrot.slane %v609_v52, 1  ;;  %v645_v32 = vrot.slane %v610_v25, 1  ;;  %v701_v57 = vmul.f32 %v7382_v29, %v8820_v34 }
 0x1a1   : > { %v6516_v56 = vsel %vm6513_vm8, %v6514_v23, %v6515_v12  ;;  %v647_v5 = vrot.slane %v611_v24, 1  ;;  %v648_v58 = vrot.slane %v612_v27, 1  ;;  %v702_v47 = vmul.f32 %v7382_v29, %v8823_v50 }
 0x1a2   : > { %v6519_v62 = vsel %vm6513_vm8, %v6517_v38, %v6518_v8  ;;  %v703_v4 = vmul.f32 %v7382_v29, %v8826_v61  ;;  %v646_v0 = vsel %vm637_vm1, %v644_v13, %v645_v32  ;;  %v683_v21 = vadd.f32 %v645_v32, %v576_v20  ;;  %v7385_v20 = vld [vmem:[%s11127_s2 + $0x5] ss:$0 sm:$0xff]  ;;  %v8866_v13 = vld [vmem:[#allocation2 + $0x58] sm:$0xf] }
 0x1a3   : > { %v6546_v1 = vpack.c.bf16 %v6519_v62, %v6516_v56  ;;  %v735_v26 = vrot.slane %v700_v54, 2  ;;  %v649_v6 = vsel %vm637_vm1, %v647_v5, %v648_v58  ;;  %v682_v42 = vadd.f32 %v646_v0, %v575_v16 }
 0x1a4   : > { %v685_v60 = vadd.f32 %v648_v58, %v578_v51  ;;  %v736_v53 = vrot.slane %v701_v57, 2  ;;  %v684_v3 = vadd.f32 %v649_v6, %v577_v44  ;;  %v738_v36 = vrot.slane %v702_v47, 2  ;;  %v7386_v51 = vld [vmem:[#allocation2 + $0x40] sm:$0xf] }
 0x1a5   : > { %7198 = vmatmul.msk.bf16.vlgmr.msra.gmra.mxu1 %vm389_vm0, %v6546_v1  ;;  %v739_v19 = vrot.slane %v703_v4, 2  ;;  %v791_v28 = vmul.f32 %v7383_v37, %v7377_v41  ;;  %v792_v49 = vmul.f32 %v7383_v37, %v8820_v34  ;;  %v793_v30 = vmul.f32 %v7383_v37, %v8823_v50  ;;  %v7384_v41 = vld [vmem:[%s11127_s2 + $0x4] ss:$0 sm:$0xff]  ;;  %v7388_v4 = vld [vmem:[%s11127_s2 + $0x6] ss:$0 sm:$0xff] }
 0x1a6   : > { %v737_v46 = vsel %vm728_vm2, %v735_v26, %v736_v53  ;;  %v774_v48 = vadd.f32 %v736_v53, %v683_v21  ;;  %v794_v39 = vmul.f32 %v7383_v37, %v8826_v61  ;;  %v880_v43 = vmul.f32 %v7384_v41, %v8820_v34 }
 0x1a7   : > { %v740_v59 = vsel %vm728_vm2, %v738_v36, %v739_v19  ;;  %v773_v35 = vadd.f32 %v737_v46, %v682_v42  ;;  %v776_v33 = vadd.f32 %v739_v19, %v685_v60  ;;  %v826_v40 = vrot.slane %v791_v28, 3 }
 0x1a8   : > { %v775_v63 = vadd.f32 %v740_v59, %v684_v3  ;;  %v827_v11 = vrot.slane %v792_v49, 3  ;;  %v829_v9 = vrot.slane %v793_v30, 3  ;;  %v830_v16 = vrot.slane %v794_v39, 3 }
 0x1a9   : > { %v881_v2 = vmul.f32 %v7384_v41, %v8826_v61  ;;  %v932_v44 = vmul.f32 %v7385_v20, %v8820_v34  ;;  %v933_v22 = vmul.f32 %v7386_v51, %v7385_v20  ;;  %v934_v52 = vmul.f32 %v7385_v20, %v8826_v61 }
 0x1aa   : > { %v828_v45 = vsel %vm819_vm3, %v826_v40, %v827_v11  ;;  %v865_v23 = vadd.f32 %v827_v11, %v774_v48  ;;  %v831_v12 = vsel %vm819_vm3, %v829_v9, %v830_v16  ;;  %v867_v25 = vadd.f32 %v830_v16, %v776_v33  ;;  %v7389_v48 = vld [vmem:[%s11127_s2 + $0x7] ss:$0 sm:$0xff] }
 0x1ab   : > { %v864_v38 = vadd.f32 %v828_v45, %v773_v35  ;;  %v896_v24 = vrot.slane %v880_v43, 4  ;;  %v866_v8 = vadd.f32 %v831_v12, %v775_v63  ;;  %v897_v27 = vrot.slane %v881_v2, 4 }
 0x1ac   : > { %v935_v29 = vmul.f32 %v8866_v13, %v7385_v20  ;;  %v967_v54 = vrot.slane %v932_v44, 5  ;;  %v968_v5 = vrot.slane %v933_v22, 5  ;;  %v970_v57 = vrot.slane %v934_v52, 5  ;;  %v7390_v20 = vld [vmem:[%s11127_s2 + $0x8] ss:$0 sm:$0xff] }
 0x1ad   : > { %v914_v56 = vadd.f32 %v896_v24, %v864_v38  ;;  %v915_v32 = vadd.f32 %v896_v24, %v865_v23  ;;  %v916_v62 = vadd.f32 %v897_v27, %v866_v8  ;;  %v917_v58 = vadd.f32 %v897_v27, %v867_v25 }
 0x1ae   : > { %v971_v47 = vrot.slane %v935_v29, 5  ;;  %v1023_v1 = vmul.f32 %v7388_v4, %v8820_v34  ;;  %v969_v0 = vsel %vm960_vm5, %v967_v54, %v968_v5  ;;  %v1024_v26 = vmul.f32 %v7388_v4, %v7386_v51  ;;  %v7391_v29 = vld [vmem:[%s11127_s2 + $0x9] ss:$0 sm:$0xff] }
 0x1af   : > { %v1005_v21 = vadd.f32 %v967_v54, %v914_v56  ;;  %v1025_v6 = vmul.f32 %v7388_v4, %v8826_v61  ;;  %v1006_v60 = vadd.f32 %v969_v0, %v915_v32  ;;  %v1007_v53 = vadd.f32 %v970_v57, %v916_v62  ;;  %v8898_v32 = vld [vmem:[#allocation2 + $0x60] sm:$0xff] }
 0x1b0   : > { %v972_v42 = vsel %vm960_vm5, %v970_v57, %v971_v47  ;;  %v1026_v3 = vmul.f32 %v7388_v4, %v8866_v13  ;;  %v1058_v19 = vrot.slane %v1023_v1, 6  ;;  %v1059_v37 = vrot.slane %v1024_v26, 6  ;;  %v8901_v57 = vld [vmem:[#allocation2 + $0x68] sm:$0xff] }
 0x1b1   : > { %v1008_v36 = vadd.f32 %v972_v42, %v917_v58  ;;  %v1061_v28 = vrot.slane %v1025_v6, 6  ;;  %v1114_v49 = vmul.f32 %v7389_v48, %v8820_v34  ;;  %v1115_v30 = vmul.f32 %v7389_v48, %v7386_v51  ;;  %v7394_v4 = vld [vmem:[%s11127_s2 + $0xa] ss:$0 sm:$0xff] }
 0x1b2   : > { %v1062_v46 = vrot.slane %v1026_v3, 6  ;;  %v1116_v59 = vmul.f32 %v7389_v48, %v8826_v61  ;;  %v1060_v35 = vsel %vm1051_vm6, %v1058_v19, %v1059_v37  ;;  %v1096_v33 = vadd.f32 %v1058_v19, %v1005_v21 }
 0x1b3   : > { %v1098_v39 = vadd.f32 %v1061_v28, %v1007_v53  ;;  %v1117_v63 = vmul.f32 %v7389_v48, %v8866_v13  ;;  %v1097_v11 = vadd.f32 %v1060_v35, %v1006_v60  ;;  %v1149_v9 = vrot.slane %v1114_v49, 7 }
 0x1b4   : > { %v1063_v40 = vsel %vm1051_vm6, %v1061_v28, %v1062_v46  ;;  %v1150_v16 = vrot.slane %v1115_v30, 7  ;;  %v1152_v43 = vrot.slane %v1116_v59, 7  ;;  %v1205_v44 = vmul.f32 %v7390_v20, %v8820_v34 }
 0x1b5   : > { %v1099_v41 = vadd.f32 %v1063_v40, %v1008_v36  ;;  %v1153_v2 = vrot.slane %v1117_v63, 7  ;;  %v1187_v23 = vadd.f32 %v1149_v9, %v1096_v33  ;;  %v1206_v22 = vmul.f32 %v7390_v20, %v7386_v51  ;;  %v7395_v36 = vld [vmem:[%s11127_s2 + $0xb] ss:$0 sm:$0xff] }
 0x1b6   : > { %v1151_v45 = vsel %vm1142_vm7, %v1149_v9, %v1150_v16  ;;  %v1207_v52 = vmul.f32 %v7390_v20, %v8826_v61  ;;  %v1189_v25 = vadd.f32 %v1152_v43, %v1098_v39  ;;  %v1208_v24 = vmul.f32 %v7390_v20, %v8866_v13 }
 0x1b7   : > { %v1154_v12 = vsel %vm1142_vm7, %v1152_v43, %v1153_v2  ;;  %v1188_v38 = vadd.f32 %v1151_v45, %v1097_v11  ;;  %v1221_v27 = vadd.f32 %v1205_v44, %v1187_v23  ;;  %v1239_v34 = vmul.f32 %v7391_v29, %v8823_v50 }
 0x1b8   : > { %v1190_v8 = vadd.f32 %v1154_v12, %v1099_v41  ;;  %v1240_v54 = vmul.f32 %v7391_v29, %v8826_v61  ;;  %v1223_v51 = vadd.f32 %v1207_v52, %v1189_v25  ;;  %v1241_v5 = vmul.f32 %v8898_v32, %v7391_v29  ;;  %v7396_v41 = vld [vmem:[%s11127_s2 + $0xc] ss:$0 sm:$0xff] }
 0x1b9   : > { %v1222_v56 = vadd.f32 %v1206_v22, %v1188_v38  ;;  %v1242_v62 = vmul.f32 %v8901_v57, %v7391_v29  ;;  %v1255_v47 = vadd.f32 %v1239_v34, %v1221_v27  ;;  %v1273_v1 = vmul.f32 %v7394_v4, %v8823_v50 }
 0x1ba   : > { %v1224_v58 = vadd.f32 %v1208_v24, %v1190_v8  ;;  %v1274_v0 = vmul.f32 %v7394_v4, %v8826_v61  ;;  %v1257_v26 = vadd.f32 %v1241_v5, %v1223_v51  ;;  %v1275_v6 = vmul.f32 %v7394_v4, %v8898_v32 }
 0x1bb   : > { %v1256_v21 = vadd.f32 %v1240_v54, %v1222_v56  ;;  %v1276_v42 = vmul.f32 %v7394_v4, %v8901_v57  ;;  %v1307_v53 = vrot.slane %v1273_v1, 1  ;;  %v1363_v19 = vmul.f32 %v7395_v36, %v8823_v50  ;;  %v7398_v54 = vld [vmem:[%s11127_s2 + $0xe] ss:$0 sm:$0xff] }
 0x1bc   : > { %v1258_v60 = vadd.f32 %v1242_v62, %v1224_v58  ;;  %v1308_v3 = vrot.slane %v1274_v0, 1  ;;  %v1310_v37 = vrot.slane %v1275_v6, 1  ;;  %v1364_v46 = vmul.f32 %v7395_v36, %v8826_v61  ;;  %v8942_v6 = vld [vmem:[#allocation2 + $0x70] sm:$0xf] }
 0x1bd   : > { %v1311_v28 = vrot.slane %v1276_v42, 1  ;;  %v1365_v48 = vmul.f32 %v7395_v36, %v8898_v32  ;;  %v1366_v59 = vmul.f32 %v7395_v36, %v8901_v57  ;;  %v1397_v35 = vrot.slane %v1363_v19, 2 }
 0x1be   : > { %v1309_v49 = vsel %vm637_vm1, %v1307_v53, %v1308_v3  ;;  %v1346_v30 = vadd.f32 %v1308_v3, %v1256_v21  ;;  %v1398_v40 = vrot.slane %v1364_v46, 2  ;;  %v1453_v43 = vmul.f32 %v7396_v41, %v8823_v50  ;;  %v7397_v50 = vld [vmem:[%s11127_s2 + $0xd] ss:$0 sm:$0xff] }
 0x1bf   : > { %v1312_v33 = vsel %vm637_vm1, %v1310_v37, %v1311_v28  ;;  %v1345_v39 = vadd.f32 %v1309_v49, %v1255_v47  ;;  %v1348_v63 = vadd.f32 %v1311_v28, %v1258_v60  ;;  %v1400_v9 = vrot.slane %v1365_v48, 2  ;;  %v7400_v48 = vld [vmem:[%s11127_s2 + $0xf] ss:$0 sm:$0xff] }
 0x1c0   : > { %v1347_v11 = vadd.f32 %v1312_v33, %v1257_v26  ;;  %v1401_v16 = vrot.slane %v1366_v59, 2  ;;  %v1399_v2 = vsel %vm728_vm2, %v1397_v35, %v1398_v40  ;;  %v1436_v20 = vadd.f32 %v1398_v40, %v1346_v30 }
 0x1c1   : > { %v1454_v44 = vmul.f32 %v7396_v41, %v8826_v61  ;;  %v1455_v45 = vmul.f32 %v7396_v41, %v8898_v32  ;;  %v1435_v22 = vadd.f32 %v1399_v2, %v1345_v39  ;;  %v1456_v12 = vmul.f32 %v7396_v41, %v8901_v57 }
 0x1c2   : > { %v1402_v23 = vsel %vm728_vm2, %v1400_v9, %v1401_v16  ;;  %v1438_v52 = vadd.f32 %v1401_v16, %v1348_v63  ;;  %v1487_v25 = vrot.slane %v1453_v43, 3  ;;  %v1541_v29 = vmul.f32 %v7397_v50, %v8826_v61 }
 0x1c3   : > { %v1437_v38 = vadd.f32 %v1402_v23, %v1347_v11  ;;  %v1488_v24 = vrot.slane %v1454_v44, 3  ;;  %v1490_v8 = vrot.slane %v1455_v45, 3  ;;  %v1491_v27 = vrot.slane %v1456_v12, 3 }
 0x1c4   : > { %v1542_v34 = vmul.f32 %v7397_v50, %v8901_v57  ;;  %v1593_v56 = vmul.f32 %v7398_v54, %v8826_v61  ;;  %v1594_v62 = vmul.f32 %v7398_v54, %v8866_v13  ;;  %v1595_v58 = vmul.f32 %v7398_v54, %v8901_v57 }
 0x1c5   : > { %v1489_v51 = vsel %vm819_vm3, %v1487_v25, %v1488_v24  ;;  %v1526_v5 = vadd.f32 %v1488_v24, %v1436_v20  ;;  %v1492_v47 = vsel %vm819_vm3, %v1490_v8, %v1491_v27  ;;  %v1528_v1 = vadd.f32 %v1491_v27, %v1438_v52  ;;  %v7401_v20 = vld [vmem:[%s11127_s2 + $0x10] ss:$0 sm:$0xff] }
 0x1c6   : > { %v1525_v4 = vadd.f32 %v1489_v51, %v1435_v22  ;;  %v1557_v0 = vrot.slane %v1541_v29, 4  ;;  %v1527_v21 = vadd.f32 %v1492_v47, %v1437_v38  ;;  %v1558_v26 = vrot.slane %v1542_v34, 4 }
 0x1c7   : > { %v1596_v42 = vmul.f32 %v8942_v6, %v7398_v54  ;;  %v1627_v60 = vrot.slane %v1593_v56, 5  ;;  %v1628_v36 = vrot.slane %v1594_v62, 5  ;;  %v1630_v19 = vrot.slane %v1595_v58, 5  ;;  %v7402_v54 = vld [vmem:[%s11127_s2 + $0x11] ss:$0 sm:$0xff] }
 0x1c8   : > { %v1575_v53 = vadd.f32 %v1557_v0, %v1525_v4  ;;  %v1576_v3 = vadd.f32 %v1557_v0, %v1526_v5  ;;  %v1577_v37 = vadd.f32 %v1558_v26, %v1527_v21  ;;  %v1578_v28 = vadd.f32 %v1558_v26, %v1528_v1 }
 0x1c9   : > { %v1631_v46 = vrot.slane %v1596_v42, 5  ;;  %v1683_v49 = vmul.f32 %v7400_v48, %v8826_v61  ;;  %v1629_v30 = vsel %vm960_vm5, %v1627_v60, %v1628_v36  ;;  %v1684_v35 = vmul.f32 %v7400_v48, %v8866_v13  ;;  %v7403_v42 = vld [vmem:[%s11127_s2 + $0x12] ss:$0 sm:$0xff] }
 0x1ca   : > { %v1665_v59 = vadd.f32 %v1627_v60, %v1575_v53  ;;  %v1685_v33 = vmul.f32 %v7400_v48, %v8901_v57  ;;  %v1666_v63 = vadd.f32 %v1629_v30, %v1576_v3  ;;  %v1667_v40 = vadd.f32 %v1630_v19, %v1577_v37  ;;  %v8977_v3 = vld [vmem:[#allocation2 + $0x78] sm:$0xff] }
 0x1cb   : > { %v1632_v39 = vsel %vm960_vm5, %v1630_v19, %v1631_v46  ;;  %v1686_v11 = vmul.f32 %v7400_v48, %v8942_v6  ;;  %v1717_v16 = vrot.slane %v1683_v49, 6  ;;  %v1718_v41 = vrot.slane %v1684_v35, 6  ;;  %v8980_v19 = vld [vmem:[#allocation2 + $0x80] sm:$0xff]  ;;  %v7406_v48 = vld [vmem:[%s11127_s2 + $0x13] ss:$0 sm:$0xff] }
 0x1cc   : > { %v1668_v9 = vadd.f32 %v1632_v39, %v1578_v28  ;;  %v1720_v43 = vrot.slane %v1685_v33, 6  ;;  %v1773_v44 = vmul.f32 %v7401_v20, %v8826_v61  ;;  %v1774_v45 = vmul.f32 %v7401_v20, %v8866_v13 }
 0x1cd   : > { %v1721_v2 = vrot.slane %v1686_v11, 6  ;;  %v1775_v23 = vmul.f32 %v7401_v20, %v8901_v57  ;;  %v1719_v22 = vsel %vm1051_vm6, %v1717_v16, %v1718_v41  ;;  %v1755_v52 = vadd.f32 %v1717_v16, %v1665_v59 }
 0x1ce   : > { %v1757_v12 = vadd.f32 %v1720_v43, %v1667_v40  ;;  %v1776_v38 = vmul.f32 %v7401_v20, %v8942_v6  ;;  %v1756_v24 = vadd.f32 %v1719_v22, %v1666_v63  ;;  %v1807_v8 = vrot.slane %v1773_v44, 7 }
 0x1cf   : > { %v1722_v25 = vsel %vm1051_vm6, %v1720_v43, %v1721_v2  ;;  %v1808_v27 = vrot.slane %v1774_v45, 7  ;;  %v1810_v29 = vrot.slane %v1775_v23, 7  ;;  %v1863_v56 = vmul.f32 %v7402_v54, %v8826_v61 }
 0x1d0   : > { %v1758_v50 = vadd.f32 %v1722_v25, %v1668_v9  ;;  %v1811_v34 = vrot.slane %v1776_v38, 7  ;;  %v1845_v5 = vadd.f32 %v1807_v8, %v1755_v52  ;;  %v1864_v62 = vmul.f32 %v7402_v54, %v8866_v13  ;;  %v7407_v9 = vld [vmem:[%s11127_s2 + $0x14] ss:$0 sm:$0xff] }
 0x1d1   : > { %v1809_v51 = vsel %vm1142_vm7, %v1807_v8, %v1808_v27  ;;  %v1865_v58 = vmul.f32 %v7402_v54, %v8901_v57  ;;  %v1847_v1 = vadd.f32 %v1810_v29, %v1757_v12  ;;  %v1866_v0 = vmul.f32 %v7402_v54, %v8942_v6 }
 0x1d2   : > { %v1812_v47 = vsel %vm1142_vm7, %v1810_v29, %v1811_v34  ;;  %v1846_v4 = vadd.f32 %v1809_v51, %v1756_v24  ;;  %v1879_v26 = vadd.f32 %v1863_v56, %v1845_v5  ;;  %v1897_v61 = vmul.f32 %v7403_v42, %v8898_v32 }
 0x1d3   : > { %v1848_v21 = vadd.f32 %v1812_v47, %v1758_v50  ;;  %v1898_v60 = vmul.f32 %v7403_v42, %v8901_v57  ;;  %v1881_v13 = vadd.f32 %v1865_v58, %v1847_v1  ;;  %v1899_v36 = vmul.f32 %v8977_v3, %v7403_v42  ;;  %v7408_v50 = vld [vmem:[%s11127_s2 + $0x15] ss:$0 sm:$0xff] }
 0x1d4   : > { %v1880_v53 = vadd.f32 %v1864_v62, %v1846_v4  ;;  %v1900_v37 = vmul.f32 %v8980_v19, %v7403_v42  ;;  %v1913_v46 = vadd.f32 %v1897_v61, %v1879_v26  ;;  %v1931_v49 = vmul.f32 %v7406_v48, %v8898_v32 }
 0x1d5   : > { %v1882_v28 = vadd.f32 %v1866_v0, %v1848_v21  ;;  %v1932_v30 = vmul.f32 %v7406_v48, %v8901_v57  ;;  %v1915_v35 = vadd.f32 %v1899_v36, %v1881_v13  ;;  %v1933_v33 = vmul.f32 %v7406_v48, %v8977_v3 }
 0x1d6   : > { %v1914_v59 = vadd.f32 %v1898_v60, %v1880_v53  ;;  %v1934_v39 = vmul.f32 %v7406_v48, %v8980_v19  ;;  %v1965_v40 = vrot.slane %v1931_v49, 1  ;;  %v2021_v16 = vmul.f32 %v7407_v9, %v8898_v32  ;;  %v7410_v60 = vld [vmem:[%s11127_s2 + $0x17] ss:$0 sm:$0xff] }
 0x1d7   : > { %v1916_v63 = vadd.f32 %v1900_v37, %v1882_v28  ;;  %v1966_v11 = vrot.slane %v1932_v30, 1  ;;  %v1968_v41 = vrot.slane %v1933_v33, 1  ;;  %v2022_v2 = vmul.f32 %v7407_v9, %v8901_v57  ;;  %v9021_v33 = vld [vmem:[#allocation2 + $0x88] sm:$0xf] }
 0x1d8   : > { %v1969_v43 = vrot.slane %v1934_v39, 1  ;;  %v2023_v20 = vmul.f32 %v7407_v9, %v8977_v3  ;;  %v2024_v23 = vmul.f32 %v7407_v9, %v8980_v19  ;;  %v2055_v22 = vrot.slane %v2021_v16, 2 }
 0x1d9   : > { %v1967_v44 = vsel %vm637_vm1, %v1965_v40, %v1966_v11  ;;  %v2004_v45 = vadd.f32 %v1966_v11, %v1914_v59  ;;  %v2056_v25 = vrot.slane %v2022_v2, 2  ;;  %v2111_v29 = vmul.f32 %v7408_v50, %v8898_v32  ;;  %v7409_v32 = vld [vmem:[%s11127_s2 + $0x16] ss:$0 sm:$0xff] }
 0x1da   : > { %v1970_v52 = vsel %vm637_vm1, %v1968_v41, %v1969_v43  ;;  %v2003_v12 = vadd.f32 %v1967_v44, %v1913_v46  ;;  %v2006_v38 = vadd.f32 %v1969_v43, %v1916_v63  ;;  %v2058_v8 = vrot.slane %v2023_v20, 2  ;;  %v7412_v20 = vld [vmem:[%s11127_s2 + $0x18] ss:$0 sm:$0xff] }
 0x1db   : > { %v2005_v24 = vadd.f32 %v1970_v52, %v1915_v35  ;;  %v2059_v27 = vrot.slane %v2024_v23, 2  ;;  %v2057_v34 = vsel %vm728_vm2, %v2055_v22, %v2056_v25  ;;  %v2094_v54 = vadd.f32 %v2056_v25, %v2004_v45 }
 0x1dc   : > { %v2112_v56 = vmul.f32 %v7408_v50, %v8901_v57  ;;  %v2113_v51 = vmul.f32 %v7408_v50, %v8977_v3  ;;  %v2093_v62 = vadd.f32 %v2057_v34, %v2003_v12  ;;  %v2114_v47 = vmul.f32 %v7408_v50, %v8980_v19 }
 0x1dd   : > { %v2060_v5 = vsel %vm728_vm2, %v2058_v8, %v2059_v27  ;;  %v2096_v58 = vadd.f32 %v2059_v27, %v2006_v38  ;;  %v2145_v1 = vrot.slane %v2111_v29, 3  ;;  %v2199_v42 = vmul.f32 %v7409_v32, %v8901_v57 }
 0x1de   : > { %v2095_v4 = vadd.f32 %v2060_v5, %v2005_v24  ;;  %v2146_v0 = vrot.slane %v2112_v56, 3  ;;  %v2148_v21 = vrot.slane %v2113_v51, 3  ;;  %v2149_v26 = vrot.slane %v2114_v47, 3 }
 0x1df   : > { %v2200_v61 = vmul.f32 %v7409_v32, %v8980_v19  ;;  %v2251_v53 = vmul.f32 %v7410_v60, %v8901_v57  ;;  %v2252_v37 = vmul.f32 %v7410_v60, %v8942_v6  ;;  %v2253_v28 = vmul.f32 %v7410_v60, %v8980_v19 }
 0x1e0   : > { %v2147_v13 = vsel %vm819_vm3, %v2145_v1, %v2146_v0  ;;  %v2184_v36 = vadd.f32 %v2146_v0, %v2094_v54  ;;  %v2150_v46 = vsel %vm819_vm3, %v2148_v21, %v2149_v26  ;;  %v2186_v49 = vadd.f32 %v2149_v26, %v2096_v58  ;;  %v7413_v54 = vld [vmem:[%s11127_s2 + $0x19] ss:$0 sm:$0xff] }
 0x1e1   : > { %v2183_v48 = vadd.f32 %v2147_v13, %v2093_v62  ;;  %v2215_v30 = vrot.slane %v2199_v42, 4  ;;  %v2185_v59 = vadd.f32 %v2150_v46, %v2095_v4  ;;  %v2216_v35 = vrot.slane %v2200_v61, 4 }
 0x1e2   : > { %v2254_v39 = vmul.f32 %v9021_v33, %v7410_v60  ;;  %v2285_v63 = vrot.slane %v2251_v53, 5  ;;  %v2286_v9 = vrot.slane %v2252_v37, 5  ;;  %v2288_v16 = vrot.slane %v2253_v28, 5  ;;  %v7414_v60 = vld [vmem:[%s11127_s2 + $0x1a] ss:$0 sm:$0xff] }
 0x1e3   : > { %v2233_v40 = vadd.f32 %v2215_v30, %v2183_v48  ;;  %v2234_v11 = vadd.f32 %v2215_v30, %v2184_v36  ;;  %v2235_v41 = vadd.f32 %v2216_v35, %v2185_v59  ;;  %v2236_v43 = vadd.f32 %v2216_v35, %v2186_v49 }
 0x1e4   : > { %v2289_v2 = vrot.slane %v2254_v39, 5  ;;  %v2341_v44 = vmul.f32 %v7412_v20, %v8901_v57  ;;  %v2287_v45 = vsel %vm960_vm5, %v2285_v63, %v2286_v9  ;;  %v2342_v22 = vmul.f32 %v7412_v20, %v8942_v6  ;;  %v7415_v39 = vld [vmem:[%s11127_s2 + $0x1b] ss:$0 sm:$0xff] }
 0x1e5   : > { %v2323_v23 = vadd.f32 %v2285_v63, %v2233_v40  ;;  %v2343_v52 = vmul.f32 %v7412_v20, %v8980_v19  ;;  %v2324_v38 = vadd.f32 %v2287_v45, %v2234_v11  ;;  %v2325_v25 = vadd.f32 %v2288_v16, %v2235_v41  ;;  %v9056_v11 = vld [vmem:[#allocation2 + $0x90] sm:$0xff] }
 0x1e6   : > { %v2290_v12 = vsel %vm960_vm5, %v2288_v16, %v2289_v2  ;;  %v2344_v24 = vmul.f32 %v7412_v20, %v9021_v33  ;;  %v2375_v27 = vrot.slane %v2341_v44, 6  ;;  %v2376_v50 = vrot.slane %v2342_v22, 6  ;;  %v9059_v16 = vld [vmem:[#allocation2 + $0x98] sm:$0xff] }
 0x1e7   : > { %v2326_v8 = vadd.f32 %v2290_v12, %v2236_v43  ;;  %v2378_v29 = vrot.slane %v2343_v52, 6  ;;  %v2431_v56 = vmul.f32 %v7413_v54, %v8901_v57  ;;  %v2432_v51 = vmul.f32 %v7413_v54, %v8942_v6  ;;  %v7418_v20 = vld [vmem:[%s11127_s2 + $0x1c] ss:$0 sm:$0xff] }
 0x1e8   : > { %v2379_v34 = vrot.slane %v2344_v24, 6  ;;  %v2433_v5 = vmul.f32 %v7413_v54, %v8980_v19  ;;  %v2377_v62 = vsel %vm1051_vm6, %v2375_v27, %v2376_v50  ;;  %v2413_v58 = vadd.f32 %v2375_v27, %v2323_v23 }
 0x1e9   : > { %v2415_v47 = vadd.f32 %v2378_v29, %v2325_v25  ;;  %v2434_v4 = vmul.f32 %v7413_v54, %v9021_v33  ;;  %v2414_v0 = vadd.f32 %v2377_v62, %v2324_v38  ;;  %v2465_v21 = vrot.slane %v2431_v56, 7 }
 0x1ea   : > { %v2380_v1 = vsel %vm1051_vm6, %v2378_v29, %v2379_v34  ;;  %v2466_v26 = vrot.slane %v2432_v51, 7  ;;  %v2468_v42 = vrot.slane %v2433_v5, 7  ;;  %v2521_v53 = vmul.f32 %v7414_v60, %v8901_v57 }
 0x1eb   : > { %v2416_v32 = vadd.f32 %v2380_v1, %v2326_v8  ;;  %v2469_v61 = vrot.slane %v2434_v4, 7  ;;  %v2503_v36 = vadd.f32 %v2465_v21, %v2413_v58  ;;  %v2522_v37 = vmul.f32 %v7414_v60, %v8942_v6  ;;  %v7419_v8 = vld [vmem:[%s11127_s2 + $0x1d] ss:$0 sm:$0xff] }
 0x1ec   : > { %v2467_v13 = vsel %vm1142_vm7, %v2465_v21, %v2466_v26  ;;  %v2523_v28 = vmul.f32 %v7414_v60, %v8980_v19  ;;  %v2505_v49 = vadd.f32 %v2468_v42, %v2415_v47  ;;  %v2524_v30 = vmul.f32 %v7414_v60, %v9021_v33 }
 0x1ed   : > { %v2470_v46 = vsel %vm1142_vm7, %v2468_v42, %v2469_v61  ;;  %v2504_v48 = vadd.f32 %v2467_v13, %v2414_v0  ;;  %v2537_v35 = vadd.f32 %v2521_v53, %v2503_v36  ;;  %v2555_v57 = vmul.f32 %v7415_v39, %v8977_v3 }
 0x1ee   : > { %v2506_v59 = vadd.f32 %v2470_v46, %v2416_v32  ;;  %v2556_v63 = vmul.f32 %v7415_v39, %v8980_v19  ;;  %v2539_v6 = vadd.f32 %v2523_v28, %v2505_v49  ;;  %v2557_v9 = vmul.f32 %v9056_v11, %v7415_v39  ;;  %v7420_v32 = vld [vmem:[%s11127_s2 + $0x1e] ss:$0 sm:$0xff] }
 0x1ef   : > { %v2538_v40 = vadd.f32 %v2522_v37, %v2504_v48  ;;  %v2558_v41 = vmul.f32 %v9059_v16, %v7415_v39  ;;  %v2571_v2 = vadd.f32 %v2555_v57, %v2537_v35  ;;  %v2589_v44 = vmul.f32 %v7418_v20, %v8977_v3 }
 0x1f0   : > { %v2540_v43 = vadd.f32 %v2524_v30, %v2506_v59  ;;  %v2590_v45 = vmul.f32 %v7418_v20, %v8980_v19  ;;  %v2573_v22 = vadd.f32 %v2557_v9, %v2539_v6  ;;  %v2591_v52 = vmul.f32 %v7418_v20, %v9056_v11 }
 0x1f1   : > { %v2572_v23 = vadd.f32 %v2556_v63, %v2538_v40  ;;  %v2592_v12 = vmul.f32 %v7418_v20, %v9059_v16  ;;  %v2623_v25 = vrot.slane %v2589_v44, 1  ;;  %v2679_v27 = vmul.f32 %v7419_v8, %v8977_v3  ;;  %v7422_v63 = vld [vmem:[%s11127_s2 + $0x20] ss:$0 sm:$0xff] }
 0x1f2   : > { %v2574_v38 = vadd.f32 %v2558_v41, %v2540_v43  ;;  %v2624_v24 = vrot.slane %v2590_v45, 1  ;;  %v2626_v50 = vrot.slane %v2591_v52, 1  ;;  %v2680_v34 = vmul.f32 %v7419_v8, %v8980_v19  ;;  %v9100_v52 = vld [vmem:[#allocation2 + $0xa0] sm:$0xf] }
 0x1f3   : > { %v2627_v29 = vrot.slane %v2592_v12, 1  ;;  %v2681_v54 = vmul.f32 %v7419_v8, %v9056_v11  ;;  %v2682_v5 = vmul.f32 %v7419_v8, %v9059_v16  ;;  %v2713_v62 = vrot.slane %v2679_v27, 2 }
 0x1f4   : > { %v2625_v56 = vsel %vm637_vm1, %v2623_v25, %v2624_v24  ;;  %v2662_v51 = vadd.f32 %v2624_v24, %v2572_v23  ;;  %v2714_v1 = vrot.slane %v2680_v34, 2  ;;  %v2769_v42 = vmul.f32 %v7420_v32, %v8977_v3  ;;  %v7421_v3 = vld [vmem:[%s11127_s2 + $0x1f] ss:$0 sm:$0xff] }
 0x1f5   : > { %v2628_v58 = vsel %vm637_vm1, %v2626_v50, %v2627_v29  ;;  %v2661_v47 = vadd.f32 %v2625_v56, %v2571_v2  ;;  %v2664_v4 = vadd.f32 %v2627_v29, %v2574_v38  ;;  %v2716_v21 = vrot.slane %v2681_v54, 2  ;;  %v7424_v54 = vld [vmem:[%s11127_s2 + $0x21] ss:$0 sm:$0xff] }
 0x1f6   : > { %v2663_v0 = vadd.f32 %v2628_v58, %v2573_v22  ;;  %v2717_v26 = vrot.slane %v2682_v5, 2  ;;  %v2715_v61 = vsel %vm728_vm2, %v2713_v62, %v2714_v1  ;;  %v2752_v60 = vadd.f32 %v2714_v1, %v2662_v51 }
 0x1f7   : > { %v2770_v53 = vmul.f32 %v7420_v32, %v8980_v19  ;;  %v2771_v13 = vmul.f32 %v7420_v32, %v9056_v11  ;;  %v2751_v37 = vadd.f32 %v2715_v61, %v2661_v47  ;;  %v2772_v46 = vmul.f32 %v7420_v32, %v9059_v16 }
 0x1f8   : > { %v2718_v36 = vsel %vm728_vm2, %v2716_v21, %v2717_v26  ;;  %v2754_v28 = vadd.f32 %v2717_v26, %v2664_v4  ;;  %v2803_v49 = vrot.slane %v2769_v42, 3  ;;  %v2857_v39 = vmul.f32 %v7421_v3, %v8980_v19 }
 0x1f9   : > { %v2753_v48 = vadd.f32 %v2718_v36, %v2663_v0  ;;  %v2804_v30 = vrot.slane %v2770_v53, 3  ;;  %v2806_v59 = vrot.slane %v2771_v13, 3  ;;  %v2807_v35 = vrot.slane %v2772_v46, 3 }
 0x1fa   : > { %v2858_v57 = vmul.f32 %v7421_v3, %v9059_v16  ;;  %v2909_v40 = vmul.f32 %v7422_v63, %v8980_v19  ;;  %v2910_v41 = vmul.f32 %v7422_v63, %v9021_v33  ;;  %v2911_v43 = vmul.f32 %v7422_v63, %v9059_v16 }
 0x1fb   : > { %v2805_v6 = vsel %vm819_vm3, %v2803_v49, %v2804_v30  ;;  %v2842_v9 = vadd.f32 %v2804_v30, %v2752_v60  ;;  %v2808_v2 = vsel %vm819_vm3, %v2806_v59, %v2807_v35  ;;  %v2844_v44 = vadd.f32 %v2807_v35, %v2754_v28  ;;  %v7425_v60 = vld [vmem:[%s11127_s2 + $0x22] ss:$0 sm:$0xff] }
 0x1fc   : > { %v2841_v20 = vadd.f32 %v2805_v6, %v2751_v37  ;;  %v2873_v45 = vrot.slane %v2857_v39, 4  ;;  %v2843_v23 = vadd.f32 %v2808_v2, %v2753_v48  ;;  %v2874_v22 = vrot.slane %v2858_v57, 4 }
 0x1fd   : > { %v2912_v12 = vmul.f32 %v9100_v52, %v7422_v63  ;;  %v2943_v38 = vrot.slane %v2909_v40, 5  ;;  %v2944_v8 = vrot.slane %v2910_v41, 5  ;;  %v2946_v27 = vrot.slane %v2911_v43, 5  ;;  %v7426_v63 = vld [vmem:[%s11127_s2 + $0x23] ss:$0 sm:$0xff] }
 0x1fe   : > { %v2891_v25 = vadd.f32 %v2873_v45, %v2841_v20  ;;  %v2892_v24 = vadd.f32 %v2873_v45, %v2842_v9  ;;  %v2893_v50 = vadd.f32 %v2874_v22, %v2843_v23  ;;  %v2894_v29 = vadd.f32 %v2874_v22, %v2844_v44 }
 0x1ff   : > { %v2947_v34 = vrot.slane %v2912_v12, 5  ;;  %v2999_v56 = vmul.f32 %v7424_v54, %v8980_v19  ;;  %v2945_v51 = vsel %vm960_vm5, %v2943_v38, %v2944_v8  ;;  %v3000_v62 = vmul.f32 %v7424_v54, %v9021_v33  ;;  %v7427_v12 = vld [vmem:[%s11127_s2 + $0x24] ss:$0 sm:$0xff] }
 0x200   : > { %v2981_v5 = vadd.f32 %v2943_v38, %v2891_v25  ;;  %v3001_v58 = vmul.f32 %v7424_v54, %v9059_v16  ;;  %v2982_v4 = vadd.f32 %v2945_v51, %v2892_v24  ;;  %v2983_v1 = vadd.f32 %v2946_v27, %v2893_v50  ;;  %v9135_v24 = vld [vmem:[#allocation2 + $0xa8] sm:$0xff] }
 0x201   : > { %v2948_v47 = vsel %vm960_vm5, %v2946_v27, %v2947_v34  ;;  %v3002_v0 = vmul.f32 %v7424_v54, %v9100_v52  ;;  %v3033_v26 = vrot.slane %v2999_v56, 6  ;;  %v3034_v32 = vrot.slane %v3000_v62, 6  ;;  %v9138_v27 = vld [vmem:[#allocation2 + $0xb0] sm:$0xff]  ;;  %v7430_v54 = vld [vmem:[%s11127_s2 + $0x25] ss:$0 sm:$0xff] }
 0x202   : > { %v2984_v21 = vadd.f32 %v2948_v47, %v2894_v29  ;;  %v3036_v42 = vrot.slane %v3001_v58, 6  ;;  %v3089_v53 = vmul.f32 %v7425_v60, %v8980_v19  ;;  %v3090_v13 = vmul.f32 %v7425_v60, %v9021_v33 }
 0x203   : > { %v3037_v61 = vrot.slane %v3002_v0, 6  ;;  %v3091_v36 = vmul.f32 %v7425_v60, %v9059_v16  ;;  %v3035_v37 = vsel %vm1051_vm6, %v3033_v26, %v3034_v32  ;;  %v3071_v28 = vadd.f32 %v3033_v26, %v2981_v5 }
 0x204   : > { %v3073_v46 = vadd.f32 %v3036_v42, %v2983_v1  ;;  %v3092_v48 = vmul.f32 %v7425_v60, %v9100_v52  ;;  %v3072_v30 = vadd.f32 %v3035_v37, %v2982_v4  ;;  %v3123_v59 = vrot.slane %v3089_v53, 7 }
 0x205   : > { %v3038_v49 = vsel %vm1051_vm6, %v3036_v42, %v3037_v61  ;;  %v3124_v35 = vrot.slane %v3090_v13, 7  ;;  %v3126_v39 = vrot.slane %v3091_v36, 7  ;;  %v3179_v40 = vmul.f32 %v7426_v63, %v8980_v19 }
 0x206   : > { %v3074_v3 = vadd.f32 %v3038_v49, %v2984_v21  ;;  %v3127_v57 = vrot.slane %v3092_v48, 7  ;;  %v3161_v9 = vadd.f32 %v3123_v59, %v3071_v28  ;;  %v3180_v41 = vmul.f32 %v7426_v63, %v9021_v33  ;;  %v7431_v21 = vld [vmem:[%s11127_s2 + $0x26] ss:$0 sm:$0xff] }
 0x207   : > { %v3125_v6 = vsel %vm1142_vm7, %v3123_v59, %v3124_v35  ;;  %v3181_v43 = vmul.f32 %v7426_v63, %v9059_v16  ;;  %v3163_v44 = vadd.f32 %v3126_v39, %v3073_v46  ;;  %v3182_v45 = vmul.f32 %v7426_v63, %v9100_v52 }
 0x208   : > { %v3128_v2 = vsel %vm1142_vm7, %v3126_v39, %v3127_v57  ;;  %v3162_v20 = vadd.f32 %v3125_v6, %v3072_v30  ;;  %v3195_v22 = vadd.f32 %v3179_v40, %v3161_v9  ;;  %v3213_v19 = vmul.f32 %v7427_v12, %v9056_v11 }
 0x209   : > { %v3164_v23 = vadd.f32 %v3128_v2, %v3074_v3  ;;  %v3214_v38 = vmul.f32 %v7427_v12, %v9059_v16  ;;  %v3197_v33 = vadd.f32 %v3181_v43, %v3163_v44  ;;  %v3215_v8 = vmul.f32 %v9135_v24, %v7427_v12  ;;  %v7432_v3 = vld [vmem:[%s11127_s2 + $0x27] ss:$0 sm:$0xff] }
 0x20a   : > { %v3196_v25 = vadd.f32 %v3180_v41, %v3162_v20  ;;  %v3216_v50 = vmul.f32 %v9138_v27, %v7427_v12  ;;  %v3229_v34 = vadd.f32 %v3213_v19, %v3195_v22  ;;  %v3247_v56 = vmul.f32 %v7430_v54, %v9056_v11 }
 0x20b   : > { %v3198_v29 = vadd.f32 %v3182_v45, %v3164_v23  ;;  %v3248_v51 = vmul.f32 %v7430_v54, %v9059_v16  ;;  %v3231_v62 = vadd.f32 %v3215_v8, %v3197_v33  ;;  %v3249_v58 = vmul.f32 %v7430_v54, %v9135_v24 }
 0x20c   : > { %v3230_v5 = vadd.f32 %v3214_v38, %v3196_v25  ;;  %v3250_v47 = vmul.f32 %v7430_v54, %v9138_v27  ;;  %v3281_v1 = vrot.slane %v3247_v56, 1  ;;  %v3337_v26 = vmul.f32 %v7431_v21, %v9056_v11  ;;  %v7434_v38 = vld [vmem:[%s11127_s2 + $0x29] ss:$0 sm:$0xff] }
 0x20d   : > { %v3232_v4 = vadd.f32 %v3216_v50, %v3198_v29  ;;  %v3282_v0 = vrot.slane %v3248_v51, 1  ;;  %v3284_v32 = vrot.slane %v3249_v58, 1  ;;  %v3338_v61 = vmul.f32 %v7431_v21, %v9059_v16  ;;  %v9179_v58 = vld [vmem:[#allocation2 + $0xb8] sm:$0xf] }
 0x20e   : > { %v3285_v42 = vrot.slane %v3250_v47, 1  ;;  %v3339_v60 = vmul.f32 %v7431_v21, %v9135_v24  ;;  %v3340_v36 = vmul.f32 %v7431_v21, %v9138_v27  ;;  %v3371_v37 = vrot.slane %v3337_v26, 2 }
 0x20f   : > { %v3283_v53 = vsel %vm637_vm1, %v3281_v1, %v3282_v0  ;;  %v3320_v13 = vadd.f32 %v3282_v0, %v3230_v5  ;;  %v3372_v49 = vrot.slane %v3338_v61, 2  ;;  %v3427_v39 = vmul.f32 %v7432_v3, %v9056_v11  ;;  %v7433_v11 = vld [vmem:[%s11127_s2 + $0x28] ss:$0 sm:$0xff] }
 0x210   : > { %v3286_v28 = vsel %vm637_vm1, %v3284_v32, %v3285_v42  ;;  %v3319_v46 = vadd.f32 %v3283_v53, %v3229_v34  ;;  %v3322_v48 = vadd.f32 %v3285_v42, %v3232_v4  ;;  %v3374_v59 = vrot.slane %v3339_v60, 2  ;;  %v7436_v60 = vld [vmem:[%s11127_s2 + $0x2a] ss:$0 sm:$0xff] }
 0x211   : > { %v3321_v30 = vadd.f32 %v3286_v28, %v3231_v62  ;;  %v3375_v35 = vrot.slane %v3340_v36, 2  ;;  %v3373_v57 = vsel %vm728_vm2, %v3371_v37, %v3372_v49  ;;  %v3410_v63 = vadd.f32 %v3372_v49, %v3320_v13 }
 0x212   : > { %v3428_v40 = vmul.f32 %v7432_v3, %v9059_v16  ;;  %v3429_v6 = vmul.f32 %v7432_v3, %v9135_v24  ;;  %v3409_v41 = vadd.f32 %v3373_v57, %v3319_v46  ;;  %v3430_v2 = vmul.f32 %v7432_v3, %v9138_v27 }
 0x213   : > { %v3376_v9 = vsel %vm728_vm2, %v3374_v59, %v3375_v35  ;;  %v3412_v43 = vadd.f32 %v3375_v35, %v3322_v48  ;;  %v3461_v44 = vrot.slane %v3427_v39, 3  ;;  %v3515_v12 = vmul.f32 %v7433_v11, %v9059_v16 }
 0x214   : > { %v3411_v20 = vadd.f32 %v3376_v9, %v3321_v30  ;;  %v3462_v45 = vrot.slane %v3428_v40, 3  ;;  %v3464_v23 = vrot.slane %v3429_v6, 3  ;;  %v3465_v22 = vrot.slane %v3430_v2, 3 }
 0x215   : > { %v3516_v19 = vmul.f32 %v7433_v11, %v9138_v27  ;;  %v3567_v25 = vmul.f32 %v7434_v38, %v9059_v16  ;;  %v3568_v50 = vmul.f32 %v7434_v38, %v9100_v52  ;;  %v3569_v29 = vmul.f32 %v7434_v38, %v9138_v27 }
 0x216   : > { %v3463_v33 = vsel %vm819_vm3, %v3461_v44, %v3462_v45  ;;  %v3500_v8 = vadd.f32 %v3462_v45, %v3410_v63  ;;  %v3466_v34 = vsel %vm819_vm3, %v3464_v23, %v3465_v22  ;;  %v3502_v56 = vadd.f32 %v3465_v22, %v3412_v43  ;;  %v7437_v63 = vld [vmem:[%s11127_s2 + $0x2b] ss:$0 sm:$0xff] }
 0x217   : > { %v3499_v54 = vadd.f32 %v3463_v33, %v3409_v41  ;;  %v3531_v51 = vrot.slane %v3515_v12, 4  ;;  %v3501_v5 = vadd.f32 %v3466_v34, %v3411_v20  ;;  %v3532_v62 = vrot.slane %v3516_v19, 4 }
 0x218   : > { %v3570_v47 = vmul.f32 %v9179_v58, %v7434_v38  ;;  %v3601_v4 = vrot.slane %v3567_v25, 5  ;;  %v3602_v21 = vrot.slane %v3568_v50, 5  ;;  %v3604_v26 = vrot.slane %v3569_v29, 5  ;;  %v7438_v38 = vld [vmem:[%s11127_s2 + $0x2c] ss:$0 sm:$0xff] }
 0x219   : > { %v3549_v1 = vadd.f32 %v3531_v51, %v3499_v54  ;;  %v3550_v0 = vadd.f32 %v3531_v51, %v3500_v8  ;;  %v3551_v32 = vadd.f32 %v3532_v62, %v3501_v5  ;;  %v3552_v42 = vadd.f32 %v3532_v62, %v3502_v56 }
 0x21a   : > { %v3605_v61 = vrot.slane %v3570_v47, 5  ;;  %v3657_v53 = vmul.f32 %v7436_v60, %v9059_v16  ;;  %v3603_v13 = vsel %vm960_vm5, %v3601_v4, %v3602_v21  ;;  %v3658_v37 = vmul.f32 %v7436_v60, %v9100_v52  ;;  %v7439_v47 = vld [vmem:[%s11127_s2 + $0x2d] ss:$0 sm:$0xff] }
 0x21b   : > { %v3639_v36 = vadd.f32 %v3601_v4, %v3549_v1  ;;  %v3659_v28 = vmul.f32 %v7436_v60, %v9138_v27  ;;  %v3640_v48 = vadd.f32 %v3603_v13, %v3550_v0  ;;  %v3641_v49 = vadd.f32 %v3604_v26, %v3551_v32  ;;  %v9214_v0 = vld [vmem:[#allocation2 + $0xc0] sm:$0xff] }
 0x21c   : > { %v3606_v46 = vsel %vm960_vm5, %v3604_v26, %v3605_v61  ;;  %v3660_v30 = vmul.f32 %v7436_v60, %v9179_v58  ;;  %v3691_v35 = vrot.slane %v3657_v53, 6  ;;  %v3692_v3 = vrot.slane %v3658_v37, 6  ;;  %v9217_v26 = vld [vmem:[#allocation2 + $0xc8] sm:$0xff] }
 0x21d   : > { %v3642_v59 = vadd.f32 %v3606_v46, %v3552_v42  ;;  %v3694_v39 = vrot.slane %v3659_v28, 6  ;;  %v3747_v40 = vmul.f32 %v7437_v63, %v9059_v16  ;;  %v3748_v6 = vmul.f32 %v7437_v63, %v9100_v52  ;;  %v7442_v60 = vld [vmem:[%s11127_s2 + $0x2e] ss:$0 sm:$0xff] }
 0x21e   : > { %v3695_v57 = vrot.slane %v3660_v30, 6  ;;  %v3749_v9 = vmul.f32 %v7437_v63, %v9138_v27  ;;  %v3693_v41 = vsel %vm1051_vm6, %v3691_v35, %v3692_v3  ;;  %v3729_v43 = vadd.f32 %v3691_v35, %v3639_v36 }
 0x21f   : > { %v3731_v2 = vadd.f32 %v3694_v39, %v3641_v49  ;;  %v3750_v20 = vmul.f32 %v7437_v63, %v9179_v58  ;;  %v3730_v45 = vadd.f32 %v3693_v41, %v3640_v48  ;;  %v3781_v23 = vrot.slane %v3747_v40, 7 }
 0x220   : > { %v3696_v44 = vsel %vm1051_vm6, %v3694_v39, %v3695_v57  ;;  %v3782_v22 = vrot.slane %v3748_v6, 7  ;;  %v3784_v12 = vrot.slane %v3749_v9, 7  ;;  %v3837_v25 = vmul.f32 %v7438_v38, %v9059_v16 }
 0x221   : > { %v3732_v11 = vadd.f32 %v3696_v44, %v3642_v59  ;;  %v3785_v19 = vrot.slane %v3750_v20, 7  ;;  %v3819_v8 = vadd.f32 %v3781_v23, %v3729_v43  ;;  %v3838_v50 = vmul.f32 %v7438_v38, %v9100_v52  ;;  %v7443_v59 = vld [vmem:[%s11127_s2 + $0x2f] ss:$0 sm:$0xff] }
 0x222   : > { %v3783_v33 = vsel %vm1142_vm7, %v3781_v23, %v3782_v22  ;;  %v3839_v29 = vmul.f32 %v7438_v38, %v9138_v27  ;;  %v3821_v56 = vadd.f32 %v3784_v12, %v3731_v2  ;;  %v3840_v51 = vmul.f32 %v7438_v38, %v9179_v58 }
 0x223   : > { %v3786_v34 = vsel %vm1142_vm7, %v3784_v12, %v3785_v19  ;;  %v3820_v54 = vadd.f32 %v3783_v33, %v3730_v45  ;;  %v3853_v62 = vadd.f32 %v3837_v25, %v3819_v8  ;;  %v3871_v16 = vmul.f32 %v7439_v47, %v9135_v24 }
 0x224   : > { %v3822_v5 = vadd.f32 %v3786_v34, %v3732_v11  ;;  %v3872_v4 = vmul.f32 %v7439_v47, %v9138_v27  ;;  %v3855_v52 = vadd.f32 %v3839_v29, %v3821_v56  ;;  %v3873_v21 = vmul.f32 %v9214_v0, %v7439_v47  ;;  %v7444_v11 = vld [vmem:[%s11127_s2 + $0x30] ss:$0 sm:$0xff] }
 0x225   : > { %v3854_v1 = vadd.f32 %v3838_v50, %v3820_v54  ;;  %v3874_v32 = vmul.f32 %v9217_v26, %v7439_v47  ;;  %v3887_v61 = vadd.f32 %v3871_v16, %v3853_v62  ;;  %v3905_v53 = vmul.f32 %v7442_v60, %v9135_v24 }
 0x226   : > { %v3856_v42 = vadd.f32 %v3840_v51, %v3822_v5  ;;  %v3906_v13 = vmul.f32 %v7442_v60, %v9138_v27  ;;  %v3889_v37 = vadd.f32 %v3873_v21, %v3855_v52  ;;  %v3907_v28 = vmul.f32 %v7442_v60, %v9214_v0 }
 0x227   : > { %v3888_v36 = vadd.f32 %v3872_v4, %v3854_v1  ;;  %v3908_v46 = vmul.f32 %v7442_v60, %v9217_v26  ;;  %v3939_v49 = vrot.slane %v3905_v53, 1  ;;  %v3995_v35 = vmul.f32 %v7443_v59, %v9135_v24  ;;  %v7446_v4 = vld [vmem:[%s11127_s2 + $0x32] ss:$0 sm:$0xff] }
 0x228   : > { %v3890_v48 = vadd.f32 %v3874_v32, %v3856_v42  ;;  %v3940_v30 = vrot.slane %v3906_v13, 1  ;;  %v3942_v3 = vrot.slane %v3907_v28, 1  ;;  %v3996_v57 = vmul.f32 %v7443_v59, %v9138_v27  ;;  %v9258_v28 = vld [vmem:[#allocation2 + $0xd0] sm:$0xf] }
 0x229   : > { %v3943_v39 = vrot.slane %v3908_v46, 1  ;;  %v3997_v63 = vmul.f32 %v7443_v59, %v9214_v0  ;;  %v3998_v9 = vmul.f32 %v7443_v59, %v9217_v26  ;;  %v4029_v41 = vrot.slane %v3995_v35, 2 }
 0x22a   : > { %v3941_v40 = vsel %vm637_vm1, %v3939_v49, %v3940_v30  ;;  %v3978_v6 = vadd.f32 %v3940_v30, %v3888_v36  ;;  %v4030_v44 = vrot.slane %v3996_v57, 2  ;;  %v4085_v12 = vmul.f32 %v7444_v11, %v9135_v24  ;;  %v7445_v24 = vld [vmem:[%s11127_s2 + $0x31] ss:$0 sm:$0xff] }
 0x22b   : > { %v3944_v43 = vsel %vm637_vm1, %v3942_v3, %v3943_v39  ;;  %v3977_v2 = vadd.f32 %v3941_v40, %v3887_v61  ;;  %v3980_v20 = vadd.f32 %v3943_v39, %v3890_v48  ;;  %v4032_v23 = vrot.slane %v3997_v63, 2  ;;  %v7448_v63 = vld [vmem:[%s11127_s2 + $0x33] ss:$0 sm:$0xff] }
 0x22c   : > { %v3979_v45 = vadd.f32 %v3944_v43, %v3889_v37  ;;  %v4033_v22 = vrot.slane %v3998_v9, 2  ;;  %v4031_v19 = vsel %vm728_vm2, %v4029_v41, %v4030_v44  ;;  %v4068_v38 = vadd.f32 %v4030_v44, %v3978_v6 }
 0x22d   : > { %v4086_v25 = vmul.f32 %v7444_v11, %v9138_v27  ;;  %v4087_v33 = vmul.f32 %v7444_v11, %v9214_v0  ;;  %v4067_v50 = vadd.f32 %v4031_v19, %v3977_v2  ;;  %v4088_v34 = vmul.f32 %v7444_v11, %v9217_v26 }
 0x22e   : > { %v4034_v8 = vsel %vm728_vm2, %v4032_v23, %v4033_v22  ;;  %v4070_v29 = vadd.f32 %v4033_v22, %v3980_v20  ;;  %v4119_v56 = vrot.slane %v4085_v12, 3  ;;  %v4173_v47 = vmul.f32 %v7445_v24, %v9138_v27 }
 0x22f   : > { %v4069_v54 = vadd.f32 %v4034_v8, %v3979_v45  ;;  %v4120_v51 = vrot.slane %v4086_v25, 3  ;;  %v4122_v5 = vrot.slane %v4087_v33, 3  ;;  %v4123_v62 = vrot.slane %v4088_v34, 3 }
 0x230   : > { %v4174_v16 = vmul.f32 %v7445_v24, %v9217_v26  ;;  %v4225_v1 = vmul.f32 %v7446_v4, %v9138_v27  ;;  %v4226_v32 = vmul.f32 %v7446_v4, %v9179_v58  ;;  %v4227_v42 = vmul.f32 %v7446_v4, %v9217_v26 }
 0x231   : > { %v4121_v52 = vsel %vm819_vm3, %v4119_v56, %v4120_v51  ;;  %v4158_v21 = vadd.f32 %v4120_v51, %v4068_v38  ;;  %v4124_v61 = vsel %vm819_vm3, %v4122_v5, %v4123_v62  ;;  %v4160_v53 = vadd.f32 %v4123_v62, %v4070_v29  ;;  %v7449_v38 = vld [vmem:[%s11127_s2 + $0x34] ss:$0 sm:$0xff] }
 0x232   : > { %v4157_v60 = vadd.f32 %v4121_v52, %v4067_v50  ;;  %v4189_v13 = vrot.slane %v4173_v47, 4  ;;  %v4159_v36 = vadd.f32 %v4124_v61, %v4069_v54  ;;  %v4190_v37 = vrot.slane %v4174_v16, 4 }
 0x233   : > { %v4228_v46 = vmul.f32 %v9258_v28, %v7446_v4  ;;  %v4259_v48 = vrot.slane %v4225_v1, 5  ;;  %v4260_v59 = vrot.slane %v4226_v32, 5  ;;  %v4262_v35 = vrot.slane %v4227_v42, 5  ;;  %v7450_v4 = vld [vmem:[%s11127_s2 + $0x35] ss:$0 sm:$0xff] }
 0x234   : > { %v4207_v49 = vadd.f32 %v4189_v13, %v4157_v60  ;;  %v4208_v30 = vadd.f32 %v4189_v13, %v4158_v21  ;;  %v4209_v3 = vadd.f32 %v4190_v37, %v4159_v36  ;;  %v4210_v39 = vadd.f32 %v4190_v37, %v4160_v53 }
 0x235   : > { %v4263_v57 = vrot.slane %v4228_v46, 5  ;;  %v4315_v40 = vmul.f32 %v7448_v63, %v9138_v27  ;;  %v4261_v6 = vsel %vm960_vm5, %v4259_v48, %v4260_v59  ;;  %v4316_v41 = vmul.f32 %v7448_v63, %v9179_v58  ;;  %v7451_v46 = vld [vmem:[%s11127_s2 + $0x36] ss:$0 sm:$0xff] }
 0x236   : > { %v4297_v9 = vadd.f32 %v4259_v48, %v4207_v49  ;;  %v4317_v43 = vmul.f32 %v7448_v63, %v9217_v26  ;;  %v4298_v20 = vadd.f32 %v4261_v6, %v4208_v30  ;;  %v4299_v44 = vadd.f32 %v4262_v35, %v4209_v3  ;;  %v9293_v30 = vld [vmem:[#allocation2 + $0xd8] sm:$0xff] }
 0x237   : > { %v4264_v2 = vsel %vm960_vm5, %v4262_v35, %v4263_v57  ;;  %v4318_v45 = vmul.f32 %v7448_v63, %v9258_v28  ;;  %v4349_v22 = vrot.slane %v4315_v40, 6  ;;  %v4350_v11 = vrot.slane %v4316_v41, 6  ;;  %v9296_v35 = vld [vmem:[#allocation2 + $0xe0] sm:$0xff]  ;;  %v7454_v63 = vld [vmem:[%s11127_s2 + $0x37] ss:$0 sm:$0xff] }
 0x238   : > { %v4300_v23 = vadd.f32 %v4264_v2, %v4210_v39  ;;  %v4352_v12 = vrot.slane %v4317_v43, 6  ;;  %v4405_v25 = vmul.f32 %v7449_v38, %v9138_v27  ;;  %v4406_v33 = vmul.f32 %v7449_v38, %v9179_v58 }
 0x239   : > { %v4353_v19 = vrot.slane %v4318_v45, 6  ;;  %v4407_v8 = vmul.f32 %v7449_v38, %v9217_v26  ;;  %v4351_v50 = vsel %vm1051_vm6, %v4349_v22, %v4350_v11  ;;  %v4387_v29 = vadd.f32 %v4349_v22, %v4297_v9 }
 0x23a   : > { %v4389_v34 = vadd.f32 %v4352_v12, %v4299_v44  ;;  %v4408_v54 = vmul.f32 %v7449_v38, %v9258_v28  ;;  %v4388_v51 = vadd.f32 %v4351_v50, %v4298_v20  ;;  %v4439_v5 = vrot.slane %v4405_v25, 7 }
 0x23b   : > { %v4354_v56 = vsel %vm1051_vm6, %v4352_v12, %v4353_v19  ;;  %v4440_v62 = vrot.slane %v4406_v33, 7  ;;  %v4442_v47 = vrot.slane %v4407_v8, 7  ;;  %v4495_v1 = vmul.f32 %v7450_v4, %v9138_v27 }
 0x23c   : > { %v4390_v24 = vadd.f32 %v4354_v56, %v4300_v23  ;;  %v4443_v16 = vrot.slane %v4408_v54, 7  ;;  %v4477_v21 = vadd.f32 %v4439_v5, %v4387_v29  ;;  %v4496_v32 = vmul.f32 %v7450_v4, %v9179_v58  ;;  %v7455_v23 = vld [vmem:[%s11127_s2 + $0x38] ss:$0 sm:$0xff] }
 0x23d   : > { %v4441_v52 = vsel %vm1142_vm7, %v4439_v5, %v4440_v62  ;;  %v4497_v42 = vmul.f32 %v7450_v4, %v9217_v26  ;;  %v4479_v53 = vadd.f32 %v4442_v47, %v4389_v34  ;;  %v4498_v13 = vmul.f32 %v7450_v4, %v9258_v28 }
 0x23e   : > { %v4444_v61 = vsel %vm1142_vm7, %v4442_v47, %v4443_v16  ;;  %v4478_v60 = vadd.f32 %v4441_v52, %v4388_v51  ;;  %v4511_v37 = vadd.f32 %v4495_v1, %v4477_v21  ;;  %v4529_v27 = vmul.f32 %v7451_v46, %v9214_v0 }
 0x23f   : > { %v4480_v36 = vadd.f32 %v4444_v61, %v4390_v24  ;;  %v4530_v48 = vmul.f32 %v7451_v46, %v9217_v26  ;;  %v4513_v58 = vadd.f32 %v4497_v42, %v4479_v53  ;;  %v4531_v59 = vmul.f32 %v9293_v30, %v7451_v46  ;;  %v7456_v24 = vld [vmem:[%s11127_s2 + $0x39] ss:$0 sm:$0xff] }
 0x240   : > { %v4512_v49 = vadd.f32 %v4496_v32, %v4478_v60  ;;  %v4532_v3 = vmul.f32 %v9296_v35, %v7451_v46  ;;  %v4545_v57 = vadd.f32 %v4529_v27, %v4511_v37  ;;  %v4563_v40 = vmul.f32 %v7454_v63, %v9214_v0 }
 0x241   : > { %v4514_v39 = vadd.f32 %v4498_v13, %v4480_v36  ;;  %v4564_v6 = vmul.f32 %v7454_v63, %v9217_v26  ;;  %v4547_v41 = vadd.f32 %v4531_v59, %v4513_v58  ;;  %v4565_v43 = vmul.f32 %v7454_v63, %v9293_v30 }
 0x242   : > { %v4546_v9 = vadd.f32 %v4530_v48, %v4512_v49  ;;  %v4566_v2 = vmul.f32 %v7454_v63, %v9296_v35  ;;  %v4597_v44 = vrot.slane %v4563_v40, 1  ;;  %v4653_v22 = vmul.f32 %v7455_v23, %v9214_v0  ;;  %v7458_v48 = vld [vmem:[%s11127_s2 + $0x3b] ss:$0 sm:$0xff] }
 0x243   : > { %v4548_v20 = vadd.f32 %v4532_v3, %v4514_v39  ;;  %v4598_v45 = vrot.slane %v4564_v6, 1  ;;  %v4600_v11 = vrot.slane %v4565_v43, 1  ;;  %v4654_v19 = vmul.f32 %v7455_v23, %v9217_v26  ;;  %v9337_v43 = vld [vmem:[#allocation2 + $0xe8] sm:$0xf] }
 0x244   : > { %v4601_v12 = vrot.slane %v4566_v2, 1  ;;  %v4655_v38 = vmul.f32 %v7455_v23, %v9293_v30  ;;  %v4656_v8 = vmul.f32 %v7455_v23, %v9296_v35  ;;  %v4687_v50 = vrot.slane %v4653_v22, 2 }
 0x245   : > { %v4599_v25 = vsel %vm637_vm1, %v4597_v44, %v4598_v45  ;;  %v4636_v33 = vadd.f32 %v4598_v45, %v4546_v9  ;;  %v4688_v56 = vrot.slane %v4654_v19, 2  ;;  %v4743_v47 = vmul.f32 %v7456_v24, %v9214_v0  ;;  %v7457_v0 = vld [vmem:[%s11127_s2 + $0x3a] ss:$0 sm:$0xff] }
 0x246   : > { %v4602_v29 = vsel %vm637_vm1, %v4600_v11, %v4601_v12  ;;  %v4635_v34 = vadd.f32 %v4599_v25, %v4545_v57  ;;  %v4638_v54 = vadd.f32 %v4601_v12, %v4548_v20  ;;  %v4690_v5 = vrot.slane %v4655_v38, 2  ;;  %v7460_v38 = vld [vmem:[%s11127_s2 + $0x3c] ss:$0 sm:$0xff] }
 0x247   : > { %v4637_v51 = vadd.f32 %v4602_v29, %v4547_v41  ;;  %v4691_v62 = vrot.slane %v4656_v8, 2  ;;  %v4689_v16 = vsel %vm728_vm2, %v4687_v50, %v4688_v56  ;;  %v4726_v4 = vadd.f32 %v4688_v56, %v4636_v33 }
 0x248   : > { %v4744_v1 = vmul.f32 %v7456_v24, %v9217_v26  ;;  %v4745_v52 = vmul.f32 %v7456_v24, %v9293_v30  ;;  %v4725_v32 = vadd.f32 %v4689_v16, %v4635_v34  ;;  %v4746_v61 = vmul.f32 %v7456_v24, %v9296_v35 }
 0x249   : > { %v4692_v21 = vsel %vm728_vm2, %v4690_v5, %v4691_v62  ;;  %v4728_v42 = vadd.f32 %v4691_v62, %v4638_v54  ;;  %v4777_v53 = vrot.slane %v4743_v47, 3  ;;  %v4831_v46 = vmul.f32 %v7457_v0, %v9217_v26 }
 0x24a   : > { %v4727_v60 = vadd.f32 %v4692_v21, %v4637_v51  ;;  %v4778_v13 = vrot.slane %v4744_v1, 3  ;;  %v4780_v36 = vrot.slane %v4745_v52, 3  ;;  %v4781_v37 = vrot.slane %v4746_v61, 3 }
 0x24b   : > { %v4832_v27 = vmul.f32 %v7457_v0, %v9296_v35  ;;  %v4883_v49 = vmul.f32 %v7458_v48, %v9217_v26  ;;  %v4884_v3 = vmul.f32 %v7458_v48, %v9258_v28  ;;  %v4885_v39 = vmul.f32 %v7458_v48, %v9296_v35 }
 0x24c   : > { %v4779_v58 = vsel %vm819_vm3, %v4777_v53, %v4778_v13  ;;  %v4816_v59 = vadd.f32 %v4778_v13, %v4726_v4  ;;  %v4782_v57 = vsel %vm819_vm3, %v4780_v36, %v4781_v37  ;;  %v4818_v40 = vadd.f32 %v4781_v37, %v4728_v42  ;;  %v7461_v4 = vld [vmem:[%s11127_s2 + $0x3d] ss:$0 sm:$0xff] }
 0x24d   : > { %v4815_v63 = vadd.f32 %v4779_v58, %v4725_v32  ;;  %v4847_v6 = vrot.slane %v4831_v46, 4  ;;  %v4817_v9 = vadd.f32 %v4782_v57, %v4727_v60  ;;  %v4848_v41 = vrot.slane %v4832_v27, 4  ;;  %v9362_v58 = vld [vmem:[#allocation2 + $0xf8] sm:$0xff] }
 0x24e   : > { %v4886_v2 = vmul.f32 %v9337_v43, %v7458_v48  ;;  %v4917_v20 = vrot.slane %v4883_v49, 5  ;;  %v4918_v23 = vrot.slane %v4884_v3, 5  ;;  %v4920_v22 = vrot.slane %v4885_v39, 5  ;;  %v7462_v48 = vld [vmem:[%s11127_s2 + $0x3e] ss:$0 sm:$0xff] }
 0x24f   : > { %v4865_v44 = vadd.f32 %v4847_v6, %v4815_v63  ;;  %v4866_v45 = vadd.f32 %v4847_v6, %v4816_v59  ;;  %v4867_v11 = vadd.f32 %v4848_v41, %v4817_v9  ;;  %v4868_v12 = vadd.f32 %v4848_v41, %v4818_v40  ;;  %v9369_v41 = vld [vmem:[#allocation2 + $0xf0] sm:$0xff] }
 0x250   : > { %v4921_v19 = vrot.slane %v4886_v2, 5  ;;  %v4973_v25 = vmul.f32 %v7460_v38, %v9217_v26  ;;  %v4919_v33 = vsel %vm960_vm5, %v4917_v20, %v4918_v23  ;;  %v4974_v50 = vmul.f32 %v7460_v38, %v9258_v28 }
 0x251   : > { %v4955_v8 = vadd.f32 %v4917_v20, %v4865_v44  ;;  %v4975_v29 = vmul.f32 %v7460_v38, %v9296_v35  ;;  %v4956_v54 = vadd.f32 %v4919_v33, %v4866_v45  ;;  %v4957_v56 = vadd.f32 %v4920_v22, %v4867_v11 }
 0x252   : > { %v4922_v34 = vsel %vm960_vm5, %v4920_v22, %v4921_v19  ;;  %v4976_v51 = vmul.f32 %v7460_v38, %v9337_v43  ;;  %v5007_v62 = vrot.slane %v4973_v25, 6  ;;  %v5008_v24 = vrot.slane %v4974_v50, 6  ;;  %v7464_v38 = vld [vmem:[%s11127_s2 + $0x40] ss:$0 sm:$0xff] }
 0x253   : > { %v4958_v5 = vadd.f32 %v4922_v34, %v4868_v12  ;;  %v5010_v47 = vrot.slane %v4975_v29, 6  ;;  %v5063_v1 = vmul.f32 %v7461_v4, %v9217_v26  ;;  %v5064_v52 = vmul.f32 %v7461_v4, %v9258_v28 }
 0x254   : > { %v5011_v16 = vrot.slane %v4976_v51, 6  ;;  %v5065_v21 = vmul.f32 %v7461_v4, %v9296_v35  ;;  %v5009_v32 = vsel %vm1051_vm6, %v5007_v62, %v5008_v24  ;;  %v5045_v42 = vadd.f32 %v5007_v62, %v4955_v8 }
 0x255   : > { %v5047_v61 = vadd.f32 %v5010_v47, %v4957_v56  ;;  %v5066_v60 = vmul.f32 %v7461_v4, %v9337_v43  ;;  %v5046_v13 = vadd.f32 %v5009_v32, %v4956_v54  ;;  %v5097_v36 = vrot.slane %v5063_v1, 7 }
 0x256   : > { %v5012_v53 = vsel %vm1051_vm6, %v5010_v47, %v5011_v16  ;;  %v5098_v37 = vrot.slane %v5064_v52, 7  ;;  %v5100_v46 = vrot.slane %v5065_v21, 7  ;;  %v5153_v49 = vmul.f32 %v7462_v48, %v9217_v26  ;;  %v7463_v26 = vld [vmem:[%s11127_s2 + $0x3f] ss:$0 sm:$0xff] }
 0x257   : > { %v5048_v0 = vadd.f32 %v5012_v53, %v4958_v5  ;;  %v5101_v27 = vrot.slane %v5066_v60, 7  ;;  %v5135_v3 = vadd.f32 %v5097_v36, %v5045_v42  ;;  %v5154_v39 = vmul.f32 %v7462_v48, %v9258_v28  ;;  %v7465_v5 = vld [vmem:[%s11127_s2 + $0x41] ss:$0 sm:$0xff] }
 0x258   : > { %v5099_v59 = vsel %vm1142_vm7, %v5097_v36, %v5098_v37  ;;  %v5155_v57 = vmul.f32 %v7462_v48, %v9296_v35  ;;  %v5137_v6 = vadd.f32 %v5100_v46, %v5047_v61  ;;  %v5156_v9 = vmul.f32 %v7462_v48, %v9337_v43 }
 0x259   : > { %v5102_v63 = vsel %vm1142_vm7, %v5100_v46, %v5101_v27  ;;  %v5136_v40 = vadd.f32 %v5099_v59, %v5046_v13  ;;  %v5169_v20 = vadd.f32 %v5153_v49, %v5135_v3  ;;  %v5187_v44 = vmul.f32 %v7463_v26, %v9293_v30 }
 0x25a   : > { %v5138_v2 = vadd.f32 %v5102_v63, %v5048_v0  ;;  %v5188_v28 = vmul.f32 %v7463_v26, %v9296_v35  ;;  %v5171_v23 = vadd.f32 %v5155_v57, %v5137_v6  ;;  %v5189_v22 = vmul.f32 %v7463_v26, %v9369_v41  ;;  %v7466_v0 = vld [vmem:[%s11127_s2 + $0x42] ss:$0 sm:$0xff] }
 0x25b   : > { %v5170_v45 = vadd.f32 %v5154_v39, %v5136_v40  ;;  %v5190_v11 = vmul.f32 %v7463_v26, %v9362_v58  ;;  %v5203_v19 = vadd.f32 %v5187_v44, %v5169_v20  ;;  %v5221_v25 = vmul.f32 %v7464_v38, %v9293_v30  ;;  %v9403_v20 = vld [vmem:[#allocation2 + $0x100] sm:$0xf] }
 0x25c   : > { %v5172_v12 = vadd.f32 %v5156_v9, %v5138_v2  ;;  %v5222_v33 = vmul.f32 %v7464_v38, %v9296_v35  ;;  %v5205_v50 = vadd.f32 %v5189_v22, %v5171_v23  ;;  %v5223_v29 = vmul.f32 %v7464_v38, %v9369_v41  ;;  %v7467_v26 = vld [vmem:[%s11127_s2 + $0x43] ss:$0 sm:$0xff] }
 0x25d   : > { %v5204_v8 = vadd.f32 %v5188_v28, %v5170_v45  ;;  %v5224_v34 = vmul.f32 %v7464_v38, %v9362_v58  ;;  %v5255_v56 = vrot.slane %v5221_v25, 1  ;;  %v5311_v62 = vmul.f32 %v7465_v5, %v9293_v30  ;;  %v7468_v45 = vld [vmem:[%s11127_s2 + $0x44] ss:$0 sm:$0xff] }
 0x25e   : > { %v5206_v54 = vadd.f32 %v5190_v11, %v5172_v12  ;;  %v5256_v51 = vrot.slane %v5222_v33, 1  ;;  %v5258_v24 = vrot.slane %v5223_v29, 1  ;;  %v5312_v16 = vmul.f32 %v7465_v5, %v9296_v35 }
 0x25f   : > { %v5259_v47 = vrot.slane %v5224_v34, 1  ;;  %v5313_v4 = vmul.f32 %v7465_v5, %v9369_v41  ;;  %v5314_v21 = vmul.f32 %v7465_v5, %v9362_v58  ;;  %v5345_v32 = vrot.slane %v5311_v62, 2 }
 0x260   : > { %v5257_v1 = vsel %vm637_vm1, %v5255_v56, %v5256_v51  ;;  %v5294_v52 = vadd.f32 %v5256_v51, %v5204_v8  ;;  %v5346_v53 = vrot.slane %v5312_v16, 2  ;;  %v5401_v46 = vmul.f32 %v7466_v0, %v9293_v30 }
 0x261   : > { %v5260_v42 = vsel %vm637_vm1, %v5258_v24, %v5259_v47  ;;  %v5293_v61 = vadd.f32 %v5257_v1, %v5203_v19  ;;  %v5296_v60 = vadd.f32 %v5259_v47, %v5206_v54  ;;  %v5348_v36 = vrot.slane %v5313_v4, 2  ;;  %v7469_v4 = vld [vmem:[%s11127_s2 + $0x45] ss:$0 sm:$0xff] }
 0x262   : > { %v5295_v13 = vadd.f32 %v5260_v42, %v5205_v50  ;;  %v5349_v37 = vrot.slane %v5314_v21, 2  ;;  %v5347_v27 = vsel %vm728_vm2, %v5345_v32, %v5346_v53  ;;  %v5384_v48 = vadd.f32 %v5346_v53, %v5294_v52 }
 0x263   : > { %v5402_v49 = vmul.f32 %v7466_v0, %v9296_v35  ;;  %v5403_v59 = vmul.f32 %v7466_v0, %v9369_v41  ;;  %v5383_v39 = vadd.f32 %v5347_v27, %v5293_v61  ;;  %v5404_v63 = vmul.f32 %v7466_v0, %v9362_v58 }
 0x264   : > { %v5350_v3 = vsel %vm728_vm2, %v5348_v36, %v5349_v37  ;;  %v5386_v57 = vadd.f32 %v5349_v37, %v5296_v60  ;;  %v5435_v6 = vrot.slane %v5401_v46, 3  ;;  %v5489_v44 = vmul.f32 %v7467_v26, %v9296_v35 }
 0x265   : > { %v5385_v40 = vadd.f32 %v5350_v3, %v5295_v13  ;;  %v5436_v9 = vrot.slane %v5402_v49, 3  ;;  %v5438_v2 = vrot.slane %v5403_v59, 3  ;;  %v5439_v30 = vrot.slane %v5404_v63, 3 }
 0x266   : > { %v5490_v28 = vmul.f32 %v7467_v26, %v9362_v58  ;;  %v5541_v23 = vmul.f32 %v7468_v45, %v9296_v35  ;;  %v5542_v12 = vmul.f32 %v7468_v45, %v9337_v43  ;;  %v5543_v19 = vmul.f32 %v7468_v45, %v9362_v58 }
 0x267   : > { %v5437_v22 = vsel %vm819_vm3, %v5435_v6, %v5436_v9  ;;  %v5474_v11 = vadd.f32 %v5436_v9, %v5384_v48  ;;  %v5440_v38 = vsel %vm819_vm3, %v5438_v2, %v5439_v30  ;;  %v5476_v33 = vadd.f32 %v5439_v30, %v5386_v57  ;;  %v7470_v48 = vld [vmem:[%s11127_s2 + $0x46] ss:$0 sm:$0xff] }
 0x268   : > { %v5473_v25 = vadd.f32 %v5437_v22, %v5383_v39  ;;  %v5505_v8 = vrot.slane %v5489_v44, 4  ;;  %v5475_v50 = vadd.f32 %v5440_v38, %v5385_v40  ;;  %v5506_v29 = vrot.slane %v5490_v28, 4  ;;  %v9441_v22 = vld [vmem:[#allocation2 + $0x110] sm:$0xff] }
 0x269   : > { %v5544_v34 = vmul.f32 %v7468_v45, %v9403_v20  ;;  %v5575_v54 = vrot.slane %v5541_v23, 5  ;;  %v5576_v5 = vrot.slane %v5542_v12, 5  ;;  %v5578_v62 = vrot.slane %v5543_v19, 5  ;;  %v7471_v45 = vld [vmem:[%s11127_s2 + $0x47] ss:$0 sm:$0xff] }
 0x26a   : > { %v5523_v56 = vadd.f32 %v5505_v8, %v5473_v25  ;;  %v5524_v51 = vadd.f32 %v5505_v8, %v5474_v11  ;;  %v5525_v24 = vadd.f32 %v5506_v29, %v5475_v50  ;;  %v5526_v47 = vadd.f32 %v5506_v29, %v5476_v33  ;;  %v554_v29 = vld [vmem:[#allocation2 + $0x108] sm:$0xff] }
 0x26b   : > { %v5579_v16 = vrot.slane %v5544_v34, 5  ;;  %v5631_v1 = vmul.f32 %v7469_v4, %v9296_v35  ;;  %v5577_v52 = vsel %vm960_vm5, %v5575_v54, %v5576_v5  ;;  %v5632_v32 = vmul.f32 %v7469_v4, %v9337_v43 }
 0x26c   : > { %v5613_v21 = vadd.f32 %v5575_v54, %v5523_v56  ;;  %v5633_v42 = vmul.f32 %v7469_v4, %v9362_v58  ;;  %v5614_v60 = vadd.f32 %v5577_v52, %v5524_v51  ;;  %v5615_v53 = vadd.f32 %v5578_v62, %v5525_v24 }
 0x26d   : > { %v5580_v61 = vsel %vm960_vm5, %v5578_v62, %v5579_v16  ;;  %v5634_v13 = vmul.f32 %v7469_v4, %v9403_v20  ;;  %v5665_v37 = vrot.slane %v5631_v1, 6  ;;  %v5666_v0 = vrot.slane %v5632_v32, 6  ;;  %v7473_v4 = vld [vmem:[%s11127_s2 + $0x49] ss:$0 sm:$0xff] }
 0x26e   : > { %v5616_v36 = vadd.f32 %v5580_v61, %v5526_v47  ;;  %v5668_v46 = vrot.slane %v5633_v42, 6  ;;  %v5721_v49 = vmul.f32 %v7470_v48, %v9296_v35  ;;  %v5722_v59 = vmul.f32 %v7470_v48, %v9337_v43 }
 0x26f   : > { %v5669_v27 = vrot.slane %v5634_v13, 6  ;;  %v5723_v3 = vmul.f32 %v7470_v48, %v9362_v58  ;;  %v5667_v39 = vsel %vm1051_vm6, %v5665_v37, %v5666_v0  ;;  %v5703_v57 = vadd.f32 %v5665_v37, %v5613_v21 }
 0x270   : > { %v5705_v63 = vadd.f32 %v5668_v46, %v5615_v53  ;;  %v5724_v40 = vmul.f32 %v7470_v48, %v9403_v20  ;;  %v5704_v9 = vadd.f32 %v5667_v39, %v5614_v60  ;;  %v5755_v2 = vrot.slane %v5721_v49, 7 }
 0x271   : > { %v5670_v6 = vsel %vm1051_vm6, %v5668_v46, %v5669_v27  ;;  %v5756_v30 = vrot.slane %v5722_v59, 7  ;;  %v5758_v44 = vrot.slane %v5723_v3, 7  ;;  %v5811_v23 = vmul.f32 %v7471_v45, %v9296_v35  ;;  %v7472_v35 = vld [vmem:[%s11127_s2 + $0x48] ss:$0 sm:$0xff] }
 0x272   : > { %v5706_v26 = vadd.f32 %v5670_v6, %v5616_v36  ;;  %v5759_v28 = vrot.slane %v5724_v40, 7  ;;  %v5793_v12 = vadd.f32 %v5755_v2, %v5703_v57  ;;  %v5812_v19 = vmul.f32 %v7471_v45, %v9337_v43  ;;  %v7474_v36 = vld [vmem:[%s11127_s2 + $0x4a] ss:$0 sm:$0xff] }
 0x273   : > { %v5757_v11 = vsel %vm1142_vm7, %v5755_v2, %v5756_v30  ;;  %v5813_v38 = vmul.f32 %v7471_v45, %v9362_v58  ;;  %v5795_v8 = vadd.f32 %v5758_v44, %v5705_v63  ;;  %v5814_v50 = vmul.f32 %v7471_v45, %v9403_v20 }
 0x274   : > { %v5760_v25 = vsel %vm1142_vm7, %v5758_v44, %v5759_v28  ;;  %v5794_v33 = vadd.f32 %v5757_v11, %v5704_v9  ;;  %v5827_v54 = vadd.f32 %v5811_v23, %v5793_v12  ;;  %v5845_v56 = vmul.f32 %v7472_v35, %v9369_v41 }
 0x275   : > { %v5796_v34 = vadd.f32 %v5760_v25, %v5706_v26  ;;  %v5846_v51 = vmul.f32 %v7472_v35, %v9362_v58  ;;  %v5829_v5 = vadd.f32 %v5813_v38, %v5795_v8  ;;  %v5847_v62 = vmul.f32 %v7472_v35, %v554_v29  ;;  %v7475_v26 = vld [vmem:[%s11127_s2 + $0x4b] ss:$0 sm:$0xff] }
 0x276   : > { %v5828_v43 = vadd.f32 %v5812_v19, %v5794_v33  ;;  %v5848_v24 = vmul.f32 %v7472_v35, %v9441_v22  ;;  %v5861_v16 = vadd.f32 %v5845_v56, %v5827_v54  ;;  %v5879_v1 = vmul.f32 %v7473_v4, %v9369_v41  ;;  %v9476_v54 = vld [vmem:[#allocation2 + $0x118] sm:$0xf] }
 0x277   : > { %v5830_v47 = vadd.f32 %v5814_v50, %v5796_v34  ;;  %v5880_v52 = vmul.f32 %v7473_v4, %v9362_v58  ;;  %v5863_v32 = vadd.f32 %v5847_v62, %v5829_v5  ;;  %v5881_v42 = vmul.f32 %v7473_v4, %v554_v29 }
 0x278   : > { %v5862_v21 = vadd.f32 %v5846_v51, %v5828_v43  ;;  %v5882_v61 = vmul.f32 %v7473_v4, %v9441_v22  ;;  %v5913_v53 = vrot.slane %v5879_v1, 1  ;;  %v5969_v37 = vmul.f32 %v7474_v36, %v9369_v41  ;;  %v7477_v51 = vld [vmem:[%s11127_s2 + $0x4d] ss:$0 sm:$0xff] }
 0x279   : > { %v5864_v60 = vadd.f32 %v5848_v24, %v5830_v47  ;;  %v5914_v13 = vrot.slane %v5880_v52, 1  ;;  %v5916_v0 = vrot.slane %v5881_v42, 1  ;;  %v5970_v27 = vmul.f32 %v7474_v36, %v9362_v58 }
 0x27a   : > { %v5917_v46 = vrot.slane %v5882_v61, 1  ;;  %v5971_v48 = vmul.f32 %v7474_v36, %v554_v29  ;;  %v5972_v3 = vmul.f32 %v7474_v36, %v9441_v22  ;;  %v6003_v39 = vrot.slane %v5969_v37, 2 }
 0x27b   : > { %v5915_v49 = vsel %vm637_vm1, %v5913_v53, %v5914_v13  ;;  %v5952_v59 = vadd.f32 %v5914_v13, %v5862_v21  ;;  %v6004_v6 = vrot.slane %v5970_v27, 2  ;;  %v6059_v44 = vmul.f32 %v7475_v26, %v9369_v41  ;;  %v7476_v41 = vld [vmem:[%s11127_s2 + $0x4c] ss:$0 sm:$0xff]  ;;  %v7478_v27 = vld [vmem:[%s11127_s2 + $0x4e] ss:$0 sm:$0xff] }
 0x27c   : > { %v5918_v57 = vsel %vm637_vm1, %v5916_v0, %v5917_v46  ;;  %v5951_v63 = vadd.f32 %v5915_v49, %v5861_v16  ;;  %v5954_v40 = vadd.f32 %v5917_v46, %v5864_v60  ;;  %v6006_v2 = vrot.slane %v5971_v48, 2 }
 0x27d   : > { %v5953_v9 = vadd.f32 %v5918_v57, %v5863_v32  ;;  %v6007_v30 = vrot.slane %v5972_v3, 2  ;;  %v6005_v28 = vsel %vm728_vm2, %v6003_v39, %v6004_v6  ;;  %v6042_v45 = vadd.f32 %v6004_v6, %v5952_v59 }
 0x27e   : > { %v6060_v23 = vmul.f32 %v7475_v26, %v9362_v58  ;;  %v6061_v11 = vmul.f32 %v7475_v26, %v554_v29  ;;  %v6041_v19 = vadd.f32 %v6005_v28, %v5951_v63  ;;  %v6062_v25 = vmul.f32 %v7475_v26, %v9441_v22  ;;  %v7479_v28 = vld [vmem:[%s11127_s2 + $0x4f] ss:$0 sm:$0xff] }
 0x27f   : > { %v6008_v12 = vsel %vm728_vm2, %v6006_v2, %v6007_v30  ;;  %v6044_v38 = vadd.f32 %v6007_v30, %v5954_v40  ;;  %v6093_v8 = vrot.slane %v6059_v44, 3  ;;  %v6147_v56 = vmul.f32 %v7476_v41, %v9362_v58 }
 0x280   : > { %v6043_v33 = vadd.f32 %v6008_v12, %v5953_v9  ;;  %v6094_v50 = vrot.slane %v6060_v23, 3  ;;  %v6096_v34 = vrot.slane %v6061_v11, 3  ;;  %v6097_v35 = vrot.slane %v6062_v25, 3 }
 0x281   : > { %v6148_v29 = vmul.f32 %v7476_v41, %v9441_v22  ;;  %v6199_v43 = vmul.f32 %v7477_v51, %v9362_v58  ;;  %v6200_v24 = vmul.f32 %v7477_v51, %v9403_v20  ;;  %v6201_v47 = vmul.f32 %v7477_v51, %v9441_v22 }
 0x282   : > { %v6095_v5 = vsel %vm819_vm3, %v6093_v8, %v6094_v50  ;;  %v6132_v62 = vadd.f32 %v6094_v50, %v6042_v45  ;;  %v6098_v16 = vsel %vm819_vm3, %v6096_v34, %v6097_v35  ;;  %v6134_v1 = vadd.f32 %v6097_v35, %v6044_v38 }
 0x283   : > { %v6131_v4 = vadd.f32 %v6095_v5, %v6041_v19  ;;  %v6163_v52 = vrot.slane %v6147_v56, 4  ;;  %v6133_v21 = vadd.f32 %v6098_v16, %v6043_v33  ;;  %v6164_v32 = vrot.slane %v6148_v29, 4  ;;  %v7480_v29 = vld [vmem:[%s11127_s2 + $0x50] ss:$0 sm:$0xff] }
 0x284   : > { %v6202_v42 = vmul.f32 %v7477_v51, %v9476_v54  ;;  %v6233_v61 = vrot.slane %v6199_v43, 5  ;;  %v6234_v13 = vrot.slane %v6200_v24, 5  ;;  %v6236_v36 = vrot.slane %v6201_v47, 5 }
 0x285   : > { %v6181_v60 = vadd.f32 %v6163_v52, %v6131_v4  ;;  %v6182_v53 = vadd.f32 %v6163_v52, %v6132_v62  ;;  %v6183_v37 = vadd.f32 %v6164_v32, %v6133_v21  ;;  %v6184_v0 = vadd.f32 %v6164_v32, %v6134_v1  ;;  %v7481_v32 = vld [vmem:[%s11127_s2] ss:$0 sm:$0xff] }
 0x286   : > { %v6237_v46 = vrot.slane %v6202_v42, 5  ;;  %v6289_v48 = vmul.f32 %v7478_v27, %v9362_v58  ;;  %v6235_v49 = vsel %vm960_vm5, %v6233_v61, %v6234_v13  ;;  %v6290_v3 = vmul.f32 %v7478_v27, %v9403_v20 }
 0x287   : > { %v6271_v59 = vadd.f32 %v6233_v61, %v6181_v60  ;;  %v6291_v39 = vmul.f32 %v7478_v27, %v9441_v22  ;;  %v6272_v63 = vadd.f32 %v6235_v49, %v6182_v53  ;;  %v6273_v40 = vadd.f32 %v6236_v36, %v6183_v37  ;;  %v9522_v61 = vld [vmem:[#allocation2 + $0x68] sm:$0xff]  ;;  %v9525_v53 = vld [vmem:[#allocation2 + $0x78] sm:$0xff] }
 0x288   : > { %v6238_v57 = vsel %vm960_vm5, %v6236_v36, %v6237_v46  ;;  %v6292_v6 = vmul.f32 %v7478_v27, %v9476_v54  ;;  %v6323_v2 = vrot.slane %v6289_v48, 6  ;;  %v6324_v30 = vrot.slane %v6290_v3, 6  ;;  %v9528_v36 = vld [vmem:[#allocation2 + $0x80] sm:$0xff] }
 0x289   : > { %v6274_v9 = vadd.f32 %v6238_v57, %v6184_v0  ;;  %v6326_v26 = vrot.slane %v6291_v39, 6  ;;  %v6379_v45 = vmul.f32 %v7479_v28, %v9362_v58  ;;  %v6380_v23 = vmul.f32 %v7479_v28, %v9403_v20  ;;  %v7486_v46 = vld [vmem:[%s11127_s2 + $0x1] ss:$0 sm:$0xff] }
 0x28a   : > { %v6327_v44 = vrot.slane %v6292_v6, 6  ;;  %v6381_v11 = vmul.f32 %v7479_v28, %v9441_v22  ;;  %v6325_v12 = vsel %vm1051_vm6, %v6323_v2, %v6324_v30  ;;  %v6361_v19 = vadd.f32 %v6323_v2, %v6271_v59  ;;  %v7487_v6 = vld [vmem:[%s11127_s2 + $0x2] ss:$0 sm:$0xff] }
 0x28b   : > { %v6363_v38 = vadd.f32 %v6326_v26, %v6273_v40  ;;  %v6382_v25 = vmul.f32 %v7479_v28, %v9476_v54  ;;  %v6362_v8 = vadd.f32 %v6325_v12, %v6272_v63  ;;  %v6413_v50 = vrot.slane %v6379_v45, 7 }
 0x28c   : > { %v6328_v33 = vsel %vm1051_vm6, %v6326_v26, %v6327_v44  ;;  %v6414_v34 = vrot.slane %v6380_v23, 7  ;;  %v6416_v41 = vrot.slane %v6381_v11, 7  ;;  %v6469_v51 = vmul.f32 %v7480_v29, %v9362_v58  ;;  %v7482_v58 = vld [vmem:[#allocation2 + $0x60] sm:$0xff] }
 0x28d   : > { %v6364_v35 = vadd.f32 %v6328_v33, %v6274_v9  ;;  %v6417_v56 = vrot.slane %v6382_v25, 7  ;;  %v6451_v5 = vadd.f32 %v6413_v50, %v6361_v19  ;;  %v6470_v62 = vmul.f32 %v7480_v29, %v9403_v20 }
 0x28e   : > { %v6415_v43 = vsel %vm1142_vm7, %v6413_v50, %v6414_v34  ;;  %v6471_v24 = vmul.f32 %v7480_v29, %v9441_v22  ;;  %v6453_v4 = vadd.f32 %v6416_v41, %v6363_v38  ;;  %v6472_v1 = vmul.f32 %v7480_v29, %v9476_v54 }
 0x28f   : > { %v6418_v47 = vsel %vm1142_vm7, %v6416_v41, %v6417_v56  ;;  %v6452_v16 = vadd.f32 %v6415_v43, %v6362_v8  ;;  %v6485_v21 = vadd.f32 %v6469_v51, %v6451_v5  ;;  %v579_v42 = vmul.f32 %v7482_v58, %v7481_v32  ;;  %v7488_v41 = vld [vmem:[%s11127_s2 + $0x3] ss:$0 sm:$0xff] }
 0x290   : > { %v6454_v52 = vadd.f32 %v6418_v47, %v6364_v35  ;;  %v580_v20 = vmul.f32 %v9522_v61, %v7481_v32  ;;  %v6487_v22 = vadd.f32 %v6471_v24, %v6453_v4  ;;  %v581_v13 = vmul.f32 %v9525_v53, %v7481_v32 }
 0x291   : > { %v6486_v60 = vadd.f32 %v6470_v62, %v6452_v16  ;;  %v582_v54 = vmul.f32 %v9528_v36, %v7481_v32  ;;  %v6520_v0 = vrot.slane %v6485_v21, 4  ;;  %v613_v27 = vmul.f32 %v7486_v46, %v7482_v58 }
 0x292   : > { %v6488_v37 = vadd.f32 %v6472_v1, %v6454_v52  ;;  %v614_v48 = vmul.f32 %v7486_v46, %v9522_v61  ;;  %v6523_v59 = vrot.slane %v6487_v22, 4  ;;  %v615_v3 = vmul.f32 %v7486_v46, %v9525_v53 }
 0x293   : > { %v6521_v49 = vrot.slane %v6486_v60, 4  ;;  %v616_v39 = vmul.f32 %v7486_v46, %v9528_v36  ;;  %v650_v63 = vrot.slane %v613_v27, 1  ;;  %v704_v9 = vmul.f32 %v7487_v6, %v7482_v58 }
 0x294   : > { %v6524_v57 = vrot.slane %v6488_v37, 4  ;;  %v651_v40 = vrot.slane %v614_v48, 1  ;;  %v653_v30 = vrot.slane %v615_v3, 1  ;;  %v705_v44 = vmul.f32 %v7487_v6, %v9522_v61  ;;  %v7491_v3 = vld [vmem:[#allocation2 + $0x70] sm:$0xf] }
 0x295   : > { %v6522_v2 = vsel %vm6513_vm8, %v6520_v0, %v6521_v49  ;;  %v654_v26 = vrot.slane %v616_v39, 1  ;;  %v706_v11 = vmul.f32 %v7487_v6, %v9525_v53  ;;  %v707_v8 = vmul.f32 %v7487_v6, %v9528_v36  ;;  %v7490_v49 = vld [vmem:[%s11127_s2 + $0x5] ss:$0 sm:$0xff]  ;;  %v9568_v6 = vld [vmem:[#allocation2 + $0x88] sm:$0xf] }
 0x296   : > { %v6525_v28 = vsel %vm6513_vm8, %v6523_v59, %v6524_v57  ;;  %v652_v45 = vsel %vm637_vm1, %v650_v63, %v651_v40  ;;  %v687_v23 = vadd.f32 %v651_v40, %v580_v20  ;;  %v741_v50 = vrot.slane %v704_v9, 2 }
 0x297   : > { %v6547_v12 = vpack.c.bf16 %v6525_v28, %v6522_v2  ;;  %v655_v19 = vsel %vm637_vm1, %v653_v30, %v654_v26  ;;  %v686_v38 = vadd.f32 %v652_v45, %v579_v42  ;;  %v689_v25 = vadd.f32 %v654_v26, %v582_v54 }
 0x298   : > { %v688_v33 = vadd.f32 %v655_v19, %v581_v13  ;;  %v742_v34 = vrot.slane %v705_v44, 2  ;;  %v744_v35 = vrot.slane %v706_v11, 2  ;;  %v795_v56 = vmul.f32 %v7488_v41, %v7482_v58  ;;  %v7489_v58 = vld [vmem:[%s11127_s2 + $0x4] ss:$0 sm:$0xff] }
 0x299   : > { %7199 = vmatmul.msk.bf16.gmra.mxu1 %vm389_vm0, %v6547_v12  ;;  %v796_v29 = vmul.f32 %v7488_v41, %v9522_v61  ;;  %v797_v51 = vmul.f32 %v7488_v41, %v9525_v53  ;;  %v745_v5 = vrot.slane %v707_v8, 2  ;;  %v798_v24 = vmul.f32 %v7488_v41, %v9528_v36 }
 0x29a   : > { %v743_v43 = vsel %vm728_vm2, %v741_v50, %v742_v34  ;;  %v778_v62 = vadd.f32 %v742_v34, %v687_v23  ;;  %v832_v16 = vrot.slane %v795_v56, 3  ;;  %v882_v42 = vmul.f32 %v7489_v58, %v9522_v61  ;;  %v7493_v23 = vld [vmem:[%s11127_s2 + $0x6] ss:$0 sm:$0xff] }
 0x29b   : > { %v777_v47 = vadd.f32 %v743_v43, %v686_v38  ;;  %v833_v4 = vrot.slane %v796_v29, 3  ;;  %v835_v1 = vrot.slane %v797_v51, 3  ;;  %v746_v52 = vsel %vm728_vm2, %v744_v35, %v745_v5 }
 0x29c   : > { %v780_v21 = vadd.f32 %v745_v5, %v689_v25  ;;  %v836_v32 = vrot.slane %v798_v24, 3  ;;  %v779_v20 = vadd.f32 %v746_v52, %v688_v33  ;;  %v883_v13 = vmul.f32 %v7489_v58, %v9528_v36  ;;  %v7494_v5 = vld [vmem:[%s11127_s2 + $0x7] ss:$0 sm:$0xff] }
 0x29d   : > { %v834_v60 = vsel %vm819_vm3, %v832_v16, %v833_v4  ;;  %v869_v22 = vadd.f32 %v833_v4, %v778_v62  ;;  %v898_v46 = vrot.slane %v882_v42, 4  ;;  %v936_v59 = vmul.f32 %v7490_v49, %v9522_v61 }
 0x29e   : > { %v837_v54 = vsel %vm819_vm3, %v835_v1, %v836_v32  ;;  %v868_v37 = vadd.f32 %v834_v60, %v777_v47  ;;  %v871_v0 = vadd.f32 %v836_v32, %v780_v21  ;;  %v899_v48 = vrot.slane %v883_v13, 4 }
 0x29f   : > { %v870_v27 = vadd.f32 %v837_v54, %v779_v20  ;;  %v937_v39 = vmul.f32 %v7491_v3, %v7490_v49  ;;  %v919_v63 = vadd.f32 %v898_v46, %v869_v22  ;;  %v938_v40 = vmul.f32 %v7490_v49, %v9528_v36  ;;  %v7495_v22 = vld [vmem:[%s11127_s2 + $0x8] ss:$0 sm:$0xff] }
 0x2a0   : > { %v918_v57 = vadd.f32 %v898_v46, %v868_v37  ;;  %v939_v9 = vmul.f32 %v9568_v6, %v7490_v49  ;;  %v921_v30 = vadd.f32 %v899_v48, %v871_v0  ;;  %v973_v26 = vrot.slane %v936_v59, 5 }
 0x2a1   : > { %v920_v2 = vadd.f32 %v899_v48, %v870_v27  ;;  %v974_v44 = vrot.slane %v937_v39, 5  ;;  %v976_v28 = vrot.slane %v938_v40, 5  ;;  %v1027_v11 = vmul.f32 %v7493_v23, %v9522_v61  ;;  %v7496_v39 = vld [vmem:[%s11127_s2 + $0x9] ss:$0 sm:$0xff]  ;;  %v9600_v40 = vld [vmem:[#allocation2 + $0x90] sm:$0xff] }
 0x2a2   : > { %v977_v45 = vrot.slane %v939_v9, 5  ;;  %v1028_v12 = vmul.f32 %v7493_v23, %v7491_v3  ;;  %v1009_v38 = vadd.f32 %v973_v26, %v918_v57  ;;  %v1029_v25 = vmul.f32 %v7493_v23, %v9528_v36 }
 0x2a3   : > { %v975_v19 = vsel %vm960_vm5, %v973_v26, %v974_v44  ;;  %v1030_v33 = vmul.f32 %v7493_v23, %v9568_v6  ;;  %v1011_v34 = vadd.f32 %v976_v28, %v920_v2  ;;  %v1064_v35 = vrot.slane %v1027_v11, 6  ;;  %v9603_v26 = vld [vmem:[#allocation2 + $0x98] sm:$0xff] }
 0x2a4   : > { %v978_v8 = vsel %vm960_vm5, %v976_v28, %v977_v45  ;;  %v1010_v50 = vadd.f32 %v975_v19, %v919_v63  ;;  %v1065_v56 = vrot.slane %v1028_v12, 6  ;;  %v1067_v29 = vrot.slane %v1029_v25, 6  ;;  %v7499_v28 = vld [vmem:[%s11127_s2 + $0xa] ss:$0 sm:$0xff] }
 0x2a5   : > { %v1012_v41 = vadd.f32 %v978_v8, %v921_v30  ;;  %v1068_v51 = vrot.slane %v1030_v33, 6  ;;  %v1100_v43 = vadd.f32 %v1064_v35, %v1009_v38  ;;  %v1118_v62 = vmul.f32 %v7494_v5, %v9522_v61 }
 0x2a6   : > { %v1119_v24 = vmul.f32 %v7494_v5, %v7491_v3  ;;  %v1120_v47 = vmul.f32 %v7494_v5, %v9528_v36  ;;  %v1066_v16 = vsel %vm1051_vm6, %v1064_v35, %v1065_v56  ;;  %v1102_v1 = vadd.f32 %v1067_v29, %v1011_v34 }
 0x2a7   : > { %v1069_v4 = vsel %vm1051_vm6, %v1067_v29, %v1068_v51  ;;  %v1121_v52 = vmul.f32 %v7494_v5, %v9568_v6  ;;  %v1101_v21 = vadd.f32 %v1066_v16, %v1010_v50  ;;  %v1155_v58 = vrot.slane %v1118_v62, 7  ;;  %v7501_v16 = vld [vmem:[%s11127_s2 + $0xc] ss:$0 sm:$0xff] }
 0x2a8   : > { %v1103_v32 = vadd.f32 %v1069_v4, %v1012_v41  ;;  %v1156_v42 = vrot.slane %v1119_v24, 7  ;;  %v1158_v20 = vrot.slane %v1120_v47, 7  ;;  %v1209_v13 = vmul.f32 %v7495_v22, %v9522_v61  ;;  %v7500_v41 = vld [vmem:[%s11127_s2 + $0xb] ss:$0 sm:$0xff] }
 0x2a9   : > { %v1159_v60 = vrot.slane %v1121_v52, 7  ;;  %v1210_v54 = vmul.f32 %v7495_v22, %v7491_v3  ;;  %v1191_v0 = vadd.f32 %v1155_v58, %v1100_v43  ;;  %v1211_v46 = vmul.f32 %v7495_v22, %v9528_v36 }
 0x2aa   : > { %v1157_v37 = vsel %vm1142_vm7, %v1155_v58, %v1156_v42  ;;  %v1212_v27 = vmul.f32 %v7495_v22, %v9568_v6  ;;  %v1193_v59 = vadd.f32 %v1158_v20, %v1102_v1  ;;  %v1243_v57 = vmul.f32 %v7496_v39, %v9525_v53 }
 0x2ab   : > { %v1160_v48 = vsel %vm1142_vm7, %v1158_v20, %v1159_v60  ;;  %v1192_v49 = vadd.f32 %v1157_v37, %v1101_v21  ;;  %v1225_v61 = vadd.f32 %v1209_v13, %v1191_v0  ;;  %v1244_v3 = vmul.f32 %v7496_v39, %v9528_v36 }
 0x2ac   : > { %v1194_v63 = vadd.f32 %v1160_v48, %v1103_v32  ;;  %v1245_v9 = vmul.f32 %v9600_v40, %v7496_v39  ;;  %v1227_v30 = vadd.f32 %v1211_v46, %v1193_v59  ;;  %v1246_v44 = vmul.f32 %v9603_v26, %v7496_v39 }
 0x2ad   : > { %v1226_v2 = vadd.f32 %v1210_v54, %v1192_v49  ;;  %v1277_v45 = vmul.f32 %v7499_v28, %v9525_v53  ;;  %v1259_v11 = vadd.f32 %v1243_v57, %v1225_v61  ;;  %v1278_v12 = vmul.f32 %v7499_v28, %v9528_v36  ;;  %v7502_v57 = vld [vmem:[%s11127_s2 + $0xd] ss:$0 sm:$0xff] }
 0x2ae   : > { %v1228_v23 = vadd.f32 %v1212_v27, %v1194_v63  ;;  %v1279_v19 = vmul.f32 %v7499_v28, %v9600_v40  ;;  %v1261_v25 = vadd.f32 %v1245_v9, %v1227_v30  ;;  %v1280_v33 = vmul.f32 %v7499_v28, %v9603_v26 }
 0x2af   : > { %v1260_v38 = vadd.f32 %v1244_v3, %v1226_v2  ;;  %v1313_v8 = vrot.slane %v1277_v45, 1  ;;  %v1314_v34 = vrot.slane %v1278_v12, 1  ;;  %v1367_v56 = vmul.f32 %v7500_v41, %v9525_v53  ;;  %v7503_v3 = vld [vmem:[%s11127_s2 + $0xe] ss:$0 sm:$0xff] }
 0x2b0   : > { %v1262_v50 = vadd.f32 %v1246_v44, %v1228_v23  ;;  %v1316_v35 = vrot.slane %v1279_v19, 1  ;;  %v1317_v29 = vrot.slane %v1280_v33, 1  ;;  %v1368_v51 = vmul.f32 %v7500_v41, %v9528_v36 }
 0x2b1   : > { %v1369_v43 = vmul.f32 %v7500_v41, %v9600_v40  ;;  %v1370_v5 = vmul.f32 %v7500_v41, %v9603_v26  ;;  %v1315_v62 = vsel %vm637_vm1, %v1313_v8, %v1314_v34  ;;  %v1350_v24 = vadd.f32 %v1314_v34, %v1260_v38 }
 0x2b2   : > { %v1403_v47 = vrot.slane %v1367_v56, 2  ;;  %v1457_v4 = vmul.f32 %v7501_v16, %v9525_v53  ;;  %v1318_v1 = vsel %vm637_vm1, %v1316_v35, %v1317_v29  ;;  %v1349_v52 = vadd.f32 %v1315_v62, %v1259_v11 }
 0x2b3   : > { %v1352_v21 = vadd.f32 %v1317_v29, %v1262_v50  ;;  %v1404_v32 = vrot.slane %v1368_v51, 2  ;;  %v1351_v58 = vadd.f32 %v1318_v1, %v1261_v25  ;;  %v1406_v42 = vrot.slane %v1369_v43, 2  ;;  %v9644_v25 = vld [vmem:[#allocation2 + $0xa0] sm:$0xf] }
 0x2b4   : > { %v1407_v20 = vrot.slane %v1370_v5, 2  ;;  %v1458_v60 = vmul.f32 %v7501_v16, %v9528_v36  ;;  %v1459_v54 = vmul.f32 %v7501_v16, %v9600_v40  ;;  %v1460_v37 = vmul.f32 %v7501_v16, %v9603_v26  ;;  %v7505_v5 = vld [vmem:[%s11127_s2 + $0xf] ss:$0 sm:$0xff] }
 0x2b5   : > { %v1405_v22 = vsel %vm728_vm2, %v1403_v47, %v1404_v32  ;;  %v1440_v13 = vadd.f32 %v1404_v32, %v1350_v24  ;;  %v1493_v27 = vrot.slane %v1457_v4, 3  ;;  %v1543_v63 = vmul.f32 %v7502_v57, %v9528_v36 }
 0x2b6   : > { %v1408_v0 = vsel %vm728_vm2, %v1406_v42, %v1407_v20  ;;  %v1439_v53 = vadd.f32 %v1405_v22, %v1349_v52  ;;  %v1442_v46 = vadd.f32 %v1407_v20, %v1352_v21  ;;  %v1494_v49 = vrot.slane %v1458_v60, 3  ;;  %v7506_v60 = vld [vmem:[%s11127_s2 + $0x10] ss:$0 sm:$0xff] }
 0x2b7   : > { %v1441_v48 = vadd.f32 %v1408_v0, %v1351_v58  ;;  %v1496_v59 = vrot.slane %v1459_v54, 3  ;;  %v1497_v39 = vrot.slane %v1460_v37, 3  ;;  %v1544_v61 = vmul.f32 %v7502_v57, %v9603_v26 }
 0x2b8   : > { %v1597_v9 = vmul.f32 %v7503_v3, %v9528_v36  ;;  %v1598_v2 = vmul.f32 %v7503_v3, %v9568_v6  ;;  %v1495_v30 = vsel %vm819_vm3, %v1493_v27, %v1494_v49  ;;  %v1530_v28 = vadd.f32 %v1494_v49, %v1440_v13 }
 0x2b9   : > { %v1498_v44 = vsel %vm819_vm3, %v1496_v59, %v1497_v39  ;;  %v1532_v45 = vadd.f32 %v1497_v39, %v1442_v46  ;;  %v1529_v23 = vadd.f32 %v1495_v30, %v1439_v53  ;;  %v1559_v12 = vrot.slane %v1543_v63, 4 }
 0x2ba   : > { %v1531_v11 = vadd.f32 %v1498_v44, %v1441_v48  ;;  %v1560_v19 = vrot.slane %v1544_v61, 4  ;;  %v1599_v38 = vmul.f32 %v7503_v3, %v9603_v26  ;;  %v1600_v33 = vmul.f32 %v9644_v25, %v7503_v3 }
 0x2bb   : > { %v1633_v8 = vrot.slane %v1597_v9, 5  ;;  %v1634_v50 = vrot.slane %v1598_v2, 5  ;;  %v1579_v34 = vadd.f32 %v1559_v12, %v1529_v23  ;;  %v1580_v35 = vadd.f32 %v1559_v12, %v1530_v28  ;;  %v7507_v9 = vld [vmem:[%s11127_s2 + $0x11] ss:$0 sm:$0xff] }
 0x2bc   : > { %v1581_v41 = vadd.f32 %v1560_v19, %v1531_v11  ;;  %v1582_v56 = vadd.f32 %v1560_v19, %v1532_v45  ;;  %v1636_v51 = vrot.slane %v1599_v38, 5  ;;  %v1637_v43 = vrot.slane %v1600_v33, 5 }
 0x2bd   : > { %v1635_v29 = vsel %vm960_vm5, %v1633_v8, %v1634_v50  ;;  %v1687_v62 = vmul.f32 %v7505_v5, %v9528_v36  ;;  %v1669_v24 = vadd.f32 %v1633_v8, %v1579_v34  ;;  %v1688_v16 = vmul.f32 %v7505_v5, %v9568_v6  ;;  %v7508_v8 = vld [vmem:[%s11127_s2 + $0x12] ss:$0 sm:$0xff] }
 0x2be   : > { %v1670_v47 = vadd.f32 %v1635_v29, %v1580_v35  ;;  %v1689_v4 = vmul.f32 %v7505_v5, %v9603_v26  ;;  %v1638_v1 = vsel %vm960_vm5, %v1636_v51, %v1637_v43  ;;  %v1671_v52 = vadd.f32 %v1636_v51, %v1581_v41  ;;  %v9682_v41 = vld [vmem:[#allocation2 + $0xb0] sm:$0xff] }
 0x2bf   : > { %v1690_v21 = vmul.f32 %v7505_v5, %v9644_v25  ;;  %v1723_v32 = vrot.slane %v1687_v62, 6  ;;  %v1672_v58 = vadd.f32 %v1638_v1, %v1582_v56  ;;  %v1724_v42 = vrot.slane %v1688_v16, 6  ;;  %v7511_v29 = vld [vmem:[%s11127_s2 + $0x13] ss:$0 sm:$0xff] }
 0x2c0   : > { %v1726_v20 = vrot.slane %v1689_v4, 6  ;;  %v1777_v22 = vmul.f32 %v7506_v60, %v9528_v36  ;;  %v1778_v37 = vmul.f32 %v7506_v60, %v9568_v6  ;;  %v1779_v0 = vmul.f32 %v7506_v60, %v9603_v26 }
 0x2c1   : > { %v1727_v13 = vrot.slane %v1690_v21, 6  ;;  %v1759_v54 = vadd.f32 %v1723_v32, %v1669_v24  ;;  %v1725_v53 = vsel %vm1051_vm6, %v1723_v32, %v1724_v42  ;;  %v1780_v27 = vmul.f32 %v7506_v60, %v9644_v25 }
 0x2c2   : > { %v1761_v46 = vadd.f32 %v1726_v20, %v1671_v52  ;;  %v1813_v48 = vrot.slane %v1777_v22, 7  ;;  %v1760_v59 = vadd.f32 %v1725_v53, %v1670_v47  ;;  %v1814_v39 = vrot.slane %v1778_v37, 7  ;;  %v7513_v53 = vld [vmem:[%s11127_s2 + $0x15] ss:$0 sm:$0xff] }
 0x2c3   : > { %v1728_v49 = vsel %vm1051_vm6, %v1726_v20, %v1727_v13  ;;  %v1816_v57 = vrot.slane %v1779_v0, 7  ;;  %v1817_v61 = vrot.slane %v1780_v27, 7  ;;  %v1867_v2 = vmul.f32 %v7507_v9, %v9528_v36 }
 0x2c4   : > { %v1762_v63 = vadd.f32 %v1728_v49, %v1672_v58  ;;  %v1849_v3 = vadd.f32 %v1813_v48, %v1759_v54  ;;  %v1815_v30 = vsel %vm1142_vm7, %v1813_v48, %v1814_v39  ;;  %v1868_v28 = vmul.f32 %v7507_v9, %v9568_v6  ;;  %v9679_v6 = vld [vmem:[#allocation2 + $0xa8] sm:$0xff]  ;;  %v7512_v58 = vld [vmem:[%s11127_s2 + $0x14] ss:$0 sm:$0xff] }
 0x2c5   : > { %v1851_v44 = vadd.f32 %v1816_v57, %v1761_v46  ;;  %v1869_v45 = vmul.f32 %v7507_v9, %v9603_v26  ;;  %v1818_v23 = vsel %vm1142_vm7, %v1816_v57, %v1817_v61  ;;  %v1850_v11 = vadd.f32 %v1815_v30, %v1760_v59 }
 0x2c6   : > { %v1870_v12 = vmul.f32 %v7507_v9, %v9644_v25  ;;  %v1883_v19 = vadd.f32 %v1867_v2, %v1849_v3  ;;  %v1852_v38 = vadd.f32 %v1818_v23, %v1762_v63  ;;  %v1901_v36 = vmul.f32 %v7508_v8, %v9600_v40 }
 0x2c7   : > { %v1885_v33 = vadd.f32 %v1869_v45, %v1851_v44  ;;  %v1902_v50 = vmul.f32 %v7508_v8, %v9603_v26  ;;  %v1884_v34 = vadd.f32 %v1868_v28, %v1850_v11  ;;  %v1903_v35 = vmul.f32 %v9679_v6, %v7508_v8 }
 0x2c8   : > { %v1904_v56 = vmul.f32 %v9682_v41, %v7508_v8  ;;  %v1935_v51 = vmul.f32 %v7511_v29, %v9600_v40  ;;  %v1886_v43 = vadd.f32 %v1870_v12, %v1852_v38  ;;  %v1917_v5 = vadd.f32 %v1901_v36, %v1883_v19  ;;  %v7514_v38 = vld [vmem:[%s11127_s2 + $0x16] ss:$0 sm:$0xff]  ;;  %v7515_v36 = vld [vmem:[%s11127_s2 + $0x17] ss:$0 sm:$0xff] }
 0x2c9   : > { %v1936_v62 = vmul.f32 %v7511_v29, %v9603_v26  ;;  %v1937_v24 = vmul.f32 %v7511_v29, %v9679_v6  ;;  %v1918_v47 = vadd.f32 %v1902_v50, %v1884_v34  ;;  %v1919_v16 = vadd.f32 %v1903_v35, %v1885_v33 }
 0x2ca   : > { %v1938_v4 = vmul.f32 %v7511_v29, %v9682_v41  ;;  %v1971_v1 = vrot.slane %v1935_v51, 1  ;;  %v1920_v52 = vadd.f32 %v1904_v56, %v1886_v43  ;;  %v2025_v42 = vmul.f32 %v7512_v58, %v9600_v40 }
 0x2cb   : > { %v1972_v21 = vrot.slane %v1936_v62, 1  ;;  %v1974_v32 = vrot.slane %v1937_v24, 1  ;;  %v2026_v60 = vmul.f32 %v7512_v58, %v9603_v26  ;;  %v2027_v22 = vmul.f32 %v7512_v58, %v9679_v6 }
 0x2cc   : > { %v1975_v20 = vrot.slane %v1938_v4, 1  ;;  %v2028_v13 = vmul.f32 %v7512_v58, %v9682_v41  ;;  %v2061_v0 = vrot.slane %v2025_v42, 2  ;;  %v2115_v46 = vmul.f32 %v7513_v53, %v9600_v40 }
 0x2cd   : > { %v1973_v54 = vsel %vm637_vm1, %v1971_v1, %v1972_v21  ;;  %v2008_v37 = vadd.f32 %v1972_v21, %v1918_v47  ;;  %v2062_v59 = vrot.slane %v2026_v60, 2  ;;  %v2064_v57 = vrot.slane %v2027_v22, 2 }
 0x2ce   : > { %v1976_v27 = vsel %vm637_vm1, %v1974_v32, %v1975_v20  ;;  %v2007_v48 = vadd.f32 %v1973_v54, %v1917_v5  ;;  %v2010_v49 = vadd.f32 %v1975_v20, %v1920_v52  ;;  %v2065_v63 = vrot.slane %v2028_v13, 2  ;;  %v7517_v13 = vld [vmem:[%s11127_s2 + $0x18] ss:$0 sm:$0xff] }
 0x2cf   : > { %v2009_v39 = vadd.f32 %v1976_v27, %v1919_v16  ;;  %v2116_v61 = vmul.f32 %v7513_v53, %v9603_v26  ;;  %v2063_v3 = vsel %vm728_vm2, %v2061_v0, %v2062_v59  ;;  %v2098_v9 = vadd.f32 %v2062_v59, %v2008_v37  ;;  %v9723_v16 = vld [vmem:[#allocation2 + $0xb8] sm:$0xf] }
 0x2d0   : > { %v2117_v2 = vmul.f32 %v7513_v53, %v9679_v6  ;;  %v2118_v30 = vmul.f32 %v7513_v53, %v9682_v41  ;;  %v2066_v44 = vsel %vm728_vm2, %v2064_v57, %v2065_v63  ;;  %v2097_v40 = vadd.f32 %v2063_v3, %v2007_v48 }
 0x2d1   : > { %v2100_v28 = vadd.f32 %v2065_v63, %v2010_v49  ;;  %v2151_v45 = vrot.slane %v2115_v46, 3  ;;  %v2099_v23 = vadd.f32 %v2066_v44, %v2009_v39  ;;  %v2152_v11 = vrot.slane %v2116_v61, 3  ;;  %v7518_v61 = vld [vmem:[%s11127_s2 + $0x19] ss:$0 sm:$0xff] }
 0x2d2   : > { %v2154_v12 = vrot.slane %v2117_v2, 3  ;;  %v2155_v19 = vrot.slane %v2118_v30, 3  ;;  %v2201_v33 = vmul.f32 %v7514_v38, %v9603_v26  ;;  %v2202_v8 = vmul.f32 %v7514_v38, %v9682_v41 }
 0x2d3   : > { %v2255_v50 = vmul.f32 %v7515_v36, %v9603_v26  ;;  %v2256_v34 = vmul.f32 %v7515_v36, %v9644_v25  ;;  %v2153_v35 = vsel %vm819_vm3, %v2151_v45, %v2152_v11  ;;  %v2188_v29 = vadd.f32 %v2152_v11, %v2098_v9 }
 0x2d4   : > { %v2156_v56 = vsel %vm819_vm3, %v2154_v12, %v2155_v19  ;;  %v2190_v51 = vadd.f32 %v2155_v19, %v2100_v28  ;;  %v2187_v43 = vadd.f32 %v2153_v35, %v2097_v40  ;;  %v2217_v62 = vrot.slane %v2201_v33, 4 }
 0x2d5   : > { %v2189_v5 = vadd.f32 %v2156_v56, %v2099_v23  ;;  %v2218_v24 = vrot.slane %v2202_v8, 4  ;;  %v2257_v47 = vmul.f32 %v7515_v36, %v9682_v41  ;;  %v2258_v4 = vmul.f32 %v9723_v16, %v7515_v36 }
 0x2d6   : > { %v2291_v1 = vrot.slane %v2255_v50, 5  ;;  %v2292_v52 = vrot.slane %v2256_v34, 5  ;;  %v2237_v21 = vadd.f32 %v2217_v62, %v2187_v43  ;;  %v2238_v32 = vadd.f32 %v2217_v62, %v2188_v29  ;;  %v7519_v50 = vld [vmem:[%s11127_s2 + $0x1a] ss:$0 sm:$0xff] }
 0x2d7   : > { %v2239_v58 = vadd.f32 %v2218_v24, %v2189_v5  ;;  %v2240_v42 = vadd.f32 %v2218_v24, %v2190_v51  ;;  %v2294_v60 = vrot.slane %v2257_v47, 5  ;;  %v2295_v22 = vrot.slane %v2258_v4, 5 }
 0x2d8   : > { %v2293_v20 = vsel %vm960_vm5, %v2291_v1, %v2292_v52  ;;  %v2345_v54 = vmul.f32 %v7517_v13, %v9603_v26  ;;  %v2327_v37 = vadd.f32 %v2291_v1, %v2237_v21  ;;  %v2346_v53 = vmul.f32 %v7517_v13, %v9644_v25  ;;  %v7520_v1 = vld [vmem:[%s11127_s2 + $0x1b] ss:$0 sm:$0xff] }
 0x2d9   : > { %v2328_v0 = vadd.f32 %v2293_v20, %v2238_v32  ;;  %v2347_v46 = vmul.f32 %v7517_v13, %v9682_v41  ;;  %v2296_v27 = vsel %vm960_vm5, %v2294_v60, %v2295_v22  ;;  %v2329_v48 = vadd.f32 %v2294_v60, %v2239_v58  ;;  %v9761_v58 = vld [vmem:[#allocation2 + $0xc8] sm:$0xff]  ;;  %v7523_v20 = vld [vmem:[%s11127_s2 + $0x1c] ss:$0 sm:$0xff] }
 0x2da   : > { %v2348_v49 = vmul.f32 %v7517_v13, %v9723_v16  ;;  %v2381_v59 = vrot.slane %v2345_v54, 6  ;;  %v2330_v39 = vadd.f32 %v2296_v27, %v2240_v42  ;;  %v2382_v57 = vrot.slane %v2346_v53, 6 }
 0x2db   : > { %v2384_v63 = vrot.slane %v2347_v46, 6  ;;  %v2435_v3 = vmul.f32 %v7518_v61, %v9603_v26  ;;  %v2436_v30 = vmul.f32 %v7518_v61, %v9644_v25  ;;  %v2437_v44 = vmul.f32 %v7518_v61, %v9682_v41 }
 0x2dc   : > { %v2385_v9 = vrot.slane %v2348_v49, 6  ;;  %v2417_v2 = vadd.f32 %v2381_v59, %v2327_v37  ;;  %v2383_v40 = vsel %vm1051_vm6, %v2381_v59, %v2382_v57  ;;  %v2438_v45 = vmul.f32 %v7518_v61, %v9723_v16 }
 0x2dd   : > { %v2419_v28 = vadd.f32 %v2384_v63, %v2329_v48  ;;  %v2471_v23 = vrot.slane %v2435_v3, 7  ;;  %v2418_v12 = vadd.f32 %v2383_v40, %v2328_v0  ;;  %v2472_v19 = vrot.slane %v2436_v30, 7  ;;  %v7525_v40 = vld [vmem:[%s11127_s2 + $0x1e] ss:$0 sm:$0xff] }
 0x2de   : > { %v2386_v11 = vsel %vm1051_vm6, %v2384_v63, %v2385_v9  ;;  %v2474_v38 = vrot.slane %v2437_v44, 7  ;;  %v2475_v8 = vrot.slane %v2438_v45, 7  ;;  %v2525_v34 = vmul.f32 %v7519_v50, %v9603_v26 }
 0x2df   : > { %v2420_v33 = vadd.f32 %v2386_v11, %v2330_v39  ;;  %v2507_v36 = vadd.f32 %v2471_v23, %v2417_v2  ;;  %v2473_v35 = vsel %vm1142_vm7, %v2471_v23, %v2472_v19  ;;  %v2526_v29 = vmul.f32 %v7519_v50, %v9644_v25  ;;  %v9758_v25 = vld [vmem:[#allocation2 + $0xc0] sm:$0xff]  ;;  %v7524_v39 = vld [vmem:[%s11127_s2 + $0x1d] ss:$0 sm:$0xff] }
 0x2e0   : > { %v2509_v56 = vadd.f32 %v2474_v38, %v2419_v28  ;;  %v2527_v51 = vmul.f32 %v7519_v50, %v9682_v41  ;;  %v2476_v43 = vsel %vm1142_vm7, %v2474_v38, %v2475_v8  ;;  %v2508_v5 = vadd.f32 %v2473_v35, %v2418_v12 }
 0x2e1   : > { %v2528_v62 = vmul.f32 %v7519_v50, %v9723_v16  ;;  %v2541_v24 = vadd.f32 %v2525_v34, %v2507_v36  ;;  %v2510_v47 = vadd.f32 %v2476_v43, %v2420_v33  ;;  %v2559_v26 = vmul.f32 %v7520_v1, %v9679_v6 }
 0x2e2   : > { %v2543_v4 = vadd.f32 %v2527_v51, %v2509_v56  ;;  %v2560_v52 = vmul.f32 %v7520_v1, %v9682_v41  ;;  %v2542_v21 = vadd.f32 %v2526_v29, %v2508_v5  ;;  %v2561_v32 = vmul.f32 %v9758_v25, %v7520_v1 }
 0x2e3   : > { %v2562_v42 = vmul.f32 %v9761_v58, %v7520_v1  ;;  %v2593_v60 = vmul.f32 %v7523_v20, %v9679_v6  ;;  %v2544_v22 = vadd.f32 %v2528_v62, %v2510_v47  ;;  %v2575_v13 = vadd.f32 %v2559_v26, %v2541_v24  ;;  %v7526_v47 = vld [vmem:[%s11127_s2 + $0x1f] ss:$0 sm:$0xff]  ;;  %v7527_v26 = vld [vmem:[%s11127_s2 + $0x20] ss:$0 sm:$0xff] }
 0x2e4   : > { %v2594_v54 = vmul.f32 %v7523_v20, %v9682_v41  ;;  %v2595_v37 = vmul.f32 %v7523_v20, %v9758_v25  ;;  %v2576_v0 = vadd.f32 %v2560_v52, %v2542_v21  ;;  %v2577_v53 = vadd.f32 %v2561_v32, %v2543_v4 }
 0x2e5   : > { %v2596_v46 = vmul.f32 %v7523_v20, %v9761_v58  ;;  %v2629_v27 = vrot.slane %v2593_v60, 1  ;;  %v2578_v48 = vadd.f32 %v2562_v42, %v2544_v22  ;;  %v2683_v57 = vmul.f32 %v7524_v39, %v9679_v6 }
 0x2e6   : > { %v2630_v49 = vrot.slane %v2594_v54, 1  ;;  %v2632_v59 = vrot.slane %v2595_v37, 1  ;;  %v2684_v61 = vmul.f32 %v7524_v39, %v9682_v41  ;;  %v2685_v3 = vmul.f32 %v7524_v39, %v9758_v25 }
 0x2e7   : > { %v2633_v63 = vrot.slane %v2596_v46, 1  ;;  %v2686_v9 = vmul.f32 %v7524_v39, %v9761_v58  ;;  %v2719_v44 = vrot.slane %v2683_v57, 2  ;;  %v2773_v28 = vmul.f32 %v7525_v40, %v9679_v6 }
 0x2e8   : > { %v2631_v2 = vsel %vm637_vm1, %v2629_v27, %v2630_v49  ;;  %v2666_v30 = vadd.f32 %v2630_v49, %v2576_v0  ;;  %v2720_v12 = vrot.slane %v2684_v61, 2  ;;  %v2722_v38 = vrot.slane %v2685_v3, 2 }
 0x2e9   : > { %v2634_v45 = vsel %vm637_vm1, %v2632_v59, %v2633_v63  ;;  %v2665_v23 = vadd.f32 %v2631_v2, %v2575_v13  ;;  %v2668_v11 = vadd.f32 %v2633_v63, %v2578_v48  ;;  %v2723_v33 = vrot.slane %v2686_v9, 2  ;;  %v7529_v9 = vld [vmem:[%s11127_s2 + $0x21] ss:$0 sm:$0xff] }
 0x2ea   : > { %v2667_v19 = vadd.f32 %v2634_v45, %v2577_v53  ;;  %v2774_v8 = vmul.f32 %v7525_v40, %v9682_v41  ;;  %v2721_v36 = vsel %vm728_vm2, %v2719_v44, %v2720_v12  ;;  %v2756_v50 = vadd.f32 %v2720_v12, %v2666_v30  ;;  %v9802_v53 = vld [vmem:[#allocation2 + $0xd0] sm:$0xf] }
 0x2eb   : > { %v2775_v34 = vmul.f32 %v7525_v40, %v9758_v25  ;;  %v2776_v35 = vmul.f32 %v7525_v40, %v9761_v58  ;;  %v2724_v56 = vsel %vm728_vm2, %v2722_v38, %v2723_v33  ;;  %v2755_v6 = vadd.f32 %v2721_v36, %v2665_v23 }
 0x2ec   : > { %v2758_v29 = vadd.f32 %v2723_v33, %v2668_v11  ;;  %v2809_v51 = vrot.slane %v2773_v28, 3  ;;  %v2757_v43 = vadd.f32 %v2724_v56, %v2667_v19  ;;  %v2810_v5 = vrot.slane %v2774_v8, 3  ;;  %v7530_v8 = vld [vmem:[%s11127_s2 + $0x22] ss:$0 sm:$0xff] }
 0x2ed   : > { %v2812_v62 = vrot.slane %v2775_v34, 3  ;;  %v2813_v24 = vrot.slane %v2776_v35, 3  ;;  %v2859_v4 = vmul.f32 %v7526_v47, %v9682_v41  ;;  %v2860_v1 = vmul.f32 %v7526_v47, %v9761_v58 }
 0x2ee   : > { %v2913_v52 = vmul.f32 %v7527_v26, %v9682_v41  ;;  %v2914_v21 = vmul.f32 %v7527_v26, %v9723_v16  ;;  %v2811_v32 = vsel %vm819_vm3, %v2809_v51, %v2810_v5  ;;  %v2846_v20 = vadd.f32 %v2810_v5, %v2756_v50 }
 0x2ef   : > { %v2814_v42 = vsel %vm819_vm3, %v2812_v62, %v2813_v24  ;;  %v2848_v60 = vadd.f32 %v2813_v24, %v2758_v29  ;;  %v2845_v22 = vadd.f32 %v2811_v32, %v2755_v6  ;;  %v2875_v54 = vrot.slane %v2859_v4, 4 }
 0x2f0   : > { %v2847_v13 = vadd.f32 %v2814_v42, %v2757_v43  ;;  %v2876_v37 = vrot.slane %v2860_v1, 4  ;;  %v2915_v0 = vmul.f32 %v7527_v26, %v9761_v58  ;;  %v2916_v46 = vmul.f32 %v9802_v53, %v7527_v26 }
 0x2f1   : > { %v2949_v27 = vrot.slane %v2913_v52, 5  ;;  %v2950_v48 = vrot.slane %v2914_v21, 5  ;;  %v2895_v49 = vadd.f32 %v2875_v54, %v2845_v22  ;;  %v2896_v59 = vadd.f32 %v2875_v54, %v2846_v20  ;;  %v7531_v52 = vld [vmem:[%s11127_s2 + $0x23] ss:$0 sm:$0xff] }
 0x2f2   : > { %v2897_v39 = vadd.f32 %v2876_v37, %v2847_v13  ;;  %v2898_v57 = vadd.f32 %v2876_v37, %v2848_v60  ;;  %v2952_v61 = vrot.slane %v2915_v0, 5  ;;  %v2953_v3 = vrot.slane %v2916_v46, 5 }
 0x2f3   : > { %v2951_v63 = vsel %vm960_vm5, %v2949_v27, %v2950_v48  ;;  %v3003_v2 = vmul.f32 %v7529_v9, %v9682_v41  ;;  %v2985_v30 = vadd.f32 %v2949_v27, %v2895_v49  ;;  %v3004_v40 = vmul.f32 %v7529_v9, %v9723_v16  ;;  %v7532_v27 = vld [vmem:[%s11127_s2 + $0x24] ss:$0 sm:$0xff] }
 0x2f4   : > { %v2986_v44 = vadd.f32 %v2951_v63, %v2896_v59  ;;  %v3005_v28 = vmul.f32 %v7529_v9, %v9761_v58  ;;  %v2954_v45 = vsel %vm960_vm5, %v2952_v61, %v2953_v3  ;;  %v2987_v23 = vadd.f32 %v2952_v61, %v2897_v39  ;;  %v9840_v39 = vld [vmem:[#allocation2 + $0xe0] sm:$0xff] }
 0x2f5   : > { %v3006_v11 = vmul.f32 %v7529_v9, %v9802_v53  ;;  %v3039_v12 = vrot.slane %v3003_v2, 6  ;;  %v2988_v19 = vadd.f32 %v2954_v45, %v2898_v57  ;;  %v3040_v38 = vrot.slane %v3004_v40, 6  ;;  %v7535_v63 = vld [vmem:[%s11127_s2 + $0x25] ss:$0 sm:$0xff] }
 0x2f6   : > { %v3042_v33 = vrot.slane %v3005_v28, 6  ;;  %v3093_v36 = vmul.f32 %v7530_v8, %v9682_v41  ;;  %v3094_v35 = vmul.f32 %v7530_v8, %v9723_v16  ;;  %v3095_v56 = vmul.f32 %v7530_v8, %v9761_v58 }
 0x2f7   : > { %v3043_v50 = vrot.slane %v3006_v11, 6  ;;  %v3075_v34 = vadd.f32 %v3039_v12, %v2985_v30  ;;  %v3041_v6 = vsel %vm1051_vm6, %v3039_v12, %v3040_v38  ;;  %v3096_v51 = vmul.f32 %v7530_v8, %v9802_v53 }
 0x2f8   : > { %v3077_v29 = vadd.f32 %v3042_v33, %v2987_v23  ;;  %v3129_v43 = vrot.slane %v3093_v36, 7  ;;  %v3076_v62 = vadd.f32 %v3041_v6, %v2986_v44  ;;  %v3130_v24 = vrot.slane %v3094_v35, 7  ;;  %v7537_v6 = vld [vmem:[%s11127_s2 + $0x27] ss:$0 sm:$0xff] }
 0x2f9   : > { %v3044_v5 = vsel %vm1051_vm6, %v3042_v33, %v3043_v50  ;;  %v3132_v47 = vrot.slane %v3095_v56, 7  ;;  %v3133_v1 = vrot.slane %v3096_v51, 7  ;;  %v3183_v21 = vmul.f32 %v7531_v52, %v9682_v41 }
 0x2fa   : > { %v3078_v4 = vadd.f32 %v3044_v5, %v2988_v19  ;;  %v3165_v26 = vadd.f32 %v3129_v43, %v3075_v34  ;;  %v3131_v32 = vsel %vm1142_vm7, %v3129_v43, %v3130_v24  ;;  %v3184_v20 = vmul.f32 %v7531_v52, %v9723_v16  ;;  %v9837_v16 = vld [vmem:[#allocation2 + $0xd8] sm:$0xff]  ;;  %v7536_v19 = vld [vmem:[%s11127_s2 + $0x26] ss:$0 sm:$0xff] }
 0x2fb   : > { %v3167_v42 = vadd.f32 %v3132_v47, %v3077_v29  ;;  %v3185_v60 = vmul.f32 %v7531_v52, %v9761_v58  ;;  %v3134_v22 = vsel %vm1142_vm7, %v3132_v47, %v3133_v1  ;;  %v3166_v13 = vadd.f32 %v3131_v32, %v3076_v62 }
 0x2fc   : > { %v3186_v54 = vmul.f32 %v7531_v52, %v9802_v53  ;;  %v3199_v37 = vadd.f32 %v3183_v21, %v3165_v26  ;;  %v3168_v0 = vadd.f32 %v3134_v22, %v3078_v4  ;;  %v3217_v41 = vmul.f32 %v7532_v27, %v9758_v25 }
 0x2fd   : > { %v3201_v46 = vadd.f32 %v3185_v60, %v3167_v42  ;;  %v3218_v48 = vmul.f32 %v7532_v27, %v9761_v58  ;;  %v3200_v49 = vadd.f32 %v3184_v20, %v3166_v13  ;;  %v3219_v59 = vmul.f32 %v9837_v16, %v7532_v27 }
 0x2fe   : > { %v3220_v57 = vmul.f32 %v9840_v39, %v7532_v27  ;;  %v3251_v61 = vmul.f32 %v7535_v63, %v9758_v25  ;;  %v3202_v3 = vadd.f32 %v3186_v54, %v3168_v0  ;;  %v3233_v9 = vadd.f32 %v3217_v41, %v3199_v37  ;;  %v7538_v0 = vld [vmem:[%s11127_s2 + $0x28] ss:$0 sm:$0xff]  ;;  %v7539_v41 = vld [vmem:[%s11127_s2 + $0x29] ss:$0 sm:$0xff] }
 0x2ff   : > { %v3252_v2 = vmul.f32 %v7535_v63, %v9761_v58  ;;  %v3253_v30 = vmul.f32 %v7535_v63, %v9837_v16  ;;  %v3234_v44 = vadd.f32 %v3218_v48, %v3200_v49  ;;  %v3235_v40 = vadd.f32 %v3219_v59, %v3201_v46 }
 0x300   : > { %v3254_v28 = vmul.f32 %v7535_v63, %v9840_v39  ;;  %v3287_v45 = vrot.slane %v3251_v61, 1  ;;  %v3236_v23 = vadd.f32 %v3220_v57, %v3202_v3  ;;  %v3341_v38 = vmul.f32 %v7536_v19, %v9758_v25 }
 0x301   : > { %v3288_v11 = vrot.slane %v3252_v2, 1  ;;  %v3290_v12 = vrot.slane %v3253_v30, 1  ;;  %v3342_v8 = vmul.f32 %v7536_v19, %v9761_v58  ;;  %v3343_v36 = vmul.f32 %v7536_v19, %v9837_v16 }
 0x302   : > { %v3291_v33 = vrot.slane %v3254_v28, 1  ;;  %v3344_v50 = vmul.f32 %v7536_v19, %v9840_v39  ;;  %v3377_v56 = vrot.slane %v3341_v38, 2  ;;  %v3431_v29 = vmul.f32 %v7537_v6, %v9758_v25 }
 0x303   : > { %v3289_v34 = vsel %vm637_vm1, %v3287_v45, %v3288_v11  ;;  %v3324_v35 = vadd.f32 %v3288_v11, %v3234_v44  ;;  %v3378_v62 = vrot.slane %v3342_v8, 2  ;;  %v3380_v47 = vrot.slane %v3343_v36, 2 }
 0x304   : > { %v3292_v51 = vsel %vm637_vm1, %v3290_v12, %v3291_v33  ;;  %v3323_v43 = vadd.f32 %v3289_v34, %v3233_v9  ;;  %v3326_v5 = vadd.f32 %v3291_v33, %v3236_v23  ;;  %v3381_v4 = vrot.slane %v3344_v50, 2  ;;  %v7541_v50 = vld [vmem:[%s11127_s2 + $0x2a] ss:$0 sm:$0xff] }
 0x305   : > { %v3325_v24 = vadd.f32 %v3292_v51, %v3235_v40  ;;  %v3432_v1 = vmul.f32 %v7537_v6, %v9761_v58  ;;  %v3379_v26 = vsel %vm728_vm2, %v3377_v56, %v3378_v62  ;;  %v3414_v52 = vadd.f32 %v3378_v62, %v3324_v35  ;;  %v9881_v40 = vld [vmem:[#allocation2 + $0xe8] sm:$0xf] }
 0x306   : > { %v3433_v21 = vmul.f32 %v7537_v6, %v9837_v16  ;;  %v3434_v32 = vmul.f32 %v7537_v6, %v9840_v39  ;;  %v3382_v42 = vsel %vm728_vm2, %v3380_v47, %v3381_v4  ;;  %v3413_v25 = vadd.f32 %v3379_v26, %v3323_v43 }
 0x307   : > { %v3416_v20 = vadd.f32 %v3381_v4, %v3326_v5  ;;  %v3467_v60 = vrot.slane %v3431_v29, 3  ;;  %v3415_v22 = vadd.f32 %v3382_v42, %v3325_v24  ;;  %v3468_v13 = vrot.slane %v3432_v1, 3  ;;  %v7542_v1 = vld [vmem:[%s11127_s2 + $0x2b] ss:$0 sm:$0xff] }
 0x308   : > { %v3470_v54 = vrot.slane %v3433_v21, 3  ;;  %v3471_v37 = vrot.slane %v3434_v32, 3  ;;  %v3517_v46 = vmul.f32 %v7538_v0, %v9761_v58  ;;  %v3518_v27 = vmul.f32 %v7538_v0, %v9840_v39 }
 0x309   : > { %v3571_v48 = vmul.f32 %v7539_v41, %v9761_v58  ;;  %v3572_v49 = vmul.f32 %v7539_v41, %v9802_v53  ;;  %v3469_v59 = vsel %vm819_vm3, %v3467_v60, %v3468_v13  ;;  %v3504_v63 = vadd.f32 %v3468_v13, %v3414_v52 }
 0x30a   : > { %v3472_v57 = vsel %vm819_vm3, %v3470_v54, %v3471_v37  ;;  %v3506_v61 = vadd.f32 %v3471_v37, %v3416_v20  ;;  %v3503_v3 = vadd.f32 %v3469_v59, %v3413_v25  ;;  %v3533_v2 = vrot.slane %v3517_v46, 4 }
 0x30b   : > { %v3505_v9 = vadd.f32 %v3472_v57, %v3415_v22  ;;  %v3534_v30 = vrot.slane %v3518_v27, 4  ;;  %v3573_v44 = vmul.f32 %v7539_v41, %v9840_v39  ;;  %v3574_v28 = vmul.f32 %v9881_v40, %v7539_v41 }
 0x30c   : > { %v3607_v45 = vrot.slane %v3571_v48, 5  ;;  %v3608_v23 = vrot.slane %v3572_v49, 5  ;;  %v3553_v11 = vadd.f32 %v3533_v2, %v3503_v3  ;;  %v3554_v12 = vadd.f32 %v3533_v2, %v3504_v63  ;;  %v7543_v48 = vld [vmem:[%s11127_s2 + $0x2c] ss:$0 sm:$0xff] }
 0x30d   : > { %v3555_v19 = vadd.f32 %v3534_v30, %v3505_v9  ;;  %v3556_v38 = vadd.f32 %v3534_v30, %v3506_v61  ;;  %v3610_v8 = vrot.slane %v3573_v44, 5  ;;  %v3611_v36 = vrot.slane %v3574_v28, 5 }
 0x30e   : > { %v3609_v33 = vsel %vm960_vm5, %v3607_v45, %v3608_v23  ;;  %v3661_v34 = vmul.f32 %v7541_v50, %v9761_v58  ;;  %v3643_v35 = vadd.f32 %v3607_v45, %v3553_v11  ;;  %v3662_v6 = vmul.f32 %v7541_v50, %v9802_v53  ;;  %v7544_v45 = vld [vmem:[%s11127_s2 + $0x2d] ss:$0 sm:$0xff] }
 0x30f   : > { %v3644_v56 = vadd.f32 %v3609_v33, %v3554_v12  ;;  %v3663_v29 = vmul.f32 %v7541_v50, %v9840_v39  ;;  %v3612_v51 = vsel %vm960_vm5, %v3610_v8, %v3611_v36  ;;  %v3645_v43 = vadd.f32 %v3610_v8, %v3555_v19  ;;  %v9919_v19 = vld [vmem:[#allocation2 + $0xf8] sm:$0xff]  ;;  %v7547_v33 = vld [vmem:[%s11127_s2 + $0x2e] ss:$0 sm:$0xff] }
 0x310   : > { %v3664_v5 = vmul.f32 %v7541_v50, %v9881_v40  ;;  %v3697_v62 = vrot.slane %v3661_v34, 6  ;;  %v3646_v24 = vadd.f32 %v3612_v51, %v3556_v38  ;;  %v3698_v47 = vrot.slane %v3662_v6, 6 }
 0x311   : > { %v3700_v4 = vrot.slane %v3663_v29, 6  ;;  %v3751_v26 = vmul.f32 %v7542_v1, %v9761_v58  ;;  %v3752_v32 = vmul.f32 %v7542_v1, %v9802_v53  ;;  %v3753_v42 = vmul.f32 %v7542_v1, %v9840_v39 }
 0x312   : > { %v3701_v52 = vrot.slane %v3664_v5, 6  ;;  %v3733_v21 = vadd.f32 %v3697_v62, %v3643_v35  ;;  %v3699_v25 = vsel %vm1051_vm6, %v3697_v62, %v3698_v47  ;;  %v3754_v60 = vmul.f32 %v7542_v1, %v9881_v40 }
 0x313   : > { %v3735_v20 = vadd.f32 %v3700_v4, %v3645_v43  ;;  %v3787_v22 = vrot.slane %v3751_v26, 7  ;;  %v3734_v54 = vadd.f32 %v3699_v25, %v3644_v56  ;;  %v3788_v37 = vrot.slane %v3752_v32, 7  ;;  %v7549_v25 = vld [vmem:[%s11127_s2 + $0x30] ss:$0 sm:$0xff] }
 0x314   : > { %v3702_v13 = vsel %vm1051_vm6, %v3700_v4, %v3701_v52  ;;  %v3790_v0 = vrot.slane %v3753_v42, 7  ;;  %v3791_v27 = vrot.slane %v3754_v60, 7  ;;  %v3841_v49 = vmul.f32 %v7543_v48, %v9761_v58 }
 0x315   : > { %v3736_v46 = vadd.f32 %v3702_v13, %v3646_v24  ;;  %v3823_v41 = vadd.f32 %v3787_v22, %v3733_v21  ;;  %v3789_v59 = vsel %vm1142_vm7, %v3787_v22, %v3788_v37  ;;  %v3842_v63 = vmul.f32 %v7543_v48, %v9802_v53  ;;  %v9916_v53 = vld [vmem:[#allocation2 + $0xf0] sm:$0xff]  ;;  %v7548_v24 = vld [vmem:[%s11127_s2 + $0x2f] ss:$0 sm:$0xff] }
 0x316   : > { %v3825_v57 = vadd.f32 %v3790_v0, %v3735_v20  ;;  %v3843_v61 = vmul.f32 %v7543_v48, %v9840_v39  ;;  %v3792_v3 = vsel %vm1142_vm7, %v3790_v0, %v3791_v27  ;;  %v3824_v9 = vadd.f32 %v3789_v59, %v3734_v54 }
 0x317   : > { %v3844_v2 = vmul.f32 %v7543_v48, %v9881_v40  ;;  %v3857_v30 = vadd.f32 %v3841_v49, %v3823_v41  ;;  %v3826_v44 = vadd.f32 %v3792_v3, %v3736_v46  ;;  %v3875_v58 = vmul.f32 %v7544_v45, %v9837_v16 }
 0x318   : > { %v3859_v28 = vadd.f32 %v3843_v61, %v3825_v57  ;;  %v3876_v23 = vmul.f32 %v7544_v45, %v9840_v39  ;;  %v3858_v11 = vadd.f32 %v3842_v63, %v3824_v9  ;;  %v3877_v12 = vmul.f32 %v9916_v53, %v7544_v45 }
 0x319   : > { %v3878_v38 = vmul.f32 %v9919_v19, %v7544_v45  ;;  %v3909_v8 = vmul.f32 %v7547_v33, %v9837_v16  ;;  %v3860_v36 = vadd.f32 %v3844_v2, %v3826_v44  ;;  %v3891_v50 = vadd.f32 %v3875_v58, %v3857_v30  ;;  %v7550_v44 = vld [vmem:[%s11127_s2 + $0x31] ss:$0 sm:$0xff]  ;;  %v7551_v58 = vld [vmem:[%s11127_s2 + $0x32] ss:$0 sm:$0xff] }
 0x31a   : > { %v3910_v34 = vmul.f32 %v7547_v33, %v9840_v39  ;;  %v3911_v35 = vmul.f32 %v7547_v33, %v9916_v53  ;;  %v3892_v56 = vadd.f32 %v3876_v23, %v3858_v11  ;;  %v3893_v6 = vadd.f32 %v3877_v12, %v3859_v28 }
 0x31b   : > { %v3912_v29 = vmul.f32 %v7547_v33, %v9919_v19  ;;  %v3945_v51 = vrot.slane %v3909_v8, 1  ;;  %v3894_v43 = vadd.f32 %v3878_v38, %v3860_v36  ;;  %v3999_v47 = vmul.f32 %v7548_v24, %v9837_v16 }
 0x31c   : > { %v3946_v5 = vrot.slane %v3910_v34, 1  ;;  %v3948_v62 = vrot.slane %v3911_v35, 1  ;;  %v4000_v1 = vmul.f32 %v7548_v24, %v9840_v39  ;;  %v4001_v26 = vmul.f32 %v7548_v24, %v9916_v53 }
 0x31d   : > { %v3949_v4 = vrot.slane %v3912_v29, 1  ;;  %v4002_v52 = vmul.f32 %v7548_v24, %v9919_v19  ;;  %v4035_v42 = vrot.slane %v3999_v47, 2  ;;  %v4089_v20 = vmul.f32 %v7549_v25, %v9837_v16 }
 0x31e   : > { %v3947_v21 = vsel %vm637_vm1, %v3945_v51, %v3946_v5  ;;  %v3982_v32 = vadd.f32 %v3946_v5, %v3892_v56  ;;  %v4036_v54 = vrot.slane %v4000_v1, 2  ;;  %v4038_v0 = vrot.slane %v4001_v26, 2 }
 0x31f   : > { %v3950_v60 = vsel %vm637_vm1, %v3948_v62, %v3949_v4  ;;  %v3981_v22 = vadd.f32 %v3947_v21, %v3891_v50  ;;  %v3984_v13 = vadd.f32 %v3949_v4, %v3894_v43  ;;  %v4039_v46 = vrot.slane %v4002_v52, 2  ;;  %v7553_v52 = vld [vmem:[%s11127_s2 + $0x33] ss:$0 sm:$0xff] }
 0x320   : > { %v3983_v37 = vadd.f32 %v3950_v60, %v3893_v6  ;;  %v4090_v27 = vmul.f32 %v7549_v25, %v9840_v39  ;;  %v4037_v41 = vsel %vm728_vm2, %v4035_v42, %v4036_v54  ;;  %v4072_v48 = vadd.f32 %v4036_v54, %v3982_v32  ;;  %v9960_v6 = vld [vmem:[#allocation2 + $0x100] sm:$0xf] }
 0x321   : > { %v4091_v49 = vmul.f32 %v7549_v25, %v9916_v53  ;;  %v4092_v59 = vmul.f32 %v7549_v25, %v9919_v19  ;;  %v4040_v57 = vsel %vm728_vm2, %v4038_v0, %v4039_v46  ;;  %v4071_v16 = vadd.f32 %v4037_v41, %v3981_v22 }
 0x322   : > { %v4074_v63 = vadd.f32 %v4039_v46, %v3984_v13  ;;  %v4125_v61 = vrot.slane %v4089_v20, 3  ;;  %v4073_v3 = vadd.f32 %v4040_v57, %v3983_v37  ;;  %v4126_v9 = vrot.slane %v4090_v27, 3  ;;  %v7554_v27 = vld [vmem:[%s11127_s2 + $0x34] ss:$0 sm:$0xff] }
 0x323   : > { %v4128_v2 = vrot.slane %v4091_v49, 3  ;;  %v4129_v30 = vrot.slane %v4092_v59, 3  ;;  %v4175_v28 = vmul.f32 %v7550_v44, %v9840_v39  ;;  %v4176_v45 = vmul.f32 %v7550_v44, %v9919_v19 }
 0x324   : > { %v4229_v23 = vmul.f32 %v7551_v58, %v9840_v39  ;;  %v4230_v11 = vmul.f32 %v7551_v58, %v9881_v40  ;;  %v4127_v12 = vsel %vm819_vm3, %v4125_v61, %v4126_v9  ;;  %v4162_v33 = vadd.f32 %v4126_v9, %v4072_v48 }
 0x325   : > { %v4130_v38 = vsel %vm819_vm3, %v4128_v2, %v4129_v30  ;;  %v4164_v8 = vadd.f32 %v4129_v30, %v4074_v63  ;;  %v4161_v36 = vadd.f32 %v4127_v12, %v4071_v16  ;;  %v4191_v34 = vrot.slane %v4175_v28, 4 }
 0x326   : > { %v4163_v50 = vadd.f32 %v4130_v38, %v4073_v3  ;;  %v4192_v35 = vrot.slane %v4176_v45, 4  ;;  %v4231_v56 = vmul.f32 %v7551_v58, %v9919_v19  ;;  %v4232_v29 = vmul.f32 %v9960_v6, %v7551_v58 }
 0x327   : > { %v4265_v51 = vrot.slane %v4229_v23, 5  ;;  %v4266_v43 = vrot.slane %v4230_v11, 5  ;;  %v4211_v5 = vadd.f32 %v4191_v34, %v4161_v36  ;;  %v4212_v62 = vadd.f32 %v4191_v34, %v4162_v33  ;;  %v7555_v23 = vld [vmem:[%s11127_s2 + $0x35] ss:$0 sm:$0xff] }
 0x328   : > { %v4213_v24 = vadd.f32 %v4192_v35, %v4163_v50  ;;  %v4214_v47 = vadd.f32 %v4192_v35, %v4164_v8  ;;  %v4268_v1 = vrot.slane %v4231_v56, 5  ;;  %v4269_v26 = vrot.slane %v4232_v29, 5 }
 0x329   : > { %v4267_v4 = vsel %vm960_vm5, %v4265_v51, %v4266_v43  ;;  %v4319_v21 = vmul.f32 %v7553_v52, %v9840_v39  ;;  %v4301_v32 = vadd.f32 %v4265_v51, %v4211_v5  ;;  %v4320_v25 = vmul.f32 %v7553_v52, %v9881_v40  ;;  %v7556_v51 = vld [vmem:[%s11127_s2 + $0x36] ss:$0 sm:$0xff] }
 0x32a   : > { %v4302_v42 = vadd.f32 %v4267_v4, %v4212_v62  ;;  %v4321_v20 = vmul.f32 %v7553_v52, %v9919_v19  ;;  %v4270_v60 = vsel %vm960_vm5, %v4268_v1, %v4269_v26  ;;  %v4303_v22 = vadd.f32 %v4268_v1, %v4213_v24  ;;  %v9998_v24 = vld [vmem:[#allocation2 + $0x110] sm:$0xff] }
 0x32b   : > { %v4322_v13 = vmul.f32 %v7553_v52, %v9960_v6  ;;  %v4355_v54 = vrot.slane %v4319_v21, 6  ;;  %v4304_v37 = vadd.f32 %v4270_v60, %v4214_v47  ;;  %v4356_v0 = vrot.slane %v4320_v25, 6  ;;  %v7559_v4 = vld [vmem:[%s11127_s2 + $0x37] ss:$0 sm:$0xff] }
 0x32c   : > { %v4358_v46 = vrot.slane %v4321_v20, 6  ;;  %v4409_v41 = vmul.f32 %v7554_v27, %v9840_v39  ;;  %v4410_v59 = vmul.f32 %v7554_v27, %v9881_v40  ;;  %v4411_v57 = vmul.f32 %v7554_v27, %v9919_v19 }
 0x32d   : > { %v4359_v48 = vrot.slane %v4322_v13, 6  ;;  %v4391_v49 = vadd.f32 %v4355_v54, %v4301_v32  ;;  %v4357_v16 = vsel %vm1051_vm6, %v4355_v54, %v4356_v0  ;;  %v4412_v61 = vmul.f32 %v7554_v27, %v9960_v6 }
 0x32e   : > { %v4393_v63 = vadd.f32 %v4358_v46, %v4303_v22  ;;  %v4445_v3 = vrot.slane %v4409_v41, 7  ;;  %v4392_v2 = vadd.f32 %v4357_v16, %v4302_v42  ;;  %v4446_v30 = vrot.slane %v4410_v59, 7  ;;  %v7561_v16 = vld [vmem:[%s11127_s2 + $0x39] ss:$0 sm:$0xff] }
 0x32f   : > { %v4360_v9 = vsel %vm1051_vm6, %v4358_v46, %v4359_v48  ;;  %v4448_v44 = vrot.slane %v4411_v57, 7  ;;  %v4449_v45 = vrot.slane %v4412_v61, 7  ;;  %v4499_v11 = vmul.f32 %v7555_v23, %v9840_v39 }
 0x330   : > { %v4394_v28 = vadd.f32 %v4360_v9, %v4304_v37  ;;  %v4481_v58 = vadd.f32 %v4445_v3, %v4391_v49  ;;  %v4447_v12 = vsel %vm1142_vm7, %v4445_v3, %v4446_v30  ;;  %v4500_v33 = vmul.f32 %v7555_v23, %v9881_v40  ;;  %v9995_v40 = vld [vmem:[#allocation2 + $0x108] sm:$0xff]  ;;  %v7560_v37 = vld [vmem:[%s11127_s2 + $0x38] ss:$0 sm:$0xff] }
 0x331   : > { %v4483_v38 = vadd.f32 %v4448_v44, %v4393_v63  ;;  %v4501_v8 = vmul.f32 %v7555_v23, %v9919_v19  ;;  %v4450_v36 = vsel %vm1142_vm7, %v4448_v44, %v4449_v45  ;;  %v4482_v50 = vadd.f32 %v4447_v12, %v4392_v2 }
 0x332   : > { %v4502_v34 = vmul.f32 %v7555_v23, %v9960_v6  ;;  %v4515_v35 = vadd.f32 %v4499_v11, %v4481_v58  ;;  %v4484_v56 = vadd.f32 %v4450_v36, %v4394_v28  ;;  %v4533_v39 = vmul.f32 %v7556_v51, %v9916_v53 }
 0x333   : > { %v4517_v29 = vadd.f32 %v4501_v8, %v4483_v38  ;;  %v4534_v43 = vmul.f32 %v7556_v51, %v9919_v19  ;;  %v4516_v5 = vadd.f32 %v4500_v33, %v4482_v50  ;;  %v4535_v62 = vmul.f32 %v9995_v40, %v7556_v51 }
 0x334   : > { %v4536_v47 = vmul.f32 %v9998_v24, %v7556_v51  ;;  %v4567_v1 = vmul.f32 %v7559_v4, %v9916_v53  ;;  %v4518_v26 = vadd.f32 %v4502_v34, %v4484_v56  ;;  %v4549_v52 = vadd.f32 %v4533_v39, %v4515_v35  ;;  %v7562_v56 = vld [vmem:[%s11127_s2 + $0x3a] ss:$0 sm:$0xff]  ;;  %v7563_v39 = vld [vmem:[%s11127_s2 + $0x3b] ss:$0 sm:$0xff] }
 0x335   : > { %v4568_v21 = vmul.f32 %v7559_v4, %v9919_v19  ;;  %v4569_v32 = vmul.f32 %v7559_v4, %v9995_v40  ;;  %v4550_v42 = vadd.f32 %v4534_v43, %v4516_v5  ;;  %v4551_v25 = vadd.f32 %v4535_v62, %v4517_v29 }
 0x336   : > { %v4570_v20 = vmul.f32 %v7559_v4, %v9998_v24  ;;  %v4603_v60 = vrot.slane %v4567_v1, 1  ;;  %v4552_v22 = vadd.f32 %v4536_v47, %v4518_v26  ;;  %v4657_v0 = vmul.f32 %v7560_v37, %v9916_v53 }
 0x337   : > { %v4604_v13 = vrot.slane %v4568_v21, 1  ;;  %v4606_v54 = vrot.slane %v4569_v32, 1  ;;  %v4658_v27 = vmul.f32 %v7560_v37, %v9919_v19  ;;  %v4659_v41 = vmul.f32 %v7560_v37, %v9995_v40 }
 0x338   : > { %v4607_v46 = vrot.slane %v4570_v20, 1  ;;  %v4660_v48 = vmul.f32 %v7560_v37, %v9998_v24  ;;  %v4693_v57 = vrot.slane %v4657_v0, 2  ;;  %v4747_v63 = vmul.f32 %v7561_v16, %v9916_v53 }
 0x339   : > { %v4605_v49 = vsel %vm637_vm1, %v4603_v60, %v4604_v13  ;;  %v4640_v59 = vadd.f32 %v4604_v13, %v4550_v42  ;;  %v4694_v2 = vrot.slane %v4658_v27, 2  ;;  %v4696_v44 = vrot.slane %v4659_v41, 2 }
 0x33a   : > { %v4608_v61 = vsel %vm637_vm1, %v4606_v54, %v4607_v46  ;;  %v4639_v3 = vadd.f32 %v4605_v49, %v4549_v52  ;;  %v4642_v9 = vadd.f32 %v4607_v46, %v4552_v22  ;;  %v4697_v28 = vrot.slane %v4660_v48, 2  ;;  %v7565_v48 = vld [vmem:[%s11127_s2 + $0x3c] ss:$0 sm:$0xff] }
 0x33b   : > { %v4641_v30 = vadd.f32 %v4608_v61, %v4551_v25  ;;  %v4748_v45 = vmul.f32 %v7561_v16, %v9919_v19  ;;  %v4695_v58 = vsel %vm728_vm2, %v4693_v57, %v4694_v2  ;;  %v4730_v23 = vadd.f32 %v4694_v2, %v4640_v59  ;;  %v10039_v25 = vld [vmem:[#allocation2 + $0x118] sm:$0xf] }
 0x33c   : > { %v4749_v11 = vmul.f32 %v7561_v16, %v9995_v40  ;;  %v4750_v12 = vmul.f32 %v7561_v16, %v9998_v24  ;;  %v4698_v38 = vsel %vm728_vm2, %v4696_v44, %v4697_v28  ;;  %v4729_v53 = vadd.f32 %v4695_v58, %v4639_v3 }
 0x33d   : > { %v4732_v33 = vadd.f32 %v4697_v28, %v4642_v9  ;;  %v4783_v8 = vrot.slane %v4747_v63, 3  ;;  %v4731_v36 = vadd.f32 %v4698_v38, %v4641_v30  ;;  %v4784_v50 = vrot.slane %v4748_v45, 3  ;;  %v7566_v45 = vld [vmem:[%s11127_s2 + $0x3d] ss:$0 sm:$0xff] }
 0x33e   : > { %v4786_v34 = vrot.slane %v4749_v11, 3  ;;  %v4787_v35 = vrot.slane %v4750_v12, 3  ;;  %v4833_v29 = vmul.f32 %v7562_v56, %v9919_v19  ;;  %v4834_v51 = vmul.f32 %v7562_v56, %v9998_v24 }
 0x33f   : > { %v4887_v43 = vmul.f32 %v7563_v39, %v9919_v19  ;;  %v4888_v5 = vmul.f32 %v7563_v39, %v9960_v6  ;;  %v4785_v62 = vsel %vm819_vm3, %v4783_v8, %v4784_v50  ;;  %v4820_v4 = vadd.f32 %v4784_v50, %v4730_v23 }
 0x340   : > { %v4788_v47 = vsel %vm819_vm3, %v4786_v34, %v4787_v35  ;;  %v4822_v1 = vadd.f32 %v4787_v35, %v4732_v33  ;;  %v4819_v26 = vadd.f32 %v4785_v62, %v4729_v53  ;;  %v4849_v21 = vrot.slane %v4833_v29, 4 }
 0x341   : > { %v4821_v52 = vadd.f32 %v4788_v47, %v4731_v36  ;;  %v4850_v32 = vrot.slane %v4834_v51, 4  ;;  %v4889_v42 = vmul.f32 %v7563_v39, %v9998_v24  ;;  %v4890_v20 = vmul.f32 %v10039_v25, %v7563_v39 }
 0x342   : > { %v4923_v60 = vrot.slane %v4887_v43, 5  ;;  %v4924_v22 = vrot.slane %v4888_v5, 5  ;;  %v4869_v13 = vadd.f32 %v4849_v21, %v4819_v26  ;;  %v4870_v54 = vadd.f32 %v4849_v21, %v4820_v4  ;;  %v7567_v43 = vld [vmem:[%s11127_s2 + $0x3e] ss:$0 sm:$0xff] }
 0x343   : > { %v4871_v37 = vadd.f32 %v4850_v32, %v4821_v52  ;;  %v4872_v0 = vadd.f32 %v4850_v32, %v4822_v1  ;;  %v4926_v27 = vrot.slane %v4889_v42, 5  ;;  %v4927_v41 = vrot.slane %v4890_v20, 5  ;;  %v10069_v42 = vld [vmem:[#allocation2 + $0x120] sm:$0xff]  ;;  %v10071_v20 = vld [vmem:[#allocation2 + $0x128] sm:$0xff] }
 0x344   : > { %v4925_v46 = vsel %vm960_vm5, %v4923_v60, %v4924_v22  ;;  %v4977_v49 = vmul.f32 %v7565_v48, %v9919_v19  ;;  %v4959_v59 = vadd.f32 %v4923_v60, %v4869_v13  ;;  %v4978_v16 = vmul.f32 %v7565_v48, %v9960_v6 }
 0x345   : > { %v4960_v57 = vadd.f32 %v4925_v46, %v4870_v54  ;;  %v4979_v63 = vmul.f32 %v7565_v48, %v9998_v24  ;;  %v4928_v61 = vsel %vm960_vm5, %v4926_v27, %v4927_v41  ;;  %v4961_v3 = vadd.f32 %v4926_v27, %v4871_v37  ;;  %v7569_v46 = vld [vmem:[%s11127_s2 + $0x40] ss:$0 sm:$0xff] }
 0x346   : > { %v4980_v9 = vmul.f32 %v7565_v48, %v10039_v25  ;;  %v5013_v2 = vrot.slane %v4977_v49, 6  ;;  %v4962_v30 = vadd.f32 %v4928_v61, %v4872_v0  ;;  %v5014_v44 = vrot.slane %v4978_v16, 6 }
 0x347   : > { %v5016_v28 = vrot.slane %v4979_v63, 6  ;;  %v5067_v58 = vmul.f32 %v7566_v45, %v9919_v19  ;;  %v5068_v12 = vmul.f32 %v7566_v45, %v9960_v6  ;;  %v5069_v38 = vmul.f32 %v7566_v45, %v9998_v24 }
 0x348   : > { %v5017_v23 = vrot.slane %v4980_v9, 6  ;;  %v5049_v11 = vadd.f32 %v5013_v2, %v4959_v59  ;;  %v5015_v53 = vsel %vm1051_vm6, %v5013_v2, %v5014_v44  ;;  %v5070_v8 = vmul.f32 %v7566_v45, %v10039_v25 }
 0x349   : > { %v5051_v33 = vadd.f32 %v5016_v28, %v4961_v3  ;;  %v5103_v36 = vrot.slane %v5067_v58, 7  ;;  %v5050_v34 = vadd.f32 %v5015_v53, %v4960_v57  ;;  %v5104_v35 = vrot.slane %v5068_v12, 7  ;;  %v7571_v53 = vld [vmem:[%s11127_s2 + $0x42] ss:$0 sm:$0xff] }
 0x34a   : > { %v5018_v50 = vsel %vm1051_vm6, %v5016_v28, %v5017_v23  ;;  %v5106_v56 = vrot.slane %v5069_v38, 7  ;;  %v5107_v51 = vrot.slane %v5070_v8, 7  ;;  %v5157_v5 = vmul.f32 %v7567_v43, %v9919_v19  ;;  %v7568_v19 = vld [vmem:[%s11127_s2 + $0x3f] ss:$0 sm:$0xff] }
 0x34b   : > { %v5052_v29 = vadd.f32 %v5018_v50, %v4962_v30  ;;  %v5139_v39 = vadd.f32 %v5103_v36, %v5049_v11  ;;  %v5105_v62 = vsel %vm1142_vm7, %v5103_v36, %v5104_v35  ;;  %v5158_v4 = vmul.f32 %v7567_v43, %v9960_v6  ;;  %v7570_v30 = vld [vmem:[%s11127_s2 + $0x41] ss:$0 sm:$0xff] }
 0x34c   : > { %v5141_v47 = vadd.f32 %v5106_v56, %v5051_v33  ;;  %v5159_v1 = vmul.f32 %v7567_v43, %v9998_v24  ;;  %v5108_v26 = vsel %vm1142_vm7, %v5106_v56, %v5107_v51  ;;  %v5140_v52 = vadd.f32 %v5105_v62, %v5050_v34 }
 0x34d   : > { %v5160_v21 = vmul.f32 %v7567_v43, %v10039_v25  ;;  %v5173_v32 = vadd.f32 %v5157_v5, %v5139_v39  ;;  %v5142_v60 = vadd.f32 %v5108_v26, %v5052_v29  ;;  %v5191_v6 = vmul.f32 %v7568_v19, %v9995_v40 }
 0x34e   : > { %v5175_v22 = vadd.f32 %v5159_v1, %v5141_v47  ;;  %v5192_v13 = vmul.f32 %v7568_v19, %v9998_v24  ;;  %v5174_v54 = vadd.f32 %v5158_v4, %v5140_v52  ;;  %v5193_v37 = vmul.f32 %v7568_v19, %v10069_v42 }
 0x34f   : > { %v5194_v0 = vmul.f32 %v7568_v19, %v10071_v20  ;;  %v5225_v27 = vmul.f32 %v7569_v46, %v9995_v40  ;;  %v5176_v41 = vadd.f32 %v5160_v21, %v5142_v60  ;;  %v5207_v48 = vadd.f32 %v5191_v6, %v5173_v32  ;;  %v7572_v60 = vld [vmem:[%s11127_s2 + $0x43] ss:$0 sm:$0xff]  ;;  %v7573_v6 = vld [vmem:[%s11127_s2 + $0x44] ss:$0 sm:$0xff] }
 0x350   : > { %v5226_v49 = vmul.f32 %v7569_v46, %v9998_v24  ;;  %v5227_v59 = vmul.f32 %v7569_v46, %v10069_v42  ;;  %v5208_v57 = vadd.f32 %v5192_v13, %v5174_v54  ;;  %v5209_v16 = vadd.f32 %v5193_v37, %v5175_v22 }
 0x351   : > { %v5228_v63 = vmul.f32 %v7569_v46, %v10071_v20  ;;  %v5261_v61 = vrot.slane %v5225_v27, 1  ;;  %v5210_v3 = vadd.f32 %v5194_v0, %v5176_v41  ;;  %v5315_v44 = vmul.f32 %v7570_v30, %v9995_v40  ;;  %v10117_v41 = vld [vmem:[#allocation2 + $0x130] sm:$0xf] }
 0x352   : > { %v5262_v9 = vrot.slane %v5226_v49, 1  ;;  %v5264_v2 = vrot.slane %v5227_v59, 1  ;;  %v5316_v45 = vmul.f32 %v7570_v30, %v9998_v24  ;;  %v5317_v58 = vmul.f32 %v7570_v30, %v10069_v42 }
 0x353   : > { %v5265_v28 = vrot.slane %v5228_v63, 1  ;;  %v5318_v23 = vmul.f32 %v7570_v30, %v10071_v20  ;;  %v5351_v38 = vrot.slane %v5315_v44, 2  ;;  %v5405_v33 = vmul.f32 %v7571_v53, %v9995_v40 }
 0x354   : > { %v5263_v11 = vsel %vm637_vm1, %v5261_v61, %v5262_v9  ;;  %v5298_v12 = vadd.f32 %v5262_v9, %v5208_v57  ;;  %v5352_v34 = vrot.slane %v5316_v45, 2  ;;  %v5354_v56 = vrot.slane %v5317_v58, 2 }
 0x355   : > { %v5266_v8 = vsel %vm637_vm1, %v5264_v2, %v5265_v28  ;;  %v5297_v36 = vadd.f32 %v5263_v11, %v5207_v48  ;;  %v5300_v50 = vadd.f32 %v5265_v28, %v5210_v3  ;;  %v5355_v29 = vrot.slane %v5318_v23, 2  ;;  %v7574_v23 = vld [vmem:[%s11127_s2 + $0x45] ss:$0 sm:$0xff] }
 0x356   : > { %v5299_v35 = vadd.f32 %v5266_v8, %v5209_v16  ;;  %v5406_v51 = vmul.f32 %v7571_v53, %v9998_v24  ;;  %v5353_v39 = vsel %vm728_vm2, %v5351_v38, %v5352_v34  ;;  %v5388_v43 = vadd.f32 %v5352_v34, %v5298_v12 }
 0x357   : > { %v5407_v5 = vmul.f32 %v7571_v53, %v10069_v42  ;;  %v5408_v62 = vmul.f32 %v7571_v53, %v10071_v20  ;;  %v5356_v47 = vsel %vm728_vm2, %v5354_v56, %v5355_v29  ;;  %v5387_v40 = vadd.f32 %v5353_v39, %v5297_v36 }
 0x358   : > { %v5390_v4 = vadd.f32 %v5355_v29, %v5300_v50  ;;  %v5441_v1 = vrot.slane %v5405_v33, 3  ;;  %v5389_v26 = vadd.f32 %v5356_v47, %v5299_v35  ;;  %v5442_v52 = vrot.slane %v5406_v51, 3  ;;  %v7575_v51 = vld [vmem:[%s11127_s2 + $0x46] ss:$0 sm:$0xff] }
 0x359   : > { %v5444_v21 = vrot.slane %v5407_v5, 3  ;;  %v5445_v32 = vrot.slane %v5408_v62, 3  ;;  %v5491_v22 = vmul.f32 %v7572_v60, %v9998_v24  ;;  %v5492_v19 = vmul.f32 %v7572_v60, %v10071_v20 }
 0x35a   : > { %v5545_v13 = vmul.f32 %v7573_v6, %v9998_v24  ;;  %v5546_v54 = vmul.f32 %v7573_v6, %v10039_v25  ;;  %v5443_v37 = vsel %vm819_vm3, %v5441_v1, %v5442_v52  ;;  %v5478_v46 = vadd.f32 %v5442_v52, %v5388_v43 }
 0x35b   : > { %v5446_v0 = vsel %vm819_vm3, %v5444_v21, %v5445_v32  ;;  %v5480_v27 = vadd.f32 %v5445_v32, %v5390_v4  ;;  %v5477_v48 = vadd.f32 %v5443_v37, %v5387_v40  ;;  %v5507_v59 = vrot.slane %v5491_v22, 4 }
 0x35c   : > { %v5479_v49 = vadd.f32 %v5446_v0, %v5389_v26  ;;  %v5508_v57 = vrot.slane %v5492_v19, 4  ;;  %v5547_v16 = vmul.f32 %v7573_v6, %v10071_v20  ;;  %v5548_v63 = vmul.f32 %v7573_v6, %v10117_v41 }
 0x35d   : > { %v5581_v61 = vrot.slane %v5545_v13, 5  ;;  %v5582_v3 = vrot.slane %v5546_v54, 5  ;;  %v5527_v9 = vadd.f32 %v5507_v59, %v5477_v48  ;;  %v5528_v2 = vadd.f32 %v5507_v59, %v5478_v46  ;;  %v7576_v13 = vld [vmem:[%s11127_s2 + $0x47] ss:$0 sm:$0xff] }
 0x35e   : > { %v5529_v30 = vadd.f32 %v5508_v57, %v5479_v49  ;;  %v5530_v44 = vadd.f32 %v5508_v57, %v5480_v27  ;;  %v5584_v45 = vrot.slane %v5547_v16, 5  ;;  %v5585_v58 = vrot.slane %v5548_v63, 5  ;;  %v560_v16 = vld [vmem:[#allocation2 + $0x138] sm:$0xff]  ;;  %v10148_v63 = vld [vmem:[#allocation2 + $0x140] sm:$0xff] }
 0x35f   : > { %v5583_v28 = vsel %vm960_vm5, %v5581_v61, %v5582_v3  ;;  %v5635_v11 = vmul.f32 %v7574_v23, %v9998_v24  ;;  %v5617_v12 = vadd.f32 %v5581_v61, %v5527_v9  ;;  %v5636_v53 = vmul.f32 %v7574_v23, %v10039_v25 }
 0x360   : > { %v5618_v38 = vadd.f32 %v5583_v28, %v5528_v2  ;;  %v5637_v33 = vmul.f32 %v7574_v23, %v10071_v20  ;;  %v5586_v8 = vsel %vm960_vm5, %v5584_v45, %v5585_v58  ;;  %v5619_v36 = vadd.f32 %v5584_v45, %v5529_v30  ;;  %v7578_v28 = vld [vmem:[%s11127_s2 + $0x49] ss:$0 sm:$0xff] }
 0x361   : > { %v5638_v50 = vmul.f32 %v7574_v23, %v10117_v41  ;;  %v5671_v34 = vrot.slane %v5635_v11, 6  ;;  %v5620_v35 = vadd.f32 %v5586_v8, %v5530_v44  ;;  %v5672_v56 = vrot.slane %v5636_v53, 6 }
 0x362   : > { %v5674_v29 = vrot.slane %v5637_v33, 6  ;;  %v5725_v39 = vmul.f32 %v7575_v51, %v9998_v24  ;;  %v5726_v62 = vmul.f32 %v7575_v51, %v10039_v25  ;;  %v5727_v47 = vmul.f32 %v7575_v51, %v10071_v20 }
 0x363   : > { %v5675_v43 = vrot.slane %v5638_v50, 6  ;;  %v5707_v5 = vadd.f32 %v5671_v34, %v5617_v12  ;;  %v5673_v40 = vsel %vm1051_vm6, %v5671_v34, %v5672_v56  ;;  %v5728_v1 = vmul.f32 %v7575_v51, %v10117_v41 }
 0x364   : > { %v5709_v4 = vadd.f32 %v5674_v29, %v5619_v36  ;;  %v5761_v26 = vrot.slane %v5725_v39, 7  ;;  %v5708_v21 = vadd.f32 %v5673_v40, %v5618_v38  ;;  %v5762_v32 = vrot.slane %v5726_v62, 7  ;;  %v7580_v40 = vld [vmem:[%s11127_s2 + $0x4b] ss:$0 sm:$0xff] }
 0x365   : > { %v5676_v52 = vsel %vm1051_vm6, %v5674_v29, %v5675_v43  ;;  %v5764_v60 = vrot.slane %v5727_v47, 7  ;;  %v5765_v19 = vrot.slane %v5728_v1, 7  ;;  %v5815_v54 = vmul.f32 %v7576_v13, %v9998_v24  ;;  %v7577_v24 = vld [vmem:[%s11127_s2 + $0x48] ss:$0 sm:$0xff] }
 0x366   : > { %v5710_v22 = vadd.f32 %v5676_v52, %v5620_v35  ;;  %v5797_v6 = vadd.f32 %v5761_v26, %v5707_v5  ;;  %v5763_v37 = vsel %vm1142_vm7, %v5761_v26, %v5762_v32  ;;  %v5816_v46 = vmul.f32 %v7576_v13, %v10039_v25  ;;  %v7579_v35 = vld [vmem:[%s11127_s2 + $0x4a] ss:$0 sm:$0xff] }
 0x367   : > { %v5799_v0 = vadd.f32 %v5764_v60, %v5709_v4  ;;  %v5817_v27 = vmul.f32 %v7576_v13, %v10071_v20  ;;  %v5766_v48 = vsel %vm1142_vm7, %v5764_v60, %v5765_v19  ;;  %v5798_v49 = vadd.f32 %v5763_v37, %v5708_v21 }
 0x368   : > { %v5818_v59 = vmul.f32 %v7576_v13, %v10117_v41  ;;  %v5831_v57 = vadd.f32 %v5815_v54, %v5797_v6  ;;  %v5800_v61 = vadd.f32 %v5766_v48, %v5710_v22  ;;  %v5849_v9 = vmul.f32 %v7577_v24, %v10069_v42 }
 0x369   : > { %v5833_v3 = vadd.f32 %v5817_v27, %v5799_v0  ;;  %v5850_v25 = vmul.f32 %v7577_v24, %v10071_v20  ;;  %v5832_v2 = vadd.f32 %v5816_v46, %v5798_v49  ;;  %v5851_v30 = vmul.f32 %v7577_v24, %v560_v16 }
 0x36a   : > { %v5852_v44 = vmul.f32 %v7577_v24, %v10148_v63  ;;  %v5883_v45 = vmul.f32 %v7578_v28, %v10069_v42  ;;  %v5834_v58 = vadd.f32 %v5818_v59, %v5800_v61  ;;  %v5865_v23 = vadd.f32 %v5849_v9, %v5831_v57  ;;  %v7581_v61 = vld [vmem:[%s11127_s2 + $0x4c] ss:$0 sm:$0xff] }
 0x36b   : > { %v5884_v11 = vmul.f32 %v7578_v28, %v10071_v20  ;;  %v5885_v12 = vmul.f32 %v7578_v28, %v560_v16  ;;  %v5866_v38 = vadd.f32 %v5850_v25, %v5832_v2  ;;  %v5867_v53 = vadd.f32 %v5851_v30, %v5833_v3 }
 0x36c   : > { %v5886_v33 = vmul.f32 %v7578_v28, %v10148_v63  ;;  %v5919_v8 = vrot.slane %v5883_v45, 1  ;;  %v5868_v36 = vadd.f32 %v5852_v44, %v5834_v58  ;;  %v5973_v56 = vmul.f32 %v7579_v35, %v10069_v42  ;;  %v562_v45 = vld [vmem:[#allocation2 + $0x148] sm:$0xf] }
 0x36d   : > { %v5920_v50 = vrot.slane %v5884_v11, 1  ;;  %v5922_v34 = vrot.slane %v5885_v12, 1  ;;  %v5974_v51 = vmul.f32 %v7579_v35, %v10071_v20  ;;  %v5975_v39 = vmul.f32 %v7579_v35, %v560_v16 }
 0x36e   : > { %v5923_v29 = vrot.slane %v5886_v33, 1  ;;  %v5976_v43 = vmul.f32 %v7579_v35, %v10148_v63  ;;  %v6009_v47 = vrot.slane %v5973_v56, 2  ;;  %v6063_v4 = vmul.f32 %v7580_v40, %v10069_v42 }
 0x36f   : > { %v5921_v5 = vsel %vm637_vm1, %v5919_v8, %v5920_v50  ;;  %v5956_v62 = vadd.f32 %v5920_v50, %v5866_v38  ;;  %v6010_v21 = vrot.slane %v5974_v51, 2  ;;  %v6012_v60 = vrot.slane %v5975_v39, 2  ;;  %v7583_v39 = vld [vmem:[%s11127_s2 + $0x4e] ss:$0 sm:$0xff] }
 0x370   : > { %v5924_v1 = vsel %vm637_vm1, %v5922_v34, %v5923_v29  ;;  %v5955_v26 = vadd.f32 %v5921_v5, %v5865_v23  ;;  %v5958_v52 = vadd.f32 %v5923_v29, %v5868_v36  ;;  %v6013_v22 = vrot.slane %v5976_v43, 2 }
 0x371   : > { %v5957_v32 = vadd.f32 %v5924_v1, %v5867_v53  ;;  %v6064_v19 = vmul.f32 %v7580_v40, %v10071_v20  ;;  %v6011_v6 = vsel %vm728_vm2, %v6009_v47, %v6010_v21  ;;  %v6046_v13 = vadd.f32 %v6010_v21, %v5956_v62 }
 0x372   : > { %v6065_v54 = vmul.f32 %v7580_v40, %v560_v16  ;;  %v6066_v37 = vmul.f32 %v7580_v40, %v10148_v63  ;;  %v6014_v0 = vsel %vm728_vm2, %v6012_v60, %v6013_v22  ;;  %v6045_v46 = vadd.f32 %v6011_v6, %v5955_v26  ;;  %v7582_v16 = vld [vmem:[%s11127_s2 + $0x4d] ss:$0 sm:$0xff] }
 0x373   : > { %v6048_v42 = vadd.f32 %v6013_v22, %v5958_v52  ;;  %v6099_v27 = vrot.slane %v6063_v4, 3  ;;  %v6047_v48 = vadd.f32 %v6014_v0, %v5957_v32  ;;  %v6100_v49 = vrot.slane %v6064_v19, 3  ;;  %v7584_v22 = vld [vmem:[%s11127_s2 + $0x4f] ss:$0 sm:$0xff] }
 0x374   : > { %v6102_v59 = vrot.slane %v6065_v54, 3  ;;  %v6103_v57 = vrot.slane %v6066_v37, 3  ;;  %v6149_v3 = vmul.f32 %v7581_v61, %v10071_v20  ;;  %v6150_v24 = vmul.f32 %v7581_v61, %v10148_v63 }
 0x375   : > { %v6203_v9 = vmul.f32 %v7582_v16, %v10071_v20  ;;  %v6204_v25 = vmul.f32 %v7582_v16, %v10117_v41  ;;  %v6101_v2 = vsel %vm819_vm3, %v6099_v27, %v6100_v49  ;;  %v6136_v44 = vadd.f32 %v6100_v49, %v6046_v13 }
 0x376   : > { %v6104_v30 = vsel %vm819_vm3, %v6102_v59, %v6103_v57  ;;  %v6138_v28 = vadd.f32 %v6103_v57, %v6048_v42  ;;  %v6135_v58 = vadd.f32 %v6101_v2, %v6045_v46  ;;  %v6165_v11 = vrot.slane %v6149_v3, 4 }
 0x377   : > { %v6137_v23 = vadd.f32 %v6104_v30, %v6047_v48  ;;  %v6166_v12 = vrot.slane %v6150_v24, 4  ;;  %v6205_v38 = vmul.f32 %v7582_v16, %v10148_v63  ;;  %v6206_v53 = vmul.f32 %v7582_v16, %v562_v45  ;;  %v7585_v16 = vld [vmem:[%s11127_s2 + $0x50] ss:$0 sm:$0xff] }
 0x378   : > { %v6239_v33 = vrot.slane %v6203_v9, 5  ;;  %v6240_v8 = vrot.slane %v6204_v25, 5  ;;  %v6185_v36 = vadd.f32 %v6165_v11, %v6135_v58  ;;  %v6186_v50 = vadd.f32 %v6165_v11, %v6136_v44 }
 0x379   : > { %v6187_v34 = vadd.f32 %v6166_v12, %v6137_v23  ;;  %v6188_v35 = vadd.f32 %v6166_v12, %v6138_v28  ;;  %v6242_v29 = vrot.slane %v6205_v38, 5  ;;  %v6243_v51 = vrot.slane %v6206_v53, 5  ;;  %v7586_v53 = vld [vmem:[%s11127_s2] ss:$0 sm:$0xff] }
 0x37a   : > { %v6241_v56 = vsel %vm960_vm5, %v6239_v33, %v6240_v8  ;;  %v6293_v43 = vmul.f32 %v7583_v39, %v10071_v20  ;;  %v6275_v5 = vadd.f32 %v6239_v33, %v6185_v36  ;;  %v6294_v47 = vmul.f32 %v7583_v39, %v10117_v41  ;;  %v7587_v33 = vld [vmem:[#allocation2 + $0x90] sm:$0xff]  ;;  %v10218_v8 = vld [vmem:[#allocation2 + $0x98] sm:$0xff] }
 0x37b   : > { %v6276_v62 = vadd.f32 %v6241_v56, %v6186_v50  ;;  %v6295_v40 = vmul.f32 %v7583_v39, %v10148_v63  ;;  %v6244_v4 = vsel %vm960_vm5, %v6242_v29, %v6243_v51  ;;  %v6277_v1 = vadd.f32 %v6242_v29, %v6187_v34  ;;  %v7591_v51 = vld [vmem:[%s11127_s2 + $0x1] ss:$0 sm:$0xff] }
 0x37c   : > { %v6296_v26 = vmul.f32 %v7583_v39, %v562_v45  ;;  %v6329_v52 = vrot.slane %v6293_v43, 6  ;;  %v6278_v21 = vadd.f32 %v6244_v4, %v6188_v35  ;;  %v6330_v32 = vrot.slane %v6294_v47, 6 }
 0x37d   : > { %v6332_v60 = vrot.slane %v6295_v40, 6  ;;  %v6383_v19 = vmul.f32 %v7584_v22, %v10071_v20  ;;  %v6384_v54 = vmul.f32 %v7584_v22, %v10117_v41  ;;  %v6385_v37 = vmul.f32 %v7584_v22, %v10148_v63  ;;  %v7592_v40 = vld [vmem:[%s11127_s2 + $0x2] ss:$0 sm:$0xff] }
 0x37e   : > { %v6333_v6 = vrot.slane %v6296_v26, 6  ;;  %v6365_v13 = vadd.f32 %v6329_v52, %v6275_v5  ;;  %v6331_v0 = vsel %vm1051_vm6, %v6329_v52, %v6330_v32  ;;  %v6386_v42 = vmul.f32 %v7584_v22, %v562_v45 }
 0x37f   : > { %v6367_v46 = vadd.f32 %v6332_v60, %v6277_v1  ;;  %v6419_v27 = vrot.slane %v6383_v19, 7  ;;  %v6366_v49 = vadd.f32 %v6331_v0, %v6276_v62  ;;  %v6420_v59 = vrot.slane %v6384_v54, 7 }
 0x380   : > { %v6334_v48 = vsel %vm1051_vm6, %v6332_v60, %v6333_v6  ;;  %v6422_v57 = vrot.slane %v6385_v37, 7  ;;  %v6423_v3 = vrot.slane %v6386_v42, 7  ;;  %v6473_v9 = vmul.f32 %v7585_v16, %v10071_v20 }
 0x381   : > { %v6368_v61 = vadd.f32 %v6334_v48, %v6278_v21  ;;  %v6455_v24 = vadd.f32 %v6419_v27, %v6365_v13  ;;  %v6421_v25 = vsel %vm1142_vm7, %v6419_v27, %v6420_v59  ;;  %v6474_v30 = vmul.f32 %v7585_v16, %v10117_v41 }
 0x382   : > { %v6457_v2 = vadd.f32 %v6422_v57, %v6367_v46  ;;  %v6475_v44 = vmul.f32 %v7585_v16, %v10148_v63  ;;  %v6424_v28 = vsel %vm1142_vm7, %v6422_v57, %v6423_v3  ;;  %v6456_v58 = vadd.f32 %v6421_v25, %v6366_v49  ;;  %v10221_v63 = vld [vmem:[#allocation2 + $0xa8] sm:$0xff]  ;;  %v7593_v3 = vld [vmem:[%s11127_s2 + $0x3] ss:$0 sm:$0xff] }
 0x383   : > { %v6476_v23 = vmul.f32 %v7585_v16, %v562_v45  ;;  %v6489_v11 = vadd.f32 %v6473_v9, %v6455_v24  ;;  %v6458_v12 = vadd.f32 %v6424_v28, %v6368_v61  ;;  %v583_v20 = vmul.f32 %v7587_v33, %v7586_v53  ;;  %v10224_v45 = vld [vmem:[#allocation2 + $0xb0] sm:$0xff] }
 0x384   : > { %v6491_v38 = vadd.f32 %v6475_v44, %v6457_v2  ;;  %v584_v36 = vmul.f32 %v10218_v8, %v7586_v53  ;;  %v6490_v41 = vadd.f32 %v6474_v30, %v6456_v58  ;;  %v585_v34 = vmul.f32 %v10221_v63, %v7586_v53  ;;  %v7594_v44 = vld [vmem:[%s11127_s2 + $0x4] ss:$0 sm:$0xff] }
 0x385   : > { %v6526_v50 = vrot.slane %v6489_v11, 4  ;;  %v586_v35 = vmul.f32 %v10224_v45, %v7586_v53  ;;  %v6492_v56 = vadd.f32 %v6476_v23, %v6458_v12  ;;  %v617_v39 = vmul.f32 %v7591_v51, %v7587_v33 }
 0x386   : > { %v6529_v29 = vrot.slane %v6491_v38, 4  ;;  %v618_v43 = vmul.f32 %v7591_v51, %v10218_v8  ;;  %v6527_v5 = vrot.slane %v6490_v41, 4  ;;  %v619_v62 = vmul.f32 %v7591_v51, %v10221_v63 }
 0x387   : > { %v620_v47 = vmul.f32 %v7591_v51, %v10224_v45  ;;  %v708_v4 = vmul.f32 %v7592_v40, %v7587_v33  ;;  %v6530_v1 = vrot.slane %v6492_v56, 4  ;;  %v656_v26 = vrot.slane %v617_v39, 1 }
 0x388   : > { %v657_v52 = vrot.slane %v618_v43, 1  ;;  %v709_v21 = vmul.f32 %v7592_v40, %v10218_v8  ;;  %v6528_v32 = vsel %vm6513_vm8, %v6526_v50, %v6527_v5  ;;  %v659_v60 = vrot.slane %v619_v62, 1  ;;  %v7595_v50 = vld [vmem:[%s11127_s2 + $0x5] ss:$0 sm:$0xff] }
 0x389   : > { %v660_v22 = vrot.slane %v620_v47, 1  ;;  %v710_v19 = vmul.f32 %v7592_v40, %v10221_v63  ;;  %v6531_v6 = vsel %vm6513_vm8, %v6529_v29, %v6530_v1  ;;  %v711_v37 = vmul.f32 %v7592_v40, %v10224_v45  ;;  %v10264_v1 = vld [vmem:[#allocation2 + $0xb8] sm:$0xf] }
 0x38a   : > { %v658_v13 = vsel %vm637_vm1, %v656_v26, %v657_v52  ;;  %v691_v54 = vadd.f32 %v657_v52, %v584_v36  ;;  %v6548_v0 = vpack.c.bf16 %v6531_v6, %v6528_v32  ;;  %v747_v49 = vrot.slane %v708_v4, 2 }
 0x38b   : > { %v661_v46 = vsel %vm637_vm1, %v659_v60, %v660_v22  ;;  %v690_v42 = vadd.f32 %v658_v13, %v583_v20  ;;  %v693_v27 = vadd.f32 %v660_v22, %v586_v35  ;;  %v748_v59 = vrot.slane %v709_v21, 2  ;;  %v7596_v35 = vld [vmem:[#allocation2 + $0xa0] sm:$0xf] }
 0x38c   : > { %v692_v48 = vadd.f32 %v661_v46, %v585_v34  ;;  %v750_v57 = vrot.slane %v710_v19, 2  ;;  %7200 = vmatmul.msk.bf16.gmra.mxu1 %vm389_vm0, %v6548_v0  ;;  %v751_v61 = vrot.slane %v711_v37, 2  ;;  %v799_v24 = vmul.f32 %v7593_v3, %v7587_v33 }
 0x38d   : > { %v800_v16 = vmul.f32 %v7593_v3, %v10218_v8  ;;  %v801_v9 = vmul.f32 %v7593_v3, %v10221_v63  ;;  %v749_v25 = vsel %vm728_vm2, %v747_v49, %v748_v59  ;;  %v782_v2 = vadd.f32 %v748_v59, %v691_v54  ;;  %v7598_v54 = vld [vmem:[%s11127_s2 + $0x6] ss:$0 sm:$0xff] }
 0x38e   : > { %v802_v30 = vmul.f32 %v7593_v3, %v10224_v45  ;;  %v884_v28 = vmul.f32 %v7594_v44, %v10218_v8  ;;  %v752_v58 = vsel %vm728_vm2, %v750_v57, %v751_v61  ;;  %v781_v23 = vadd.f32 %v749_v25, %v690_v42 }
 0x38f   : > { %v784_v11 = vadd.f32 %v751_v61, %v693_v27  ;;  %v838_v12 = vrot.slane %v799_v24, 3  ;;  %v783_v38 = vadd.f32 %v752_v58, %v692_v48  ;;  %v839_v53 = vrot.slane %v800_v16, 3  ;;  %v7599_v16 = vld [vmem:[%s11127_s2 + $0x7] ss:$0 sm:$0xff] }
 0x390   : > { %v841_v33 = vrot.slane %v801_v9, 3  ;;  %v842_v20 = vrot.slane %v802_v30, 3  ;;  %v885_v36 = vmul.f32 %v7594_v44, %v10224_v45  ;;  %v900_v41 = vrot.slane %v884_v28, 4 }
 0x391   : > { %v940_v34 = vmul.f32 %v7595_v50, %v10218_v8  ;;  %v941_v56 = vmul.f32 %v7596_v35, %v7595_v50  ;;  %v840_v29 = vsel %vm819_vm3, %v838_v12, %v839_v53  ;;  %v873_v39 = vadd.f32 %v839_v53, %v782_v2 }
 0x392   : > { %v843_v51 = vsel %vm819_vm3, %v841_v33, %v842_v20  ;;  %v875_v43 = vadd.f32 %v842_v20, %v784_v11  ;;  %v872_v5 = vadd.f32 %v840_v29, %v781_v23  ;;  %v901_v47 = vrot.slane %v885_v36, 4  ;;  %v7600_v20 = vld [vmem:[%s11127_s2 + $0x8] ss:$0 sm:$0xff] }
 0x393   : > { %v874_v62 = vadd.f32 %v843_v51, %v783_v38  ;;  %v942_v40 = vmul.f32 %v7595_v50, %v10224_v45  ;;  %v923_v4 = vadd.f32 %v900_v41, %v873_v39  ;;  %v943_v26 = vmul.f32 %v10264_v1, %v7595_v50 }
 0x394   : > { %v979_v52 = vrot.slane %v940_v34, 5  ;;  %v980_v21 = vrot.slane %v941_v56, 5  ;;  %v922_v32 = vadd.f32 %v900_v41, %v872_v5  ;;  %v925_v22 = vadd.f32 %v901_v47, %v875_v43 }
 0x395   : > { %v924_v60 = vadd.f32 %v901_v47, %v874_v62  ;;  %v982_v19 = vrot.slane %v942_v40, 5  ;;  %v983_v13 = vrot.slane %v943_v26, 5  ;;  %v1031_v37 = vmul.f32 %v7598_v54, %v10218_v8  ;;  %v7601_v40 = vld [vmem:[%s11127_s2 + $0x9] ss:$0 sm:$0xff] }
 0x396   : > { %v981_v6 = vsel %vm960_vm5, %v979_v52, %v980_v21  ;;  %v1032_v0 = vmul.f32 %v7598_v54, %v7596_v35  ;;  %v1013_v46 = vadd.f32 %v979_v52, %v922_v32  ;;  %v1033_v48 = vmul.f32 %v7598_v54, %v10224_v45  ;;  %v10296_v52 = vld [vmem:[#allocation2 + $0xc0] sm:$0xff] }
 0x397   : > { %v1014_v42 = vadd.f32 %v981_v6, %v923_v4  ;;  %v1015_v27 = vadd.f32 %v982_v19, %v924_v60  ;;  %v984_v49 = vsel %vm960_vm5, %v982_v19, %v983_v13  ;;  %v1034_v59 = vmul.f32 %v7598_v54, %v10264_v1  ;;  %v10299_v60 = vld [vmem:[#allocation2 + $0xc8] sm:$0xff] }
 0x398   : > { %v1070_v57 = vrot.slane %v1031_v37, 6  ;;  %v1071_v61 = vrot.slane %v1032_v0, 6  ;;  %v1016_v3 = vadd.f32 %v984_v49, %v925_v22  ;;  %v1073_v24 = vrot.slane %v1033_v48, 6  ;;  %v7604_v6 = vld [vmem:[%s11127_s2 + $0xa] ss:$0 sm:$0xff] }
 0x399   : > { %v1122_v9 = vmul.f32 %v7599_v16, %v10218_v8  ;;  %v1123_v25 = vmul.f32 %v7599_v16, %v7596_v35  ;;  %v1074_v30 = vrot.slane %v1034_v59, 6  ;;  %v1124_v28 = vmul.f32 %v7599_v16, %v10224_v45  ;;  %v7605_v49 = vld [vmem:[%s11127_s2 + $0xb] ss:$0 sm:$0xff] }
 0x39a   : > { %v1072_v2 = vsel %vm1051_vm6, %v1070_v57, %v1071_v61  ;;  %v1104_v44 = vadd.f32 %v1070_v57, %v1013_v46  ;;  %v1106_v23 = vadd.f32 %v1073_v24, %v1015_v27  ;;  %v1125_v11 = vmul.f32 %v7599_v16, %v10264_v1 }
 0x39b   : > { %v1105_v58 = vadd.f32 %v1072_v2, %v1014_v42  ;;  %v1161_v12 = vrot.slane %v1122_v9, 7  ;;  %v1075_v38 = vsel %vm1051_vm6, %v1073_v24, %v1074_v30  ;;  %v1162_v53 = vrot.slane %v1123_v25, 7 }
 0x39c   : > { %v1164_v33 = vrot.slane %v1124_v28, 7  ;;  %v1213_v36 = vmul.f32 %v7600_v20, %v10218_v8  ;;  %v1107_v41 = vadd.f32 %v1075_v38, %v1016_v3  ;;  %v1165_v50 = vrot.slane %v1125_v11, 7 }
 0x39d   : > { %v1195_v34 = vadd.f32 %v1161_v12, %v1104_v44  ;;  %v1214_v56 = vmul.f32 %v7600_v20, %v7596_v35  ;;  %v1163_v29 = vsel %vm1142_vm7, %v1161_v12, %v1162_v53  ;;  %v1215_v39 = vmul.f32 %v7600_v20, %v10224_v45 }
 0x39e   : > { %v1197_v51 = vadd.f32 %v1164_v33, %v1106_v23  ;;  %v1216_v43 = vmul.f32 %v7600_v20, %v10264_v1  ;;  %v1166_v5 = vsel %vm1142_vm7, %v1164_v33, %v1165_v50  ;;  %v1196_v62 = vadd.f32 %v1163_v29, %v1105_v58  ;;  %v7606_v58 = vld [vmem:[%s11127_s2 + $0xc] ss:$0 sm:$0xff] }
 0x39f   : > { %v1229_v47 = vadd.f32 %v1213_v36, %v1195_v34  ;;  %v1247_v8 = vmul.f32 %v7601_v40, %v10221_v63  ;;  %v1198_v4 = vadd.f32 %v1166_v5, %v1107_v41  ;;  %v1248_v35 = vmul.f32 %v7601_v40, %v10224_v45 }
 0x3a0   : > { %v1231_v26 = vadd.f32 %v1215_v39, %v1197_v51  ;;  %v1249_v21 = vmul.f32 %v10296_v52, %v7601_v40  ;;  %v1230_v32 = vadd.f32 %v1214_v56, %v1196_v62  ;;  %v1250_v22 = vmul.f32 %v10299_v60, %v7601_v40 }
 0x3a1   : > { %v1263_v19 = vadd.f32 %v1247_v8, %v1229_v47  ;;  %v1281_v13 = vmul.f32 %v7604_v6, %v10221_v63  ;;  %v1232_v54 = vadd.f32 %v1216_v43, %v1198_v4  ;;  %v1282_v0 = vmul.f32 %v7604_v6, %v10224_v45  ;;  %v7607_v43 = vld [vmem:[%s11127_s2 + $0xd] ss:$0 sm:$0xff] }
 0x3a2   : > { %v1265_v37 = vadd.f32 %v1249_v21, %v1231_v26  ;;  %v1283_v46 = vmul.f32 %v7604_v6, %v10296_v52  ;;  %v1264_v42 = vadd.f32 %v1248_v35, %v1230_v32  ;;  %v1284_v27 = vmul.f32 %v7604_v6, %v10299_v60  ;;  %v7608_v35 = vld [vmem:[%s11127_s2 + $0xe] ss:$0 sm:$0xff] }
 0x3a3   : > { %v1319_v48 = vrot.slane %v1281_v13, 1  ;;  %v1371_v59 = vmul.f32 %v7605_v49, %v10221_v63  ;;  %v1266_v57 = vadd.f32 %v1250_v22, %v1232_v54  ;;  %v1320_v61 = vrot.slane %v1282_v0, 1 }
 0x3a4   : > { %v1322_v3 = vrot.slane %v1283_v46, 1  ;;  %v1372_v24 = vmul.f32 %v7605_v49, %v10224_v45  ;;  %v1323_v16 = vrot.slane %v1284_v27, 1  ;;  %v1373_v9 = vmul.f32 %v7605_v49, %v10296_v52  ;;  %v10340_v27 = vld [vmem:[#allocation2 + $0xd0] sm:$0xf] }
 0x3a5   : > { %v1374_v25 = vmul.f32 %v7605_v49, %v10299_v60  ;;  %v1409_v2 = vrot.slane %v1371_v59, 2  ;;  %v1321_v30 = vsel %vm637_vm1, %v1319_v48, %v1320_v61  ;;  %v1354_v44 = vadd.f32 %v1320_v61, %v1264_v42 }
 0x3a6   : > { %v1410_v28 = vrot.slane %v1372_v24, 2  ;;  %v1461_v23 = vmul.f32 %v7606_v58, %v10221_v63  ;;  %v1324_v11 = vsel %vm637_vm1, %v1322_v3, %v1323_v16  ;;  %v1353_v12 = vadd.f32 %v1321_v30, %v1263_v19 }
 0x3a7   : > { %v1356_v38 = vadd.f32 %v1323_v16, %v1266_v57  ;;  %v1412_v53 = vrot.slane %v1373_v9, 2  ;;  %v1355_v33 = vadd.f32 %v1324_v11, %v1265_v37  ;;  %v1413_v36 = vrot.slane %v1374_v25, 2  ;;  %v7610_v25 = vld [vmem:[%s11127_s2 + $0xf] ss:$0 sm:$0xff] }
 0x3a8   : > { %v1411_v20 = vsel %vm728_vm2, %v1409_v2, %v1410_v28  ;;  %v1444_v41 = vadd.f32 %v1410_v28, %v1354_v44  ;;  %v1462_v34 = vmul.f32 %v7606_v58, %v10224_v45  ;;  %v1463_v56 = vmul.f32 %v7606_v58, %v10296_v52 }
 0x3a9   : > { %v1443_v50 = vadd.f32 %v1411_v20, %v1353_v12  ;;  %v1464_v29 = vmul.f32 %v7606_v58, %v10299_v60  ;;  %v1414_v51 = vsel %vm728_vm2, %v1412_v53, %v1413_v36  ;;  %v1446_v63 = vadd.f32 %v1413_v36, %v1356_v38  ;;  %v7611_v36 = vld [vmem:[%s11127_s2 + $0x10] ss:$0 sm:$0xff] }
 0x3aa   : > { %v1499_v39 = vrot.slane %v1461_v23, 3  ;;  %v1545_v5 = vmul.f32 %v7607_v43, %v10224_v45  ;;  %v1445_v62 = vadd.f32 %v1414_v51, %v1355_v33  ;;  %v1500_v47 = vrot.slane %v1462_v34, 3 }
 0x3ab   : > { %v1502_v40 = vrot.slane %v1463_v56, 3  ;;  %v1503_v8 = vrot.slane %v1464_v29, 3  ;;  %v1546_v4 = vmul.f32 %v7607_v43, %v10299_v60  ;;  %v1601_v21 = vmul.f32 %v7608_v35, %v10224_v45 }
 0x3ac   : > { %v1561_v26 = vrot.slane %v1545_v5, 4  ;;  %v1602_v32 = vmul.f32 %v7608_v35, %v10264_v1  ;;  %v1501_v22 = vsel %vm819_vm3, %v1499_v39, %v1500_v47  ;;  %v1534_v6 = vadd.f32 %v1500_v47, %v1444_v41 }
 0x3ad   : > { %v1504_v19 = vsel %vm819_vm3, %v1502_v40, %v1503_v8  ;;  %v1536_v13 = vadd.f32 %v1503_v8, %v1446_v63  ;;  %v1533_v54 = vadd.f32 %v1501_v22, %v1443_v50  ;;  %v1562_v0 = vrot.slane %v1546_v4, 4  ;;  %v7612_v8 = vld [vmem:[%s11127_s2 + $0x11] ss:$0 sm:$0xff] }
 0x3ae   : > { %v1535_v37 = vadd.f32 %v1504_v19, %v1445_v62  ;;  %v1603_v46 = vmul.f32 %v7608_v35, %v10299_v60  ;;  %v1584_v42 = vadd.f32 %v1561_v26, %v1534_v6  ;;  %v1604_v48 = vmul.f32 %v10340_v27, %v7608_v35 }
 0x3af   : > { %v1639_v49 = vrot.slane %v1601_v21, 5  ;;  %v1640_v59 = vrot.slane %v1602_v32, 5  ;;  %v1583_v57 = vadd.f32 %v1561_v26, %v1533_v54  ;;  %v1586_v3 = vadd.f32 %v1562_v0, %v1536_v13 }
 0x3b0   : > { %v1585_v61 = vadd.f32 %v1562_v0, %v1535_v37  ;;  %v1642_v24 = vrot.slane %v1603_v46, 5  ;;  %v1643_v9 = vrot.slane %v1604_v48, 5  ;;  %v1691_v2 = vmul.f32 %v7610_v25, %v10224_v45 }
 0x3b1   : > { %v1641_v16 = vsel %vm960_vm5, %v1639_v49, %v1640_v59  ;;  %v1692_v30 = vmul.f32 %v7610_v25, %v10264_v1  ;;  %v1673_v44 = vadd.f32 %v1639_v49, %v1583_v57  ;;  %v1693_v23 = vmul.f32 %v7610_v25, %v10299_v60  ;;  %v10375_v49 = vld [vmem:[#allocation2 + $0xd8] sm:$0xff] }
 0x3b2   : > { %v1674_v28 = vadd.f32 %v1641_v16, %v1584_v42  ;;  %v1675_v58 = vadd.f32 %v1642_v24, %v1585_v61  ;;  %v1644_v11 = vsel %vm960_vm5, %v1642_v24, %v1643_v9  ;;  %v1694_v12 = vmul.f32 %v7610_v25, %v10340_v27  ;;  %v10378_v61 = vld [vmem:[#allocation2 + $0xe0] sm:$0xff]  ;;  %v7616_v16 = vld [vmem:[%s11127_s2 + $0x13] ss:$0 sm:$0xff] }
 0x3b3   : > { %v1729_v38 = vrot.slane %v1691_v2, 6  ;;  %v1730_v53 = vrot.slane %v1692_v30, 6  ;;  %v1676_v33 = vadd.f32 %v1644_v11, %v1586_v3  ;;  %v1732_v20 = vrot.slane %v1693_v23, 6  ;;  %v7617_v11 = vld [vmem:[%s11127_s2 + $0x14] ss:$0 sm:$0xff] }
 0x3b4   : > { %v1781_v41 = vmul.f32 %v7611_v36, %v10224_v45  ;;  %v1782_v50 = vmul.f32 %v7611_v36, %v10264_v1  ;;  %v1733_v56 = vrot.slane %v1694_v12, 6  ;;  %v1783_v51 = vmul.f32 %v7611_v36, %v10299_v60 }
 0x3b5   : > { %v1731_v34 = vsel %vm1051_vm6, %v1729_v38, %v1730_v53  ;;  %v1763_v29 = vadd.f32 %v1729_v38, %v1673_v44  ;;  %v1765_v39 = vadd.f32 %v1732_v20, %v1675_v58  ;;  %v1784_v43 = vmul.f32 %v7611_v36, %v10340_v27 }
 0x3b6   : > { %v1764_v63 = vadd.f32 %v1731_v34, %v1674_v28  ;;  %v1819_v5 = vrot.slane %v1781_v41, 7  ;;  %v1734_v62 = vsel %vm1051_vm6, %v1732_v20, %v1733_v56  ;;  %v1820_v47 = vrot.slane %v1782_v50, 7 }
 0x3b7   : > { %v1822_v40 = vrot.slane %v1783_v51, 7  ;;  %v1871_v4 = vmul.f32 %v7612_v8, %v10224_v45  ;;  %v1766_v26 = vadd.f32 %v1734_v62, %v1676_v33  ;;  %v1823_v35 = vrot.slane %v1784_v43, 7  ;;  %v7613_v45 = vld [vmem:[%s11127_s2 + $0x12] ss:$0 sm:$0xff] }
 0x3b8   : > { %v1853_v21 = vadd.f32 %v1819_v5, %v1763_v29  ;;  %v1872_v32 = vmul.f32 %v7612_v8, %v10264_v1  ;;  %v1821_v22 = vsel %vm1142_vm7, %v1819_v5, %v1820_v47  ;;  %v1873_v6 = vmul.f32 %v7612_v8, %v10299_v60 }
 0x3b9   : > { %v1855_v19 = vadd.f32 %v1822_v40, %v1765_v39  ;;  %v1874_v13 = vmul.f32 %v7612_v8, %v10340_v27  ;;  %v1824_v54 = vsel %vm1142_vm7, %v1822_v40, %v1823_v35  ;;  %v1854_v37 = vadd.f32 %v1821_v22, %v1764_v63  ;;  %v7618_v63 = vld [vmem:[%s11127_s2 + $0x15] ss:$0 sm:$0xff] }
 0x3ba   : > { %v1887_v0 = vadd.f32 %v1871_v4, %v1853_v21  ;;  %v1905_v46 = vmul.f32 %v7613_v45, %v10296_v52  ;;  %v1856_v42 = vadd.f32 %v1824_v54, %v1766_v26  ;;  %v1906_v1 = vmul.f32 %v7613_v45, %v10299_v60 }
 0x3bb   : > { %v1889_v48 = vadd.f32 %v1873_v6, %v1855_v19  ;;  %v1907_v59 = vmul.f32 %v10375_v49, %v7613_v45  ;;  %v1888_v57 = vadd.f32 %v1872_v32, %v1854_v37  ;;  %v1908_v3 = vmul.f32 %v10378_v61, %v7613_v45 }
 0x3bc   : > { %v1921_v24 = vadd.f32 %v1905_v46, %v1887_v0  ;;  %v1939_v9 = vmul.f32 %v7616_v16, %v10296_v52  ;;  %v1890_v25 = vadd.f32 %v1874_v13, %v1856_v42  ;;  %v1940_v30 = vmul.f32 %v7616_v16, %v10299_v60  ;;  %v7619_v13 = vld [vmem:[%s11127_s2 + $0x16] ss:$0 sm:$0xff] }
 0x3bd   : > { %v1923_v2 = vadd.f32 %v1907_v59, %v1889_v48  ;;  %v1941_v44 = vmul.f32 %v7616_v16, %v10375_v49  ;;  %v1922_v28 = vadd.f32 %v1906_v1, %v1888_v57  ;;  %v1942_v58 = vmul.f32 %v7616_v16, %v10378_v61  ;;  %v7620_v1 = vld [vmem:[%s11127_s2 + $0x17] ss:$0 sm:$0xff] }
 0x3be   : > { %v1977_v23 = vrot.slane %v1939_v9, 1  ;;  %v2029_v12 = vmul.f32 %v7617_v11, %v10296_v52  ;;  %v1924_v38 = vadd.f32 %v1908_v3, %v1890_v25  ;;  %v1978_v53 = vrot.slane %v1940_v30, 1 }
 0x3bf   : > { %v1980_v33 = vrot.slane %v1941_v44, 1  ;;  %v2030_v20 = vmul.f32 %v7617_v11, %v10299_v60  ;;  %v1981_v36 = vrot.slane %v1942_v58, 1  ;;  %v2031_v41 = vmul.f32 %v7617_v11, %v10375_v49  ;;  %v10419_v58 = vld [vmem:[#allocation2 + $0xe8] sm:$0xf] }
 0x3c0   : > { %v2032_v50 = vmul.f32 %v7617_v11, %v10378_v61  ;;  %v2067_v34 = vrot.slane %v2029_v12, 2  ;;  %v1979_v56 = vsel %vm637_vm1, %v1977_v23, %v1978_v53  ;;  %v2012_v29 = vadd.f32 %v1978_v53, %v1922_v28 }
 0x3c1   : > { %v2068_v51 = vrot.slane %v2030_v20, 2  ;;  %v2119_v39 = vmul.f32 %v7618_v63, %v10296_v52  ;;  %v1982_v43 = vsel %vm637_vm1, %v1980_v33, %v1981_v36  ;;  %v2011_v5 = vadd.f32 %v1979_v56, %v1921_v24 }
 0x3c2   : > { %v2014_v62 = vadd.f32 %v1981_v36, %v1924_v38  ;;  %v2070_v47 = vrot.slane %v2031_v41, 2  ;;  %v2013_v40 = vadd.f32 %v1982_v43, %v1923_v2  ;;  %v2071_v4 = vrot.slane %v2032_v50, 2  ;;  %v7622_v50 = vld [vmem:[%s11127_s2 + $0x18] ss:$0 sm:$0xff] }
 0x3c3   : > { %v2069_v8 = vsel %vm728_vm2, %v2067_v34, %v2068_v51  ;;  %v2102_v26 = vadd.f32 %v2068_v51, %v2012_v29  ;;  %v2120_v21 = vmul.f32 %v7618_v63, %v10299_v60  ;;  %v2121_v32 = vmul.f32 %v7618_v63, %v10375_v49 }
 0x3c4   : > { %v2101_v35 = vadd.f32 %v2069_v8, %v2011_v5  ;;  %v2122_v22 = vmul.f32 %v7618_v63, %v10378_v61  ;;  %v2072_v19 = vsel %vm728_vm2, %v2070_v47, %v2071_v4  ;;  %v2104_v52 = vadd.f32 %v2071_v4, %v2014_v62  ;;  %v7623_v4 = vld [vmem:[%s11127_s2 + $0x19] ss:$0 sm:$0xff] }
 0x3c5   : > { %v2157_v6 = vrot.slane %v2119_v39, 3  ;;  %v2203_v54 = vmul.f32 %v7619_v13, %v10299_v60  ;;  %v2103_v37 = vadd.f32 %v2072_v19, %v2013_v40  ;;  %v2158_v0 = vrot.slane %v2120_v21, 3 }
 0x3c6   : > { %v2160_v45 = vrot.slane %v2121_v32, 3  ;;  %v2161_v46 = vrot.slane %v2122_v22, 3  ;;  %v2204_v42 = vmul.f32 %v7619_v13, %v10378_v61  ;;  %v2259_v59 = vmul.f32 %v7620_v1, %v10299_v60 }
 0x3c7   : > { %v2219_v48 = vrot.slane %v2203_v54, 4  ;;  %v2260_v57 = vmul.f32 %v7620_v1, %v10340_v27  ;;  %v2159_v3 = vsel %vm819_vm3, %v2157_v6, %v2158_v0  ;;  %v2192_v16 = vadd.f32 %v2158_v0, %v2102_v26 }
 0x3c8   : > { %v2162_v24 = vsel %vm819_vm3, %v2160_v45, %v2161_v46  ;;  %v2194_v9 = vadd.f32 %v2161_v46, %v2104_v52  ;;  %v2191_v25 = vadd.f32 %v2159_v3, %v2101_v35  ;;  %v2220_v30 = vrot.slane %v2204_v42, 4  ;;  %v7624_v46 = vld [vmem:[%s11127_s2 + $0x1a] ss:$0 sm:$0xff] }
 0x3c9   : > { %v2193_v2 = vadd.f32 %v2162_v24, %v2103_v37  ;;  %v2261_v44 = vmul.f32 %v7620_v1, %v10378_v61  ;;  %v2242_v28 = vadd.f32 %v2219_v48, %v2192_v16  ;;  %v2262_v23 = vmul.f32 %v10419_v58, %v7620_v1 }
 0x3ca   : > { %v2297_v11 = vrot.slane %v2259_v59, 5  ;;  %v2298_v12 = vrot.slane %v2260_v57, 5  ;;  %v2241_v38 = vadd.f32 %v2219_v48, %v2191_v25  ;;  %v2244_v33 = vadd.f32 %v2220_v30, %v2194_v9 }
 0x3cb   : > { %v2243_v53 = vadd.f32 %v2220_v30, %v2193_v2  ;;  %v2300_v20 = vrot.slane %v2261_v44, 5  ;;  %v2301_v41 = vrot.slane %v2262_v23, 5  ;;  %v2349_v34 = vmul.f32 %v7622_v50, %v10299_v60 }
 0x3cc   : > { %v2299_v36 = vsel %vm960_vm5, %v2297_v11, %v2298_v12  ;;  %v2350_v56 = vmul.f32 %v7622_v50, %v10340_v27  ;;  %v2331_v29 = vadd.f32 %v2297_v11, %v2241_v38  ;;  %v2351_v39 = vmul.f32 %v7622_v50, %v10378_v61  ;;  %v10454_v11 = vld [vmem:[#allocation2 + $0xf0] sm:$0xff] }
 0x3cd   : > { %v2332_v51 = vadd.f32 %v2299_v36, %v2242_v28  ;;  %v2333_v63 = vadd.f32 %v2300_v20, %v2243_v53  ;;  %v2302_v43 = vsel %vm960_vm5, %v2300_v20, %v2301_v41  ;;  %v2352_v5 = vmul.f32 %v7622_v50, %v10419_v58  ;;  %v10457_v53 = vld [vmem:[#allocation2 + $0xf8] sm:$0xff] }
 0x3ce   : > { %v2387_v62 = vrot.slane %v2349_v34, 6  ;;  %v2388_v47 = vrot.slane %v2350_v56, 6  ;;  %v2334_v40 = vadd.f32 %v2302_v43, %v2244_v33  ;;  %v2390_v8 = vrot.slane %v2351_v39, 6  ;;  %v7628_v36 = vld [vmem:[%s11127_s2 + $0x1c] ss:$0 sm:$0xff] }
 0x3cf   : > { %v2439_v26 = vmul.f32 %v7623_v4, %v10299_v60  ;;  %v2440_v35 = vmul.f32 %v7623_v4, %v10340_v27  ;;  %v2391_v32 = vrot.slane %v2352_v5, 6  ;;  %v2441_v19 = vmul.f32 %v7623_v4, %v10378_v61  ;;  %v7629_v43 = vld [vmem:[%s11127_s2 + $0x1d] ss:$0 sm:$0xff] }
 0x3d0   : > { %v2389_v21 = vsel %vm1051_vm6, %v2387_v62, %v2388_v47  ;;  %v2421_v22 = vadd.f32 %v2387_v62, %v2331_v29  ;;  %v2423_v6 = vadd.f32 %v2390_v8, %v2333_v63  ;;  %v2442_v13 = vmul.f32 %v7623_v4, %v10419_v58 }
 0x3d1   : > { %v2422_v52 = vadd.f32 %v2389_v21, %v2332_v51  ;;  %v2477_v54 = vrot.slane %v2439_v26, 7  ;;  %v2392_v37 = vsel %vm1051_vm6, %v2390_v8, %v2391_v32  ;;  %v2478_v0 = vrot.slane %v2440_v35, 7 }
 0x3d2   : > { %v2480_v45 = vrot.slane %v2441_v19, 7  ;;  %v2529_v42 = vmul.f32 %v7624_v46, %v10299_v60  ;;  %v2424_v48 = vadd.f32 %v2392_v37, %v2334_v40  ;;  %v2481_v1 = vrot.slane %v2442_v13, 7  ;;  %v7625_v60 = vld [vmem:[%s11127_s2 + $0x1b] ss:$0 sm:$0xff] }
 0x3d3   : > { %v2511_v59 = vadd.f32 %v2477_v54, %v2421_v22  ;;  %v2530_v57 = vmul.f32 %v7624_v46, %v10340_v27  ;;  %v2479_v3 = vsel %vm1142_vm7, %v2477_v54, %v2478_v0  ;;  %v2531_v16 = vmul.f32 %v7624_v46, %v10378_v61 }
 0x3d4   : > { %v2513_v24 = vadd.f32 %v2480_v45, %v2423_v6  ;;  %v2532_v9 = vmul.f32 %v7624_v46, %v10419_v58  ;;  %v2482_v25 = vsel %vm1142_vm7, %v2480_v45, %v2481_v1  ;;  %v2512_v2 = vadd.f32 %v2479_v3, %v2422_v52  ;;  %v7630_v52 = vld [vmem:[%s11127_s2 + $0x1e] ss:$0 sm:$0xff] }
 0x3d5   : > { %v2545_v30 = vadd.f32 %v2529_v42, %v2511_v59  ;;  %v2563_v44 = vmul.f32 %v7625_v60, %v10375_v49  ;;  %v2514_v28 = vadd.f32 %v2482_v25, %v2424_v48  ;;  %v2564_v27 = vmul.f32 %v7625_v60, %v10378_v61 }
 0x3d6   : > { %v2547_v23 = vadd.f32 %v2531_v16, %v2513_v24  ;;  %v2565_v12 = vmul.f32 %v10454_v11, %v7625_v60  ;;  %v2546_v38 = vadd.f32 %v2530_v57, %v2512_v2  ;;  %v2566_v33 = vmul.f32 %v10457_v53, %v7625_v60 }
 0x3d7   : > { %v2579_v20 = vadd.f32 %v2563_v44, %v2545_v30  ;;  %v2597_v41 = vmul.f32 %v7628_v36, %v10375_v49  ;;  %v2548_v50 = vadd.f32 %v2532_v9, %v2514_v28  ;;  %v2598_v56 = vmul.f32 %v7628_v36, %v10378_v61  ;;  %v7631_v9 = vld [vmem:[%s11127_s2 + $0x1f] ss:$0 sm:$0xff] }
 0x3d8   : > { %v2581_v34 = vadd.f32 %v2565_v12, %v2547_v23  ;;  %v2599_v29 = vmul.f32 %v7628_v36, %v10454_v11  ;;  %v2580_v51 = vadd.f32 %v2564_v27, %v2546_v38  ;;  %v2600_v63 = vmul.f32 %v7628_v36, %v10457_v53  ;;  %v7632_v27 = vld [vmem:[%s11127_s2 + $0x20] ss:$0 sm:$0xff] }
 0x3d9   : > { %v2635_v39 = vrot.slane %v2597_v41, 1  ;;  %v2687_v5 = vmul.f32 %v7629_v43, %v10375_v49  ;;  %v2582_v62 = vadd.f32 %v2566_v33, %v2548_v50  ;;  %v2636_v47 = vrot.slane %v2598_v56, 1 }
 0x3da   : > { %v2638_v40 = vrot.slane %v2599_v29, 1  ;;  %v2688_v8 = vmul.f32 %v7629_v43, %v10378_v61  ;;  %v2639_v4 = vrot.slane %v2600_v63, 1  ;;  %v2689_v26 = vmul.f32 %v7629_v43, %v10454_v11  ;;  %v10498_v63 = vld [vmem:[#allocation2 + $0x100] sm:$0xf] }
 0x3db   : > { %v2690_v35 = vmul.f32 %v7629_v43, %v10457_v53  ;;  %v2725_v21 = vrot.slane %v2687_v5, 2  ;;  %v2637_v32 = vsel %vm637_vm1, %v2635_v39, %v2636_v47  ;;  %v2670_v22 = vadd.f32 %v2636_v47, %v2580_v51 }
 0x3dc   : > { %v2726_v19 = vrot.slane %v2688_v8, 2  ;;  %v2777_v6 = vmul.f32 %v7630_v52, %v10375_v49  ;;  %v2640_v13 = vsel %vm637_vm1, %v2638_v40, %v2639_v4  ;;  %v2669_v54 = vadd.f32 %v2637_v32, %v2579_v20 }
 0x3dd   : > { %v2672_v37 = vadd.f32 %v2639_v4, %v2582_v62  ;;  %v2728_v0 = vrot.slane %v2689_v26, 2  ;;  %v2671_v45 = vadd.f32 %v2640_v13, %v2581_v34  ;;  %v2729_v42 = vrot.slane %v2690_v35, 2  ;;  %v7634_v35 = vld [vmem:[%s11127_s2 + $0x21] ss:$0 sm:$0xff] }
 0x3de   : > { %v2727_v46 = vsel %vm728_vm2, %v2725_v21, %v2726_v19  ;;  %v2760_v48 = vadd.f32 %v2726_v19, %v2670_v22  ;;  %v2778_v59 = vmul.f32 %v7630_v52, %v10378_v61  ;;  %v2779_v57 = vmul.f32 %v7630_v52, %v10454_v11 }
 0x3df   : > { %v2759_v1 = vadd.f32 %v2727_v46, %v2669_v54  ;;  %v2780_v3 = vmul.f32 %v7630_v52, %v10457_v53  ;;  %v2730_v24 = vsel %vm728_vm2, %v2728_v0, %v2729_v42  ;;  %v2762_v49 = vadd.f32 %v2729_v42, %v2672_v37  ;;  %v7635_v42 = vld [vmem:[%s11127_s2 + $0x22] ss:$0 sm:$0xff] }
 0x3e0   : > { %v2815_v16 = vrot.slane %v2777_v6, 3  ;;  %v2861_v25 = vmul.f32 %v7631_v9, %v10378_v61  ;;  %v2761_v2 = vadd.f32 %v2730_v24, %v2671_v45  ;;  %v2816_v30 = vrot.slane %v2778_v59, 3 }
 0x3e1   : > { %v2818_v60 = vrot.slane %v2779_v57, 3  ;;  %v2819_v44 = vrot.slane %v2780_v3, 3  ;;  %v2862_v28 = vmul.f32 %v7631_v9, %v10457_v53  ;;  %v2917_v12 = vmul.f32 %v7632_v27, %v10378_v61 }
 0x3e2   : > { %v2877_v23 = vrot.slane %v2861_v25, 4  ;;  %v2918_v38 = vmul.f32 %v7632_v27, %v10419_v58  ;;  %v2817_v33 = vsel %vm819_vm3, %v2815_v16, %v2816_v30  ;;  %v2850_v36 = vadd.f32 %v2816_v30, %v2760_v48 }
 0x3e3   : > { %v2820_v20 = vsel %vm819_vm3, %v2818_v60, %v2819_v44  ;;  %v2852_v41 = vadd.f32 %v2819_v44, %v2762_v49  ;;  %v2849_v50 = vadd.f32 %v2817_v33, %v2759_v1  ;;  %v2878_v56 = vrot.slane %v2862_v28, 4  ;;  %v7636_v44 = vld [vmem:[%s11127_s2 + $0x23] ss:$0 sm:$0xff] }
 0x3e4   : > { %v2851_v34 = vadd.f32 %v2820_v20, %v2761_v2  ;;  %v2919_v29 = vmul.f32 %v7632_v27, %v10457_v53  ;;  %v2900_v51 = vadd.f32 %v2877_v23, %v2850_v36  ;;  %v2920_v39 = vmul.f32 %v10498_v63, %v7632_v27 }
 0x3e5   : > { %v2955_v43 = vrot.slane %v2917_v12, 5  ;;  %v2956_v5 = vrot.slane %v2918_v38, 5  ;;  %v2899_v62 = vadd.f32 %v2877_v23, %v2849_v50  ;;  %v2902_v40 = vadd.f32 %v2878_v56, %v2852_v41 }
 0x3e6   : > { %v2901_v47 = vadd.f32 %v2878_v56, %v2851_v34  ;;  %v2958_v8 = vrot.slane %v2919_v29, 5  ;;  %v2959_v26 = vrot.slane %v2920_v39, 5  ;;  %v3007_v21 = vmul.f32 %v7634_v35, %v10378_v61 }
 0x3e7   : > { %v2957_v4 = vsel %vm960_vm5, %v2955_v43, %v2956_v5  ;;  %v3008_v32 = vmul.f32 %v7634_v35, %v10419_v58  ;;  %v2989_v22 = vadd.f32 %v2955_v43, %v2899_v62  ;;  %v3009_v6 = vmul.f32 %v7634_v35, %v10457_v53  ;;  %v10533_v43 = vld [vmem:[#allocation2 + $0x108] sm:$0xff] }
 0x3e8   : > { %v2990_v19 = vadd.f32 %v2957_v4, %v2900_v51  ;;  %v2991_v52 = vadd.f32 %v2958_v8, %v2901_v47  ;;  %v2960_v13 = vsel %vm960_vm5, %v2958_v8, %v2959_v26  ;;  %v3010_v54 = vmul.f32 %v7634_v35, %v10498_v63  ;;  %v10536_v47 = vld [vmem:[#allocation2 + $0x110] sm:$0xff]  ;;  %v7640_v4 = vld [vmem:[%s11127_s2 + $0x25] ss:$0 sm:$0xff] }
 0x3e9   : > { %v3045_v37 = vrot.slane %v3007_v21, 6  ;;  %v3046_v0 = vrot.slane %v3008_v32, 6  ;;  %v2992_v45 = vadd.f32 %v2960_v13, %v2902_v40  ;;  %v3048_v46 = vrot.slane %v3009_v6, 6  ;;  %v7641_v13 = vld [vmem:[%s11127_s2 + $0x26] ss:$0 sm:$0xff] }
 0x3ea   : > { %v3097_v48 = vmul.f32 %v7635_v42, %v10378_v61  ;;  %v3098_v1 = vmul.f32 %v7635_v42, %v10419_v58  ;;  %v3049_v57 = vrot.slane %v3010_v54, 6  ;;  %v3099_v24 = vmul.f32 %v7635_v42, %v10457_v53 }
 0x3eb   : > { %v3047_v59 = vsel %vm1051_vm6, %v3045_v37, %v3046_v0  ;;  %v3079_v3 = vadd.f32 %v3045_v37, %v2989_v22  ;;  %v3081_v16 = vadd.f32 %v3048_v46, %v2991_v52  ;;  %v3100_v9 = vmul.f32 %v7635_v42, %v10498_v63 }
 0x3ec   : > { %v3080_v49 = vadd.f32 %v3047_v59, %v2990_v19  ;;  %v3135_v25 = vrot.slane %v3097_v48, 7  ;;  %v3050_v2 = vsel %vm1051_vm6, %v3048_v46, %v3049_v57  ;;  %v3136_v30 = vrot.slane %v3098_v1, 7 }
 0x3ed   : > { %v3138_v60 = vrot.slane %v3099_v24, 7  ;;  %v3187_v28 = vmul.f32 %v7636_v44, %v10378_v61  ;;  %v3082_v23 = vadd.f32 %v3050_v2, %v2992_v45  ;;  %v3139_v27 = vrot.slane %v3100_v9, 7  ;;  %v7637_v61 = vld [vmem:[%s11127_s2 + $0x24] ss:$0 sm:$0xff] }
 0x3ee   : > { %v3169_v12 = vadd.f32 %v3135_v25, %v3079_v3  ;;  %v3188_v38 = vmul.f32 %v7636_v44, %v10419_v58  ;;  %v3137_v33 = vsel %vm1142_vm7, %v3135_v25, %v3136_v30  ;;  %v3189_v36 = vmul.f32 %v7636_v44, %v10457_v53 }
 0x3ef   : > { %v3171_v20 = vadd.f32 %v3138_v60, %v3081_v16  ;;  %v3190_v41 = vmul.f32 %v7636_v44, %v10498_v63  ;;  %v3140_v50 = vsel %vm1142_vm7, %v3138_v60, %v3139_v27  ;;  %v3170_v34 = vadd.f32 %v3137_v33, %v3080_v49  ;;  %v7642_v49 = vld [vmem:[%s11127_s2 + $0x27] ss:$0 sm:$0xff] }
 0x3f0   : > { %v3203_v56 = vadd.f32 %v3187_v28, %v3169_v12  ;;  %v3221_v29 = vmul.f32 %v7637_v61, %v10454_v11  ;;  %v3172_v51 = vadd.f32 %v3140_v50, %v3082_v23  ;;  %v3222_v58 = vmul.f32 %v7637_v61, %v10457_v53 }
 0x3f1   : > { %v3205_v39 = vadd.f32 %v3189_v36, %v3171_v20  ;;  %v3223_v5 = vmul.f32 %v10533_v43, %v7637_v61  ;;  %v3204_v62 = vadd.f32 %v3188_v38, %v3170_v34  ;;  %v3224_v40 = vmul.f32 %v10536_v47, %v7637_v61 }
 0x3f2   : > { %v3237_v8 = vadd.f32 %v3221_v29, %v3203_v56  ;;  %v3255_v26 = vmul.f32 %v7640_v4, %v10454_v11  ;;  %v3206_v35 = vadd.f32 %v3190_v41, %v3172_v51  ;;  %v3256_v32 = vmul.f32 %v7640_v4, %v10457_v53  ;;  %v7643_v41 = vld [vmem:[%s11127_s2 + $0x28] ss:$0 sm:$0xff] }
 0x3f3   : > { %v3239_v21 = vadd.f32 %v3223_v5, %v3205_v39  ;;  %v3257_v22 = vmul.f32 %v7640_v4, %v10533_v43  ;;  %v3238_v19 = vadd.f32 %v3222_v58, %v3204_v62  ;;  %v3258_v52 = vmul.f32 %v7640_v4, %v10536_v47  ;;  %v7644_v58 = vld [vmem:[%s11127_s2 + $0x29] ss:$0 sm:$0xff] }
 0x3f4   : > { %v3293_v6 = vrot.slane %v3255_v26, 1  ;;  %v3345_v54 = vmul.f32 %v7641_v13, %v10454_v11  ;;  %v3240_v37 = vadd.f32 %v3224_v40, %v3206_v35  ;;  %v3294_v0 = vrot.slane %v3256_v32, 1 }
 0x3f5   : > { %v3296_v45 = vrot.slane %v3257_v22, 1  ;;  %v3346_v46 = vmul.f32 %v7641_v13, %v10457_v53  ;;  %v3297_v42 = vrot.slane %v3258_v52, 1  ;;  %v3347_v48 = vmul.f32 %v7641_v13, %v10533_v43  ;;  %v10577_v52 = vld [vmem:[#allocation2 + $0x118] sm:$0xf] }
 0x3f6   : > { %v3348_v1 = vmul.f32 %v7641_v13, %v10536_v47  ;;  %v3383_v59 = vrot.slane %v3345_v54, 2  ;;  %v3295_v57 = vsel %vm637_vm1, %v3293_v6, %v3294_v0  ;;  %v3328_v3 = vadd.f32 %v3294_v0, %v3238_v19 }
 0x3f7   : > { %v3384_v24 = vrot.slane %v3346_v46, 2  ;;  %v3435_v16 = vmul.f32 %v7642_v49, %v10454_v11  ;;  %v3298_v9 = vsel %vm637_vm1, %v3296_v45, %v3297_v42  ;;  %v3327_v25 = vadd.f32 %v3295_v57, %v3237_v8 }
 0x3f8   : > { %v3330_v2 = vadd.f32 %v3297_v42, %v3240_v37  ;;  %v3386_v30 = vrot.slane %v3347_v48, 2  ;;  %v3329_v60 = vadd.f32 %v3298_v9, %v3239_v21  ;;  %v3387_v28 = vrot.slane %v3348_v1, 2  ;;  %v7646_v1 = vld [vmem:[%s11127_s2 + $0x2a] ss:$0 sm:$0xff] }
 0x3f9   : > { %v3385_v44 = vsel %vm728_vm2, %v3383_v59, %v3384_v24  ;;  %v3418_v23 = vadd.f32 %v3384_v24, %v3328_v3  ;;  %v3436_v12 = vmul.f32 %v7642_v49, %v10457_v53  ;;  %v3437_v38 = vmul.f32 %v7642_v49, %v10533_v43 }
 0x3fa   : > { %v3417_v27 = vadd.f32 %v3385_v44, %v3327_v25  ;;  %v3438_v33 = vmul.f32 %v7642_v49, %v10536_v47  ;;  %v3388_v20 = vsel %vm728_vm2, %v3386_v30, %v3387_v28  ;;  %v3420_v11 = vadd.f32 %v3387_v28, %v3330_v2  ;;  %v7647_v28 = vld [vmem:[%s11127_s2 + $0x2b] ss:$0 sm:$0xff] }
 0x3fb   : > { %v3473_v36 = vrot.slane %v3435_v16, 3  ;;  %v3519_v50 = vmul.f32 %v7643_v41, %v10457_v53  ;;  %v3419_v34 = vadd.f32 %v3388_v20, %v3329_v60  ;;  %v3474_v56 = vrot.slane %v3436_v12, 3 }
 0x3fc   : > { %v3476_v61 = vrot.slane %v3437_v38, 3  ;;  %v3477_v29 = vrot.slane %v3438_v33, 3  ;;  %v3520_v51 = vmul.f32 %v7643_v41, %v10536_v47  ;;  %v3575_v5 = vmul.f32 %v7644_v58, %v10457_v53 }
 0x3fd   : > { %v3535_v39 = vrot.slane %v3519_v50, 4  ;;  %v3576_v62 = vmul.f32 %v7644_v58, %v10498_v63  ;;  %v3475_v40 = vsel %vm819_vm3, %v3473_v36, %v3474_v56  ;;  %v3508_v4 = vadd.f32 %v3474_v56, %v3418_v23 }
 0x3fe   : > { %v3478_v8 = vsel %vm819_vm3, %v3476_v61, %v3477_v29  ;;  %v3510_v26 = vadd.f32 %v3477_v29, %v3420_v11  ;;  %v3507_v35 = vadd.f32 %v3475_v40, %v3417_v27  ;;  %v3536_v32 = vrot.slane %v3520_v51, 4  ;;  %v7648_v29 = vld [vmem:[%s11127_s2 + $0x2c] ss:$0 sm:$0xff] }
 0x3ff   : > { %v3509_v21 = vadd.f32 %v3478_v8, %v3419_v34  ;;  %v3577_v22 = vmul.f32 %v7644_v58, %v10536_v47  ;;  %v3558_v19 = vadd.f32 %v3535_v39, %v3508_v4  ;;  %v3578_v6 = vmul.f32 %v10577_v52, %v7644_v58 }
 0x400   : > { %v3613_v13 = vrot.slane %v3575_v5, 5  ;;  %v3614_v54 = vrot.slane %v3576_v62, 5  ;;  %v3557_v37 = vadd.f32 %v3535_v39, %v3507_v35  ;;  %v3560_v45 = vadd.f32 %v3536_v32, %v3510_v26 }
 0x401   : > { %v3559_v0 = vadd.f32 %v3536_v32, %v3509_v21  ;;  %v3616_v46 = vrot.slane %v3577_v22, 5  ;;  %v3617_v48 = vrot.slane %v3578_v6, 5  ;;  %v3665_v59 = vmul.f32 %v7646_v1, %v10457_v53 }
 0x402   : > { %v3615_v42 = vsel %vm960_vm5, %v3613_v13, %v3614_v54  ;;  %v3666_v57 = vmul.f32 %v7646_v1, %v10498_v63  ;;  %v3647_v3 = vadd.f32 %v3613_v13, %v3557_v37  ;;  %v3667_v16 = vmul.f32 %v7646_v1, %v10536_v47  ;;  %v10612_v13 = vld [vmem:[#allocation2 + $0x120] sm:$0xff] }
 0x403   : > { %v3648_v24 = vadd.f32 %v3615_v42, %v3558_v19  ;;  %v3649_v49 = vadd.f32 %v3616_v46, %v3559_v0  ;;  %v3618_v9 = vsel %vm960_vm5, %v3616_v46, %v3617_v48  ;;  %v3668_v25 = vmul.f32 %v7646_v1, %v10577_v52  ;;  %v10615_v0 = vld [vmem:[#allocation2 + $0x128] sm:$0xff] }
 0x404   : > { %v3703_v2 = vrot.slane %v3665_v59, 6  ;;  %v3704_v30 = vrot.slane %v3666_v57, 6  ;;  %v3650_v60 = vadd.f32 %v3618_v9, %v3560_v45  ;;  %v3706_v44 = vrot.slane %v3667_v16, 6  ;;  %v7652_v42 = vld [vmem:[%s11127_s2 + $0x2e] ss:$0 sm:$0xff] }
 0x405   : > { %v3755_v23 = vmul.f32 %v7647_v28, %v10457_v53  ;;  %v3756_v27 = vmul.f32 %v7647_v28, %v10498_v63  ;;  %v3707_v38 = vrot.slane %v3668_v25, 6  ;;  %v3757_v20 = vmul.f32 %v7647_v28, %v10536_v47  ;;  %v7653_v9 = vld [vmem:[%s11127_s2 + $0x2f] ss:$0 sm:$0xff] }
 0x406   : > { %v3705_v12 = vsel %vm1051_vm6, %v3703_v2, %v3704_v30  ;;  %v3737_v33 = vadd.f32 %v3703_v2, %v3647_v3  ;;  %v3739_v36 = vadd.f32 %v3706_v44, %v3649_v49  ;;  %v3758_v41 = vmul.f32 %v7647_v28, %v10577_v52 }
 0x407   : > { %v3738_v11 = vadd.f32 %v3705_v12, %v3648_v24  ;;  %v3793_v50 = vrot.slane %v3755_v23, 7  ;;  %v3708_v34 = vsel %vm1051_vm6, %v3706_v44, %v3707_v38  ;;  %v3794_v56 = vrot.slane %v3756_v27, 7 }
 0x408   : > { %v3796_v61 = vrot.slane %v3757_v20, 7  ;;  %v3845_v51 = vmul.f32 %v7648_v29, %v10457_v53  ;;  %v3740_v39 = vadd.f32 %v3708_v34, %v3650_v60  ;;  %v3797_v58 = vrot.slane %v3758_v41, 7  ;;  %v7649_v53 = vld [vmem:[%s11127_s2 + $0x2d] ss:$0 sm:$0xff] }
 0x409   : > { %v3827_v5 = vadd.f32 %v3793_v50, %v3737_v33  ;;  %v3846_v62 = vmul.f32 %v7648_v29, %v10498_v63  ;;  %v3795_v40 = vsel %vm1142_vm7, %v3793_v50, %v3794_v56  ;;  %v3847_v4 = vmul.f32 %v7648_v29, %v10536_v47 }
 0x40a   : > { %v3829_v8 = vadd.f32 %v3796_v61, %v3739_v36  ;;  %v3848_v26 = vmul.f32 %v7648_v29, %v10577_v52  ;;  %v3798_v35 = vsel %vm1142_vm7, %v3796_v61, %v3797_v58  ;;  %v3828_v21 = vadd.f32 %v3795_v40, %v3738_v11  ;;  %v7654_v11 = vld [vmem:[%s11127_s2 + $0x30] ss:$0 sm:$0xff] }
 0x40b   : > { %v3861_v32 = vadd.f32 %v3845_v51, %v3827_v5  ;;  %v3879_v22 = vmul.f32 %v7649_v53, %v10533_v43  ;;  %v3830_v19 = vadd.f32 %v3798_v35, %v3740_v39  ;;  %v3880_v63 = vmul.f32 %v7649_v53, %v10536_v47 }
 0x40c   : > { %v3863_v6 = vadd.f32 %v3847_v4, %v3829_v8  ;;  %v3881_v54 = vmul.f32 %v10612_v13, %v7649_v53  ;;  %v3862_v37 = vadd.f32 %v3846_v62, %v3828_v21  ;;  %v3882_v45 = vmul.f32 %v10615_v0, %v7649_v53 }
 0x40d   : > { %v3895_v46 = vadd.f32 %v3879_v22, %v3861_v32  ;;  %v3913_v48 = vmul.f32 %v7652_v42, %v10533_v43  ;;  %v3864_v1 = vadd.f32 %v3848_v26, %v3830_v19  ;;  %v3914_v57 = vmul.f32 %v7652_v42, %v10536_v47  ;;  %v7655_v26 = vld [vmem:[%s11127_s2 + $0x31] ss:$0 sm:$0xff] }
 0x40e   : > { %v3897_v59 = vadd.f32 %v3881_v54, %v3863_v6  ;;  %v3915_v3 = vmul.f32 %v7652_v42, %v10612_v13  ;;  %v3896_v24 = vadd.f32 %v3880_v63, %v3862_v37  ;;  %v3916_v49 = vmul.f32 %v7652_v42, %v10615_v0  ;;  %v7656_v63 = vld [vmem:[%s11127_s2 + $0x32] ss:$0 sm:$0xff] }
 0x40f   : > { %v3951_v16 = vrot.slane %v3913_v48, 1  ;;  %v4003_v25 = vmul.f32 %v7653_v9, %v10533_v43  ;;  %v3898_v2 = vadd.f32 %v3882_v45, %v3864_v1  ;;  %v3952_v30 = vrot.slane %v3914_v57, 1 }
 0x410   : > { %v3954_v60 = vrot.slane %v3915_v3, 1  ;;  %v4004_v44 = vmul.f32 %v7653_v9, %v10536_v47  ;;  %v3955_v28 = vrot.slane %v3916_v49, 1  ;;  %v4005_v23 = vmul.f32 %v7653_v9, %v10612_v13  ;;  %v10656_v49 = vld [vmem:[#allocation2 + $0x130] sm:$0xf] }
 0x411   : > { %v4006_v27 = vmul.f32 %v7653_v9, %v10615_v0  ;;  %v4041_v12 = vrot.slane %v4003_v25, 2  ;;  %v3953_v38 = vsel %vm637_vm1, %v3951_v16, %v3952_v30  ;;  %v3986_v33 = vadd.f32 %v3952_v30, %v3896_v24 }
 0x412   : > { %v4042_v20 = vrot.slane %v4004_v44, 2  ;;  %v4093_v36 = vmul.f32 %v7654_v11, %v10533_v43  ;;  %v3956_v41 = vsel %vm637_vm1, %v3954_v60, %v3955_v28  ;;  %v3985_v50 = vadd.f32 %v3953_v38, %v3895_v46 }
 0x413   : > { %v3988_v34 = vadd.f32 %v3955_v28, %v3898_v2  ;;  %v4044_v56 = vrot.slane %v4005_v23, 2  ;;  %v3987_v61 = vadd.f32 %v3956_v41, %v3897_v59  ;;  %v4045_v51 = vrot.slane %v4006_v27, 2  ;;  %v7658_v27 = vld [vmem:[%s11127_s2 + $0x33] ss:$0 sm:$0xff] }
 0x414   : > { %v4043_v29 = vsel %vm728_vm2, %v4041_v12, %v4042_v20  ;;  %v4076_v39 = vadd.f32 %v4042_v20, %v3986_v33  ;;  %v4094_v5 = vmul.f32 %v7654_v11, %v10536_v47  ;;  %v4095_v62 = vmul.f32 %v7654_v11, %v10612_v13 }
 0x415   : > { %v4075_v58 = vadd.f32 %v4043_v29, %v3985_v50  ;;  %v4096_v40 = vmul.f32 %v7654_v11, %v10615_v0  ;;  %v4046_v8 = vsel %vm728_vm2, %v4044_v56, %v4045_v51  ;;  %v4078_v43 = vadd.f32 %v4045_v51, %v3988_v34  ;;  %v7659_v51 = vld [vmem:[%s11127_s2 + $0x34] ss:$0 sm:$0xff] }
 0x416   : > { %v4131_v4 = vrot.slane %v4093_v36, 3  ;;  %v4177_v35 = vmul.f32 %v7655_v26, %v10536_v47  ;;  %v4077_v21 = vadd.f32 %v4046_v8, %v3987_v61  ;;  %v4132_v32 = vrot.slane %v4094_v5, 3 }
 0x417   : > { %v4134_v53 = vrot.slane %v4095_v62, 3  ;;  %v4135_v22 = vrot.slane %v4096_v40, 3  ;;  %v4178_v19 = vmul.f32 %v7655_v26, %v10615_v0  ;;  %v4233_v54 = vmul.f32 %v7656_v63, %v10536_v47 }
 0x418   : > { %v4193_v6 = vrot.slane %v4177_v35, 4  ;;  %v4234_v37 = vmul.f32 %v7656_v63, %v10577_v52  ;;  %v4133_v45 = vsel %vm819_vm3, %v4131_v4, %v4132_v32  ;;  %v4166_v42 = vadd.f32 %v4132_v32, %v4076_v39 }
 0x419   : > { %v4136_v46 = vsel %vm819_vm3, %v4134_v53, %v4135_v22  ;;  %v4168_v48 = vadd.f32 %v4135_v22, %v4078_v43  ;;  %v4165_v1 = vadd.f32 %v4133_v45, %v4075_v58  ;;  %v4194_v57 = vrot.slane %v4178_v19, 4  ;;  %v7660_v22 = vld [vmem:[%s11127_s2 + $0x35] ss:$0 sm:$0xff] }
 0x41a   : > { %v4167_v59 = vadd.f32 %v4136_v46, %v4077_v21  ;;  %v4235_v3 = vmul.f32 %v7656_v63, %v10615_v0  ;;  %v4216_v24 = vadd.f32 %v4193_v6, %v4166_v42  ;;  %v4236_v16 = vmul.f32 %v10656_v49, %v7656_v63 }
 0x41b   : > { %v4271_v9 = vrot.slane %v4233_v54, 5  ;;  %v4272_v25 = vrot.slane %v4234_v37, 5  ;;  %v4215_v2 = vadd.f32 %v4193_v6, %v4165_v1  ;;  %v4218_v60 = vadd.f32 %v4194_v57, %v4168_v48 }
 0x41c   : > { %v4217_v30 = vadd.f32 %v4194_v57, %v4167_v59  ;;  %v4274_v44 = vrot.slane %v4235_v3, 5  ;;  %v4275_v23 = vrot.slane %v4236_v16, 5  ;;  %v4323_v12 = vmul.f32 %v7658_v27, %v10536_v47 }
 0x41d   : > { %v4273_v28 = vsel %vm960_vm5, %v4271_v9, %v4272_v25  ;;  %v4324_v38 = vmul.f32 %v7658_v27, %v10577_v52  ;;  %v4305_v33 = vadd.f32 %v4271_v9, %v4215_v2  ;;  %v4325_v36 = vmul.f32 %v7658_v27, %v10615_v0  ;;  %v10691_v9 = vld [vmem:[#allocation2 + $0x138] sm:$0xff] }
 0x41e   : > { %v4306_v20 = vadd.f32 %v4273_v28, %v4216_v24  ;;  %v4307_v11 = vadd.f32 %v4274_v44, %v4217_v30  ;;  %v4276_v41 = vsel %vm960_vm5, %v4274_v44, %v4275_v23  ;;  %v4326_v50 = vmul.f32 %v7658_v27, %v10656_v49  ;;  %v10694_v30 = vld [vmem:[#allocation2 + $0x140] sm:$0xff]  ;;  %v7664_v28 = vld [vmem:[%s11127_s2 + $0x37] ss:$0 sm:$0xff] }
 0x41f   : > { %v4361_v34 = vrot.slane %v4323_v12, 6  ;;  %v4362_v56 = vrot.slane %v4324_v38, 6  ;;  %v4308_v61 = vadd.f32 %v4276_v41, %v4218_v60  ;;  %v4364_v29 = vrot.slane %v4325_v36, 6  ;;  %v7665_v41 = vld [vmem:[%s11127_s2 + $0x38] ss:$0 sm:$0xff] }
 0x420   : > { %v4413_v39 = vmul.f32 %v7659_v51, %v10536_v47  ;;  %v4414_v58 = vmul.f32 %v7659_v51, %v10577_v52  ;;  %v4365_v62 = vrot.slane %v4326_v50, 6  ;;  %v4415_v8 = vmul.f32 %v7659_v51, %v10615_v0 }
 0x421   : > { %v4363_v5 = vsel %vm1051_vm6, %v4361_v34, %v4362_v56  ;;  %v4395_v40 = vadd.f32 %v4361_v34, %v4305_v33  ;;  %v4397_v4 = vadd.f32 %v4364_v29, %v4307_v11  ;;  %v4416_v26 = vmul.f32 %v7659_v51, %v10656_v49 }
 0x422   : > { %v4396_v43 = vadd.f32 %v4363_v5, %v4306_v20  ;;  %v4451_v35 = vrot.slane %v4413_v39, 7  ;;  %v4366_v21 = vsel %vm1051_vm6, %v4364_v29, %v4365_v62  ;;  %v4452_v32 = vrot.slane %v4414_v58, 7 }
 0x423   : > { %v4454_v53 = vrot.slane %v4415_v8, 7  ;;  %v4503_v19 = vmul.f32 %v7660_v22, %v10536_v47  ;;  %v4398_v6 = vadd.f32 %v4366_v21, %v4308_v61  ;;  %v4455_v63 = vrot.slane %v4416_v26, 7  ;;  %v7661_v47 = vld [vmem:[%s11127_s2 + $0x36] ss:$0 sm:$0xff] }
 0x424   : > { %v4485_v54 = vadd.f32 %v4451_v35, %v4395_v40  ;;  %v4504_v37 = vmul.f32 %v7660_v22, %v10577_v52  ;;  %v4453_v45 = vsel %vm1142_vm7, %v4451_v35, %v4452_v32  ;;  %v4505_v42 = vmul.f32 %v7660_v22, %v10615_v0 }
 0x425   : > { %v4487_v46 = vadd.f32 %v4454_v53, %v4397_v4  ;;  %v4506_v48 = vmul.f32 %v7660_v22, %v10656_v49  ;;  %v4456_v1 = vsel %vm1142_vm7, %v4454_v53, %v4455_v63  ;;  %v4486_v59 = vadd.f32 %v4453_v45, %v4396_v43  ;;  %v7666_v43 = vld [vmem:[%s11127_s2 + $0x39] ss:$0 sm:$0xff] }
 0x426   : > { %v4519_v57 = vadd.f32 %v4503_v19, %v4485_v54  ;;  %v4537_v3 = vmul.f32 %v7661_v47, %v10612_v13  ;;  %v4488_v24 = vadd.f32 %v4456_v1, %v4398_v6  ;;  %v4538_v52 = vmul.f32 %v7661_v47, %v10615_v0 }
 0x427   : > { %v4521_v16 = vadd.f32 %v4505_v42, %v4487_v46  ;;  %v4539_v25 = vmul.f32 %v10691_v9, %v7661_v47  ;;  %v4520_v2 = vadd.f32 %v4504_v37, %v4486_v59  ;;  %v4540_v60 = vmul.f32 %v10694_v30, %v7661_v47 }
 0x428   : > { %v4553_v44 = vadd.f32 %v4537_v3, %v4519_v57  ;;  %v4571_v23 = vmul.f32 %v7664_v28, %v10612_v13  ;;  %v4522_v27 = vadd.f32 %v4506_v48, %v4488_v24  ;;  %v4572_v38 = vmul.f32 %v7664_v28, %v10615_v0  ;;  %v7667_v48 = vld [vmem:[%s11127_s2 + $0x3a] ss:$0 sm:$0xff] }
 0x429   : > { %v4555_v12 = vadd.f32 %v4539_v25, %v4521_v16  ;;  %v4573_v33 = vmul.f32 %v7664_v28, %v10691_v9  ;;  %v4554_v20 = vadd.f32 %v4538_v52, %v4520_v2  ;;  %v4574_v11 = vmul.f32 %v7664_v28, %v10694_v30  ;;  %v7668_v52 = vld [vmem:[%s11127_s2 + $0x3b] ss:$0 sm:$0xff] }
 0x42a   : > { %v4609_v36 = vrot.slane %v4571_v23, 1  ;;  %v4661_v50 = vmul.f32 %v7665_v41, %v10612_v13  ;;  %v4556_v34 = vadd.f32 %v4540_v60, %v4522_v27  ;;  %v4610_v56 = vrot.slane %v4572_v38, 1 }
 0x42b   : > { %v4612_v61 = vrot.slane %v4573_v33, 1  ;;  %v4662_v29 = vmul.f32 %v7665_v41, %v10615_v0  ;;  %v4613_v51 = vrot.slane %v4574_v11, 1  ;;  %v4663_v39 = vmul.f32 %v7665_v41, %v10691_v9  ;;  %v10735_v11 = vld [vmem:[#allocation2 + $0x148] sm:$0xf] }
 0x42c   : > { %v4664_v58 = vmul.f32 %v7665_v41, %v10694_v30  ;;  %v4699_v5 = vrot.slane %v4661_v50, 2  ;;  %v4611_v62 = vsel %vm637_vm1, %v4609_v36, %v4610_v56  ;;  %v4644_v40 = vadd.f32 %v4610_v56, %v4554_v20 }
 0x42d   : > { %v4700_v8 = vrot.slane %v4662_v29, 2  ;;  %v4751_v4 = vmul.f32 %v7666_v43, %v10612_v13  ;;  %v4614_v26 = vsel %vm637_vm1, %v4612_v61, %v4613_v51  ;;  %v4643_v35 = vadd.f32 %v4611_v62, %v4553_v44 }
 0x42e   : > { %v4646_v21 = vadd.f32 %v4613_v51, %v4556_v34  ;;  %v4702_v32 = vrot.slane %v4663_v39, 2  ;;  %v4645_v53 = vadd.f32 %v4614_v26, %v4555_v12  ;;  %v4703_v19 = vrot.slane %v4664_v58, 2  ;;  %v7670_v58 = vld [vmem:[%s11127_s2 + $0x3c] ss:$0 sm:$0xff] }
 0x42f   : > { %v4701_v22 = vsel %vm728_vm2, %v4699_v5, %v4700_v8  ;;  %v4734_v6 = vadd.f32 %v4700_v8, %v4644_v40  ;;  %v4752_v54 = vmul.f32 %v7666_v43, %v10615_v0  ;;  %v4753_v37 = vmul.f32 %v7666_v43, %v10691_v9 }
 0x430   : > { %v4733_v63 = vadd.f32 %v4701_v22, %v4643_v35  ;;  %v4754_v45 = vmul.f32 %v7666_v43, %v10694_v30  ;;  %v4704_v46 = vsel %vm728_vm2, %v4702_v32, %v4703_v19  ;;  %v4736_v13 = vadd.f32 %v4703_v19, %v4646_v21  ;;  %v7671_v19 = vld [vmem:[%s11127_s2 + $0x3d] ss:$0 sm:$0xff] }
 0x431   : > { %v4789_v42 = vrot.slane %v4751_v4, 3  ;;  %v4835_v1 = vmul.f32 %v7667_v48, %v10615_v0  ;;  %v4735_v59 = vadd.f32 %v4704_v46, %v4645_v53  ;;  %v4790_v57 = vrot.slane %v4752_v54, 3 }
 0x432   : > { %v4792_v47 = vrot.slane %v4753_v37, 3  ;;  %v4793_v3 = vrot.slane %v4754_v45, 3  ;;  %v4836_v24 = vmul.f32 %v7667_v48, %v10694_v30  ;;  %v4891_v25 = vmul.f32 %v7668_v52, %v10615_v0 }
 0x433   : > { %v4851_v16 = vrot.slane %v4835_v1, 4  ;;  %v4892_v2 = vmul.f32 %v7668_v52, %v10656_v49  ;;  %v4791_v60 = vsel %vm819_vm3, %v4789_v42, %v4790_v57  ;;  %v4824_v28 = vadd.f32 %v4790_v57, %v4734_v6 }
 0x434   : > { %v4794_v44 = vsel %vm819_vm3, %v4792_v47, %v4793_v3  ;;  %v4826_v23 = vadd.f32 %v4793_v3, %v4736_v13  ;;  %v4823_v27 = vadd.f32 %v4791_v60, %v4733_v63  ;;  %v4852_v38 = vrot.slane %v4836_v24, 4  ;;  %v7672_v3 = vld [vmem:[%s11127_s2 + $0x3e] ss:$0 sm:$0xff] }
 0x435   : > { %v4825_v12 = vadd.f32 %v4794_v44, %v4735_v59  ;;  %v4893_v33 = vmul.f32 %v7668_v52, %v10694_v30  ;;  %v4874_v20 = vadd.f32 %v4851_v16, %v4824_v28  ;;  %v4894_v36 = vmul.f32 %v10735_v11, %v7668_v52  ;;  %v10763_v44 = vld [vmem:[#allocation2 + $0x158] sm:$0xff] }
 0x436   : > { %v4929_v41 = vrot.slane %v4891_v25, 5  ;;  %v4930_v50 = vrot.slane %v4892_v2, 5  ;;  %v4873_v34 = vadd.f32 %v4851_v16, %v4823_v27  ;;  %v4876_v61 = vadd.f32 %v4852_v38, %v4826_v23  ;;  %v10760_v16 = vld [vmem:[#allocation2 + $0x150] sm:$0xff] }
 0x437   : > { %v4875_v56 = vadd.f32 %v4852_v38, %v4825_v12  ;;  %v4932_v29 = vrot.slane %v4893_v33, 5  ;;  %v4933_v39 = vrot.slane %v4894_v36, 5  ;;  %v4981_v5 = vmul.f32 %v7670_v58, %v10615_v0 }
 0x438   : > { %v4931_v51 = vsel %vm960_vm5, %v4929_v41, %v4930_v50  ;;  %v4982_v62 = vmul.f32 %v7670_v58, %v10656_v49  ;;  %v4963_v40 = vadd.f32 %v4929_v41, %v4873_v34  ;;  %v4983_v4 = vmul.f32 %v7670_v58, %v10694_v30 }
 0x439   : > { %v4964_v8 = vadd.f32 %v4931_v51, %v4874_v20  ;;  %v4965_v43 = vadd.f32 %v4932_v29, %v4875_v56  ;;  %v4934_v26 = vsel %vm960_vm5, %v4932_v29, %v4933_v39  ;;  %v4984_v35 = vmul.f32 %v7670_v58, %v10735_v11  ;;  %v7673_v20 = vld [vmem:[%s11127_s2 + $0x3f] ss:$0 sm:$0xff]  ;;  %v7674_v51 = vld [vmem:[%s11127_s2 + $0x40] ss:$0 sm:$0xff] }
 0x43a   : > { %v5019_v21 = vrot.slane %v4981_v5, 6  ;;  %v5020_v32 = vrot.slane %v4982_v62, 6  ;;  %v4966_v53 = vadd.f32 %v4934_v26, %v4876_v61  ;;  %v5022_v22 = vrot.slane %v4983_v4, 6  ;;  %v7675_v26 = vld [vmem:[%s11127_s2 + $0x41] ss:$0 sm:$0xff] }
 0x43b   : > { %v5071_v6 = vmul.f32 %v7671_v19, %v10615_v0  ;;  %v5072_v63 = vmul.f32 %v7671_v19, %v10656_v49  ;;  %v5023_v37 = vrot.slane %v4984_v35, 6  ;;  %v5073_v46 = vmul.f32 %v7671_v19, %v10694_v30 }
 0x43c   : > { %v5021_v54 = vsel %vm1051_vm6, %v5019_v21, %v5020_v32  ;;  %v5053_v45 = vadd.f32 %v5019_v21, %v4963_v40  ;;  %v5055_v42 = vadd.f32 %v5022_v22, %v4965_v43  ;;  %v5074_v48 = vmul.f32 %v7671_v19, %v10735_v11 }
 0x43d   : > { %v5054_v13 = vadd.f32 %v5021_v54, %v4964_v8  ;;  %v5109_v1 = vrot.slane %v5071_v6, 7  ;;  %v5024_v59 = vsel %vm1051_vm6, %v5022_v22, %v5023_v37  ;;  %v5110_v57 = vrot.slane %v5072_v63, 7 }
 0x43e   : > { %v5112_v47 = vrot.slane %v5073_v46, 7  ;;  %v5161_v24 = vmul.f32 %v7672_v3, %v10615_v0  ;;  %v5056_v52 = vadd.f32 %v5024_v59, %v4966_v53  ;;  %v5113_v25 = vrot.slane %v5074_v48, 7 }
 0x43f   : > { %v5143_v2 = vadd.f32 %v5109_v1, %v5053_v45  ;;  %v5162_v60 = vmul.f32 %v7672_v3, %v10656_v49  ;;  %v5111_v28 = vsel %vm1142_vm7, %v5109_v1, %v5110_v57  ;;  %v5163_v27 = vmul.f32 %v7672_v3, %v10694_v30 }
 0x440   : > { %v5145_v23 = vadd.f32 %v5112_v47, %v5055_v42  ;;  %v5164_v12 = vmul.f32 %v7672_v3, %v10735_v11  ;;  %v5114_v38 = vsel %vm1142_vm7, %v5112_v47, %v5113_v25  ;;  %v5144_v33 = vadd.f32 %v5111_v28, %v5054_v13  ;;  %v7676_v13 = vld [vmem:[%s11127_s2 + $0x42] ss:$0 sm:$0xff] }
 0x441   : > { %v5177_v0 = vadd.f32 %v5161_v24, %v5143_v2  ;;  %v5195_v36 = vmul.f32 %v7673_v20, %v10691_v9  ;;  %v5146_v49 = vadd.f32 %v5114_v38, %v5056_v52  ;;  %v5196_v50 = vmul.f32 %v7673_v20, %v10694_v30 }
 0x442   : > { %v5179_v41 = vadd.f32 %v5163_v27, %v5145_v23  ;;  %v5197_v34 = vmul.f32 %v7673_v20, %v10760_v16  ;;  %v5178_v56 = vadd.f32 %v5162_v60, %v5144_v33  ;;  %v5198_v61 = vmul.f32 %v7673_v20, %v10763_v44 }
 0x443   : > { %v5211_v29 = vadd.f32 %v5195_v36, %v5177_v0  ;;  %v5229_v39 = vmul.f32 %v7674_v51, %v10691_v9  ;;  %v5180_v58 = vadd.f32 %v5164_v12, %v5146_v49  ;;  %v5230_v62 = vmul.f32 %v7674_v51, %v10694_v30  ;;  %v7677_v12 = vld [vmem:[%s11127_s2 + $0x43] ss:$0 sm:$0xff] }
 0x444   : > { %v5213_v5 = vadd.f32 %v5197_v34, %v5179_v41  ;;  %v5231_v40 = vmul.f32 %v7674_v51, %v10760_v16  ;;  %v5212_v8 = vadd.f32 %v5196_v50, %v5178_v56  ;;  %v5232_v43 = vmul.f32 %v7674_v51, %v10763_v44  ;;  %v10805_v49 = vld [vmem:[#allocation2 + $0x160] sm:$0xf]  ;;  %v7678_v34 = vld [vmem:[%s11127_s2 + $0x44] ss:$0 sm:$0xff] }
 0x445   : > { %v5267_v4 = vrot.slane %v5229_v39, 1  ;;  %v5319_v35 = vmul.f32 %v7675_v26, %v10691_v9  ;;  %v5214_v21 = vadd.f32 %v5198_v61, %v5180_v58  ;;  %v5268_v32 = vrot.slane %v5230_v62, 1 }
 0x446   : > { %v5270_v53 = vrot.slane %v5231_v40, 1  ;;  %v5320_v22 = vmul.f32 %v7675_v26, %v10694_v30  ;;  %v5271_v19 = vrot.slane %v5232_v43, 1  ;;  %v5321_v6 = vmul.f32 %v7675_v26, %v10760_v16 }
 0x447   : > { %v5322_v63 = vmul.f32 %v7675_v26, %v10763_v44  ;;  %v5357_v54 = vrot.slane %v5319_v35, 2  ;;  %v5269_v37 = vsel %vm637_vm1, %v5267_v4, %v5268_v32  ;;  %v5302_v45 = vadd.f32 %v5268_v32, %v5212_v8 }
 0x448   : > { %v5358_v46 = vrot.slane %v5320_v22, 2  ;;  %v5409_v42 = vmul.f32 %v7676_v13, %v10691_v9  ;;  %v5272_v48 = vsel %vm637_vm1, %v5270_v53, %v5271_v19  ;;  %v5301_v1 = vadd.f32 %v5269_v37, %v5211_v29 }
 0x449   : > { %v5304_v59 = vadd.f32 %v5271_v19, %v5214_v21  ;;  %v5360_v57 = vrot.slane %v5321_v6, 2  ;;  %v5303_v47 = vadd.f32 %v5272_v48, %v5213_v5  ;;  %v5361_v24 = vrot.slane %v5322_v63, 2  ;;  %v7679_v63 = vld [vmem:[%s11127_s2 + $0x45] ss:$0 sm:$0xff] }
 0x44a   : > { %v5359_v3 = vsel %vm728_vm2, %v5357_v54, %v5358_v46  ;;  %v5392_v52 = vadd.f32 %v5358_v46, %v5302_v45  ;;  %v5410_v2 = vmul.f32 %v7676_v13, %v10694_v30  ;;  %v5411_v60 = vmul.f32 %v7676_v13, %v10760_v16 }
 0x44b   : > { %v5391_v25 = vadd.f32 %v5359_v3, %v5301_v1  ;;  %v5412_v28 = vmul.f32 %v7676_v13, %v10763_v44  ;;  %v5362_v23 = vsel %vm728_vm2, %v5360_v57, %v5361_v24  ;;  %v5394_v9 = vadd.f32 %v5361_v24, %v5304_v59  ;;  %v7680_v24 = vld [vmem:[%s11127_s2 + $0x46] ss:$0 sm:$0xff] }
 0x44c   : > { %v5447_v27 = vrot.slane %v5409_v42, 3  ;;  %v5493_v38 = vmul.f32 %v7677_v12, %v10694_v30  ;;  %v5393_v33 = vadd.f32 %v5362_v23, %v5303_v47  ;;  %v5448_v0 = vrot.slane %v5410_v2, 3 }
 0x44d   : > { %v5450_v20 = vrot.slane %v5411_v60, 3  ;;  %v5451_v36 = vrot.slane %v5412_v28, 3  ;;  %v5494_v41 = vmul.f32 %v7677_v12, %v10763_v44  ;;  %v5549_v56 = vmul.f32 %v7678_v34, %v10694_v30 }
 0x44e   : > { %v5509_v50 = vrot.slane %v5493_v38, 4  ;;  %v5550_v61 = vmul.f32 %v7678_v34, %v10735_v11  ;;  %v5449_v29 = vsel %vm819_vm3, %v5447_v27, %v5448_v0  ;;  %v5482_v39 = vadd.f32 %v5448_v0, %v5392_v52 }
 0x44f   : > { %v5452_v51 = vsel %vm819_vm3, %v5450_v20, %v5451_v36  ;;  %v5484_v58 = vadd.f32 %v5451_v36, %v5394_v9  ;;  %v5481_v5 = vadd.f32 %v5449_v29, %v5391_v25  ;;  %v5510_v40 = vrot.slane %v5494_v41, 4  ;;  %v7681_v36 = vld [vmem:[%s11127_s2 + $0x47] ss:$0 sm:$0xff] }
 0x450   : > { %v5483_v62 = vadd.f32 %v5452_v51, %v5393_v33  ;;  %v5551_v8 = vmul.f32 %v7678_v34, %v10763_v44  ;;  %v5532_v43 = vadd.f32 %v5509_v50, %v5482_v39  ;;  %v5552_v4 = vmul.f32 %v7678_v34, %v10805_v49  ;;  %v10840_v51 = vld [vmem:[#allocation2 + $0x170] sm:$0xff] }
 0x451   : > { %v5587_v26 = vrot.slane %v5549_v56, 5  ;;  %v5588_v35 = vrot.slane %v5550_v61, 5  ;;  %v5531_v21 = vadd.f32 %v5509_v50, %v5481_v5  ;;  %v5534_v53 = vadd.f32 %v5510_v40, %v5484_v58  ;;  %v566_v50 = vld [vmem:[#allocation2 + $0x168] sm:$0xff] }
 0x452   : > { %v5533_v32 = vadd.f32 %v5510_v40, %v5483_v62  ;;  %v5590_v22 = vrot.slane %v5551_v8, 5  ;;  %v5591_v6 = vrot.slane %v5552_v4, 5  ;;  %v5639_v54 = vmul.f32 %v7679_v63, %v10694_v30 }
 0x453   : > { %v5589_v19 = vsel %vm960_vm5, %v5587_v26, %v5588_v35  ;;  %v5640_v37 = vmul.f32 %v7679_v63, %v10735_v11  ;;  %v5621_v45 = vadd.f32 %v5587_v26, %v5531_v21  ;;  %v5641_v42 = vmul.f32 %v7679_v63, %v10763_v44 }
 0x454   : > { %v5622_v46 = vadd.f32 %v5589_v19, %v5532_v43  ;;  %v5623_v13 = vadd.f32 %v5590_v22, %v5533_v32  ;;  %v5592_v48 = vsel %vm960_vm5, %v5590_v22, %v5591_v6  ;;  %v5642_v1 = vmul.f32 %v7679_v63, %v10805_v49  ;;  %v7683_v19 = vld [vmem:[%s11127_s2 + $0x49] ss:$0 sm:$0xff] }
 0x455   : > { %v5677_v59 = vrot.slane %v5639_v54, 6  ;;  %v5678_v57 = vrot.slane %v5640_v37, 6  ;;  %v5624_v47 = vadd.f32 %v5592_v48, %v5534_v53  ;;  %v5680_v3 = vrot.slane %v5641_v42, 6  ;;  %v7684_v48 = vld [vmem:[%s11127_s2 + $0x4a] ss:$0 sm:$0xff] }
 0x456   : > { %v5729_v52 = vmul.f32 %v7680_v24, %v10694_v30  ;;  %v5730_v25 = vmul.f32 %v7680_v24, %v10735_v11  ;;  %v5681_v60 = vrot.slane %v5642_v1, 6  ;;  %v5731_v23 = vmul.f32 %v7680_v24, %v10763_v44 }
 0x457   : > { %v5679_v2 = vsel %vm1051_vm6, %v5677_v59, %v5678_v57  ;;  %v5711_v28 = vadd.f32 %v5677_v59, %v5621_v45  ;;  %v5713_v27 = vadd.f32 %v5680_v3, %v5623_v13  ;;  %v5732_v12 = vmul.f32 %v7680_v24, %v10805_v49 }
 0x458   : > { %v5712_v9 = vadd.f32 %v5679_v2, %v5622_v46  ;;  %v5767_v38 = vrot.slane %v5729_v52, 7  ;;  %v5682_v33 = vsel %vm1051_vm6, %v5680_v3, %v5681_v60  ;;  %v5768_v0 = vrot.slane %v5730_v25, 7 }
 0x459   : > { %v5770_v20 = vrot.slane %v5731_v23, 7  ;;  %v5819_v41 = vmul.f32 %v7681_v36, %v10694_v30  ;;  %v5714_v34 = vadd.f32 %v5682_v33, %v5624_v47  ;;  %v5771_v56 = vrot.slane %v5732_v12, 7  ;;  %v7682_v30 = vld [vmem:[%s11127_s2 + $0x48] ss:$0 sm:$0xff] }
 0x45a   : > { %v5801_v61 = vadd.f32 %v5767_v38, %v5711_v28  ;;  %v5820_v29 = vmul.f32 %v7681_v36, %v10735_v11  ;;  %v5769_v39 = vsel %vm1142_vm7, %v5767_v38, %v5768_v0  ;;  %v5821_v5 = vmul.f32 %v7681_v36, %v10763_v44 }
 0x45b   : > { %v5803_v58 = vadd.f32 %v5770_v20, %v5713_v27  ;;  %v5822_v62 = vmul.f32 %v7681_v36, %v10805_v49  ;;  %v5772_v40 = vsel %vm1142_vm7, %v5770_v20, %v5771_v56  ;;  %v5802_v8 = vadd.f32 %v5769_v39, %v5712_v9  ;;  %v7685_v9 = vld [vmem:[%s11127_s2 + $0x4b] ss:$0 sm:$0xff] }
 0x45c   : > { %v5835_v43 = vadd.f32 %v5819_v41, %v5801_v61  ;;  %v5853_v4 = vmul.f32 %v7682_v30, %v10760_v16  ;;  %v5804_v11 = vadd.f32 %v5772_v40, %v5714_v34  ;;  %v5854_v35 = vmul.f32 %v7682_v30, %v10763_v44 }
 0x45d   : > { %v5837_v26 = vadd.f32 %v5821_v5, %v5803_v58  ;;  %v5855_v21 = vmul.f32 %v7682_v30, %v566_v50  ;;  %v5836_v32 = vadd.f32 %v5820_v29, %v5802_v8  ;;  %v5856_v53 = vmul.f32 %v7682_v30, %v10840_v51 }
 0x45e   : > { %v5869_v22 = vadd.f32 %v5853_v4, %v5835_v43  ;;  %v5887_v6 = vmul.f32 %v7683_v19, %v10760_v16  ;;  %v5838_v63 = vadd.f32 %v5822_v62, %v5804_v11  ;;  %v5888_v37 = vmul.f32 %v7683_v19, %v10763_v44  ;;  %v7686_v62 = vld [vmem:[%s11127_s2 + $0x4c] ss:$0 sm:$0xff]  ;;  %v10878_v11 = vld [vmem:[#allocation2 + $0x178] sm:$0xf] }
 0x45f   : > { %v5871_v54 = vadd.f32 %v5855_v21, %v5837_v26  ;;  %v5889_v45 = vmul.f32 %v7683_v19, %v566_v50  ;;  %v5870_v46 = vadd.f32 %v5854_v35, %v5836_v32  ;;  %v5890_v13 = vmul.f32 %v7683_v19, %v10840_v51  ;;  %v7687_v35 = vld [vmem:[%s11127_s2 + $0x4d] ss:$0 sm:$0xff] }
 0x460   : > { %v5925_v42 = vrot.slane %v5887_v6, 1  ;;  %v5977_v1 = vmul.f32 %v7684_v48, %v10760_v16  ;;  %v5872_v59 = vadd.f32 %v5856_v53, %v5838_v63  ;;  %v5926_v57 = vrot.slane %v5888_v37, 1 }
 0x461   : > { %v5928_v47 = vrot.slane %v5889_v45, 1  ;;  %v5978_v3 = vmul.f32 %v7684_v48, %v10763_v44  ;;  %v5929_v24 = vrot.slane %v5890_v13, 1  ;;  %v5979_v52 = vmul.f32 %v7684_v48, %v566_v50 }
 0x462   : > { %v5980_v25 = vmul.f32 %v7684_v48, %v10840_v51  ;;  %v6015_v2 = vrot.slane %v5977_v1, 2  ;;  %v5927_v60 = vsel %vm637_vm1, %v5925_v42, %v5926_v57  ;;  %v5960_v28 = vadd.f32 %v5926_v57, %v5870_v46  ;;  %v6587_v46 = vpop.f32.mrf.mxu1 }
 0x463   : > { %v6016_v23 = vrot.slane %v5978_v3, 2  ;;  %v6067_v27 = vmul.f32 %v7685_v9, %v10760_v16  ;;  %v5930_v12 = vsel %vm637_vm1, %v5928_v47, %v5929_v24  ;;  %v5959_v38 = vadd.f32 %v5927_v60, %v5869_v22 }
 0x464   : > { %v5962_v33 = vadd.f32 %v5929_v24, %v5872_v59  ;;  %v6018_v0 = vrot.slane %v5979_v52, 2  ;;  %v5961_v20 = vadd.f32 %v5930_v12, %v5871_v54  ;;  %v6019_v41 = vrot.slane %v5980_v25, 2  ;;  %v7688_v25 = vld [vmem:[%s11127_s2 + $0x4e] ss:$0 sm:$0xff] }
 0x465   : > { %v6017_v36 = vsel %vm728_vm2, %v6015_v2, %v6016_v23  ;;  %v6050_v34 = vadd.f32 %v6016_v23, %v5960_v28  ;;  %v6068_v61 = vmul.f32 %v7685_v9, %v10763_v44  ;;  %v6069_v29 = vmul.f32 %v7685_v9, %v566_v50 }
 0x466   : > { %v6049_v56 = vadd.f32 %v6017_v36, %v5959_v38  ;;  %v6070_v39 = vmul.f32 %v7685_v9, %v10840_v51  ;;  %v6020_v58 = vsel %vm728_vm2, %v6018_v0, %v6019_v41  ;;  %v6052_v5 = vadd.f32 %v6019_v41, %v5962_v33  ;;  %v7689_v41 = vld [vmem:[%s11127_s2 + $0x4f] ss:$0 sm:$0xff] }
 0x467   : > { %v6105_v16 = vrot.slane %v6067_v27, 3  ;;  %v6151_v40 = vmul.f32 %v7686_v62, %v10763_v44  ;;  %v6051_v8 = vadd.f32 %v6020_v58, %v5961_v20  ;;  %v6106_v43 = vrot.slane %v6068_v61, 3 }
 0x468   : > { %v6108_v30 = vrot.slane %v6069_v29, 3  ;;  %v6109_v4 = vrot.slane %v6070_v39, 3  ;;  %v6152_v50 = vmul.f32 %v7686_v62, %v10840_v51  ;;  %v6207_v21 = vmul.f32 %v7687_v35, %v10763_v44 }
 0x469   : > { %v6167_v26 = vrot.slane %v6151_v40, 4  ;;  %v6208_v32 = vmul.f32 %v7687_v35, %v10805_v49  ;;  %v6107_v53 = vsel %vm819_vm3, %v6105_v16, %v6106_v43  ;;  %v6140_v19 = vadd.f32 %v6106_v43, %v6050_v34 }
 0x46a   : > { %v6110_v22 = vsel %vm819_vm3, %v6108_v30, %v6109_v4  ;;  %v6142_v6 = vadd.f32 %v6109_v4, %v6052_v5  ;;  %v6139_v63 = vadd.f32 %v6107_v53, %v6049_v56  ;;  %v6168_v37 = vrot.slane %v6152_v50, 4  ;;  %v7690_v50 = vld [vmem:[%s11127_s2 + $0x50] ss:$0 sm:$0xff] }
 0x46b   : > { %v6141_v54 = vadd.f32 %v6110_v22, %v6051_v8  ;;  %v6209_v45 = vmul.f32 %v7687_v35, %v10840_v51  ;;  %v6190_v13 = vadd.f32 %v6167_v26, %v6140_v19  ;;  %v6210_v42 = vmul.f32 %v7687_v35, %v10878_v11  ;;  %v10910_v8 = vld [vmem:[%s11129_s4] ss:$0 sm:$0xff]  ;;  %v6589_v19 = vpop.f32.mrf.mxu1 }
 0x46c   : > { %v6245_v48 = vrot.slane %v6207_v21, 5  ;;  %v6246_v1 = vrot.slane %v6208_v32, 5  ;;  %v6189_v59 = vadd.f32 %v6167_v26, %v6139_v63  ;;  %v6192_v47 = vadd.f32 %v6168_v37, %v6142_v6  ;;  %v10921_v22 = vld [vmem:[%s11130_s5] ss:$0 sm:$0xff] }
 0x46d   : > { %v6191_v57 = vadd.f32 %v6168_v37, %v6141_v54  ;;  %v6248_v3 = vrot.slane %v6209_v45, 5  ;;  %v6249_v52 = vrot.slane %v6210_v42, 5  ;;  %v6297_v2 = vmul.f32 %v7688_v25, %v10763_v44 }
 0x46e   : > { %v6247_v24 = vsel %vm960_vm5, %v6245_v48, %v6246_v1  ;;  %v6298_v60 = vmul.f32 %v7688_v25, %v10805_v49  ;;  %v6279_v28 = vadd.f32 %v6245_v48, %v6189_v59  ;;  %v6299_v27 = vmul.f32 %v7688_v25, %v10840_v51 }
 0x46f   : > { %v6280_v23 = vadd.f32 %v6247_v24, %v6190_v13  ;;  %v6281_v9 = vadd.f32 %v6248_v3, %v6191_v57  ;;  %v6250_v12 = vsel %vm960_vm5, %v6248_v3, %v6249_v52  ;;  %v6300_v38 = vmul.f32 %v7688_v25, %v10878_v11 }
 0x470   : > { %v6335_v33 = vrot.slane %v6297_v2, 6  ;;  %v6336_v0 = vrot.slane %v6298_v60, 6  ;;  %v6282_v20 = vadd.f32 %v6250_v12, %v6192_v47  ;;  %v6338_v36 = vrot.slane %v6299_v27, 6 }
 0x471   : > { %v6387_v34 = vmul.f32 %v7689_v41, %v10763_v44  ;;  %v6388_v56 = vmul.f32 %v7689_v41, %v10805_v49  ;;  %v6339_v29 = vrot.slane %v6300_v38, 6  ;;  %v6389_v58 = vmul.f32 %v7689_v41, %v10840_v51 }
 0x472   : > { %v6337_v61 = vsel %vm1051_vm6, %v6335_v33, %v6336_v0  ;;  %v6369_v39 = vadd.f32 %v6335_v33, %v6279_v28  ;;  %v6371_v16 = vadd.f32 %v6338_v36, %v6281_v9  ;;  %v6390_v62 = vmul.f32 %v7689_v41, %v10878_v11  ;;  %v7244_v28 = vld [vmem:[%s11131_s6 + $0x10] sm:$0xff]  ;;  %v7242_v41 = vld [vmem:[%s11131_s6] sm:$0xff] }
 0x473   : > { %v6370_v5 = vadd.f32 %v6337_v61, %v6280_v23  ;;  %v6425_v40 = vrot.slane %v6387_v34, 7  ;;  %v6340_v43 = vsel %vm1051_vm6, %v6338_v36, %v6339_v29  ;;  %v6426_v30 = vrot.slane %v6388_v56, 7 }
 0x474   : > { %v6428_v4 = vrot.slane %v6389_v58, 7  ;;  %v6477_v26 = vmul.f32 %v7690_v50, %v10763_v44  ;;  %v6372_v35 = vadd.f32 %v6340_v43, %v6282_v20  ;;  %v6429_v21 = vrot.slane %v6390_v62, 7  ;;  %v7243_v20 = vld [vmem:[%s11131_s6 + $0x8] sm:$0xff] }
 0x475   : > { %v6459_v32 = vadd.f32 %v6425_v40, %v6369_v39  ;;  %v6478_v53 = vmul.f32 %v7690_v50, %v10805_v49  ;;  %v6427_v6 = vsel %vm1142_vm7, %v6425_v40, %v6426_v30  ;;  %v6479_v54 = vmul.f32 %v7690_v50, %v10840_v51 }
 0x476   : > { %v6461_v63 = vadd.f32 %v6428_v4, %v6371_v16  ;;  %v6480_v37 = vmul.f32 %v7690_v50, %v10878_v11  ;;  %v6430_v44 = vsel %vm1142_vm7, %v6428_v4, %v6429_v21  ;;  %v6460_v45 = vadd.f32 %v6427_v6, %v6370_v5 }
 0x477   : > { %v6493_v13 = vadd.f32 %v6477_v26, %v6459_v32  ;;  %v6611_v42 = vmul.f32 %v10910_v8, %v6587_v46  ;;  %v6462_v49 = vadd.f32 %v6430_v44, %v6372_v35  ;;  %v6612_v1 = vmul.f32 %v10910_v8, %v6589_v19  ;;  %v7245_v46 = vld [vmem:[%s11131_s6 + $0x18] sm:$0xff] }
 0x478   : > { %v6495_v48 = vadd.f32 %v6479_v54, %v6461_v63  ;;  %v6494_v59 = vadd.f32 %v6478_v53, %v6460_v45  ;;  %7008 = vmatpush.bf16.msra.mxu2 %v7245_v46 }
 0x479   : > { %v10930_v57 = vadd.f32 %v10921_v22, %v6611_v42  ;;  %v6496_v47 = vadd.f32 %v6480_v37, %v6462_v49  ;;  %v6532_v3 = vrot.slane %v6493_v13, 4  ;;  %v10933_v51 = vadd.f32 %v10921_v22, %v6612_v1 }
 0x47a   : > { %v6535_v24 = vrot.slane %v6495_v48, 4  ;;  %v6533_v11 = vrot.slane %v6494_v59, 4 }
 0x47b   : > { %v10936_v52 = vmul.f32 0.70710677, %v10930_v57  ;;  %v6536_v25 = vrot.slane %v6496_v47, 4  ;;  %v10942_v2 = vmul.f32 0.70710677, %v10933_v51 }
 0x47c   : > { %v6534_v23 = vsel %vm6513_vm8, %v6532_v3, %v6533_v11  ;;  %7009 = vmatpush.bf16.msra.mxu2 %v7244_v28 }
 0x47d   : > { %v6663_v60 = vand.u32 2147483647, %v10936_v52  ;;  %v6537_v9 = vsel %vm6513_vm8, %v6535_v24, %v6536_v25  ;;  %v6664_v27 = vand.u32 2147483647, %v10942_v2  ;;  %vm6647_vm2 = vcmp.ge.f32.partialorder %v10936_v52, 0.0 }
 0x47e   : > { %v6549_v12 = vpack.c.bf16 %v6537_v9, %v6534_v23  ;;  %vm6648_vm3 = vcmp.ge.f32.partialorder %v10942_v2, 0.0  ;;  %v6592_v2 = vpop.f32.mrf.mxu1 }
 0x47f   : > { %v6671_v38 = vmul.f32 0.3275911, %v6663_v60  ;;  %v6672_v33 = vmul.f32 0.3275911, %v6664_v27  ;;  %v6879_v53 = vsub.f32 0.0, %v6663_v60  ;;  %v6880_v19 = vsub.f32 0.0, %v6664_v27 }
 0x480   : > { %7201 = vmatmul.msk.bf16.gmra.mxu1 %vm389_vm0, %v6549_v12  ;;  %7010 = vmatpush.bf16.msra.mxu2 %v7243_v20 }
 0x481   : > { %v6679_v0 = vadd.f32 1.0, %v6671_v38  ;;  %v6680_v36 = vadd.f32 1.0, %v6672_v33  ;;  %v6887_v44 = vmul.f32 %v6879_v53, %v6663_v60  ;;  %v6888_v42 = vmul.f32 %v6880_v19, %v6664_v27 }
 0x483   : > { %7344 = vrcp.f32 %v6679_v0  ;;  %v6698_v62 = vand.u32 2147483648, %v6679_v0  ;;  %v6713_v40 = vand.u32 2147483648, %v6680_v36  ;;  %vm6692_vm11 = vweird.f32 %v6679_v0 }
 0x484   : > { %7346 = vrcp.f32 %v6680_v36  ;;  %7011 = vmatpush.bf16.msra.mxu2 %v7242_v41  ;;  %v6696_v43 = vand.u32 2147483647, %v6679_v0  ;;  %v6711_v30 = vand.u32 2147483647, %v6680_v36  ;;  %vm6707_vm12 = vweird.f32 %v6680_v36 }
 0x485   : > { %v6699_v35 = vor.u32 1.1754944e-38, %v6698_v62  ;;  %v6714_v32 = vor.u32 1.1754944e-38, %v6713_v40  ;;  %v6895_v1 = vmul.f32 1.442695, %v6887_v44  ;;  %v6897_v3 = vmul.f32 1.442695, %v6888_v42 }
 0x486   : > { %vm6697_vm15 = vcmp.eq.f32.partialorder %v6696_v43, 8.507059e+37  ;;  %vm6712_vm1 = vcmp.eq.f32.partialorder %v6711_v30, 8.507059e+37  ;;  %v6613_v30 = vmul.f32 %v10910_v8, %v6592_v2 }
 0x487   : > { %7348 = vpow2.f32 %v6895_v1 }
 0x488   : > { %7350 = vpow2.f32 %v6897_v3 }
 0x489   : > { %v7345_v34 = vpop.eup %7344 }
 0x48a   : > { %v7347_v56 = vpop.eup %7346  ;;  %v6688_v61 = vmul.f32 %v7345_v34, %v6679_v0  ;;  %vm6693_vm9 = vweird.f32 %v7345_v34 }
 0x48b   : > { %v6703_v29 = vmul.f32 %v7347_v56, %v6680_v36  ;;  %vm6708_vm10 = vweird.f32 %v7347_v56  ;;  %vm6694_vm13 = vmor %vm6692_vm11, %vm6693_vm9 }
 0x48c   : > { %v6689_v39 = vsub.f32 1.0, %v6688_v61  ;;  %vm6709_vm14 = vmor %vm6707_vm12, %vm6708_vm10 }
 0x48d   : > { %v6704_v58 = vsub.f32 1.0, %v6703_v29  ;;  %v7349_v60 = vpop.eup %7348 }
 0x48e   : > { %v6690_v5 = vmul.f32 %v7345_v34, %v6689_v39  ;;  %v7351_v27 = vpop.eup %7350 }
 0x48f   : > { %v6705_v16 = vmul.f32 %v7347_v56, %v6704_v58  ;;  %v6631_v58 = vmul.f32 0.5, %v10930_v57 }
 0x490   : > { %v6691_v4 = vadd.f32 %v7345_v34, %v6690_v5  ;;  %v6632_v5 = vmul.f32 0.5, %v10933_v51 }
 0x491   : > { %v6706_v50 = vadd.f32 %v7347_v56, %v6705_v16 }
 0x492   : > { %v6695_v26 = vsel %vm6694_vm13, %v7345_v34, %v6691_v4  ;;  %v7701_v34 = vmov -1.0   ;;  %v10967_v4 = vadd.f32 %v10921_v22, %v6613_v30 }
 0x493   : > { %v6710_v21 = vsel %vm6709_vm14, %v7347_v56, %v6706_v50  ;;  %v6700_v6 = vsel %vm6697_vm15, %v6699_v35, %v6695_v26  ;;  %v6655_v56 = vsel %vm6647_vm2, 1.0, %v7701_v34  ;;  %v6656_v61 = vsel %vm6648_vm3, 1.0, %v7701_v34  ;;  %v6594_v50 = vpop.f32.mrf.mxu1 }
 0x494   : > { %v6715_v63 = vsel %vm6712_vm1, %v6714_v32, %v6710_v21  ;;  %v6807_v54 = vmul.f32 1.0614054, %v6700_v6  ;;  %v10970_v26 = vmul.f32 0.70710677, %v10967_v4  ;;  %v6614_v57 = vmul.f32 %v10910_v8, %v6594_v50 }
 0x495   : > { %v6808_v37 = vmul.f32 1.0614054, %v6715_v63 }
 0x496   : > { %v6815_v45 = vadd.f32 -1.4531521, %v6807_v54  ;;  %v6665_v51 = vand.u32 2147483647, %v10970_v26  ;;  %v10975_v35 = vadd.f32 %v10921_v22, %v6614_v57  ;;  %vm6649_vm13 = vcmp.ge.f32.partialorder %v10970_v26, 0.0 }
 0x497   : > { %v6816_v13 = vadd.f32 -1.4531521, %v6808_v37 }
 0x498   : > { %v6823_v49 = vmul.f32 %v6815_v45, %v6700_v6  ;;  %v6673_v32 = vmul.f32 0.3275911, %v6665_v51  ;;  %v10978_v53 = vmul.f32 0.70710677, %v10975_v35 }
 0x499   : > { %v6824_v48 = vmul.f32 %v6816_v13, %v6715_v63 }
 0x49a   : > { %v6831_v59 = vadd.f32 1.4214138, %v6823_v49  ;;  %v6681_v19 = vadd.f32 1.0, %v6673_v32  ;;  %vm6650_vm15 = vcmp.ge.f32.partialorder %v10978_v53, 0.0 }
 0x49b   : > { %v6832_v47 = vadd.f32 1.4214138, %v6824_v48  ;;  %v6597_v21 = vpop.f32.mrf.mxu1 }
 0x49c   : > { %v6839_v24 = vmul.f32 %v6831_v59, %v6700_v6  ;;  %7352 = vrcp.f32 %v6681_v19  ;;  %v6615_v37 = vmul.f32 %v10910_v8, %v6597_v21  ;;  %vm6722_vm6 = vweird.f32 %v6681_v19 }
 0x49d   : > { %v6840_v11 = vmul.f32 %v6832_v47, %v6715_v63 }
 0x49e   : > { %v6847_v46 = vadd.f32 -0.28449672, %v6839_v24  ;;  %v10987_v42 = vadd.f32 %v10921_v22, %v6615_v37 }
 0x49f   : > { %v6848_v25 = vadd.f32 -0.28449672, %v6840_v11 }
 0x4a0   : > { %v6855_v28 = vmul.f32 %v6847_v46, %v6700_v6  ;;  %v10993_v1 = vmul.f32 0.70710677, %v10987_v42 }
 0x4a1   : > { %v6856_v23 = vmul.f32 %v6848_v25, %v6715_v63 }
 0x4a2   : > { %v6863_v9 = vadd.f32 0.2548296, %v6855_v28  ;;  %v7353_v13 = vpop.eup %7352  ;;  %v10999_v24 = vand.u32 2147483647, %v10993_v1  ;;  %v6728_v28 = vand.u32 2147483648, %v6681_v19 }
 0x4a3   : > { %v6864_v12 = vadd.f32 0.2548296, %v6856_v23  ;;  %v6599_v54 = vpop.f32.mrf.mxu1  ;;  %v6718_v48 = vmul.f32 %v7353_v13, %v6681_v19  ;;  %vm6723_vm5 = vweird.f32 %v7353_v13 }
 0x4a4   : > { %v6871_v38 = vmul.f32 %v6863_v9, %v6700_v6  ;;  %v10981_v6 = vand.u32 2147483647, %v10978_v53  ;;  %v6616_v44 = vmul.f32 %v10910_v8, %v6599_v54  ;;  %v6675_v23 = vmul.f32 0.3275911, %v10999_v24  ;;  %vm6724_vm7 = vmor %vm6722_vm6, %vm6723_vm5 }
 0x4a5   : > { %v6872_v33 = vmul.f32 %v6864_v12, %v6715_v63  ;;  %v6719_v47 = vsub.f32 1.0, %v6718_v48  ;;  %v6726_v12 = vand.u32 2147483647, %v6681_v19  ;;  %v6883_v26 = vsub.f32 0.0, %v10999_v24 }
 0x4a6   : > { %v6911_v0 = vmul.f32 %v7349_v60, %v6871_v38  ;;  %v6674_v63 = vmul.f32 0.3275911, %v10981_v6  ;;  %v10990_v49 = vadd.f32 %v10921_v22, %v6616_v44  ;;  %v6882_v50 = vsub.f32 0.0, %v10981_v6 }
 0x4a7   : > { %v6912_v20 = vmul.f32 %v7351_v27, %v6872_v33  ;;  %v6720_v46 = vmul.f32 %v7353_v13, %v6719_v47  ;;  %v11006_v33 = vadd.f32 1.0, %v6675_v23  ;;  %v6729_v27 = vor.u32 1.1754944e-38, %v6728_v28 }
 0x4a8   : > { %v6919_v36 = vsub.f32 1.0, %v6911_v0  ;;  %v6682_v45 = vadd.f32 1.0, %v6674_v63  ;;  %v10996_v59 = vmul.f32 0.70710677, %v10990_v49  ;;  %vm6727_vm8 = vcmp.eq.f32.partialorder %v6726_v12, 8.507059e+37 }
 0x4a9   : > { %v6920_v41 = vsub.f32 1.0, %v6912_v20  ;;  %v6721_v38 = vadd.f32 %v7353_v13, %v6720_v46  ;;  %v6890_v37 = vmul.f32 %v6882_v50, %v10981_v6  ;;  %v6758_v6 = vand.u32 2147483648, %v11006_v33 }
 0x4aa   : > { %v6927_v29 = vmul.f32 %v6919_v36, %v6655_v56  ;;  %7354 = vrcp.f32 %v6682_v45  ;;  %v11002_v11 = vand.u32 2147483647, %v10996_v59  ;;  %v6881_v36 = vsub.f32 0.0, %v6665_v51 }
 0x4ab   : > { %v6928_v39 = vmul.f32 %v6920_v41, %v6656_v61  ;;  %v6725_v20 = vsel %vm6724_vm7, %v7353_v13, %v6721_v38  ;;  %7356 = vrcp.f32 %v11006_v33  ;;  %vm6737_vm10 = vweird.f32 %v6682_v45 }
 0x4ac   : > { %v6935_v16 = vadd.f32 1.0, %v6927_v29  ;;  %v6676_v9 = vmul.f32 0.3275911, %v11002_v11  ;;  %v6730_v41 = vsel %vm6727_vm8, %v6729_v27, %v6725_v20  ;;  %v6743_v29 = vand.u32 2147483648, %v6682_v45 }
 0x4ad   : > { %v6936_v62 = vadd.f32 1.0, %v6928_v39  ;;  %v6809_v61 = vmul.f32 1.0614054, %v6730_v41  ;;  %v6741_v39 = vand.u32 2147483647, %v6682_v45  ;;  %v6657_v27 = vsel %vm6649_vm13, 1.0, %v7701_v34 }
 0x4ae   : > { %v6943_v52 = vmul.f32 %v6935_v16, %v6631_v58  ;;  %v11008_v0 = vadd.f32 1.0, %v6676_v9  ;;  %v6901_v46 = vmul.f32 1.442695, %v6890_v37  ;;  %vm6752_vm1 = vweird.f32 %v11006_v33 }
 0x4af   : > { %v6944_v40 = vmul.f32 %v6936_v62, %v6632_v5  ;;  %v6817_v58 = vadd.f32 -1.4531521, %v6809_v61  ;;  %v6889_v5 = vmul.f32 %v6881_v36, %v6665_v51  ;;  %vm6742_vm12 = vcmp.eq.f32.partialorder %v6741_v39, 8.507059e+37 }
 0x4b0   : > { %v7355_v3 = vpop.eup %7354  ;;  %7358 = vrcp.f32 %v11008_v0  ;;  %v6773_v36 = vand.u32 2147483648, %v11008_v0  ;;  %v6756_v61 = vand.u32 2147483647, %v11006_v33  ;;  %vm6767_vm2 = vweird.f32 %v11008_v0 }
 0x4b1   : > { %v6951_v43 = vpack.c.bf16 %v6944_v40, %v6943_v52  ;;  %v6733_v25 = vmul.f32 %v7355_v3, %v6682_v45  ;;  %vm6738_vm9 = vweird.f32 %v7355_v3  ;;  %v6825_v62 = vmul.f32 %v6817_v58, %v6730_v41 }
 0x4b2   : > { %vm6739_vm11 = vmor %vm6737_vm10, %vm6738_vm9  ;;  %v6744_v52 = vor.u32 1.1754944e-38, %v6743_v29  ;;  %v6899_v30 = vmul.f32 1.442695, %v6889_v5  ;;  %vm6757_vm6 = vcmp.eq.f32.partialorder %v6756_v61, 8.507059e+37  ;;  %v6634_v53 = vmul.f32 0.5, %v10975_v35 }
 0x4b3   : > { %7218 = vmatmul.msk.bf16.vlgmr.msra.gmra.mxu2 %vm6991_vm4, %v6951_v43  ;;  %v6734_v60 = vsub.f32 1.0, %v6733_v25  ;;  %v6833_v2 = vadd.f32 1.4214138, %v6825_v62  ;;  %v7357_v43 = vpop.eup %7356  ;;  %v6759_v62 = vor.u32 1.1754944e-38, %v6758_v6  ;;  %vm6651_vm9 = vcmp.ge.f32.partialorder %v10993_v1, 0.0 }
 0x4b4   : > { %v6748_v63 = vmul.f32 %v7357_v43, %v11006_v33  ;;  %7360 = vpow2.f32 %v6899_v30  ;;  %vm6753_vm14 = vweird.f32 %v7357_v43  ;;  %v6774_v33 = vor.u32 1.1754944e-38, %v6773_v36 }
 0x4b5   : > { %v6735_v56 = vmul.f32 %v7355_v3, %v6734_v60  ;;  %v6841_v19 = vmul.f32 %v6833_v2, %v6730_v41  ;;  %7362 = vpow2.f32 %v6901_v46  ;;  %vm6754_vm3 = vmor %vm6752_vm1, %vm6753_vm14 }
 0x4b6   : > { %v7359_v21 = vpop.eup %7358  ;;  %v6749_v48 = vsub.f32 1.0, %v6748_v63 }
 0x4b7   : > { %v6736_v16 = vadd.f32 %v7355_v3, %v6735_v56  ;;  %v6849_v51 = vadd.f32 -0.28449672, %v6841_v19  ;;  %v6763_v44 = vmul.f32 %v7359_v21, %v11008_v0  ;;  %vm6768_vm5 = vweird.f32 %v7359_v21 }
 0x4b8   : > { %v6750_v12 = vmul.f32 %v7357_v43, %v6749_v48  ;;  %vm6769_vm7 = vmor %vm6767_vm2, %vm6768_vm5 }
 0x4b9   : > { %v6740_v40 = vsel %vm6739_vm11, %v7355_v3, %v6736_v16  ;;  %v6857_v13 = vmul.f32 %v6849_v51, %v6730_v41  ;;  %v6764_v25 = vsub.f32 1.0, %v6763_v44  ;;  %vm6652_vm11 = vcmp.ge.f32.partialorder %v10996_v59, 0.0 }
 0x4ba   : > { %v6745_v57 = vsel %vm6742_vm12, %v6744_v52, %v6740_v40  ;;  %v7361_v9 = vpop.eup %7360  ;;  %v6751_v5 = vadd.f32 %v7357_v43, %v6750_v12 }
 0x4bb   : > { %v6810_v32 = vmul.f32 1.0614054, %v6745_v57  ;;  %v6865_v3 = vadd.f32 0.2548296, %v6857_v13  ;;  %v6765_v20 = vmul.f32 %v7359_v21, %v6764_v25  ;;  %v7363_v30 = vpop.eup %7362  ;;  %v6658_v13 = vsel %vm6650_vm15, 1.0, %v7701_v34 }
 0x4bc   : > { %v6755_v2 = vsel %vm6754_vm3, %v7357_v43, %v6751_v5  ;;  %v6884_v43 = vsub.f32 0.0, %v11002_v11 }
 0x4bd   : > { %v6818_v54 = vadd.f32 -1.4531521, %v6810_v32  ;;  %v6873_v23 = vmul.f32 %v6865_v3, %v6730_v41  ;;  %v6771_v41 = vand.u32 2147483647, %v11008_v0  ;;  %v6766_v52 = vadd.f32 %v7359_v21, %v6765_v20 }
 0x4be   : > { %v6760_v0 = vsel %vm6757_vm6, %v6759_v62, %v6755_v2 }
 0x4bf   : > { %v6826_v45 = vmul.f32 %v6818_v54, %v6745_v57  ;;  %v6913_v38 = vmul.f32 %v7361_v9, %v6873_v23  ;;  %v6770_v32 = vsel %vm6769_vm7, %v7359_v21, %v6766_v52  ;;  %vm6772_vm8 = vcmp.eq.f32.partialorder %v6771_v41, 8.507059e+37 }
 0x4c0   : > { %v6775_v54 = vsel %vm6772_vm8, %v6774_v33, %v6770_v32  ;;  %v6811_v51 = vmul.f32 1.0614054, %v6760_v0  ;;  %v6633_v23 = vmul.f32 0.5, %v10967_v4 }
 0x4c1   : > { %v6834_v47 = vadd.f32 1.4214138, %v6826_v45  ;;  %v6921_v58 = vsub.f32 1.0, %v6913_v38  ;;  %v6812_v44 = vmul.f32 1.0614054, %v6775_v54  ;;  %v6892_v38 = vmul.f32 %v6884_v43, %v11002_v11 }
 0x4c2   : > { %v6819_v45 = vadd.f32 -1.4531521, %v6811_v51 }
 0x4c3   : > { %v6842_v28 = vmul.f32 %v6834_v47, %v6745_v57  ;;  %v6929_v63 = vmul.f32 %v6921_v58, %v6657_v27  ;;  %v6820_v21 = vadd.f32 -1.4531521, %v6812_v44  ;;  %v6891_v47 = vmul.f32 %v6883_v26, %v10999_v24 }
 0x4c4   : > { %v6905_v41 = vmul.f32 1.442695, %v6892_v38  ;;  %v6635_v38 = vmul.f32 0.5, %v10987_v42 }
 0x4c5   : > { %v6850_v60 = vadd.f32 -0.28449672, %v6842_v28  ;;  %v6937_v25 = vadd.f32 1.0, %v6929_v63  ;;  %v6827_v28 = vmul.f32 %v6819_v45, %v6760_v0 }
 0x4c7   : > { %v6858_v56 = vmul.f32 %v6850_v60, %v6745_v57  ;;  %v6828_v60 = vmul.f32 %v6820_v21, %v6775_v54  ;;  %v6835_v6 = vadd.f32 1.4214138, %v6827_v28  ;;  %v6945_v61 = vmul.f32 %v6937_v25, %v6633_v23 }
 0x4c9   : > { %v6866_v39 = vadd.f32 0.2548296, %v6858_v56  ;;  %v6836_v36 = vadd.f32 1.4214138, %v6828_v60  ;;  %v6903_v56 = vmul.f32 1.442695, %v6891_v47  ;;  %v6843_v4 = vmul.f32 %v6835_v6, %v6760_v0 }
 0x4ca   : > { %v6659_v47 = vsel %vm6651_vm9, 1.0, %v7701_v34 }
 0x4cb   : > { %v6874_v40 = vmul.f32 %v6866_v39, %v6745_v57  ;;  %v6844_v35 = vmul.f32 %v6836_v36, %v6775_v54  ;;  %v6851_v39 = vadd.f32 -0.28449672, %v6843_v4 }
 0x4cd   : > { %v6914_v19 = vmul.f32 %v7363_v30, %v6874_v40  ;;  %v6859_v58 = vmul.f32 %v6851_v39, %v6760_v0 }
 0x4cf   : > { %v6922_v57 = vsub.f32 1.0, %v6914_v19  ;;  %v6867_v52 = vadd.f32 0.2548296, %v6859_v58 }
 0x4d1   : > { %v6930_v46 = vmul.f32 %v6922_v57, %v6658_v13  ;;  %v6875_v30 = vmul.f32 %v6867_v52, %v6760_v0 }
 0x4d3   : > { %v6938_v27 = vadd.f32 1.0, %v6930_v46 }
 0x4d5   : > { %v6946_v26 = vmul.f32 %v6938_v27, %v6634_v53  ;;  %v6636_v27 = vmul.f32 0.5, %v10990_v49 }
 0x4fd   : > { %v6602_v29 = vpop.f32.mrf.mxu1 }
 0x4fe   : > { %v6617_v16 = vmul.f32 %v10910_v8, %v6602_v29  ;;  %v6952_v29 = vpack.c.bf16 %v6946_v26, %v6945_v61 }
 0x500   : > { %v11028_v50 = vadd.f32 %v10921_v22, %v6617_v16  ;;  %7219 = vmatmul.msk.bf16.gmra.mxu2 %vm6991_vm4, %v6952_v29 }
 0x502   : > { %v11031_v37 = vmul.f32 0.70710677, %v11028_v50 }
 0x504   : > { %v11038_v48 = vand.u32 2147483647, %v11031_v37  ;;  %vm6653_vm5 = vcmp.ge.f32.partialorder %v11031_v37, 0.0  ;;  %v7342_v37 = vld [vmem:[%s11132_s7] ss:$0 sm:$0xff] }
 0x505   : > { %v6604_v3 = vpop.f32.mrf.mxu1 }
 0x506   : > { %v6677_v9 = vmul.f32 0.3275911, %v11038_v48  ;;  %v6618_v12 = vmul.f32 %v10910_v8, %v6604_v3  ;;  %v6885_v59 = vsub.f32 0.0, %v11038_v48 }
 0x508   : > { %v6685_v20 = vadd.f32 1.0, %v6677_v9  ;;  %v11047_v24 = vadd.f32 %v10921_v22, %v6618_v12  ;;  %v6852_v22 = vadd.f32 -0.28449672, %v6844_v35  ;;  %v6893_v29 = vmul.f32 %v6885_v59, %v11038_v48 }
 0x50a   : > { %7364 = vrcp.f32 %v6685_v20  ;;  %v11050_v8 = vmul.f32 0.70710677, %v11047_v24  ;;  %v6860_v16 = vmul.f32 %v6852_v22, %v6775_v54  ;;  %v6788_v63 = vand.u32 2147483648, %v6685_v20 }
 0x50b   : > { %7366 = vpow2.f32 %v6903_v56  ;;  %v6786_v45 = vand.u32 2147483647, %v6685_v20  ;;  %vm6782_vm12 = vweird.f32 %v6685_v20 }
 0x50c   : > { %v11053_v11 = vand.u32 2147483647, %v11050_v8  ;;  %7368 = vpow2.f32 %v6905_v41  ;;  %v6868_v33 = vadd.f32 0.2548296, %v6860_v16  ;;  %v6789_v25 = vor.u32 1.1754944e-38, %v6788_v63 }
 0x50d   : > { %vm6787_vm14 = vcmp.eq.f32.partialorder %v6786_v45, 8.507059e+37  ;;  %v6907_v16 = vmul.f32 1.442695, %v6893_v29  ;;  %vm6654_vm6 = vcmp.ge.f32.partialorder %v11050_v8, 0.0 }
 0x50e   : > { %v6678_v5 = vmul.f32 0.3275911, %v11053_v11  ;;  %v6876_v51 = vmul.f32 %v6868_v33, %v6775_v54  ;;  %v6660_v54 = vsel %vm6652_vm11, 1.0, %v7701_v34 }
 0x510   : > { %v7365_v62 = vpop.eup %7364  ;;  %v6686_v2 = vadd.f32 1.0, %v6678_v5  ;;  %v7247_v5 = vld [vmem:[%s11133_s8 + $0x8] sm:$0xff] }
 0x511   : > { %v6778_v40 = vmul.f32 %v7365_v62, %v6685_v20  ;;  %v7367_v32 = vpop.eup %7366  ;;  %vm6783_vm10 = vweird.f32 %v7365_v62  ;;  %7083 = vmatpush.bf16.msra.mxu3 %v7247_v5 }
 0x512   : > { %7370 = vrcp.f32 %v6686_v2  ;;  %v6915_v44 = vmul.f32 %v7367_v32, %v6875_v30  ;;  %v7369_v43 = vpop.eup %7368  ;;  %vm6784_vm13 = vmor %vm6782_vm12, %vm6783_vm10  ;;  %v6803_v36 = vand.u32 2147483648, %v6686_v2  ;;  %v6801_v56 = vand.u32 2147483647, %v6686_v2 }
 0x513   : > { %v6779_v19 = vsub.f32 1.0, %v6778_v40  ;;  %v6916_v13 = vmul.f32 %v7369_v43, %v6876_v51  ;;  %vm6797_vm1 = vweird.f32 %v6686_v2  ;;  %7372 = vpow2.f32 %v6907_v16 }
 0x514   : > { %v6923_v21 = vsub.f32 1.0, %v6915_v44  ;;  %v6804_v58 = vor.u32 1.1754944e-38, %v6803_v36  ;;  %vm6802_vm3 = vcmp.eq.f32.partialorder %v6801_v56, 8.507059e+37 }
 0x515   : > { %v6780_v57 = vmul.f32 %v7365_v62, %v6779_v19  ;;  %v6924_v3 = vsub.f32 1.0, %v6916_v13 }
 0x516   : > { %v6931_v46 = vmul.f32 %v6923_v21, %v6659_v47 }
 0x517   : > { %v6781_v0 = vadd.f32 %v7365_v62, %v6780_v57  ;;  %v6932_v9 = vmul.f32 %v6924_v3, %v6660_v54 }
 0x518   : > { %v7371_v1 = vpop.eup %7370  ;;  %v6939_v12 = vadd.f32 1.0, %v6931_v46 }
 0x519   : > { %v6785_v28 = vsel %vm6784_vm13, %v7365_v62, %v6781_v0  ;;  %v6793_v23 = vmul.f32 %v7371_v1, %v6686_v2  ;;  %v6940_v20 = vadd.f32 1.0, %v6932_v9  ;;  %vm6798_vm15 = vweird.f32 %v7371_v1  ;;  %v7246_v2 = vld [vmem:[%s11133_s8] sm:$0xff]  ;;  %v7373_v13 = vpop.eup %7372 }
 0x51a   : > { %v6790_v60 = vsel %vm6787_vm14, %v6789_v25, %v6785_v28  ;;  %v6947_v4 = vmul.f32 %v6939_v12, %v6635_v38  ;;  %vm6799_vm2 = vmor %vm6797_vm1, %vm6798_vm15  ;;  %v6886_v62 = vsub.f32 0.0, %v11053_v11  ;;  %7084 = vmatpush.bf16.msra.mxu3 %v7246_v2  ;;  %v6662_v12 = vsel %vm6654_vm6, 1.0, %v7701_v34 }
 0x51b   : > { %v6813_v53 = vmul.f32 1.0614054, %v6790_v60  ;;  %v6794_v6 = vsub.f32 1.0, %v6793_v23  ;;  %v6948_v41 = vmul.f32 %v6940_v20, %v6636_v27  ;;  %v6638_v38 = vmul.f32 0.5, %v11047_v24 }
 0x51c   : > { %v6894_v32 = vmul.f32 %v6886_v62, %v11053_v11  ;;  %v6661_v11 = vsel %vm6653_vm5, 1.0, %v7701_v34 }
 0x51d   : > { %v6821_v61 = vadd.f32 -1.4531521, %v6813_v53  ;;  %v6795_v26 = vmul.f32 %v7371_v1, %v6794_v6  ;;  %v6953_v39 = vpack.c.bf16 %v6948_v41, %v6947_v4  ;;  %v6637_v53 = vmul.f32 0.5, %v11028_v50 }
 0x51e   : > { %v6909_v43 = vmul.f32 1.442695, %v6894_v32 }
 0x51f   : > { %v6829_v35 = vmul.f32 %v6821_v61, %v6790_v60  ;;  %v6796_v22 = vadd.f32 %v7371_v1, %v6795_v26  ;;  %7220 = vmatmul.msk.bf16.gmra.mxu2 %vm6991_vm4, %v6953_v39 }
 0x520   : > { %7374 = vpow2.f32 %v6909_v43 }
 0x521   : > { %v6837_v42 = vadd.f32 1.4214138, %v6829_v35  ;;  %v6800_v49 = vsel %vm6799_vm2, %v7371_v1, %v6796_v22 }
 0x522   : > { %v6805_v52 = vsel %vm6802_vm3, %v6804_v58, %v6800_v49 }
 0x523   : > { %v6845_v48 = vmul.f32 %v6837_v42, %v6790_v60  ;;  %v6814_v40 = vmul.f32 1.0614054, %v6805_v52 }
 0x525   : > { %v6853_v33 = vadd.f32 -0.28449672, %v6845_v48  ;;  %v6822_v30 = vadd.f32 -1.4531521, %v6814_v40 }
 0x526   : > { %v7375_v1 = vpop.eup %7374 }
 0x527   : > { %v6861_v19 = vmul.f32 %v6853_v33, %v6790_v60  ;;  %v6830_v63 = vmul.f32 %v6822_v30, %v6805_v52 }
 0x529   : > { %v6869_v51 = vadd.f32 0.2548296, %v6861_v19  ;;  %v6838_v44 = vadd.f32 1.4214138, %v6830_v63 }
 0x52b   : > { %v6877_v57 = vmul.f32 %v6869_v51, %v6790_v60  ;;  %v6846_v45 = vmul.f32 %v6838_v44, %v6805_v52 }
 0x52d   : > { %v6854_v21 = vadd.f32 -0.28449672, %v6846_v45  ;;  %v6917_v47 = vmul.f32 %v7373_v13, %v6877_v57 }
 0x52f   : > { %v6862_v0 = vmul.f32 %v6854_v21, %v6805_v52  ;;  %v6925_v46 = vsub.f32 1.0, %v6917_v47 }
 0x531   : > { %v6870_v3 = vadd.f32 0.2548296, %v6862_v0  ;;  %v6933_v28 = vmul.f32 %v6925_v46, %v6661_v11 }
 0x533   : > { %v6878_v25 = vmul.f32 %v6870_v3, %v6805_v52  ;;  %v6941_v59 = vadd.f32 1.0, %v6933_v28 }
 0x535   : > { %v6918_v54 = vmul.f32 %v7375_v1, %v6878_v25  ;;  %v6949_v6 = vmul.f32 %v6941_v59, %v6637_v53 }
 0x536   : > { %v7013_v23 = vpop.f32.mrf.mxu2 }
 0x537   : > { %v6926_v9 = vsub.f32 1.0, %v6918_v54  ;;  %v7014_v8 = vadd.f32 %v7342_v37, %v7013_v23 }
 0x539   : > { %v6934_v60 = vmul.f32 %v6926_v9, %v6662_v12  ;;  %v7033_v34 = vmul.f32 %v7014_v8, %v7783_v14 }
 0x53b   : > { %v6942_v27 = vadd.f32 1.0, %v6934_v60 }
 0x53d   : > { %v6950_v20 = vmul.f32 %v6942_v27, %v6638_v38 }
 0x53e   : > { %v7015_v36 = vpop.f32.mrf.mxu2 }
 0x53f   : > { %v6954_v56 = vpack.c.bf16 %v6950_v20, %v6949_v6  ;;  %v7016_v61 = vadd.f32 %v7342_v37, %v7015_v36 }
 0x541   : > { %7221 = vmatmul.msk.bf16.gmra.mxu2 %vm6991_vm4, %v6954_v56  ;;  %v7034_v26 = vmul.f32 %v7016_v61, %v7787_v15 }
 0x543   : > { %v7041_v4 = vpack.c.bf16 %v7034_v26, %v7033_v34 }
 0x545   : > { %7230 = vmatmul.msk.bf16.vlgmr.msra.gmra.mxu3 %vm389_vm0, %v7041_v4 }
 0x583   : > { %v7018_v41 = vpop.f32.mrf.mxu2 }
 0x584   : > { %v7019_v50 = vadd.f32 %v7342_v37, %v7018_v41 }
 0x586   : > { %v7035_v35 = vmul.f32 %v7019_v50, %v7799_v17  ;;  %v7343_v17 = vld [vmem:[%s11134_s9] ss:$0 sm:$0xff] }
 0x58b   : > { %v7020_v29 = vpop.f32.mrf.mxu2 }
 0x58c   : > { %v7021_v24 = vadd.f32 %v7342_v37, %v7020_v29 }
 0x58e   : > { %v7036_v39 = vmul.f32 %v7021_v24, %v7850_v31 }
 0x590   : > { %v7042_v22 = vpack.c.bf16 %v7036_v39, %v7035_v35 }
 0x592   : > { %7231 = vmatmul.msk.bf16.gmra.mxu3 %vm389_vm0, %v7042_v22 }
 0x5a2   : > { %v7023_v58 = vpop.f32.mrf.mxu2 }
 0x5a3   : > { %v7024_v42 = vadd.f32 %v7342_v37, %v7023_v58 }
 0x5a5   : > { %v7037_v15 = vmul.f32 %v7024_v42, %v7906_v55 }
 0x5aa   : > { %v7025_v14 = vpop.f32.mrf.mxu2 }
 0x5ab   : > { %v7026_v49 = vadd.f32 %v7342_v37, %v7025_v14 }
 0x5ad   : > { %v7038_v5 = vmul.f32 %v7026_v49, %v7978_v18 }
 0x5af   : > { %v7043_v16 = vpack.c.bf16 %v7038_v5, %v7037_v15 }
 0x5b1   : > { %7232 = vmatmul.msk.bf16.gmra.mxu3 %vm389_vm0, %v7043_v16 }
 0x5c4   : > { %v7028_v62 = vpop.f32.mrf.mxu2 }
 0x5c5   : > { %v7029_v18 = vadd.f32 %v7342_v37, %v7028_v62 }
 0x5c7   : > { %v7039_v40 = vmul.f32 %v7029_v18, %v8052_v7 }
 0x5c8   : > { %v7086_v31 = vpop.f32.mrf.mxu3 }
 0x5c9   : > { %v7087_v55 = vadd.f32 %v7343_v17, %v7086_v31 }
 0x5cb   : > { %7106 = vst.msk [vmem:[%s11101_s18] sm:$0xff] %vm389_vm0, %v7087_v55 }
 0x5cc   : > { %v7030_v52 = vpop.f32.mrf.mxu2 }
 0x5cd   : > { %v7031_v48 = vadd.f32 %v7342_v37, %v7030_v52 }
 0x5cf   : > { %v7040_v2 = vmul.f32 %v7031_v48, %v8109_v10 }
 0x5d0   : > { %v7088_v33 = vpop.f32.mrf.mxu3 }
 0x5d1   : > { %v7044_v30 = vpack.c.bf16 %v7040_v2, %v7039_v40  ;;  %v7089_v32 = vadd.f32 %v7343_v17, %v7088_v33 }
 0x5d3   : > { %7233 = vmatmul.msk.bf16.gmra.mxu3 %vm389_vm0, %v7044_v30  ;;  %7107 = vst.msk [vmem:[%s11101_s18 + $0x8] sm:$0xff] %vm389_vm0, %v7089_v32 }
 0x615   : > { %v7091_v19 = vpop.f32.mrf.mxu3 }
 0x616   : > { %v7092_v63 = vadd.f32 %v7343_v17, %v7091_v19 }
 0x618   : > { %7108 = vst.msk [vmem:[%s11101_s18 + $0x10] sm:$0xff] %vm389_vm0, %v7092_v63 }
 0x61d   : > { %v7093_v51 = vpop.f32.mrf.mxu3 }
 0x61e   : > { %v7094_v44 = vadd.f32 %v7343_v17, %v7093_v51 }
 0x620   : > { %7109 = vst.msk [vmem:[%s11101_s18 + $0x18] sm:$0xff] %vm389_vm0, %v7094_v44 }
 0x634   : > { %v7096_v7 = vpop.f32.mrf.mxu3 }
 0x635   : > { %v7097_v10 = vadd.f32 %v7343_v17, %v7096_v7 }
 0x637   : > { %7110 = vst.msk [vmem:[%s11101_s18 + $0x20] sm:$0xff] %vm389_vm0, %v7097_v10 }
 0x63c   : > { %v7098_v43 = vpop.f32.mrf.mxu3 }
 0x63d   : > { %v7099_v57 = vadd.f32 %v7343_v17, %v7098_v43 }
 0x63f   : > { %7111 = vst.msk [vmem:[%s11101_s18 + $0x28] sm:$0xff] %vm389_vm0, %v7099_v57 }
 0x656   : > { %v7101_v45 = vpop.f32.mrf.mxu3 }
 0x657   : > { %v7102_v13 = vadd.f32 %v7343_v17, %v7101_v45 }
 0x659   : > { %7112 = vst.msk [vmem:[%s11101_s18 + $0x30] sm:$0xff] %vm389_vm0, %v7102_v13 }
 0x65e   : > { %v7103_v21 = vpop.f32.mrf.mxu3 }
 0x65f   : > { %v7104_v47 = vadd.f32 %v7343_v17, %v7103_v21 }
 0x661   : > { %7113 = vst.msk [vmem:[%s11101_s18 + $0x38] sm:$0xff] %vm389_vm0, %v7104_v47 }
 0x662 PF: > { %s20_s13 = sadd.s32 1, %s7697_s13  }
 0x663   : > { %p17_p4 = scmp.ge.s32.totalorder %s20_s13, 4  }
 0x665   :  { %19 = sbr.rel (!%p17_p4) target bundleno = 1 (0x1), region = 91 }

</bundles_post_ra>
